<compile_context>
chip_gen: v6e
topology: v6e:2x2x1
jax: 0.10.0
libtpu: 0.0.40
codegen_flags: <defaults>
</compile_context>

<pallas_src>
import math
import functools

import jax
import jax.numpy as jnp
from jax import lax
from jax.experimental import pallas as pl
from jax.experimental.pallas import tpu as pltpu

EPS = 1e-6  # T5 layer_norm_epsilon


# ----------------------------- in-kernel helpers ---------------------------- #

def _rmsnorm(x, w):
    """T5LayerNorm: RMS norm, no mean subtraction, no bias. x: (N, D) f32."""
    var = jnp.mean(x * x, axis=-1, keepdims=True)
    return x * lax.rsqrt(var + EPS) * w


# ------------------------------- fused kernel ------------------------------- #

def t5_encoder_kernel(x_ref, bias_ref, ln1_ref, wq_ref, wk_ref, wv_ref, wo_ref,
                      ln2_ref, wi_ref, woff_ref, fln_ref,
                      pre_ref, out_ref, h_res,
                      *, num_heads, d_kv, compute_dtype):
    """One grid step == one T5 encoder block (grid axis = layers, sequential).

    x_ref:    (N, D)      flattened tokens (N = B*S), loaded once (constant block index).
    bias_ref: (H, N, N)   rel-pos bias + block-diagonal batch mask + key padding mask, resident.
    ln1/ln2:  (1, 1, D)   wq/wk/wv: (1, D, H*dk)   wo: (1, H, dk, D)   wi: (1, D, F)  woff: (1, F, D)
    fln_ref:  (1, D)      final RMSNorm weight, resident.
    pre_ref:  (1, N, D)   hidden state at the *entry* of this layer (per-layer output block).
    out_ref:  (N, D)      final post-norm output (written at the last layer only).
    h_res:    (N, D) f32  VMEM scratch: residual stream carried across layers.
    """
    l = pl.program_id(0)
    cd = compute_dtype

    @pl.when(l == 0)
    def _():
        h_res[...] = x_ref[...].astype(jnp.float32)

    h = h_res[...]                                           # (N, D) f32
    pre_ref[0] = h.astype(pre_ref.dtype)                     # pre-layer hidden state

    # ---------------- self-attention sublayer ---------------- #
    hn = _rmsnorm(h, ln1_ref[0]).astype(cd)                  # (N, D)
    # full-width projections over all tokens (MXU-friendly), f32 accumulation
    q = jnp.dot(hn, wq_ref[0], preferred_element_type=jnp.float32)     # (N, H*dk)
    k = jnp.dot(hn, wk_ref[0], preferred_element_type=jnp.float32)
    v = jnp.dot(hn, wv_ref[0], preferred_element_type=jnp.float32)

    def to_heads(t):                                         # (N, H*dk) -> (H, N, dk)
        return jnp.stack(
            [t[:, hh * d_kv:(hh + 1) * d_kv] for hh in range(num_heads)], axis=0
        ).astype(cd)

    qh = to_heads(q)
    kh = to_heads(k)
    vh = to_heads(v)

    # T5 does NOT scale scores by 1/sqrt(d_kv). Heads are the batch dim of the einsums;
    # cross-batch token pairs / padded keys are killed by the additive mask inside bias_ref.
    scores = jnp.einsum('hqd,hkd->hqk', qh, kh,
                        preferred_element_type=jnp.float32)  # (H, N, N) f32
    scores = scores + bias_ref[...]

    m = jnp.max(scores, axis=-1, keepdims=True)
    p = jnp.exp(scores - m)
    p = p * pl.reciprocal(jnp.sum(p, axis=-1, keepdims=True), approx=True)

    ctx = jnp.einsum('hqk,hkd->hqd', p.astype(cd), vh,
                     preferred_element_type=jnp.float32)     # (H, N, dk)

    # per-head output projection (batched over heads), then reduce over heads
    attn3 = jnp.einsum('hnd,hdm->hnm', ctx.astype(cd), wo_ref[0],
                       preferred_element_type=jnp.float32)   # (H, N, D)
    attn = jnp.sum(attn3, axis=0)                            # (N, D)
    # NOTE: dropout(p=0.1) is identity in eval mode.
    h = h + attn

    # ---------------- feed-forward sublayer ---------------- #
    hn2 = _rmsnorm(h, ln2_ref[0]).astype(cd)
    a = jnp.maximum(jnp.dot(hn2, wi_ref[0], preferred_element_type=jnp.float32), 0.0)
    ff = jnp.dot(a.astype(cd), woff_ref[0], preferred_element_type=jnp.float32)
    h = h + ff

    h_res[...] = h

    # ---------------- final RMSNorm (last layer only) ---------------- #
    @pl.when(l == pl.num_programs(0) - 1)
    def _():
        out_ref[...] = _rmsnorm(h, fln_ref[...]).astype(out_ref.dtype)


# ------------------------------ kernel wrapper ------------------------------ #

def t5_encoder_stack(x2d, bias, ln1, wq, wk, wv, wo_heads, ln2, wi, wo_ff, final_ln,
                     *, num_heads, d_kv, compute_dtype):
    L = wq.shape[0]
    N, D = x2d.shape
    HD = num_heads * d_kv
    F = wi.shape[-1]

    kernel = functools.partial(t5_encoder_kernel, num_heads=num_heads, d_kv=d_kv,
                               compute_dtype=compute_dtype)

    pre_states, memory = pl.pallas_call(
        kernel,
        out_shape=(jax.ShapeDtypeStruct((L, N, D), x2d.dtype),
                   jax.ShapeDtypeStruct((N, D), x2d.dtype)),
        grid=(L,),
        in_specs=[
            pl.BlockSpec((N, D), lambda l: (0, 0)),                         # x (resident)
            pl.BlockSpec((num_heads, N, N), lambda l: (0, 0, 0)),           # bias (resident)
            pl.BlockSpec((1, 1, D), lambda l: (l, 0, 0)),                   # ln1[l]
            pl.BlockSpec((1, D, HD), lambda l: (l, 0, 0)),                  # wq[l]
            pl.BlockSpec((1, D, HD), lambda l: (l, 0, 0)),                  # wk[l]
            pl.BlockSpec((1, D, HD), lambda l: (l, 0, 0)),                  # wv[l]
            pl.BlockSpec((1, num_heads, d_kv, D), lambda l: (l, 0, 0, 0)),  # wo[l] per-head slabs
            pl.BlockSpec((1, 1, D), lambda l: (l, 0, 0)),                   # ln2[l]
            pl.BlockSpec((1, D, F), lambda l: (l, 0, 0)),                   # wi[l]
            pl.BlockSpec((1, F, D), lambda l: (l, 0, 0)),                   # wo_ff[l]
            pl.BlockSpec((1, D), lambda l: (0, 0)),                         # final LN (resident)
        ],
        out_specs=(
            pl.BlockSpec((1, N, D), lambda l: (l, 0, 0)),                   # pre-layer states
            pl.BlockSpec((N, D), lambda l: (0, 0)),                         # final output
        ),
        scratch_shapes=[pltpu.VMEM((N, D), jnp.float32)],                   # residual stream
        compiler_params=pltpu.CompilerParams(
            dimension_semantics=("arbitrary",),          # layers have a sequential dependency
            vmem_limit_bytes=32 * 1024 * 1024),
    )(x2d, bias, ln1, wq, wk, wv, wo_heads, ln2, wi, wo_ff, final_ln)
    return pre_states, memory


# -------------------- relative position bias (JAX glue) -------------------- #

def t5_relative_position_bias(rel_emb, seq_len, num_buckets=32, max_distance=128):
    """rel_emb: (num_buckets, num_heads) -> bias (H, S, S). Bidirectional (encoder)."""
    context_position = jnp.arange(seq_len)[:, None]
    memory_position = jnp.arange(seq_len)[None, :]
    relative_position = memory_position - context_position            # (S, S)

    nb = num_buckets // 2
    buckets = (relative_position > 0).astype(jnp.int32) * nb
    rp_abs = jnp.abs(relative_position)
    max_exact = nb // 2
    is_small = rp_abs < max_exact
    rp_large = max_exact + (
        jnp.log(jnp.maximum(rp_abs, 1).astype(jnp.float32) / max_exact)
        / math.log(max_distance / max_exact) * (nb - max_exact)
    ).astype(jnp.int32)
    rp_large = jnp.minimum(rp_large, nb - 1)
    buckets = buckets + jnp.where(is_small, rp_abs, rp_large)          # (S, S)

    values = rel_emb[buckets]                                          # (S, S, H)
    return jnp.transpose(values, (2, 0, 1))                            # (H, S, S)


def build_encoder_bias(rel_emb, src_mask, *, num_heads, num_buckets):
    """Combined (H, N, N) additive bias: rel-pos bias tiled over batches + block-diagonal batch
    separation + key-padding mask (tokens flattened to N = B*S)."""
    B, S = src_mask.shape
    N = B * S
    pos = t5_relative_position_bias(rel_emb, S, num_buckets)           # (H, S, S)
    pos_full = jnp.tile(pos, (1, B, B))                                # (H, N, N)

    key_keep = src_mask.reshape(N) > 0.5                               # (N,)
    bidx = jnp.repeat(jnp.arange(B), S)                                # (N,)
    same_batch = bidx[:, None] == bidx[None, :]                        # (N, N)
    allowed = jnp.logical_and(same_batch, key_keep[None, :])
    add_mask = jnp.where(allowed, 0.0, -1e9).astype(jnp.float32)       # (N, N)
    return pos_full + add_mask[None]


# --------------------------------- Encoder ---------------------------------- #

class EncoderPallas:
    """JAX/Pallas equivalent of Encoder(T5Stack) forward (eval mode)."""

    def __init__(self, key, *, d_model=512, d_kv=64, d_ff=1024, num_layers=2,
                 num_heads=8, num_buckets=32, matmul_dtype=jnp.bfloat16):
        self.d_model, self.d_kv, self.d_ff = d_model, d_kv, d_ff
        self.num_layers, self.num_heads, self.num_buckets = num_layers, num_heads, num_buckets
        self.matmul_dtype = matmul_dtype
        hd = num_heads * d_kv
        L = num_layers

        ks = jax.random.split(key, 7)

        def init(k, shape, scale):
            return jax.random.normal(k, shape, jnp.float32) * scale

        wdt = matmul_dtype
        # layer-stacked parameters (weights at rest in matmul_dtype; norms/bias table in f32)
        self.ln1 = jnp.ones((L, 1, d_model), jnp.float32)
        self.ln2 = jnp.ones((L, 1, d_model), jnp.float32)
        self.final_ln = jnp.ones((1, d_model), jnp.float32)
        self.wq = init(ks[0], (L, d_model, hd), (d_model * d_kv) ** -0.5).astype(wdt)
        self.wk = init(ks[1], (L, d_model, hd), d_model ** -0.5).astype(wdt)
        self.wv = init(ks[2], (L, d_model, hd), d_model ** -0.5).astype(wdt)
        self.wo = init(ks[3], (L, hd, d_model), hd ** -0.5).reshape(
            L, num_heads, d_kv, d_model).astype(wdt)                   # per-head output slabs
        self.wi = init(ks[4], (L, d_model, d_ff), d_model ** -0.5).astype(wdt)
        self.wo_ff = init(ks[5], (L, d_ff, d_model), d_ff ** -0.5).astype(wdt)
        # relative attention bias embedding (block 0 owns it, shared by all blocks)
        self.rel_emb = init(ks[6], (num_buckets, num_heads), d_model ** -0.5)

    def __call__(self, inputs_embeds, src_mask):
        B, S, D = inputs_embeds.shape
        bias = build_encoder_bias(self.rel_emb, src_mask,
                                  num_heads=self.num_heads, num_buckets=self.num_buckets)
        x2d = inputs_embeds.reshape(B * S, D)

        pre, mem = t5_encoder_stack(
            x2d, bias, self.ln1, self.wq, self.wk, self.wv, self.wo,
            self.ln2, self.wi, self.wo_ff, self.final_ln,
            num_heads=self.num_heads, d_kv=self.d_kv, compute_dtype=self.matmul_dtype)

        memory_bank = mem.reshape(B, S, D)
        pre4 = pre.reshape(self.num_layers, B, S, D)
        pre_states = tuple(pre4[l] for l in range(self.num_layers))
        # T5Stack.hidden_states = (pre-layer inputs..., final post-norm output)
        layer_outputs = pre_states + (memory_bank,)
        return memory_bank, layer_outputs


# ----------------------------------- main ------------------------------------ #

if __name__ == "__main__":
    key = jax.random.PRNGKey(0)
    k_param, k_x = jax.random.split(key)

    # Shapes consistent with the module: d_model=512 hardcoded by config; args -> d_k=64,
    # d_ff=1024, nlayers=2, num_head=8. batch=2, seq=8.
    B, S = 2, 8
    D, DK, DFF, L, H = 512, 64, 1024, 2, 8

    enc = EncoderPallas(k_param, d_model=D, d_kv=DK, d_ff=DFF,
                        num_layers=L, num_heads=H)

    x = jax.random.normal(k_x, (B, S, D), dtype=jnp.float32)
    src_mask = jnp.ones((B, S), dtype=jnp.float32).at[1, 6:].set(0.0)  # pad last 2 tokens of sample 1

    fwd = jax.jit(lambda a, m: enc(a, m))
    memory_bank, layer_outputs = fwd(x, src_mask)

    jax.block_until_ready(memory_bank)
    for ho in layer_outputs:
        jax.block_until_ready(ho)

    assert memory_bank.shape == (B, S, D)
    assert len(layer_outputs) == L + 1
    assert bool(jnp.all(jnp.isfinite(memory_bank)))
    print("KERNEL_OK")
</pallas_src>

<mosaic_0001>
module attributes {stable_mosaic.version = 11 : i64} {
  func.func @t5_encoder_kernel(%arg0: i32, %arg1: memref<16x512xf32, #tpu.memory_space<vmem>>, %arg2: memref<8x16x16xf32, #tpu.memory_space<vmem>>, %arg3: memref<1x1x512xf32, #tpu.memory_space<vmem>>, %arg4: memref<1x512x512xbf16, #tpu.memory_space<vmem>>, %arg5: memref<1x512x512xbf16, #tpu.memory_space<vmem>>, %arg6: memref<1x512x512xbf16, #tpu.memory_space<vmem>>, %arg7: memref<1x8x64x512xbf16, #tpu.memory_space<vmem>>, %arg8: memref<1x1x512xf32, #tpu.memory_space<vmem>>, %arg9: memref<1x512x1024xbf16, #tpu.memory_space<vmem>>, %arg10: memref<1x1024x512xbf16, #tpu.memory_space<vmem>>, %arg11: memref<1x512xf32, #tpu.memory_space<vmem>>, %arg12: memref<1x16x512xf32, #tpu.memory_space<vmem>>, %arg13: memref<16x512xf32, #tpu.memory_space<vmem>>, %arg14: memref<16x512xf32, #tpu.memory_space<vmem>>) attributes {dimension_semantics = [#tpu.dimension_semantics<arbitrary>], iteration_bounds = array<i64: 2>, scalar_prefetch = 0 : i64, scratch_operands = 1 : i64, tpu.core_type = #tpu.core_type<tc>, window_params = [{pipeline_mode = #tpu.pipeline_mode<synchronous>, transform_indices = @transform_0, window_bounds = array<i64: 16, 512>}, {pipeline_mode = #tpu.pipeline_mode<synchronous>, transform_indices = @transform_1, window_bounds = array<i64: 8, 16, 16>}, {transform_indices = @transform_2, window_bounds = array<i64: 1, 1, 512>}, {transform_indices = @transform_3, window_bounds = array<i64: 1, 512, 512>}, {transform_indices = @transform_4, window_bounds = array<i64: 1, 512, 512>}, {transform_indices = @transform_5, window_bounds = array<i64: 1, 512, 512>}, {transform_indices = @transform_6, window_bounds = array<i64: 1, 8, 64, 512>}, {transform_indices = @transform_7, window_bounds = array<i64: 1, 1, 512>}, {transform_indices = @transform_8, window_bounds = array<i64: 1, 512, 1024>}, {transform_indices = @transform_9, window_bounds = array<i64: 1, 1024, 512>}, {pipeline_mode = #tpu.pipeline_mode<synchronous>, transform_indices = @transform_10, window_bounds = array<i64: 1, 512>}, {transform_indices = @transform_11, window_bounds = array<i64: 1, 16, 512>}, {pipeline_mode = #tpu.pipeline_mode<synchronous>, transform_indices = @transform_12, window_bounds = array<i64: 16, 512>}]} {
    %c0_i32 = arith.constant 0 : i32
    %0 = arith.cmpi eq, %arg0, %c0_i32 : i32
    %1 = arith.extui %0 : i1 to i32
    %c0_i32_0 = arith.constant 0 : i32
    %2 = arith.cmpi ne, %1, %c0_i32_0 : i32
    scf.if %2 {
      %c0_53 = arith.constant 0 : index
      %c0_54 = arith.constant 0 : index
      %135 = vector.load %arg1[%c0_53, %c0_54] : memref<16x512xf32, #tpu.memory_space<vmem>>, vector<16x512xf32>
      %c0_55 = arith.constant 0 : index
      %c0_56 = arith.constant 0 : index
      %136 = vector.load %arg14[%c0_55, %c0_56] : memref<16x512xf32, #tpu.memory_space<vmem>>, vector<16x512xf32>
      tpu.vector_store %arg14[%c0_55, %c0_56], %135 {strides = array<i32>} : memref<16x512xf32, #tpu.memory_space<vmem>>, vector<16x512xf32>,
    } else {
    }
    %c0 = arith.constant 0 : index
    %c0_1 = arith.constant 0 : index
    %3 = vector.load %arg14[%c0, %c0_1] : memref<16x512xf32, #tpu.memory_space<vmem>>, vector<16x512xf32>
    %c0_2 = arith.constant 0 : index
    %c0_3 = arith.constant 0 : index
    %c0_4 = arith.constant 0 : index
    %4 = vector.load %arg12[%c0_2, %c0_3, %c0_4] : memref<1x16x512xf32, #tpu.memory_space<vmem>>, vector<1x16x512xf32>
    %5 = vector.shape_cast %4 : vector<1x16x512xf32> to vector<16x512xf32>
    %6 = vector.shape_cast %3 : vector<16x512xf32> to vector<1x16x512xf32>
    tpu.vector_store %arg12[%c0_2, %c0_3, %c0_4], %6 {strides = array<i32>} : memref<1x16x512xf32, #tpu.memory_space<vmem>>, vector<1x16x512xf32>,
    %c0_5 = arith.constant 0 : index
    %c0_6 = arith.constant 0 : index
    %c0_7 = arith.constant 0 : index
    %7 = vector.load %arg3[%c0_5, %c0_6, %c0_7] : memref<1x1x512xf32, #tpu.memory_space<vmem>>, vector<1x1x512xf32>
    %8 = vector.shape_cast %7 : vector<1x1x512xf32> to vector<1x512xf32>
    %9 = arith.mulf %3, %3 : vector<16x512xf32>
    %cst = arith.constant dense<0.000000e+00> : vector<16xf32>
    %10 = vector.multi_reduction <add>, %9, %cst [1] : vector<16x512xf32> to vector<16xf32>
    %11 = vector.shape_cast %10 : vector<16xf32> to vector<16x1xf32>
    %cst_8 = arith.constant 5.120000e+02 : f32
    %12 = vector.broadcast %cst_8 : f32 to vector<16x1xf32>
    %13 = arith.divf %11, %12 : vector<16x1xf32>
    %cst_9 = arith.constant 9.99999997E-7 : f32
    %14 = vector.broadcast %cst_9 : f32 to vector<16x1xf32>
    %15 = arith.addf %13, %14 : vector<16x1xf32>
    %16 = math.rsqrt %15 : vector<16x1xf32>
    %17 = vector.broadcast %16 : vector<16x1xf32> to vector<16x512xf32>
    %18 = arith.mulf %3, %17 : vector<16x512xf32>
    %19 = vector.broadcast %8 : vector<1x512xf32> to vector<16x512xf32>
    %20 = arith.mulf %18, %19 : vector<16x512xf32>
    %21 = arith.truncf %20 : vector<16x512xf32> to vector<16x512xbf16>
    %c0_10 = arith.constant 0 : index
    %c0_11 = arith.constant 0 : index
    %c0_12 = arith.constant 0 : index
    %22 = vector.load %arg4[%c0_10, %c0_11, %c0_12] : memref<1x512x512xbf16, #tpu.memory_space<vmem>>, vector<1x512x512xbf16>
    %23 = vector.shape_cast %22 : vector<1x512x512xbf16> to vector<512x512xbf16>
    %cst_13 = arith.constant dense<0.000000e+00> : vector<16x512xf32>
    %24 = tpu.matmul %21, %23, %cst_13 {dimension_numbers = #tpu.dot_dimension_numbers<[1], [0], [0], [1], [0, 0, 1, 1], [], []>} : vector<16x512xbf16>, vector<512x512xbf16>, vector<16x512xf32> -> vector<16x512xf32>
    %c0_14 = arith.constant 0 : index
    %c0_15 = arith.constant 0 : index
    %c0_16 = arith.constant 0 : index
    %25 = vector.load %arg5[%c0_14, %c0_15, %c0_16] : memref<1x512x512xbf16, #tpu.memory_space<vmem>>, vector<1x512x512xbf16>
    %26 = vector.shape_cast %25 : vector<1x512x512xbf16> to vector<512x512xbf16>
    %cst_17 = arith.constant dense<0.000000e+00> : vector<16x512xf32>
    %27 = tpu.matmul %21, %26, %cst_17 {dimension_numbers = #tpu.dot_dimension_numbers<[1], [0], [0], [1], [0, 0, 1, 1], [], []>} : vector<16x512xbf16>, vector<512x512xbf16>, vector<16x512xf32> -> vector<16x512xf32>
    %c0_18 = arith.constant 0 : index
    %c0_19 = arith.constant 0 : index
    %c0_20 = arith.constant 0 : index
    %28 = vector.load %arg6[%c0_18, %c0_19, %c0_20] : memref<1x512x512xbf16, #tpu.memory_space<vmem>>, vector<1x512x512xbf16>
    %29 = vector.shape_cast %28 : vector<1x512x512xbf16> to vector<512x512xbf16>
    %cst_21 = arith.constant dense<0.000000e+00> : vector<16x512xf32>
    %30 = tpu.matmul %21, %29, %cst_21 {dimension_numbers = #tpu.dot_dimension_numbers<[1], [0], [0], [1], [0, 0, 1, 1], [], []>} : vector<16x512xbf16>, vector<512x512xbf16>, vector<16x512xf32> -> vector<16x512xf32>
    %31 = vector.extract_strided_slice %24 {offsets = [0, 0], sizes = [16, 64], strides = [1, 1]} : vector<16x512xf32> to vector<16x64xf32>
    %32 = vector.extract_strided_slice %24 {offsets = [0, 64], sizes = [16, 64], strides = [1, 1]} : vector<16x512xf32> to vector<16x64xf32>
    %33 = vector.extract_strided_slice %24 {offsets = [0, 128], sizes = [16, 64], strides = [1, 1]} : vector<16x512xf32> to vector<16x64xf32>
    %34 = vector.extract_strided_slice %24 {offsets = [0, 192], sizes = [16, 64], strides = [1, 1]} : vector<16x512xf32> to vector<16x64xf32>
    %35 = vector.extract_strided_slice %24 {offsets = [0, 256], sizes = [16, 64], strides = [1, 1]} : vector<16x512xf32> to vector<16x64xf32>
    %36 = vector.extract_strided_slice %24 {offsets = [0, 320], sizes = [16, 64], strides = [1, 1]} : vector<16x512xf32> to vector<16x64xf32>
    %37 = vector.extract_strided_slice %24 {offsets = [0, 384], sizes = [16, 64], strides = [1, 1]} : vector<16x512xf32> to vector<16x64xf32>
    %38 = vector.extract_strided_slice %24 {offsets = [0, 448], sizes = [16, 64], strides = [1, 1]} : vector<16x512xf32> to vector<16x64xf32>
    %39 = vector.shape_cast %31 : vector<16x64xf32> to vector<1x16x64xf32>
    %40 = vector.shape_cast %32 : vector<16x64xf32> to vector<1x16x64xf32>
    %41 = vector.shape_cast %33 : vector<16x64xf32> to vector<1x16x64xf32>
    %42 = vector.shape_cast %34 : vector<16x64xf32> to vector<1x16x64xf32>
    %43 = vector.shape_cast %35 : vector<16x64xf32> to vector<1x16x64xf32>
    %44 = vector.shape_cast %36 : vector<16x64xf32> to vector<1x16x64xf32>
    %45 = vector.shape_cast %37 : vector<16x64xf32> to vector<1x16x64xf32>
    %46 = vector.shape_cast %38 : vector<16x64xf32> to vector<1x16x64xf32>
    %47 = tpu.concatenate %39, %40, %41, %42, %43, %44, %45, %46 in 0 : vector<1x16x64xf32>, vector<1x16x64xf32>, vector<1x16x64xf32>, vector<1x16x64xf32>, vector<1x16x64xf32>, vector<1x16x64xf32>, vector<1x16x64xf32>, vector<1x16x64xf32> -> vector<8x16x64xf32>
    %48 = arith.truncf %47 : vector<8x16x64xf32> to vector<8x16x64xbf16>
    %49 = vector.extract_strided_slice %27 {offsets = [0, 0], sizes = [16, 64], strides = [1, 1]} : vector<16x512xf32> to vector<16x64xf32>
    %50 = vector.extract_strided_slice %27 {offsets = [0, 64], sizes = [16, 64], strides = [1, 1]} : vector<16x512xf32> to vector<16x64xf32>
    %51 = vector.extract_strided_slice %27 {offsets = [0, 128], sizes = [16, 64], strides = [1, 1]} : vector<16x512xf32> to vector<16x64xf32>
    %52 = vector.extract_strided_slice %27 {offsets = [0, 192], sizes = [16, 64], strides = [1, 1]} : vector<16x512xf32> to vector<16x64xf32>
    %53 = vector.extract_strided_slice %27 {offsets = [0, 256], sizes = [16, 64], strides = [1, 1]} : vector<16x512xf32> to vector<16x64xf32>
    %54 = vector.extract_strided_slice %27 {offsets = [0, 320], sizes = [16, 64], strides = [1, 1]} : vector<16x512xf32> to vector<16x64xf32>
    %55 = vector.extract_strided_slice %27 {offsets = [0, 384], sizes = [16, 64], strides = [1, 1]} : vector<16x512xf32> to vector<16x64xf32>
    %56 = vector.extract_strided_slice %27 {offsets = [0, 448], sizes = [16, 64], strides = [1, 1]} : vector<16x512xf32> to vector<16x64xf32>
    %57 = vector.shape_cast %49 : vector<16x64xf32> to vector<1x16x64xf32>
    %58 = vector.shape_cast %50 : vector<16x64xf32> to vector<1x16x64xf32>
    %59 = vector.shape_cast %51 : vector<16x64xf32> to vector<1x16x64xf32>
    %60 = vector.shape_cast %52 : vector<16x64xf32> to vector<1x16x64xf32>
    %61 = vector.shape_cast %53 : vector<16x64xf32> to vector<1x16x64xf32>
    %62 = vector.shape_cast %54 : vector<16x64xf32> to vector<1x16x64xf32>
    %63 = vector.shape_cast %55 : vector<16x64xf32> to vector<1x16x64xf32>
    %64 = vector.shape_cast %56 : vector<16x64xf32> to vector<1x16x64xf32>
    %65 = tpu.concatenate %57, %58, %59, %60, %61, %62, %63, %64 in 0 : vector<1x16x64xf32>, vector<1x16x64xf32>, vector<1x16x64xf32>, vector<1x16x64xf32>, vector<1x16x64xf32>, vector<1x16x64xf32>, vector<1x16x64xf32>, vector<1x16x64xf32> -> vector<8x16x64xf32>
    %66 = arith.truncf %65 : vector<8x16x64xf32> to vector<8x16x64xbf16>
    %67 = vector.extract_strided_slice %30 {offsets = [0, 0], sizes = [16, 64], strides = [1, 1]} : vector<16x512xf32> to vector<16x64xf32>
    %68 = vector.extract_strided_slice %30 {offsets = [0, 64], sizes = [16, 64], strides = [1, 1]} : vector<16x512xf32> to vector<16x64xf32>
    %69 = vector.extract_strided_slice %30 {offsets = [0, 128], sizes = [16, 64], strides = [1, 1]} : vector<16x512xf32> to vector<16x64xf32>
    %70 = vector.extract_strided_slice %30 {offsets = [0, 192], sizes = [16, 64], strides = [1, 1]} : vector<16x512xf32> to vector<16x64xf32>
    %71 = vector.extract_strided_slice %30 {offsets = [0, 256], sizes = [16, 64], strides = [1, 1]} : vector<16x512xf32> to vector<16x64xf32>
    %72 = vector.extract_strided_slice %30 {offsets = [0, 320], sizes = [16, 64], strides = [1, 1]} : vector<16x512xf32> to vector<16x64xf32>
    %73 = vector.extract_strided_slice %30 {offsets = [0, 384], sizes = [16, 64], strides = [1, 1]} : vector<16x512xf32> to vector<16x64xf32>
    %74 = vector.extract_strided_slice %30 {offsets = [0, 448], sizes = [16, 64], strides = [1, 1]} : vector<16x512xf32> to vector<16x64xf32>
    %75 = vector.shape_cast %67 : vector<16x64xf32> to vector<1x16x64xf32>
    %76 = vector.shape_cast %68 : vector<16x64xf32> to vector<1x16x64xf32>
    %77 = vector.shape_cast %69 : vector<16x64xf32> to vector<1x16x64xf32>
    %78 = vector.shape_cast %70 : vector<16x64xf32> to vector<1x16x64xf32>
    %79 = vector.shape_cast %71 : vector<16x64xf32> to vector<1x16x64xf32>
    %80 = vector.shape_cast %72 : vector<16x64xf32> to vector<1x16x64xf32>
    %81 = vector.shape_cast %73 : vector<16x64xf32> to vector<1x16x64xf32>
    %82 = vector.shape_cast %74 : vector<16x64xf32> to vector<1x16x64xf32>
    %83 = tpu.concatenate %75, %76, %77, %78, %79, %80, %81, %82 in 0 : vector<1x16x64xf32>, vector<1x16x64xf32>, vector<1x16x64xf32>, vector<1x16x64xf32>, vector<1x16x64xf32>, vector<1x16x64xf32>, vector<1x16x64xf32>, vector<1x16x64xf32> -> vector<8x16x64xf32>
    %84 = arith.truncf %83 : vector<8x16x64xf32> to vector<8x16x64xbf16>
    "tpu.trace_start"() <{level = 10 : i32, message = "hqd,hkd->hqk"}> : () -> ()
    %cst_22 = arith.constant dense<0.000000e+00> : vector<8x16x16xf32>
    %85 = tpu.matmul %48, %66, %cst_22 {dimension_numbers = #tpu.dot_dimension_numbers<[2], [2], [1], [1], [0, 0, 0, 1, 1, 1], [0], [0]>} : vector<8x16x64xbf16>, vector<8x16x64xbf16>, vector<8x16x16xf32> -> vector<8x16x16xf32>
    "tpu.trace_stop"() : () -> ()
    %c0_23 = arith.constant 0 : index
    %c0_24 = arith.constant 0 : index
    %c0_25 = arith.constant 0 : index
    %86 = vector.load %arg2[%c0_23, %c0_24, %c0_25] : memref<8x16x16xf32, #tpu.memory_space<vmem>>, vector<8x16x16xf32>
    %87 = arith.addf %85, %86 : vector<8x16x16xf32>
    %cst_26 = arith.constant dense<0xFF800000> : vector<8x16xf32>
    %88 = vector.multi_reduction <maximumf>, %87, %cst_26 [2] : vector<8x16x16xf32> to vector<8x16xf32>
    %89 = vector.shape_cast %88 : vector<8x16xf32> to vector<8x16x1xf32>
    %90 = vector.broadcast %89 : vector<8x16x1xf32> to vector<8x16x16xf32>
    %91 = arith.subf %87, %90 : vector<8x16x16xf32>
    %92 = math.exp %91 : vector<8x16x16xf32>
    %cst_27 = arith.constant dense<0.000000e+00> : vector<8x16xf32>
    %93 = vector.multi_reduction <add>, %92, %cst_27 [2] : vector<8x16x16xf32> to vector<8x16xf32>
    %94 = vector.shape_cast %93 : vector<8x16xf32> to vector<8x16x1xf32>
    %95 = tpu.reciprocal %94 {approx = true} : vector<8x16x1xf32> -> vector<8x16x1xf32>
    %96 = vector.broadcast %95 : vector<8x16x1xf32> to vector<8x16x16xf32>
    %97 = arith.mulf %92, %96 : vector<8x16x16xf32>
    %98 = arith.truncf %97 : vector<8x16x16xf32> to vector<8x16x16xbf16>
    "tpu.trace_start"() <{level = 10 : i32, message = "hqk,hkd->hqd"}> : () -> ()
    %cst_28 = arith.constant dense<0.000000e+00> : vector<8x16x64xf32>
    %99 = tpu.matmul %98, %84, %cst_28 {dimension_numbers = #tpu.dot_dimension_numbers<[2], [1], [1], [2], [0, 0, 0, 1, 1, 2], [0], [0]>} : vector<8x16x16xbf16>, vector<8x16x64xbf16>, vector<8x16x64xf32> -> vector<8x16x64xf32>
    "tpu.trace_stop"() : () -> ()
    %100 = arith.truncf %99 : vector<8x16x64xf32> to vector<8x16x64xbf16>
    %c0_29 = arith.constant 0 : index
    %c0_30 = arith.constant 0 : index
    %c0_31 = arith.constant 0 : index
    %c0_32 = arith.constant 0 : index
    %101 = vector.load %arg7[%c0_29, %c0_30, %c0_31, %c0_32] : memref<1x8x64x512xbf16, #tpu.memory_space<vmem>>, vector<1x8x64x512xbf16>
    %102 = vector.shape_cast %101 : vector<1x8x64x512xbf16> to vector<8x64x512xbf16>
    "tpu.trace_start"() <{level = 10 : i32, message = "hnd,hdm->hnm"}> : () -> ()
    %cst_33 = arith.constant dense<0.000000e+00> : vector<8x16x512xf32>
    %103 = tpu.matmul %100, %102, %cst_33 {dimension_numbers = #tpu.dot_dimension_numbers<[2], [1], [1], [2], [0, 0, 0, 1, 1, 2], [0], [0]>} : vector<8x16x64xbf16>, vector<8x64x512xbf16>, vector<8x16x512xf32> -> vector<8x16x512xf32>
    "tpu.trace_stop"() : () -> ()
    %cst_34 = arith.constant dense<0.000000e+00> : vector<16x512xf32>
    %104 = vector.multi_reduction <add>, %103, %cst_34 [0] : vector<8x16x512xf32> to vector<16x512xf32>
    %105 = arith.addf %3, %104 : vector<16x512xf32>
    %c0_35 = arith.constant 0 : index
    %c0_36 = arith.constant 0 : index
    %c0_37 = arith.constant 0 : index
    %106 = vector.load %arg8[%c0_35, %c0_36, %c0_37] : memref<1x1x512xf32, #tpu.memory_space<vmem>>, vector<1x1x512xf32>
    %107 = vector.shape_cast %106 : vector<1x1x512xf32> to vector<1x512xf32>
    %108 = arith.mulf %105, %105 : vector<16x512xf32>
    %cst_38 = arith.constant dense<0.000000e+00> : vector<16xf32>
    %109 = vector.multi_reduction <add>, %108, %cst_38 [1] : vector<16x512xf32> to vector<16xf32>
    %110 = vector.shape_cast %109 : vector<16xf32> to vector<16x1xf32>
    %cst_39 = arith.constant 5.120000e+02 : f32
    %111 = vector.broadcast %cst_39 : f32 to vector<16x1xf32>
    %112 = arith.divf %110, %111 : vector<16x1xf32>
    %cst_40 = arith.constant 9.99999997E-7 : f32
    %113 = vector.broadcast %cst_40 : f32 to vector<16x1xf32>
    %114 = arith.addf %112, %113 : vector<16x1xf32>
    %115 = math.rsqrt %114 : vector<16x1xf32>
    %116 = vector.broadcast %115 : vector<16x1xf32> to vector<16x512xf32>
    %117 = arith.mulf %105, %116 : vector<16x512xf32>
    %118 = vector.broadcast %107 : vector<1x512xf32> to vector<16x512xf32>
    %119 = arith.mulf %117, %118 : vector<16x512xf32>
    %120 = arith.truncf %119 : vector<16x512xf32> to vector<16x512xbf16>
    %c0_41 = arith.constant 0 : index
    %c0_42 = arith.constant 0 : index
    %c0_43 = arith.constant 0 : index
    %121 = vector.load %arg9[%c0_41, %c0_42, %c0_43] : memref<1x512x1024xbf16, #tpu.memory_space<vmem>>, vector<1x512x1024xbf16>
    %122 = vector.shape_cast %121 : vector<1x512x1024xbf16> to vector<512x1024xbf16>
    %cst_44 = arith.constant dense<0.000000e+00> : vector<16x1024xf32>
    %123 = tpu.matmul %120, %122, %cst_44 {dimension_numbers = #tpu.dot_dimension_numbers<[1], [0], [0], [1], [0, 0, 1, 1], [], []>} : vector<16x512xbf16>, vector<512x1024xbf16>, vector<16x1024xf32> -> vector<16x1024xf32>
    %cst_45 = arith.constant 0.000000e+00 : f32
    %124 = vector.broadcast %cst_45 : f32 to vector<16x1024xf32>
    %125 = arith.maximumf %123, %124 : vector<16x1024xf32>
    %126 = arith.truncf %125 : vector<16x1024xf32> to vector<16x1024xbf16>
    %c0_46 = arith.constant 0 : index
    %c0_47 = arith.constant 0 : index
    %c0_48 = arith.constant 0 : index
    %127 = vector.load %arg10[%c0_46, %c0_47, %c0_48] : memref<1x1024x512xbf16, #tpu.memory_space<vmem>>, vector<1x1024x512xbf16>
    %128 = vector.shape_cast %127 : vector<1x1024x512xbf16> to vector<1024x512xbf16>
    %cst_49 = arith.constant dense<0.000000e+00> : vector<16x512xf32>
    %129 = tpu.matmul %126, %128, %cst_49 {dimension_numbers = #tpu.dot_dimension_numbers<[1], [0], [0], [1], [0, 0, 1, 1], [], []>} : vector<16x1024xbf16>, vector<1024x512xbf16>, vector<16x512xf32> -> vector<16x512xf32>
    %130 = arith.addf %105, %129 : vector<16x512xf32>
    %c0_50 = arith.constant 0 : index
    %c0_51 = arith.constant 0 : index
    %131 = vector.load %arg14[%c0_50, %c0_51] : memref<16x512xf32, #tpu.memory_space<vmem>>, vector<16x512xf32>
    tpu.vector_store %arg14[%c0_50, %c0_51], %130 {strides = array<i32>} : memref<16x512xf32, #tpu.memory_space<vmem>>, vector<16x512xf32>,
    %c1_i32 = arith.constant 1 : i32
    %132 = arith.cmpi eq, %arg0, %c1_i32 : i32
    %133 = arith.extui %132 : i1 to i32
    %c0_i32_52 = arith.constant 0 : i32
    %134 = arith.cmpi ne, %133, %c0_i32_52 : i32
    scf.if %134 {
      %c0_53 = arith.constant 0 : index
      %c0_54 = arith.constant 0 : index
      %135 = vector.load %arg11[%c0_53, %c0_54] : memref<1x512xf32, #tpu.memory_space<vmem>>, vector<1x512xf32>
      %136 = arith.mulf %130, %130 : vector<16x512xf32>
      %cst_55 = arith.constant dense<0.000000e+00> : vector<16xf32>
      %137 = vector.multi_reduction <add>, %136, %cst_55 [1] : vector<16x512xf32> to vector<16xf32>
      %138 = vector.shape_cast %137 : vector<16xf32> to vector<16x1xf32>
      %cst_56 = arith.constant 5.120000e+02 : f32
      %139 = vector.broadcast %cst_56 : f32 to vector<16x1xf32>
      %140 = arith.divf %138, %139 : vector<16x1xf32>
      %cst_57 = arith.constant 9.99999997E-7 : f32
      %141 = vector.broadcast %cst_57 : f32 to vector<16x1xf32>
      %142 = arith.addf %140, %141 : vector<16x1xf32>
      %143 = math.rsqrt %142 : vector<16x1xf32>
      %144 = vector.broadcast %143 : vector<16x1xf32> to vector<16x512xf32>
      %145 = arith.mulf %130, %144 : vector<16x512xf32>
      %146 = vector.broadcast %135 : vector<1x512xf32> to vector<16x512xf32>
      %147 = arith.mulf %145, %146 : vector<16x512xf32>
      %c0_58 = arith.constant 0 : index
      %c0_59 = arith.constant 0 : index
      %148 = vector.load %arg13[%c0_58, %c0_59] : memref<16x512xf32, #tpu.memory_space<vmem>>, vector<16x512xf32>
      tpu.vector_store %arg13[%c0_58, %c0_59], %147 {strides = array<i32>} : memref<16x512xf32, #tpu.memory_space<vmem>>, vector<16x512xf32>,
    } else {
    }
    return
  }
  func.func @transform_0(%arg0: i32) -> (i32, i32) {
    %c0_i32 = arith.constant 0 : i32
    %c0_i32_0 = arith.constant 0 : i32
    %c0_i32_1 = arith.constant 0 : i32
    return %c0_i32, %c0_i32_0 : i32, i32
  }
  func.func @transform_1(%arg0: i32) -> (i32, i32, i32) {
    %c0_i32 = arith.constant 0 : i32
    %c0_i32_0 = arith.constant 0 : i32
    %c0_i32_1 = arith.constant 0 : i32
    %c0_i32_2 = arith.constant 0 : i32
    return %c0_i32, %c0_i32_0, %c0_i32_1 : i32, i32, i32
  }
  func.func @transform_2(%arg0: i32) -> (i32, i32, i32) {
    %c0_i32 = arith.constant 0 : i32
    %c0_i32_0 = arith.constant 0 : i32
    %c0_i32_1 = arith.constant 0 : i32
    return %arg0, %c0_i32, %c0_i32_0 : i32, i32, i32
  }
  func.func @transform_3(%arg0: i32) -> (i32, i32, i32) {
    %c0_i32 = arith.constant 0 : i32
    %c0_i32_0 = arith.constant 0 : i32
    %c0_i32_1 = arith.constant 0 : i32
    return %arg0, %c0_i32, %c0_i32_0 : i32, i32, i32
  }
  func.func @transform_4(%arg0: i32) -> (i32, i32, i32) {
    %c0_i32 = arith.constant 0 : i32
    %c0_i32_0 = arith.constant 0 : i32
    %c0_i32_1 = arith.constant 0 : i32
    return %arg0, %c0_i32, %c0_i32_0 : i32, i32, i32
  }
  func.func @transform_5(%arg0: i32) -> (i32, i32, i32) {
    %c0_i32 = arith.constant 0 : i32
    %c0_i32_0 = arith.constant 0 : i32
    %c0_i32_1 = arith.constant 0 : i32
    return %arg0, %c0_i32, %c0_i32_0 : i32, i32, i32
  }
  func.func @transform_6(%arg0: i32) -> (i32, i32, i32, i32) {
    %c0_i32 = arith.constant 0 : i32
    %c0_i32_0 = arith.constant 0 : i32
    %c0_i32_1 = arith.constant 0 : i32
    %c0_i32_2 = arith.constant 0 : i32
    return %arg0, %c0_i32, %c0_i32_0, %c0_i32_1 : i32, i32, i32, i32
  }
  func.func @transform_7(%arg0: i32) -> (i32, i32, i32) {
    %c0_i32 = arith.constant 0 : i32
    %c0_i32_0 = arith.constant 0 : i32
    %c0_i32_1 = arith.constant 0 : i32
    return %arg0, %c0_i32, %c0_i32_0 : i32, i32, i32
  }
  func.func @transform_8(%arg0: i32) -> (i32, i32, i32) {
    %c0_i32 = arith.constant 0 : i32
    %c0_i32_0 = arith.constant 0 : i32
    %c0_i32_1 = arith.constant 0 : i32
    return %arg0, %c0_i32, %c0_i32_0 : i32, i32, i32
  }
  func.func @transform_9(%arg0: i32) -> (i32, i32, i32) {
    %c0_i32 = arith.constant 0 : i32
    %c0_i32_0 = arith.constant 0 : i32
    %c0_i32_1 = arith.constant 0 : i32
    return %arg0, %c0_i32, %c0_i32_0 : i32, i32, i32
  }
  func.func @transform_10(%arg0: i32) -> (i32, i32) {
    %c0_i32 = arith.constant 0 : i32
    %c0_i32_0 = arith.constant 0 : i32
    %c0_i32_1 = arith.constant 0 : i32
    return %c0_i32, %c0_i32_0 : i32, i32
  }
  func.func @transform_11(%arg0: i32) -> (i32, i32, i32) {
    %c0_i32 = arith.constant 0 : i32
    %c0_i32_0 = arith.constant 0 : i32
    %c0_i32_1 = arith.constant 0 : i32
    return %arg0, %c0_i32, %c0_i32_0 : i32, i32, i32
  }
  func.func @transform_12(%arg0: i32) -> (i32, i32) {
    %c0_i32 = arith.constant 0 : i32
    %c0_i32_0 = arith.constant 0 : i32
    %c0_i32_1 = arith.constant 0 : i32
    return %c0_i32, %c0_i32_0 : i32, i32
  }
}

</mosaic_0001>

<bundles_post_ra>
// kernel: tile.9
= control target key start
LH: loop header
LB: loop body
LE: loop exit
PB: predicated region body
PF: predicated region fallthrough
CT: control target
= control target key end

     0   :  { %vm643_vm0 = vcmask 1047556   ;;  %s1241_s10 = smov 8   ;;  %vm645_vm1 = vcmask 64512   ;;  %vm790_vm2 = vcmask 130112   ;;  %s1812_s0 = inlined_call_operand.vmem [shape: f32[8,2,8,2,8], index: 0, kind: input, shape index: {}]   ;;  %s1813_s1 = inlined_call_operand.vmem [shape: f32[8,16,16], index: 1, kind: output, shape index: {}]  }
   0x1   :  { %v1203_v0 = vld [vmem:[%s1812_s0 + $0xe] sm:$0x3]  ;;  %v1204_v1 = vld [vmem:[%s1812_s0 + $0xc] sm:$0x3]  ;;  %v1205_v2 = vld [vmem:[%s1812_s0 + $0xa] sm:$0x3] }
   0x2   :  { %609 = vst [vmem:[#allocation0 + $0x38] sm:$0x3] %v1203_v0  ;;  %614 = vst [vmem:[#allocation0 + $0x30] sm:$0x3] %v1204_v1  ;;  %v1206_v3 = vld [vmem:[%s1812_s0 + $0x8] sm:$0x3] }
   0x3   :  { %619 = vst [vmem:[#allocation0 + $0x28] sm:$0x3] %v1205_v2  ;;  %v1207_v4 = vld [vmem:[%s1812_s0 + $0x6] sm:$0x3]  ;;  %v1208_v5 = vld [vmem:[%s1812_s0 + $0x4] sm:$0x3] }
   0x4   :  { %624 = vst [vmem:[#allocation0 + $0x20] sm:$0x3] %v1206_v3  ;;  %629 = vst [vmem:[#allocation0 + $0x18] sm:$0x3] %v1207_v4  ;;  %v1209_v6 = vld [vmem:[%s1812_s0 + $0x2] sm:$0x3] }
   0x5   :  { %634 = vst [vmem:[#allocation0 + $0x10] sm:$0x3] %v1208_v5  ;;  %v639_v7 = vld [vmem:[%s1812_s0] sm:$0x3]  ;;  %638 = vst [vmem:[#allocation0 + $0x8] sm:$0x3] %v1209_v6 }
   0x6   :  { %640 = vst [vmem:[#allocation0] sm:$0x3] %v639_v7  ;;  %v1139_v8 = vld [vmem:[%s1812_s0 + $0x8e] sm:$0x3]  ;;  %v1140_v9 = vld [vmem:[%s1812_s0 + $0x8c] sm:$0x3] }
   0x7   :  { %v1141_v10 = vld [vmem:[%s1812_s0 + $0x8a] sm:$0x3]  ;;  %289 = vst [vmem:[#allocation0 + $0x238] sm:$0x3] %v1139_v8  ;;  %294 = vst [vmem:[#allocation0 + $0x230] sm:$0x3] %v1140_v9 }
   0x8   :  { %299 = vst [vmem:[#allocation0 + $0x228] sm:$0x3] %v1141_v10  ;;  %v1142_v11 = vld [vmem:[%s1812_s0 + $0x88] sm:$0x3]  ;;  %v1143_v12 = vld [vmem:[%s1812_s0 + $0x86] sm:$0x3] }
   0x9   :  { %v1144_v13 = vld [vmem:[%s1812_s0 + $0x84] sm:$0x3]  ;;  %304 = vst [vmem:[#allocation0 + $0x220] sm:$0x3] %v1142_v11  ;;  %309 = vst [vmem:[#allocation0 + $0x218] sm:$0x3] %v1143_v12 }
   0xa   :  { %314 = vst [vmem:[#allocation0 + $0x210] sm:$0x3] %v1144_v13  ;;  %v1145_v14 = vld [vmem:[%s1812_s0 + $0x82] sm:$0x3]  ;;  %v1146_v15 = vld [vmem:[%s1812_s0 + $0x80] sm:$0x3] }
   0xb   :  { %v1171_v16 = vld [vmem:[%s1812_s0 + $0x4e] sm:$0x3]  ;;  %319 = vst [vmem:[#allocation0 + $0x208] sm:$0x3] %v1145_v14  ;;  %324 = vst [vmem:[#allocation0 + $0x200] sm:$0x3] %v1146_v15 }
   0xc   :  { %449 = vst [vmem:[#allocation0 + $0x138] sm:$0x3] %v1171_v16  ;;  %v1172_v17 = vld [vmem:[%s1812_s0 + $0x4c] sm:$0x3]  ;;  %v1173_v18 = vld [vmem:[%s1812_s0 + $0x4a] sm:$0x3] }
   0xd   :  { %v1174_v19 = vld [vmem:[%s1812_s0 + $0x48] sm:$0x3]  ;;  %454 = vst [vmem:[#allocation0 + $0x130] sm:$0x3] %v1172_v17  ;;  %459 = vst [vmem:[#allocation0 + $0x128] sm:$0x3] %v1173_v18 }
   0xe   :  { %464 = vst [vmem:[#allocation0 + $0x120] sm:$0x3] %v1174_v19  ;;  %v1175_v20 = vld [vmem:[%s1812_s0 + $0x46] sm:$0x3]  ;;  %v1176_v21 = vld [vmem:[%s1812_s0 + $0x44] sm:$0x3] }
   0xf   :  { %v1177_v22 = vld [vmem:[%s1812_s0 + $0x42] sm:$0x3]  ;;  %469 = vst [vmem:[#allocation0 + $0x118] sm:$0x3] %v1175_v20  ;;  %474 = vst [vmem:[#allocation0 + $0x110] sm:$0x3] %v1176_v21 }
  0x10   :  { %479 = vst [vmem:[#allocation0 + $0x108] sm:$0x3] %v1177_v22  ;;  %v1178_v23 = vld [vmem:[%s1812_s0 + $0x40] sm:$0x3]  ;;  %v1107_v24 = vld [vmem:[%s1812_s0 + $0xce] sm:$0x3] }
  0x11   :  { %v1108_v25 = vld [vmem:[%s1812_s0 + $0xcc] sm:$0x3]  ;;  %v785_v26 = vld [vmem:[#allocation0 + $0x1] ss:$8 sm:$0xf0]  }
  0x12   :  { %484 = vst [vmem:[#allocation0 + $0x100] sm:$0x3] %v1178_v23  ;;  %129 = vst [vmem:[#allocation0 + $0x338] sm:$0x3] %v1107_v24  ;;  %v1109_v27 = vld [vmem:[%s1812_s0 + $0xca] sm:$0x3] }
  0x13   :  { %134 = vst [vmem:[#allocation0 + $0x330] sm:$0x3] %v1108_v25  ;;  %v783_v28 = vld [vmem:[#allocation0 + $0x1] ss:$8 sm:$0xf]  }
  0x14   :  { %139 = vst [vmem:[#allocation0 + $0x328] sm:$0x3] %v1109_v27  ;;  %v1110_v29 = vld [vmem:[%s1812_s0 + $0xc8] sm:$0x3]  ;;  %v787_v30 = vsel %vm643_vm0, %v785_v26, %v783_v28  ;;  %v1111_v31 = vld [vmem:[%s1812_s0 + $0xc6] sm:$0x3] }
  0x15   :  { %144 = vst [vmem:[#allocation0 + $0x320] sm:$0x3] %v1110_v29  ;;  %v1112_v32 = vld [vmem:[%s1812_s0 + $0xc4] sm:$0x3]  ;;  %v1113_v33 = vld [vmem:[%s1812_s0 + $0xc2] sm:$0x3]  ;;  %788 = vrot.lane.b32.xlu0 %v787_v30, %s1241_s10 }
  0x16   :  { %v806_v34 = vld [vmem:[#allocation0 + $0x201] ss:$8 sm:$0xf0]   ;;  %149 = vst [vmem:[#allocation0 + $0x318] sm:$0x3] %v1111_v31 }
  0x17   :  { %154 = vst [vmem:[#allocation0 + $0x310] sm:$0x3] %v1112_v32  ;;  %159 = vst [vmem:[#allocation0 + $0x308] sm:$0x3] %v1113_v33  ;;  %v1114_v35 = vld [vmem:[%s1812_s0 + $0xc0] sm:$0x3] }
  0x18   :  { %v804_v36 = vld [vmem:[#allocation0 + $0x201] ss:$8 sm:$0xf]   ;;  %164 = vst [vmem:[#allocation0 + $0x300] sm:$0x3] %v1114_v35 }
  0x19   :  { %v1195_v37 = vld [vmem:[%s1812_s0 + $0x1e] sm:$0x3]  ;;  %v808_v38 = vsel %vm643_vm0, %v806_v34, %v804_v36  ;;  %v795_v39 = vld [vmem:[#allocation0 + $0x101] ss:$8 sm:$0xf0]  }
  0x1a   :  { %569 = vst [vmem:[#allocation0 + $0x78] sm:$0x3] %v1195_v37  ;;  %v1196_v40 = vld [vmem:[%s1812_s0 + $0x1c] sm:$0x3]  ;;  %809 = vrot.lane.b32.xlu1 %v808_v38, %s1241_s10  ;;  %v1197_v41 = vld [vmem:[%s1812_s0 + $0x1a] sm:$0x3] }
  0x1b   :  { %574 = vst [vmem:[#allocation0 + $0x70] sm:$0x3] %v1196_v40  ;;  %v1198_v42 = vld [vmem:[%s1812_s0 + $0x18] sm:$0x3]  ;;  %v1199_v43 = vld [vmem:[%s1812_s0 + $0x16] sm:$0x3] }
  0x1c   :  { %v793_v44 = vld [vmem:[#allocation0 + $0x101] ss:$8 sm:$0xf]   ;;  %579 = vst [vmem:[#allocation0 + $0x68] sm:$0x3] %v1197_v41 }
  0x1d   :  { %584 = vst [vmem:[#allocation0 + $0x60] sm:$0x3] %v1198_v42  ;;  %589 = vst [vmem:[#allocation0 + $0x58] sm:$0x3] %v1199_v43  ;;  %v1200_v45 = vld [vmem:[%s1812_s0 + $0x14] sm:$0x3]  ;;  %v797_v46 = vsel %vm643_vm0, %v795_v39, %v793_v44 }
  0x1e   :  { %594 = vst [vmem:[#allocation0 + $0x50] sm:$0x3] %v1200_v45  ;;  %v1201_v47 = vld [vmem:[%s1812_s0 + $0x12] sm:$0x3]  ;;  %v1202_v48 = vld [vmem:[%s1812_s0 + $0x10] sm:$0x3]  ;;  %798 = vrot.lane.b32.xlu0 %v797_v46, %s1241_s10 }
  0x1f   :  { %v1163_v49 = vld [vmem:[%s1812_s0 + $0x5e] sm:$0x3]  ;;  %v817_v50 = vld [vmem:[#allocation0 + $0x301] ss:$8 sm:$0xf0]  }
  0x20   :  { %599 = vst [vmem:[#allocation0 + $0x48] sm:$0x3] %v1201_v47  ;;  %604 = vst [vmem:[#allocation0 + $0x40] sm:$0x3] %v1202_v48  ;;  %v1164_v51 = vld [vmem:[%s1812_s0 + $0x5c] sm:$0x3] }
  0x21   :  { %409 = vst [vmem:[#allocation0 + $0x178] sm:$0x3] %v1163_v49  ;;  %414 = vst [vmem:[#allocation0 + $0x170] sm:$0x3] %v1164_v51  ;;  %v1165_v52 = vld [vmem:[%s1812_s0 + $0x5a] sm:$0x3] }
  0x22   :  { %v1166_v53 = vld [vmem:[%s1812_s0 + $0x58] sm:$0x3]  ;;  %v1167_v54 = vld [vmem:[%s1812_s0 + $0x56] sm:$0x3]  ;;  %419 = vst [vmem:[#allocation0 + $0x168] sm:$0x3] %v1165_v52 }
  0x23   :  { %v815_v55 = vld [vmem:[#allocation0 + $0x301] ss:$8 sm:$0xf]   ;;  %424 = vst [vmem:[#allocation0 + $0x160] sm:$0x3] %v1166_v53 }
  0x24   :  { %429 = vst [vmem:[#allocation0 + $0x158] sm:$0x3] %v1167_v54  ;;  %v1168_v56 = vld [vmem:[%s1812_s0 + $0x54] sm:$0x3]  ;;  %v819_v57 = vsel %vm643_vm0, %v817_v50, %v815_v55  ;;  %v1169_v58 = vld [vmem:[%s1812_s0 + $0x52] sm:$0x3] }
  0x25   :  { %434 = vst [vmem:[#allocation0 + $0x150] sm:$0x3] %v1168_v56  ;;  %v1170_v59 = vld [vmem:[%s1812_s0 + $0x50] sm:$0x3]  ;;  %v1131_v60 = vld [vmem:[%s1812_s0 + $0x9e] sm:$0x3]  ;;  %820 = vrot.lane.b32.xlu1 %v819_v57, %s1241_s10 }
  0x26   :  { %439 = vst [vmem:[#allocation0 + $0x148] sm:$0x3] %v1169_v58  ;;  %444 = vst [vmem:[#allocation0 + $0x140] sm:$0x3] %v1170_v59  ;;  %v1132_v61 = vld [vmem:[%s1812_s0 + $0x9c] sm:$0x3] }
  0x27   :  { %249 = vst [vmem:[#allocation0 + $0x278] sm:$0x3] %v1131_v60  ;;  %v1133_v62 = vld [vmem:[%s1812_s0 + $0x9a] sm:$0x3]  ;;  %v1134_v63 = vld [vmem:[%s1812_s0 + $0x98] sm:$0x3] }
  0x28   :  { %v828_v0 = vld [vmem:[#allocation0 + $0x41] ss:$8 sm:$0xf0]   ;;  %254 = vst [vmem:[#allocation0 + $0x270] sm:$0x3] %v1132_v61 }
  0x29   :  { %259 = vst [vmem:[#allocation0 + $0x268] sm:$0x3] %v1133_v62  ;;  %264 = vst [vmem:[#allocation0 + $0x260] sm:$0x3] %v1134_v63  ;;  %v1135_v1 = vld [vmem:[%s1812_s0 + $0x96] sm:$0x3] }
  0x2a   :  { %269 = vst [vmem:[#allocation0 + $0x258] sm:$0x3] %v1135_v1  ;;  %v1136_v2 = vld [vmem:[%s1812_s0 + $0x94] sm:$0x3]  ;;  %v1137_v3 = vld [vmem:[%s1812_s0 + $0x92] sm:$0x3] }
  0x2b   :  { %v1138_v4 = vld [vmem:[%s1812_s0 + $0x90] sm:$0x3]  ;;  %274 = vst [vmem:[#allocation0 + $0x250] sm:$0x3] %v1136_v2  ;;  %279 = vst [vmem:[#allocation0 + $0x248] sm:$0x3] %v1137_v3 }
  0x2c   :  { %v826_v5 = vld [vmem:[#allocation0 + $0x41] ss:$8 sm:$0xf]   ;;  %284 = vst [vmem:[#allocation0 + $0x240] sm:$0x3] %v1138_v4 }
  0x2d   :  { %v1099_v6 = vld [vmem:[%s1812_s0 + $0xde] sm:$0x3]  ;;  %v830_v7 = vsel %vm643_vm0, %v828_v0, %v826_v5  ;;  %v1100_v8 = vld [vmem:[%s1812_s0 + $0xdc] sm:$0x3]  ;;  %v1101_v9 = vld [vmem:[%s1812_s0 + $0xda] sm:$0x3] }
  0x2e   :  { %89 = vst [vmem:[#allocation0 + $0x378] sm:$0x3] %v1099_v6  ;;  %v1102_v10 = vld [vmem:[%s1812_s0 + $0xd8] sm:$0x3]  ;;  %831 = vrot.lane.b32.xlu0 %v830_v7, %s1241_s10  ;;  %94 = vst [vmem:[#allocation0 + $0x370] sm:$0x3] %v1100_v8 }
  0x2f   :  { %v839_v11 = vld [vmem:[#allocation0 + $0x141] ss:$8 sm:$0xf0]   ;;  %99 = vst [vmem:[#allocation0 + $0x368] sm:$0x3] %v1101_v9 }
  0x30   :  { %104 = vst [vmem:[#allocation0 + $0x360] sm:$0x3] %v1102_v10  ;;  %v1103_v12 = vld [vmem:[%s1812_s0 + $0xd6] sm:$0x3]  ;;  %v1104_v13 = vld [vmem:[%s1812_s0 + $0xd4] sm:$0x3] }
  0x31   :  { %109 = vst [vmem:[#allocation0 + $0x358] sm:$0x3] %v1103_v12  ;;  %v1105_v14 = vld [vmem:[%s1812_s0 + $0xd2] sm:$0x3]  ;;  %v1106_v15 = vld [vmem:[%s1812_s0 + $0xd0] sm:$0x3] }
  0x32   :  { %v837_v16 = vld [vmem:[#allocation0 + $0x141] ss:$8 sm:$0xf]   ;;  %114 = vst [vmem:[#allocation0 + $0x350] sm:$0x3] %v1104_v13 }
  0x33   :  { %119 = vst [vmem:[#allocation0 + $0x348] sm:$0x3] %v1105_v14  ;;  %124 = vst [vmem:[#allocation0 + $0x340] sm:$0x3] %v1106_v15  ;;  %v1187_v17 = vld [vmem:[%s1812_s0 + $0x2e] sm:$0x3]  ;;  %v841_v18 = vsel %vm643_vm0, %v839_v11, %v837_v16 }
  0x34   :  { %v850_v19 = vld [vmem:[#allocation0 + $0x241] ss:$8 sm:$0xf0]   ;;  %529 = vst [vmem:[#allocation0 + $0xb8] sm:$0x3] %v1187_v17  ;;  %842 = vrot.lane.b32.xlu1 %v841_v18, %s1241_s10 }
  0x35   :  { %v1188_v20 = vld [vmem:[%s1812_s0 + $0x2c] sm:$0x3]  ;;  %v1189_v21 = vld [vmem:[%s1812_s0 + $0x2a] sm:$0x3]  ;;  %v1190_v22 = vld [vmem:[%s1812_s0 + $0x28] sm:$0x3] }
  0x36   :  { %534 = vst [vmem:[#allocation0 + $0xb0] sm:$0x3] %v1188_v20  ;;  %v1191_v23 = vld [vmem:[%s1812_s0 + $0x26] sm:$0x3]  ;;  %539 = vst [vmem:[#allocation0 + $0xa8] sm:$0x3] %v1189_v21 }
  0x37   :  { %v848_v24 = vld [vmem:[#allocation0 + $0x241] ss:$8 sm:$0xf]   ;;  %544 = vst [vmem:[#allocation0 + $0xa0] sm:$0x3] %v1190_v22 }
  0x38   :  { %549 = vst [vmem:[#allocation0 + $0x98] sm:$0x3] %v1191_v23  ;;  %v1192_v25 = vld [vmem:[%s1812_s0 + $0x24] sm:$0x3]  ;;  %v852_v26 = vsel %vm643_vm0, %v850_v19, %v848_v24  ;;  %v1193_v27 = vld [vmem:[%s1812_s0 + $0x22] sm:$0x3] }
  0x39   :  { %554 = vst [vmem:[#allocation0 + $0x90] sm:$0x3] %v1192_v25  ;;  %v1194_v28 = vld [vmem:[%s1812_s0 + $0x20] sm:$0x3]  ;;  %v1155_v29 = vld [vmem:[%s1812_s0 + $0x6e] sm:$0x3]  ;;  %853 = vrot.lane.b32.xlu0 %v852_v26, %s1241_s10 }
  0x3a   :  { %v861_v30 = vld [vmem:[#allocation0 + $0x341] ss:$8 sm:$0xf0]   ;;  %559 = vst [vmem:[#allocation0 + $0x88] sm:$0x3] %v1193_v27 }
  0x3b   :  { %564 = vst [vmem:[#allocation0 + $0x80] sm:$0x3] %v1194_v28  ;;  %369 = vst [vmem:[#allocation0 + $0x1b8] sm:$0x3] %v1155_v29  ;;  %v1156_v31 = vld [vmem:[%s1812_s0 + $0x6c] sm:$0x3] }
  0x3c   :  { %374 = vst [vmem:[#allocation0 + $0x1b0] sm:$0x3] %v1156_v31  ;;  %v1157_v32 = vld [vmem:[%s1812_s0 + $0x6a] sm:$0x3]  ;;  %v1158_v33 = vld [vmem:[%s1812_s0 + $0x68] sm:$0x3] }
  0x3d   :  { %v1159_v34 = vld [vmem:[%s1812_s0 + $0x66] sm:$0x3]  ;;  %v859_v35 = vld [vmem:[#allocation0 + $0x341] ss:$8 sm:$0xf]  }
  0x3e   :  { %379 = vst [vmem:[#allocation0 + $0x1a8] sm:$0x3] %v1157_v32  ;;  %384 = vst [vmem:[#allocation0 + $0x1a0] sm:$0x3] %v1158_v33  ;;  %v1160_v36 = vld [vmem:[%s1812_s0 + $0x64] sm:$0x3]  ;;  %v863_v37 = vsel %vm643_vm0, %v861_v30, %v859_v35 }
  0x3f   :  { %389 = vst [vmem:[#allocation0 + $0x198] sm:$0x3] %v1159_v34  ;;  %394 = vst [vmem:[#allocation0 + $0x190] sm:$0x3] %v1160_v36  ;;  %v1161_v38 = vld [vmem:[%s1812_s0 + $0x62] sm:$0x3]  ;;  %864 = vrot.lane.b32.xlu1 %v863_v37, %s1241_s10 }
  0x40   :  { %v1162_v39 = vld [vmem:[%s1812_s0 + $0x60] sm:$0x3]  ;;  %v1123_v40 = vld [vmem:[%s1812_s0 + $0xae] sm:$0x3]  ;;  %399 = vst [vmem:[#allocation0 + $0x188] sm:$0x3] %v1161_v38 }
  0x41   :  { %404 = vst [vmem:[#allocation0 + $0x180] sm:$0x3] %v1162_v39  ;;  %209 = vst [vmem:[#allocation0 + $0x2b8] sm:$0x3] %v1123_v40  ;;  %v1124_v41 = vld [vmem:[%s1812_s0 + $0xac] sm:$0x3] }
  0x42   :  { %v1125_v42 = vld [vmem:[%s1812_s0 + $0xaa] sm:$0x3]  ;;  %v1126_v43 = vld [vmem:[%s1812_s0 + $0xa8] sm:$0x3]  ;;  %214 = vst [vmem:[#allocation0 + $0x2b0] sm:$0x3] %v1124_v41 }
  0x43   :  { %v872_v44 = vld [vmem:[#allocation0 + $0x81] ss:$8 sm:$0xf0]   ;;  %219 = vst [vmem:[#allocation0 + $0x2a8] sm:$0x3] %v1125_v42 }
  0x44   :  { %224 = vst [vmem:[#allocation0 + $0x2a0] sm:$0x3] %v1126_v43  ;;  %v1127_v45 = vld [vmem:[%s1812_s0 + $0xa6] sm:$0x3]  ;;  %v1128_v46 = vld [vmem:[%s1812_s0 + $0xa4] sm:$0x3] }
  0x45   :  { %229 = vst [vmem:[#allocation0 + $0x298] sm:$0x3] %v1127_v45  ;;  %v1129_v47 = vld [vmem:[%s1812_s0 + $0xa2] sm:$0x3]  ;;  %v1130_v48 = vld [vmem:[%s1812_s0 + $0xa0] sm:$0x3] }
  0x46   :  { %v870_v49 = vld [vmem:[#allocation0 + $0x81] ss:$8 sm:$0xf]   ;;  %234 = vst [vmem:[#allocation0 + $0x290] sm:$0x3] %v1128_v46 }
  0x47   :  { %239 = vst [vmem:[#allocation0 + $0x288] sm:$0x3] %v1129_v47  ;;  %244 = vst [vmem:[#allocation0 + $0x280] sm:$0x3] %v1130_v48  ;;  %v1091_v50 = vld [vmem:[%s1812_s0 + $0xee] sm:$0x3]  ;;  %v874_v51 = vsel %vm643_vm0, %v872_v44, %v870_v49 }
  0x48   :  { %49 = vst [vmem:[#allocation0 + $0x3b8] sm:$0x3] %v1091_v50  ;;  %v1092_v52 = vld [vmem:[%s1812_s0 + $0xec] sm:$0x3]  ;;  %v1093_v53 = vld [vmem:[%s1812_s0 + $0xea] sm:$0x3]  ;;  %875 = vrot.lane.b32.xlu0 %v874_v51, %s1241_s10 }
  0x49   :  { %v1094_v54 = vld [vmem:[%s1812_s0 + $0xe8] sm:$0x3]  ;;  %54 = vst [vmem:[#allocation0 + $0x3b0] sm:$0x3] %v1092_v52  ;;  %59 = vst [vmem:[#allocation0 + $0x3a8] sm:$0x3] %v1093_v53 }
  0x4a   :  { %v883_v55 = vld [vmem:[#allocation0 + $0x181] ss:$8 sm:$0xf0]   ;;  %64 = vst [vmem:[#allocation0 + $0x3a0] sm:$0x3] %v1094_v54 }
  0x4b   :  { %v1095_v56 = vld [vmem:[%s1812_s0 + $0xe6] sm:$0x3]  ;;  %v1096_v57 = vld [vmem:[%s1812_s0 + $0xe4] sm:$0x3]  ;;  %v1097_v58 = vld [vmem:[%s1812_s0 + $0xe2] sm:$0x3] }
  0x4c   :  { %69 = vst [vmem:[#allocation0 + $0x398] sm:$0x3] %v1095_v56  ;;  %v1098_v59 = vld [vmem:[%s1812_s0 + $0xe0] sm:$0x3]  ;;  %74 = vst [vmem:[#allocation0 + $0x390] sm:$0x3] %v1096_v57 }
  0x4d   :  { %v881_v60 = vld [vmem:[#allocation0 + $0x181] ss:$8 sm:$0xf]   ;;  %79 = vst [vmem:[#allocation0 + $0x388] sm:$0x3] %v1097_v58 }
  0x4e   :  { %84 = vst [vmem:[#allocation0 + $0x380] sm:$0x3] %v1098_v59  ;;  %v1179_v61 = vld [vmem:[%s1812_s0 + $0x3e] sm:$0x3]  ;;  %v885_v62 = vsel %vm643_vm0, %v883_v55, %v881_v60  ;;  %v1180_v0 = vld [vmem:[%s1812_s0 + $0x3c] sm:$0x3] }
  0x4f   :  { %v894_v63 = vld [vmem:[#allocation0 + $0x281] ss:$8 sm:$0xf0]   ;;  %489 = vst [vmem:[#allocation0 + $0xf8] sm:$0x3] %v1179_v61  ;;  %886 = vrot.lane.b32.xlu1 %v885_v62, %s1241_s10 }
  0x50   :  { %494 = vst [vmem:[#allocation0 + $0xf0] sm:$0x3] %v1180_v0  ;;  %v1181_v1 = vld [vmem:[%s1812_s0 + $0x3a] sm:$0x3]  ;;  %v1182_v2 = vld [vmem:[%s1812_s0 + $0x38] sm:$0x3] }
  0x51   :  { %v1183_v3 = vld [vmem:[%s1812_s0 + $0x36] sm:$0x3]  ;;  %v892_v4 = vld [vmem:[#allocation0 + $0x281] ss:$8 sm:$0xf]  }
  0x52   :  { %499 = vst [vmem:[#allocation0 + $0xe8] sm:$0x3] %v1181_v1  ;;  %504 = vst [vmem:[#allocation0 + $0xe0] sm:$0x3] %v1182_v2  ;;  %v1184_v5 = vld [vmem:[%s1812_s0 + $0x34] sm:$0x3]  ;;  %v896_v6 = vsel %vm643_vm0, %v894_v63, %v892_v4 }
  0x53   :  { %509 = vst [vmem:[#allocation0 + $0xd8] sm:$0x3] %v1183_v3  ;;  %514 = vst [vmem:[#allocation0 + $0xd0] sm:$0x3] %v1184_v5  ;;  %v1185_v7 = vld [vmem:[%s1812_s0 + $0x32] sm:$0x3]  ;;  %897 = vrot.lane.b32.xlu0 %v896_v6, %s1241_s10 }
  0x54   :  { %v1186_v8 = vld [vmem:[%s1812_s0 + $0x30] sm:$0x3]  ;;  %v1147_v9 = vld [vmem:[%s1812_s0 + $0x7e] sm:$0x3]  ;;  %519 = vst [vmem:[#allocation0 + $0xc8] sm:$0x3] %v1185_v7 }
  0x55   :  { %v905_v10 = vld [vmem:[#allocation0 + $0x381] ss:$8 sm:$0xf0]   ;;  %524 = vst [vmem:[#allocation0 + $0xc0] sm:$0x3] %v1186_v8 }
  0x56   :  { %329 = vst [vmem:[#allocation0 + $0x1f8] sm:$0x3] %v1147_v9  ;;  %v1148_v11 = vld [vmem:[%s1812_s0 + $0x7c] sm:$0x3]  ;;  %v1149_v12 = vld [vmem:[%s1812_s0 + $0x7a] sm:$0x3] }
  0x57   :  { %334 = vst [vmem:[#allocation0 + $0x1f0] sm:$0x3] %v1148_v11  ;;  %v1150_v13 = vld [vmem:[%s1812_s0 + $0x78] sm:$0x3]  ;;  %v1151_v14 = vld [vmem:[%s1812_s0 + $0x76] sm:$0x3] }
  0x58   :  { %v903_v15 = vld [vmem:[#allocation0 + $0x381] ss:$8 sm:$0xf]   ;;  %339 = vst [vmem:[#allocation0 + $0x1e8] sm:$0x3] %v1149_v12 }
  0x59   :  { %344 = vst [vmem:[#allocation0 + $0x1e0] sm:$0x3] %v1150_v13  ;;  %349 = vst [vmem:[#allocation0 + $0x1d8] sm:$0x3] %v1151_v14  ;;  %v1152_v16 = vld [vmem:[%s1812_s0 + $0x74] sm:$0x3]  ;;  %v907_v17 = vsel %vm643_vm0, %v905_v10, %v903_v15 }
  0x5a   :  { %354 = vst [vmem:[#allocation0 + $0x1d0] sm:$0x3] %v1152_v16  ;;  %v1153_v18 = vld [vmem:[%s1812_s0 + $0x72] sm:$0x3]  ;;  %v1154_v19 = vld [vmem:[%s1812_s0 + $0x70] sm:$0x3]  ;;  %908 = vrot.lane.b32.xlu1 %v907_v17, %s1241_s10 }
  0x5b   :  { %v1115_v20 = vld [vmem:[%s1812_s0 + $0xbe] sm:$0x3]  ;;  %359 = vst [vmem:[#allocation0 + $0x1c8] sm:$0x3] %v1153_v18  ;;  %364 = vst [vmem:[#allocation0 + $0x1c0] sm:$0x3] %v1154_v19 }
  0x5c   :  { %169 = vst [vmem:[#allocation0 + $0x2f8] sm:$0x3] %v1115_v20  ;;  %v1116_v21 = vld [vmem:[%s1812_s0 + $0xbc] sm:$0x3]  ;;  %v1117_v22 = vld [vmem:[%s1812_s0 + $0xba] sm:$0x3] }
  0x5d   :  { %v1118_v23 = vld [vmem:[%s1812_s0 + $0xb8] sm:$0x3]  ;;  %174 = vst [vmem:[#allocation0 + $0x2f0] sm:$0x3] %v1116_v21  ;;  %179 = vst [vmem:[#allocation0 + $0x2e8] sm:$0x3] %v1117_v22 }
  0x5e   :  { %v916_v24 = vld [vmem:[#allocation0 + $0xc1] ss:$8 sm:$0xf0]   ;;  %184 = vst [vmem:[#allocation0 + $0x2e0] sm:$0x3] %v1118_v23 }
  0x5f   :  { %v1119_v25 = vld [vmem:[%s1812_s0 + $0xb6] sm:$0x3]  ;;  %v1120_v26 = vld [vmem:[%s1812_s0 + $0xb4] sm:$0x3]  ;;  %v1121_v27 = vld [vmem:[%s1812_s0 + $0xb2] sm:$0x3] }
  0x60   :  { %189 = vst [vmem:[#allocation0 + $0x2d8] sm:$0x3] %v1119_v25  ;;  %v1122_v28 = vld [vmem:[%s1812_s0 + $0xb0] sm:$0x3]  ;;  %194 = vst [vmem:[#allocation0 + $0x2d0] sm:$0x3] %v1120_v26 }
  0x61   :  { %v914_v29 = vld [vmem:[#allocation0 + $0xc1] ss:$8 sm:$0xf]   ;;  %199 = vst [vmem:[#allocation0 + $0x2c8] sm:$0x3] %v1121_v27 }
  0x62   :  { %204 = vst [vmem:[#allocation0 + $0x2c0] sm:$0x3] %v1122_v28  ;;  %v1083_v30 = vld [vmem:[%s1812_s0 + $0xfe] sm:$0x3]  ;;  %v918_v31 = vsel %vm643_vm0, %v916_v24, %v914_v29  ;;  %v1084_v32 = vld [vmem:[%s1812_s0 + $0xfc] sm:$0x3] }
  0x63   :  { %9 = vst [vmem:[#allocation0 + $0x3f8] sm:$0x3] %v1083_v30  ;;  %v1085_v33 = vld [vmem:[%s1812_s0 + $0xfa] sm:$0x3]  ;;  %v1086_v34 = vld [vmem:[%s1812_s0 + $0xf8] sm:$0x3]  ;;  %919 = vrot.lane.b32.xlu0 %v918_v31, %s1241_s10 }
  0x64   :  { %v927_v35 = vld [vmem:[#allocation0 + $0x1c1] ss:$8 sm:$0xf0]   ;;  %14 = vst [vmem:[#allocation0 + $0x3f0] sm:$0x3] %v1084_v32 }
  0x65   :  { %19 = vst [vmem:[#allocation0 + $0x3e8] sm:$0x3] %v1085_v33  ;;  %24 = vst [vmem:[#allocation0 + $0x3e0] sm:$0x3] %v1086_v34  ;;  %v1087_v36 = vld [vmem:[%s1812_s0 + $0xf6] sm:$0x3] }
  0x66   :  { %29 = vst [vmem:[#allocation0 + $0x3d8] sm:$0x3] %v1087_v36  ;;  %v1088_v37 = vld [vmem:[%s1812_s0 + $0xf4] sm:$0x3]  ;;  %v1089_v38 = vld [vmem:[%s1812_s0 + $0xf2] sm:$0x3] }
  0x67   :  { %v1090_v39 = vld [vmem:[%s1812_s0 + $0xf0] sm:$0x3]  ;;  %34 = vst [vmem:[#allocation0 + $0x3d0] sm:$0x3] %v1088_v37  ;;  %39 = vst [vmem:[#allocation0 + $0x3c8] sm:$0x3] %v1089_v38 }
  0x68   :  { %v925_v40 = vld [vmem:[#allocation0 + $0x1c1] ss:$8 sm:$0xf]   ;;  %44 = vst [vmem:[#allocation0 + $0x3c0] sm:$0x3] %v1090_v39 }
  0x69   :  { %v641_v41 = vld [vmem:[#allocation0] ss:$8 sm:$0xf]   ;;  %v929_v42 = vsel %vm643_vm0, %v927_v35, %v925_v40  ;;  %v938_v43 = vld [vmem:[#allocation0 + $0x2c1] ss:$8 sm:$0xf0]  }
  0x6a   :  { %v642_v44 = vld [vmem:[#allocation0] ss:$8 sm:$0xf0]   ;;  %930 = vrot.lane.b32.xlu1 %v929_v42, %s1241_s10  ;;  %v936_v48 = vld [vmem:[#allocation0 + $0x2c1] ss:$8 sm:$0xf]  }
  0x6b   :  { %v644_v45 = vsel %vm643_vm0, %v642_v44, %v641_v41  ;;  %v711_v46 = vld [vmem:[#allocation0 + $0x200] ss:$8 sm:$0xf]   ;;  %v940_v51 = vsel %vm643_vm0, %v938_v43, %v936_v48 }
  0x6c   :  { %v713_v47 = vld [vmem:[#allocation0 + $0x200] ss:$8 sm:$0xf0]   ;;  %646 = vst.msk [vmem:[%s1813_s1] sm:$0xff] %vm645_vm1, %v644_v45   ;;  %941 = vrot.lane.b32.xlu0 %v940_v51, %s1241_s10 }
  0x6d   :  { %v715_v49 = vsel %vm643_vm0, %v713_v47, %v711_v46  ;;  %v675_v50 = vld [vmem:[#allocation0 + $0x100] ss:$8 sm:$0xf]   ;;  %v949_v54 = vld [vmem:[#allocation0 + $0x3c1] ss:$8 sm:$0xf0]  }
  0x6e   :  { %1217 = vst.msk [vmem:[%s1813_s1 + $0x40] sm:$0xff] %vm645_vm1, %v715_v49   ;;  %v677_v52 = vld [vmem:[#allocation0 + $0x100] ss:$8 sm:$0xf0]  }
  0x6f   :  { %v747_v53 = vld [vmem:[#allocation0 + $0x300] ss:$8 sm:$0xf]   ;;  %v679_v55 = vsel %vm643_vm0, %v677_v52, %v675_v50  ;;  %v947_v60 = vld [vmem:[#allocation0 + $0x3c1] ss:$8 sm:$0xf]  }
  0x70   :  { %v749_v56 = vld [vmem:[#allocation0 + $0x300] ss:$8 sm:$0xf0]   ;;  %1213 = vst.msk [vmem:[%s1813_s1 + $0x20] sm:$0xff] %vm645_vm1, %v679_v55   ;;  %v951_v63 = vsel %vm643_vm0, %v949_v54, %v947_v60 }
  0x71   :  { %v751_v57 = vsel %vm643_vm0, %v749_v56, %v747_v53  ;;  %v648_v58 = vld [vmem:[#allocation0 + $0x40] ss:$8 sm:$0xf]   ;;  %952 = vrot.lane.b32.xlu1 %v951_v63, %s1241_s10 }
  0x72   :  { %v650_v59 = vld [vmem:[#allocation0 + $0x40] ss:$8 sm:$0xf0]   ;;  %1221 = vst.msk [vmem:[%s1813_s1 + $0x60] sm:$0xff] %vm645_vm1, %v751_v57  }
  0x73   :  { %v652_v61 = vsel %vm643_vm0, %v650_v59, %v648_v58  ;;  %v684_v62 = vld [vmem:[#allocation0 + $0x140] ss:$8 sm:$0xf]  }
  0x74   :  { %1210 = vst.msk [vmem:[%s1813_s1 + $0x8] sm:$0xff] %vm645_vm1, %v652_v61   ;;  %v686_v0 = vld [vmem:[#allocation0 + $0x140] ss:$8 sm:$0xf0]  }
  0x75   :  { %v720_v1 = vld [vmem:[#allocation0 + $0x240] ss:$8 sm:$0xf]   ;;  %v688_v2 = vsel %vm643_vm0, %v686_v0, %v684_v62 }
  0x76   :  { %v722_v3 = vld [vmem:[#allocation0 + $0x240] ss:$8 sm:$0xf0]   ;;  %1214 = vst.msk [vmem:[%s1813_s1 + $0x28] sm:$0xff] %vm645_vm1, %v688_v2  }
  0x77   :  { %v756_v4 = vld [vmem:[#allocation0 + $0x340] ss:$8 sm:$0xf]   ;;  %v724_v5 = vsel %vm643_vm0, %v722_v3, %v720_v1 }
  0x78   :  { %v758_v6 = vld [vmem:[#allocation0 + $0x340] ss:$8 sm:$0xf0]   ;;  %1218 = vst.msk [vmem:[%s1813_s1 + $0x48] sm:$0xff] %vm645_vm1, %v724_v5  }
  0x79   :  { %v657_v7 = vld [vmem:[#allocation0 + $0x80] ss:$8 sm:$0xf]   ;;  %v760_v8 = vsel %vm643_vm0, %v758_v6, %v756_v4 }
  0x7a   :  { %v659_v9 = vld [vmem:[#allocation0 + $0x80] ss:$8 sm:$0xf0]   ;;  %1222 = vst.msk [vmem:[%s1813_s1 + $0x68] sm:$0xff] %vm645_vm1, %v760_v8  }
  0x7b   :  { %v693_v10 = vld [vmem:[#allocation0 + $0x180] ss:$8 sm:$0xf]   ;;  %v661_v11 = vsel %vm643_vm0, %v659_v9, %v657_v7 }
  0x7c   :  { %v695_v12 = vld [vmem:[#allocation0 + $0x180] ss:$8 sm:$0xf0]   ;;  %1211 = vst.msk [vmem:[%s1813_s1 + $0x10] sm:$0xff] %vm645_vm1, %v661_v11  }
  0x7d   :  { %v729_v13 = vld [vmem:[#allocation0 + $0x280] ss:$8 sm:$0xf]   ;;  %v697_v14 = vsel %vm643_vm0, %v695_v12, %v693_v10 }
  0x7e   :  { %v731_v15 = vld [vmem:[#allocation0 + $0x280] ss:$8 sm:$0xf0]   ;;  %1215 = vst.msk [vmem:[%s1813_s1 + $0x30] sm:$0xff] %vm645_vm1, %v697_v14  }
  0x7f   :  { %v765_v16 = vld [vmem:[#allocation0 + $0x380] ss:$8 sm:$0xf]   ;;  %v733_v17 = vsel %vm643_vm0, %v731_v15, %v729_v13 }
  0x80   :  { %v767_v18 = vld [vmem:[#allocation0 + $0x380] ss:$8 sm:$0xf0]   ;;  %1219 = vst.msk [vmem:[%s1813_s1 + $0x50] sm:$0xff] %vm645_vm1, %v733_v17  }
  0x81   :  { %v666_v19 = vld [vmem:[#allocation0 + $0xc0] ss:$8 sm:$0xf]   ;;  %v769_v20 = vsel %vm643_vm0, %v767_v18, %v765_v16 }
  0x82   :  { %v668_v21 = vld [vmem:[#allocation0 + $0xc0] ss:$8 sm:$0xf0]   ;;  %1223 = vst.msk [vmem:[%s1813_s1 + $0x70] sm:$0xff] %vm645_vm1, %v769_v20  }
  0x83   :  { %v702_v22 = vld [vmem:[#allocation0 + $0x1c0] ss:$8 sm:$0xf]   ;;  %v670_v23 = vsel %vm643_vm0, %v668_v21, %v666_v19 }
  0x84   :  { %v704_v24 = vld [vmem:[#allocation0 + $0x1c0] ss:$8 sm:$0xf0]   ;;  %1212 = vst.msk [vmem:[%s1813_s1 + $0x18] sm:$0xff] %vm645_vm1, %v670_v23  }
  0x85   :  { %v738_v25 = vld [vmem:[#allocation0 + $0x2c0] ss:$8 sm:$0xf]   ;;  %v706_v26 = vsel %vm643_vm0, %v704_v24, %v702_v22 }
  0x86   :  { %v740_v27 = vld [vmem:[#allocation0 + $0x2c0] ss:$8 sm:$0xf0]   ;;  %1216 = vst.msk [vmem:[%s1813_s1 + $0x38] sm:$0xff] %vm645_vm1, %v706_v26  }
  0x87   :  { %v774_v28 = vld [vmem:[#allocation0 + $0x3c0] ss:$8 sm:$0xf]   ;;  %v742_v29 = vsel %vm643_vm0, %v740_v27, %v738_v25  ;;  %v789_v32 = vpop.permute.xlu0 %788  }
  0x88   :  { %v776_v30 = vld [vmem:[#allocation0 + $0x3c0] ss:$8 sm:$0xf0]   ;;  %1220 = vst.msk [vmem:[%s1813_s1 + $0x58] sm:$0xff] %vm645_vm1, %v742_v29  }
  0x89   :  { %v778_v31 = vsel %vm643_vm0, %v776_v30, %v774_v28  ;;  %791 = vst.msk [vmem:[%s1813_s1] sm:$0xff] %vm790_vm2, %v789_v32  }
  0x8a   :  { %1224 = vst.msk [vmem:[%s1813_s1 + $0x78] sm:$0xff] %vm645_vm1, %v778_v31  }
  0x8c   :  { %v810_v33 = vpop.permute.xlu1 %809  }
  0x8d   :  { %1226 = vst.msk [vmem:[%s1813_s1 + $0x40] sm:$0xff] %vm790_vm2, %v810_v33  }
  0x90   :  { %v799_v34 = vpop.permute.xlu0 %798  }
  0x91   :  { %1225 = vst.msk [vmem:[%s1813_s1 + $0x20] sm:$0xff] %vm790_vm2, %v799_v34  }
  0x97   :  { %v821_v35 = vpop.permute.xlu1 %820  }
  0x98   :  { %1227 = vst.msk [vmem:[%s1813_s1 + $0x60] sm:$0xff] %vm790_vm2, %v821_v35  }
  0xa0   :  { %v832_v36 = vpop.permute.xlu0 %831  }
  0xa1   :  { %1228 = vst.msk [vmem:[%s1813_s1 + $0x8] sm:$0xff] %vm790_vm2, %v832_v36  }
  0xa6   :  { %v843_v37 = vpop.permute.xlu1 %842  }
  0xa7   :  { %1229 = vst.msk [vmem:[%s1813_s1 + $0x28] sm:$0xff] %vm790_vm2, %v843_v37  }
  0xab   :  { %v854_v38 = vpop.permute.xlu0 %853  }
  0xac   :  { %1230 = vst.msk [vmem:[%s1813_s1 + $0x48] sm:$0xff] %vm790_vm2, %v854_v38  }
  0xb1   :  { %v865_v39 = vpop.permute.xlu1 %864  }
  0xb2   :  { %1231 = vst.msk [vmem:[%s1813_s1 + $0x68] sm:$0xff] %vm790_vm2, %v865_v39  }
  0xba   :  { %v876_v40 = vpop.permute.xlu0 %875  }
  0xbb   :  { %1232 = vst.msk [vmem:[%s1813_s1 + $0x10] sm:$0xff] %vm790_vm2, %v876_v40  }
  0xc1   :  { %v887_v41 = vpop.permute.xlu1 %886  }
  0xc2   :  { %1233 = vst.msk [vmem:[%s1813_s1 + $0x30] sm:$0xff] %vm790_vm2, %v887_v41  }
  0xc5   :  { %v898_v42 = vpop.permute.xlu0 %897  }
  0xc6   :  { %1234 = vst.msk [vmem:[%s1813_s1 + $0x50] sm:$0xff] %vm790_vm2, %v898_v42  }
  0xcc   :  { %v909_v43 = vpop.permute.xlu1 %908  }
  0xcd   :  { %1235 = vst.msk [vmem:[%s1813_s1 + $0x70] sm:$0xff] %vm790_vm2, %v909_v43  }
  0xd5   :  { %v920_v44 = vpop.permute.xlu0 %919  }
  0xd6   :  { %1236 = vst.msk [vmem:[%s1813_s1 + $0x18] sm:$0xff] %vm790_vm2, %v920_v44  }
  0xdc   :  { %v931_v45 = vpop.permute.xlu1 %930  }
  0xdd   :  { %1237 = vst.msk [vmem:[%s1813_s1 + $0x38] sm:$0xff] %vm790_vm2, %v931_v45  }
  0xde   :  { %v942_v46 = vpop.permute.xlu0 %941  }
  0xdf   :  { %1238 = vst.msk [vmem:[%s1813_s1 + $0x58] sm:$0xff] %vm790_vm2, %v942_v46  }
  0xe3   :  { %v953_v47 = vpop.permute.xlu1 %952  }
  0xe4   :  { %1239 = vst.msk [vmem:[%s1813_s1 + $0x78] sm:$0xff] %vm790_vm2, %v953_v47  }

// kernel: _lambda_.1
= control target key start
LH: loop header
LB: loop body
LE: loop exit
PB: predicated region body
PF: predicated region fallthrough
CT: control target
= control target key end

     0   :  { %s15429_s0 = inlined_call_operand.hbm [shape: f32[16,512], index: 0, kind: input, shape index: {}]   ;;  %s15430_s1 = inlined_call_operand.vmem [shape: f32[8,16,16], index: 1, kind: input, shape index: {}]   ;;  %s15431_s2 = inlined_call_operand.vmem [shape: f32[2,1,512], index: 2, kind: input, shape index: {}, may-alias: {2,7}]   ;;  %s15432_s3 = inlined_call_operand.hbm [shape: bf16[2,512,512], index: 3, kind: input, shape index: {}]   ;;  %s15433_s4 = inlined_call_operand.hbm [shape: bf16[2,512,512], index: 4, kind: input, shape index: {}]   ;;  %s15434_s5 = inlined_call_operand.hbm [shape: bf16[2,512,512], index: 5, kind: input, shape index: {}]   ;;  %s15435_s6 = inlined_call_operand.hbm [shape: bf16[2,8,64,512], index: 6, kind: input, shape index: {}]   ;;  %s15436_s7 = inlined_call_operand.vmem [shape: f32[2,1,512], index: 7, kind: input, shape index: {}, may-alias: {2,7}]   ;;  %s15437_s8 = inlined_call_operand.hbm [shape: bf16[2,512,1024], index: 8, kind: input, shape index: {}]   ;;  %s15438_s9 = inlined_call_operand.hbm [shape: bf16[2,1024,512], index: 9, kind: input, shape index: {}]   ;;  %s15439_s10 = inlined_call_operand.vmem [shape: f32[1,512], index: 10, kind: input, shape index: {}]   ;;  %s15440_s11 = inlined_call_operand.vmem [shape: f32[2,16,512], index: 11, kind: output, shape index: {0}]   ;;  %s15441_s12 = inlined_call_operand.vmem [shape: f32[16,512], index: 12, kind: output, shape index: {1}]  }
   0x1   :  { %15464 = sst [smem:[#allocation25_spill]] %s15430_s1 }
   0x2   :  { %15465 = sst [smem:[#allocation26_spill]] %s15432_s3 }
   0x3   :  { %15466 = sst [smem:[#allocation27_spill]] %s15434_s5 }
   0x4   :  { %15467 = sst [smem:[#allocation28_spill]] %s15437_s8 }
   0x5   :  { %15468 = sst [smem:[#allocation29_spill]] %s15439_s10 }
   0x6   :  { %15469 = sst [smem:[#allocation30_spill]] %s15440_s11 }
   0x7   :  { %15470 = sst [smem:[#allocation31_spill]] %s15441_s12 }
   0x8   :  { %18 = vsyncpa [#allocation4], 0 }
   0x9   :  { %19 = vsyncpa [#allocation6], 0 }
   0xa   :  { %21 = vsyncpa [#allocation6 + $0x1], 0 }
   0xb   :  { %22 = vsyncpa [#allocation9], 0 }
   0xc   :  { %24 = vsyncpa [#allocation9 + $0x1], 0 }
   0xd   :  { %25 = vsyncpa [#allocation12], 0 }
   0xe   :  { %27 = vsyncpa [#allocation12 + $0x1], 0  ;;  %s13283_s21 = smov 0   ;;  %s13285_s22 = smov 0  }
   0xf   :  { %s13287_s23 = smov 0   ;;  %s13289_s24 = smov 0  }
  0x10 LB: > { %15471 = sst [smem:[#allocation18_spill]] %s13197_s23  ;;  %s13304_s25 = sadd.s32 1, %s13201_s24   ;;  %s13201_s24 = sphi %s13289_s24, %s15514_s24   ;;  %s13197_s23 = sphi %s13287_s23, %s15516_s23   ;;  %s13193_s22 = sphi %s13285_s22, %s15518_s22   ;;  %s13189_s21 = sphi %s13283_s21, %s15517_s21  }
  0x11   : > { %15472 = sst [smem:[#allocation19_spill]] %s13304_s25  ;;  %s108_s26 = sadd.s32 1, %s13197_s23 }
  0x12   : > { %s105_s27 = ssub.s32 %s13201_s24, %s13304_s25  ;;  %p115_p0 = scmp.ne.s32.totalorder %s13197_s23, %s13193_s22 }
  0x13   : > { %p106_p1 = scmp.eq.s32.totalorder %s105_s27, 0  ;;  %p116_p2 = scmp.eq.s32.totalorder %s13201_s24, 0 }
  0x14   : > { %p11622_p3 = scmp.lt.s32.totalorder %s13201_s24, 2  ;;  %s13317_s29 = sand.u32 1, %s13201_s24  }
  0x15   : > { %s13314_s28 = scalar_select %p106_p1, %s13197_s23, %s108_s26  }
  0x16   : > { %p117_p4 = por %p116_p2, %p115_p0  ;;  %s15442_s30 = sand.u32 1, %s13197_s23  }
  0x17   : > { %15473 = sst [smem:[#allocation20_spill]] %s13314_s28  ;;  %s13322_s13 = sshll.u32 %s15442_s30, 10 }
  0x18   : > { %s13325_s14 = sshll.u32 %s13201_s24, 14  ;;  %s15474_s3 = sld [smem:[#allocation26_spill]] }
  0x19   : > { %s399_s18 = scalar_lea.vmem [#allocation5], %s13322_s13  ;;  %p13334_p5 = pnand %p11622_p3, %p117_p4 }
  0x1a   : > { %s406_s19 = sshll.u32 %s399_s18, 4  ;;  %s13338_s19 = int_to_ptr.vmem [resolvable:$true] %s406_s19 }
  0x1b   : > { %p13345_p7 = pneg %p13334_p5 }
  0x1e   : > { %s13331_s17 = scalar_lea.hbm %s15474_s3, %s13325_s14  ;;  %s12966_s30 = scalar_lea.hbm %s15474_s3, 32768 }
  0x1f   : > { %s12961_s27 = scalar_lea.hbm %s13331_s17, 16384  ;;  %p12967_p10 = scmp.lt.s32.totalorder %s13331_s17, %s15474_s3 }
  0x20   : > { %p12962_p6 = scmp.ne.s32.totalorder %s13331_s17, %s12961_s27  ;;  %p12968_p11 = scmp.lt.s32.totalorder %s12966_s30, %s12961_s27 }
  0x22   : > { %p12964_p8 = pnand %p13345_p7, %p12962_p6  ;;  %p12969_p12 = por %p12968_p11, %p12967_p10 }
  0x24   : > { %p12965_p9 = pneg %p12964_p8 }
  0x26   : > { %p12970_p13 = pnand %p12969_p12, %p12965_p9 }
  0x28   : > { %12973 = shalt.err (!%p12970_p13)
}
  0x29   : > { %s12974_s26 = scalar_lea.vmem %s13338_s19, 16384  ;;  %s13203_s12 = smov [#allocation5]  }
  0x2a   : > { %p12975_p0 = scmp.ne.s32.totalorder %s13338_s19, %s12974_s26  ;;  %s12979_s16 = sshll.u32 %s13203_s12, 4  ;;  %s12980_s16 = int_to_ptr.vmem [resolvable:$false] %s12979_s16 }
  0x2b   : > { %s12981_s18 = scalar_lea.vmem %s12980_s16, 32768  ;;  %p12982_p3 = scmp.lt.s32.totalorder %s13338_s19, %s12980_s16 }
  0x2c   : > { %p12977_p1 = pnand %p12975_p0, %p13345_p7  ;;  %p12983_p4 = scmp.lt.s32.totalorder %s12981_s18, %s12974_s26 }
  0x2e   : > { %p12978_p2 = pneg %p12977_p1  ;;  %p12984_p6 = por %p12983_p4, %p12982_p3 }
  0x30   : > { %p12985_p8 = pnand %p12984_p6, %p12978_p2 }
  0x32   : > { %12988 = shalt.err (!%p12985_p8)
}
  0x33   : > { %s15448_s25 = smov 256   ;;  %s15453_s28 = smov 16  }
  0x34   : > { %s15477_s12 = scalar_lea.sflag [#allocation6], %s13317_s29  ;;  %s15478_s5 = sld [smem:[#allocation27_spill]] }
  0x35   : > { %11605 = dma.hbm_to_vmem [thread:$0]  (!%p13334_p5), %s13331_s17, 16384, %s13338_s19, %s15477_s12, %s15448_s25, %s15448_s25, %s15453_s28  }
  0x36   : > { %s441_s16 = scalar_lea.vmem [#allocation8], %s13322_s13  ;;  %s15447_s3 = scalar_lea.sflag [#allocation9], %s13317_s29 }
  0x37   : > { %s448_s18 = sshll.u32 %s441_s16, 4  ;;  %s13379_s18 = int_to_ptr.vmem [resolvable:$true] %s448_s18 }
  0x3a   : > { %s13376_s27 = scalar_lea.hbm %s15478_s5, %s13325_s14  ;;  %s12994_s19 = scalar_lea.hbm %s15478_s5, 32768 }
  0x3b   : > { %s12989_s10 = scalar_lea.hbm %s13376_s27, 16384  ;;  %p12995_p12 = scmp.lt.s32.totalorder %s13376_s27, %s15478_s5 }
  0x3c   : > { %p12990_p9 = scmp.ne.s32.totalorder %s13376_s27, %s12989_s10  ;;  %p12996_p13 = scmp.lt.s32.totalorder %s12994_s19, %s12989_s10 }
  0x3e   : > { %p12992_p10 = pnand %p12990_p9, %p13345_p7  ;;  %p12997_p0 = por %p12996_p13, %p12995_p12 }
  0x40   : > { %p12993_p11 = pneg %p12992_p10 }
  0x42   : > { %p12998_p1 = pnand %p12997_p0, %p12993_p11 }
  0x44   : > { %13001 = shalt.err (!%p12998_p1)
}
  0x45   : > { %s13002_s26 = scalar_lea.vmem %s13379_s18, 16384  ;;  %s13206_s16 = smov [#allocation8]  }
  0x46   : > { %p13003_p2 = scmp.ne.s32.totalorder %s13379_s18, %s13002_s26  ;;  %s13007_s1 = sshll.u32 %s13206_s16, 4  ;;  %s13008_s1 = int_to_ptr.vmem [resolvable:$false] %s13007_s1 }
  0x47   : > { %s13009_s17 = scalar_lea.vmem %s13008_s1, 32768  ;;  %p13010_p6 = scmp.lt.s32.totalorder %s13379_s18, %s13008_s1 }
  0x48   : > { %p13005_p3 = pnand %p13003_p2, %p13345_p7  ;;  %p13011_p8 = scmp.lt.s32.totalorder %s13009_s17, %s13002_s26 }
  0x4a   : > { %p13006_p4 = pneg %p13005_p3  ;;  %p13012_p9 = por %p13011_p8, %p13010_p6 }
  0x4c   : > { %p13013_p10 = pnand %p13012_p9, %p13006_p4 }
  0x4e   : > { %13016 = shalt.err (!%p13013_p10)
}
  0x4f   : > { %11611 = dma.hbm_to_vmem [thread:$0]  (!%p13334_p5), %s13376_s27, 16384, %s13379_s18, %s15447_s3, %s15448_s25, %s15448_s25, %s15453_s28  }
  0x50   : > { %s15479_s10 = sand.u32 1, %s13197_s23   ;;  %s11451_s12 = sshll.u32 %s13201_s24, 15 }
  0x51   : > { %s13409_s19 = sshll.u32 %s15479_s10, 11  ;;  %s15480_s8 = sld [smem:[#allocation28_spill]] }
  0x52   : > { %s490_s1 = scalar_lea.vmem [#allocation11], %s13409_s19  ;;  %s15450_s5 = scalar_lea.sflag [#allocation12], %s13317_s29 }
  0x53   : > { %s497_s17 = sshll.u32 %s490_s1, 4  ;;  %s13420_s17 = int_to_ptr.vmem [resolvable:$true] %s497_s17 }
  0x57   : > { %s13417_s16 = scalar_lea.hbm %s15480_s8, %s11451_s12  ;;  %s13022_s3 = scalar_lea.hbm %s15480_s8, 65536 }
  0x58   : > { %s13017_s27 = scalar_lea.hbm %s13417_s16, 32768  ;;  %p13023_p0 = scmp.lt.s32.totalorder %s13417_s16, %s15480_s8 }
  0x59   : > { %p13018_p11 = scmp.ne.s32.totalorder %s13417_s16, %s13017_s27  ;;  %p13024_p1 = scmp.lt.s32.totalorder %s13022_s3, %s13017_s27 }
  0x5b   : > { %p13020_p12 = pnand %p13018_p11, %p13345_p7  ;;  %p13025_p2 = por %p13024_p1, %p13023_p0 }
  0x5d   : > { %p13021_p13 = pneg %p13020_p12 }
  0x5f   : > { %p13026_p3 = pnand %p13025_p2, %p13021_p13 }
  0x61   : > { %13029 = shalt.err (!%p13026_p3)
}
  0x62   : > { %s13030_s1 = scalar_lea.vmem %s13420_s17, 32768  ;;  %s13207_s25 = smov [#allocation11]  }
  0x63   : > { %p13031_p4 = scmp.ne.s32.totalorder %s13420_s17, %s13030_s1  ;;  %s13035_s18 = sshll.u32 %s13207_s25, 4  ;;  %s13036_s18 = int_to_ptr.vmem [resolvable:$false] %s13035_s18 }
  0x64   : > { %s13037_s10 = scalar_lea.vmem %s13036_s18, 65536  ;;  %p13038_p9 = scmp.lt.s32.totalorder %s13420_s17, %s13036_s18 }
  0x65   : > { %p13033_p6 = pnand %p13031_p4, %p13345_p7  ;;  %p13039_p10 = scmp.lt.s32.totalorder %s13037_s10, %s13030_s1 }
  0x67   : > { %p13034_p8 = pneg %p13033_p6  ;;  %p13040_p11 = por %p13039_p10, %p13038_p9 }
  0x69   : > { %p13041_p12 = pnand %p13040_p11, %p13034_p8 }
  0x6b   : > { %13044 = shalt.err (!%p13041_p12)
}
  0x6c   : > { %s15451_s3 = smov 512   ;;  %s15452_s25 = smov 32  }
  0x6d   : > { %11617 = dma.hbm_to_vmem [thread:$0]  (!%p13334_p5), %s13417_s16, 32768, %s13420_s17, %s15450_s5, %s15451_s3, %s15451_s3, %s15452_s25  }
  0x6e   : > { %s13453_s26 = scalar_lea.hbm %s15438_s9, %s11451_s12  ;;  %s511_s1 = scalar_lea.vmem [#allocation13], %s13409_s19 }
  0x6f   : > { %s13456_s18 = sshll.u32 %s511_s1, 4  ;;  %s13459_s10 = sadd.s32 4294967295, %s13201_s24   ;;  %s13537_s18 = int_to_ptr.vmem [resolvable:$true] %s13456_s18 }
  0x70   : > { %p121_p13 = scmp.ne.s32.totalorder %s13193_s22, %s13189_s21  ;;  %p15455_p0 = scmp.eq.s32.totalorder %s13459_s10, 0 }
  0x71   : > { %p10354_p1 = scmp.ge.s32.totalorder %s13201_s24, 1  ;;  %p356_p2 = scmp.lt.s32.totalorder %s13201_s24, 3 }
  0x72   : > { %p13469_p4 = por %p15455_p0, %p121_p13  ;;  %s13210_s16 = smov [#allocation3]  }
  0x73   : > { %p13473_p6 = pnand %p10354_p1, %p356_p2  ;;  %s368_s17 = sshll.u32 %s13210_s16, 4  ;;  %s13477_s17 = int_to_ptr.vmem [resolvable:$true] %s368_s17 }
  0x74   : > { %s15481_s12 = scalar_select %p13469_p4, 1, 0 }
  0x75   : > { %s15482_s19 = scalar_select %p13473_p6, 1, 0 }
  0x76   : > { %p11598_p8 = pneg %p13473_p6  ;;  %s13485_s24 = scalar_lea.hbm %s15433_s4, %s13325_s14 }
  0x77   : > { %s420_s30 = scalar_lea.vmem [#allocation7], %s13322_s13  ;;  %s13045_s16 = scalar_lea.hbm %s13485_s24, 16384 }
  0x78   : > { %s427_s1 = sshll.u32 %s420_s30, 4  ;;  %p13490_p9 = pnand %p11598_p8, %p15455_p0  ;;  %s428_s1 = int_to_ptr.vmem [resolvable:$true] %s427_s1 }
  0x79   : > { %p13046_p10 = scmp.ne.s32.totalorder %s13485_s24, %s13045_s16  ;;  %s13050_s27 = scalar_lea.hbm %s15433_s4, 32768 }
  0x7a   : > { %s15483_s5 = scalar_select %p13490_p9, 1, 0 }
  0x7b   : > { %p13048_p11 = pnand %p13046_p10, %p13345_p7  ;;  %p13051_p13 = scmp.lt.s32.totalorder %s13485_s24, %s15433_s4 }
  0x7c   : > { %p13052_p1 = scmp.lt.s32.totalorder %s13050_s27, %s13045_s16 }
  0x7d   : > { %p13049_p12 = pneg %p13048_p11 }
  0x7e   : > { %p13053_p2 = por %p13052_p1, %p13051_p13 }
  0x80   : > { %p13054_p8 = pnand %p13053_p2, %p13049_p12 }
  0x82   : > { %13057 = shalt.err (!%p13054_p8)
}
  0x83   : > { %s13058_s30 = scalar_lea.vmem %s428_s1, 16384  ;;  %s13211_s8 = smov [#allocation7]  }
  0x84   : > { %p13059_p3 = scmp.ne.s32.totalorder %s428_s1, %s13058_s30  ;;  %s13063_s23 = sshll.u32 %s13211_s8, 4  ;;  %s13064_s23 = int_to_ptr.vmem [resolvable:$false] %s13063_s23 }
  0x85   : > { %s13065_s11 = scalar_lea.vmem %s13064_s23, 32768  ;;  %p13066_p10 = scmp.lt.s32.totalorder %s428_s1, %s13064_s23 }
  0x86   : > { %p13061_p0 = pnand %p13059_p3, %p13345_p7  ;;  %p13067_p11 = scmp.lt.s32.totalorder %s13065_s11, %s13058_s30 }
  0x88   : > { %p13062_p4 = pneg %p13061_p0  ;;  %p13068_p6 = por %p13067_p11, %p13066_p10 }
  0x8a   : > { %p13069_p9 = pnand %p13068_p6, %p13062_p4 }
  0x8c   : > { %13072 = shalt.err (!%p13069_p9)
}
  0x8d   : > { %s15484_s28 = smov 16   ;;  %s15485_s3 = smov 256  }
  0x8e   : > { %s15486_s25 = scalar_lea.sflag [#allocation6], %s13317_s29  ;;  %s13519_s11 = scalar_lea.hbm %s15435_s6, %s13325_s14 }
  0x8f   : > { %11608 = dma.hbm_to_vmem [thread:$0]  (!%p13334_p5), %s13485_s24, 16384, %s428_s1, %s15486_s25, %s15485_s3, %s15485_s3, %s15484_s28  }
  0x90   : > { %p15487_p0 = scmp.ne.s32.totalorder %s15483_s5, 0  ;;  %s13084_s16 = scalar_lea.vmem %s13477_s17, 1024 }
  0x91   : > { %p13085_p4 = scmp.ne.s32.totalorder %s13477_s17, %s13084_s16  ;;  %p13092_p12 = scmp.lt.s32.totalorder %s13477_s17, %s13477_s17 }
  0x92   : > { %p13075_p3 = pneg %p15487_p0  ;;  %p13093_p13 = scmp.lt.s32.totalorder %s13084_s16, %s13084_s16 }
  0x94   : > { %p13087_p6 = pnand %p13085_p4, %p13075_p3  ;;  %p13094_p1 = por %p13093_p13, %p13092_p12 }
  0x96   : > { %p13088_p9 = pneg %p13087_p6 }
  0x98   : > { %p13095_p2 = pnand %p13094_p1, %p13088_p9 }
  0x9a   : > { %13098 = shalt.err (!%p13095_p2)
}
  0x9b   : > { %s15488_s24 = smov 32   ;;  %s15489_s1 = smov 512  }
  0x9c   : > { %11601 = dma.hbm_to_vmem [thread:$0]  (!%p15487_p0), %s15429_s0, 1024, %s13477_s17, [#allocation4], %s15489_s1, %s15489_s1, %s15488_s24  }
  0x9d   : > { %s462_s27 = scalar_lea.vmem [#allocation10], %s13322_s13  ;;  %s13099_s5 = scalar_lea.hbm %s13519_s11, 16384 }
  0x9e   : > { %s469_s30 = sshll.u32 %s462_s27, 4  ;;  %p13100_p8 = scmp.ne.s32.totalorder %s13519_s11, %s13099_s5  ;;  %s470_s30 = int_to_ptr.vmem [resolvable:$true] %s469_s30 }
  0x9f   : > { %s13104_s23 = scalar_lea.hbm %s15435_s6, 32768  ;;  %p13105_p3 = scmp.lt.s32.totalorder %s13519_s11, %s15435_s6 }
  0xa0   : > { %p13102_p10 = pnand %p13100_p8, %p13345_p7  ;;  %p13106_p4 = scmp.lt.s32.totalorder %s13104_s23, %s13099_s5 }
  0xa2   : > { %p13103_p11 = pneg %p13102_p10  ;;  %p13107_p0 = por %p13106_p4, %p13105_p3 }
  0xa4   : > { %p13108_p6 = pnand %p13107_p0, %p13103_p11 }
  0xa6   : > { %13111 = shalt.err (!%p13108_p6)
}
  0xa7   : > { %s13112_s13 = scalar_lea.vmem %s470_s30, 16384  ;;  %s13212_s17 = smov [#allocation10]  }
  0xa8   : > { %p13113_p9 = scmp.ne.s32.totalorder %s470_s30, %s13112_s13  ;;  %s13117_s24 = sshll.u32 %s13212_s17, 4  ;;  %s13118_s24 = int_to_ptr.vmem [resolvable:$false] %s13117_s24 }
  0xa9   : > { %s13119_s1 = scalar_lea.vmem %s13118_s24, 32768  ;;  %p13120_p1 = scmp.lt.s32.totalorder %s470_s30, %s13118_s24 }
  0xaa   : > { %p13115_p12 = pnand %p13113_p9, %p13345_p7  ;;  %p13121_p2 = scmp.lt.s32.totalorder %s13119_s1, %s13112_s13 }
  0xac   : > { %p13116_p13 = pneg %p13115_p12  ;;  %p13122_p8 = por %p13121_p2, %p13120_p1 }
  0xae   : > { %p13123_p10 = pnand %p13122_p8, %p13116_p13 }
  0xb0   : > { %13126 = shalt.err (!%p13123_p10)
}
  0xb1   : > { %s15490_s21 = scalar_lea.sflag [#allocation9], %s13317_s29  ;;  %s13127_s27 = scalar_lea.hbm %s13453_s26, 32768 }
  0xb2   : > { %11614 = dma.hbm_to_vmem [thread:$0]  (!%p13334_p5), %s13519_s11, 16384, %s470_s30, %s15490_s21, %s15485_s3, %s15485_s3, %s15484_s28  }
  0xb3   : > { %p13128_p11 = scmp.ne.s32.totalorder %s13453_s26, %s13127_s27  ;;  %s13132_s8 = scalar_lea.hbm %s15438_s9, 65536 }
  0xb4   : > { %p13133_p0 = scmp.lt.s32.totalorder %s13453_s26, %s15438_s9  ;;  %p13134_p6 = scmp.lt.s32.totalorder %s13132_s8, %s13127_s27 }
  0xb5   : > { %p13130_p3 = pnand %p13128_p11, %p13345_p7 }
  0xb6   : > { %p13135_p9 = por %p13134_p6, %p13133_p0 }
  0xb7   : > { %p13131_p4 = pneg %p13130_p3 }
  0xb9   : > { %p13136_p12 = pnand %p13135_p9, %p13131_p4 }
  0xbb   : > { %13139 = shalt.err (!%p13136_p12)
}
  0xbc   : > { %s13140_s11 = scalar_lea.vmem %s13537_s18, 32768  ;;  %s13213_s30 = smov [#allocation13]  }
  0xbd   : > { %p13141_p13 = scmp.ne.s32.totalorder %s13537_s18, %s13140_s11  ;;  %s13145_s14 = sshll.u32 %s13213_s30, 4  ;;  %s13146_s14 = int_to_ptr.vmem [resolvable:$false] %s13145_s14 }
  0xbe   : > { %s13147_s13 = scalar_lea.vmem %s13146_s14, 65536  ;;  %p13148_p8 = scmp.lt.s32.totalorder %s13537_s18, %s13146_s14 }
  0xbf   : > { %p13143_p1 = pnand %p13141_p13, %p13345_p7  ;;  %p13149_p10 = scmp.lt.s32.totalorder %s13147_s13, %s13140_s11 }
  0xc1   : > { %p13144_p2 = pneg %p13143_p1  ;;  %p13150_p11 = por %p13149_p10, %p13148_p8 }
  0xc3   : > { %p13151_p3 = pnand %p13150_p11, %p13144_p2 }
  0xc5   : > { %13154 = shalt.err (!%p13151_p3)
}
  0xc6   : > { %s15491_s17 = scalar_lea.sflag [#allocation12], %s13317_s29  ;;  %p15492_p7 = scmp.ne.s32.totalorder %s15482_s19, 0 }
  0xc7   : > { %11620 = dma.hbm_to_vmem [thread:$0]  (!%p13334_p5), %s13453_s26, 32768, %s13537_s18, %s15491_s17, %s15485_s3, %s15485_s3, %s15484_s28  }
  0xc8   : > { %530 = sbr.rel (%p15492_p7) target bundleno = 3024 (0xbd0), region = 64 }
  0xcd   : > { %p15493_p4 = scmp.eq.s32.totalorder %s13459_s10, 0 }
  0xcf   : > { %13172 = dma.done.wait (%p15493_p4), [#allocation4], 1024   ;;  %p15494_p0 = pmov %p15493_p4 }
  0xd0   : > { %s536_s20 = sand.u32 1, %s13459_s10   ;;  %s538_s15 = sand.u32 1, %s13193_s22  }
  0xd1   : > { %13174 = vsyncadd (%p15494_p0), [#allocation4], 4294966272  ;;  %s10377_s24 = sshll.u32 %s538_s15, 10  ;;  %s537_s1 = scalar_lea.sflag [#allocation6], %s536_s20 }
  0xd2   : > { %s13594_s29 = scalar_lea.vmem [#allocation5], %s10377_s24  ;;  %p15495_p6 = scmp.ne.s32.totalorder %s15481_s12, 0 }
  0xd4   : > { %13176 = dma.done.wait (%p15495_p6), %s537_s1, 32768  }
  0xd5   : > { %13178 = vsyncadd (%p15495_p6), %s537_s1, 4294934528  ;;  %s13600_s26 = scalar_lea.vmem [#allocation7], %s10377_s24  ;;  %s555_s18 = scalar_lea.sflag [#allocation9], %s536_s20 }
  0xd6   : > { %s13602_s19 = scalar_lea.vmem [#allocation8], %s10377_s24 }
  0xd7   : > { %13180 = dma.done.wait (%p15495_p6), %s555_s18, 32768  }
  0xd8   : > { %13182 = vsyncadd (%p15495_p6), %s555_s18, 4294934528  ;;  %s10381_s28 = sshll.u32 %s538_s15, 11  ;;  %s13608_s3 = scalar_lea.vmem [#allocation10], %s10377_s24 }
  0xd9   : > { %s573_s21 = scalar_lea.sflag [#allocation12], %s536_s20  ;;  %s13610_s27 = scalar_lea.vmem [#allocation11], %s10381_s28 }
  0xda   : > { %13184 = dma.done.wait (%p15495_p6), %s573_s21, 65536  }
  0xdb   : > { %13186 = vsyncadd (%p15495_p6), %s573_s21, 4294901760  ;;  %p659_p5 = scmp.lt.s32.totalorder %s13459_s10, 1  ;;  %s15496_s12 = sld [smem:[#allocation30_spill]] }
  0xdc   : > { %s13633_s24 = scalar_lea.vmem [#allocation13], %s10381_s28  ;;  %p15497_p9 = scmp.ne.s32.totalorder %s13459_s10, 0 }
  0xdd   : > { %s660_s5 = scalar_select %p659_p5, %s13459_s10, 1 }
  0xde   : > { %676 = sbr.rel (%p15497_p9) target bundleno = 232 (0xe8), region = 96 }
  0xdf   : > { %s10383_s25 = sshll.u32 %s660_s5, 2  ;;  %s11453_s8 = sshll.u32 %s660_s5, 6 }
  0xe0   : > { %s13621_s11 = scalar_lea.vmem %s15431_s2, %s10383_s25  ;;  %s13626_s13 = scalar_lea.vmem %s15436_s7, %s10383_s25 }
  0xe1   : > { %s13631_s15 = scalar_lea.vmem %s15496_s12, %s11453_s8 }
  0xe3   : > { %v677_v0 = vld [vmem:[#allocation3] sm:$0xff]  ;;  %v678_v1 = vld [vmem:[#allocation3 + $0x8] sm:$0xff]  ;;  %v679_v2 = vld [vmem:[#allocation3 + $0x10] sm:$0xff] }
  0xe4   : > { %685 = vst [vmem:[#allocation2 + $0x30] sm:$0xff] %v677_v0  ;;  %686 = vst [vmem:[#allocation2] sm:$0xff] %v678_v1  ;;  %v680_v3 = vld [vmem:[#allocation3 + $0x18] sm:$0xff]  ;;  %v681_v4 = vld [vmem:[#allocation3 + $0x20] sm:$0xff] }
  0xe5   : > { %687 = vst [vmem:[#allocation2 + $0x18] sm:$0xff] %v679_v2  ;;  %v682_v5 = vld [vmem:[#allocation3 + $0x28] sm:$0xff]  ;;  %688 = vst [vmem:[#allocation2 + $0x10] sm:$0xff] %v680_v3  ;;  %v683_v6 = vld [vmem:[#allocation3 + $0x30] sm:$0xff] }
  0xe6   : > { %689 = vst [vmem:[#allocation2 + $0x8] sm:$0xff] %v681_v4  ;;  %690 = vst [vmem:[#allocation2 + $0x20] sm:$0xff] %v682_v5  ;;  %v684_v7 = vld [vmem:[#allocation3 + $0x38] sm:$0xff] }
  0xe7   : > { %691 = vst [vmem:[#allocation2 + $0x28] sm:$0xff] %v683_v6  ;;  %692 = vst [vmem:[#allocation2 + $0x38] sm:$0xff] %v684_v7 }
  0xe8 PF: > { %v11725_v24 = vld [vmem:[%s13594_s29 + $0xe4] ss:$16 sps:$4 sm:$0xff]   ;;  %v11729_v27 = vld [vmem:[%s13594_s29 + $0xe0] ss:$16 sps:$4 sm:$0xff]   ;;  %vm13215_vm0 = vmmov 0   ;;  %vm3732_vm1 = vcmask 523264  }
  0xe9   : > { %v11727_v26 = vld [vmem:[%s13594_s29 + $0x2e4] ss:$16 sps:$4 sm:$0xff]   ;;  %1544 = vmatprep.subr.bf16.mxu0 %v11725_v24  ;;  %v11730_v30 = vld [vmem:[%s13594_s29 + $0x2e0] ss:$16 sps:$4 sm:$0xff]   ;;  %s13216_s1 = smov 64   ;;  %s15502_s18 = sld [smem:[#allocation25_spill]] }
  0xea   : > { %1587 = vmatprep.subr.bf16.mxu1 %v11727_v26  ;;  %1545 = vmatpush1.bf16.msra.mxu0 %v11729_v27  ;;  %v11731_v32 = vld [vmem:[%s13594_s29 + $0xc4] ss:$16 sps:$4 sm:$0xff]   ;;  %v11735_v35 = vld [vmem:[%s13594_s29 + $0xc0] ss:$16 sps:$4 sm:$0xff]   ;;  %vm4109_vm2 = vcmask 130048   ;;  %p11444_p12 = scmp.ne.s32.totalorder %s13459_s10, 1 }
  0xeb   : > { %v13637_v8 = vld [vmem:[#allocation2 + $0x30] sm:$0xff]  ;;  %v13639_v9 = vld [vmem:[#allocation2] sm:$0xff]  ;;  %1588 = vmatpush1.bf16.msra.mxu1 %v11730_v30  ;;  %1546 = vmatprep.subr.bf16.mxu0 %v11731_v32 }
  0xec   : > { %v13641_v10 = vld [vmem:[#allocation2 + $0x18] sm:$0xff]  ;;  %v13643_v11 = vld [vmem:[#allocation2 + $0x10] sm:$0xff]  ;;  %702 = vst [vmem:[%s13631_s15 + $0x8] sm:$0xff] %v13639_v9  ;;  %v710_v12 = vmul.f32 %v13637_v8, %v13637_v8  ;;  %v711_v13 = vmul.f32 %v13639_v9, %v13639_v9  ;;  %701 = vst [vmem:[%s13631_s15] sm:$0xff] %v13637_v8 }
  0xed   : > { %703 = vst [vmem:[%s13631_s15 + $0x10] sm:$0xff] %v13641_v10  ;;  %v712_v14 = vmul.f32 %v13641_v10, %v13641_v10  ;;  %v13657_v15 = vld [vmem:[#allocation2 + $0x8] sm:$0xff]  ;;  %v13659_v16 = vld [vmem:[#allocation2 + $0x20] sm:$0xff]  ;;  %704 = vst [vmem:[%s13631_s15 + $0x18] sm:$0xff] %v13643_v11  ;;  %v713_v21 = vmul.f32 %v13643_v11, %v13643_v11 }
  0xee   : > { %v13663_v17 = vld [vmem:[#allocation2 + $0x28] sm:$0xff]  ;;  %v13665_v18 = vld [vmem:[#allocation2 + $0x38] sm:$0xff]  ;;  %705 = vst [vmem:[%s13631_s15 + $0x20] sm:$0xff] %v13657_v15  ;;  %706 = vst [vmem:[%s13631_s15 + $0x28] sm:$0xff] %v13659_v16  ;;  %v714_v19 = vmul.f32 %v13657_v15, %v13657_v15  ;;  %v715_v20 = vmul.f32 %v13659_v16, %v13659_v16  ;;  %v718_v22 = vadd.f32 %v711_v13, %v710_v12  ;;  %1547 = vmatpush1.bf16.msra.mxu0 %v11735_v35 }
  0xef   : > { %707 = vst [vmem:[%s13631_s15 + $0x30] sm:$0xff] %v13663_v17  ;;  %708 = vst [vmem:[%s13631_s15 + $0x38] sm:$0xff] %v13665_v18  ;;  %v716_v23 = vmul.f32 %v13663_v17, %v13663_v17  ;;  %v717_v29 = vmul.f32 %v13665_v18, %v13665_v18  ;;  %v11733_v34 = vld [vmem:[%s13594_s29 + $0x2c4] ss:$16 sps:$4 sm:$0xff]   ;;  %v11736_v36 = vld [vmem:[%s13594_s29 + $0x2c0] ss:$16 sps:$4 sm:$0xff]  }
  0xf0   : > { %v723_v25 = vadd.f32 %v715_v20, %v714_v19  ;;  %v719_v28 = vadd.f32 %v718_v22, %v712_v14  ;;  %v11737_v37 = vld [vmem:[%s13594_s29 + $0xa4] ss:$16 sps:$4 sm:$0xff]   ;;  %1589 = vmatprep.subr.bf16.mxu1 %v11733_v34  ;;  %v11741_v40 = vld [vmem:[%s13594_s29 + $0xa0] ss:$16 sps:$4 sm:$0xff]  }
  0xf1   : > { %v11739_v39 = vld [vmem:[%s13594_s29 + $0x2a4] ss:$16 sps:$4 sm:$0xff]   ;;  %v11742_v41 = vld [vmem:[%s13594_s29 + $0x2a0] ss:$16 sps:$4 sm:$0xff]   ;;  %1590 = vmatpush1.bf16.msra.mxu1 %v11736_v36  ;;  %1548 = vmatprep.subr.bf16.mxu0 %v11737_v37 }
  0xf2   : > { %v724_v31 = vadd.f32 %v723_v25, %v716_v23  ;;  %v720_v33 = vadd.f32 %v719_v28, %v713_v21  ;;  %v11743_v42 = vld [vmem:[%s13594_s29 + $0x84] ss:$16 sps:$4 sm:$0xff]   ;;  %1591 = vmatprep.subr.bf16.mxu1 %v11739_v39  ;;  %1549 = vmatpush1.bf16.msra.mxu0 %v11741_v40  ;;  %v11747_v44 = vld [vmem:[%s13594_s29 + $0x80] ss:$16 sps:$4 sm:$0xff]   ;;  %v11826_v39 = vld [vmem:[%s13594_s29 + $0x2ec] ss:$16 sps:$4 sm:$0xff]  }
  0xf3   : > { %v11745_v43 = vld [vmem:[%s13594_s29 + $0x284] ss:$16 sps:$4 sm:$0xff]   ;;  %1550 = vmatprep.subr.bf16.mxu0 %v11743_v42  ;;  %v11748_v45 = vld [vmem:[%s13594_s29 + $0x280] ss:$16 sps:$4 sm:$0xff]  }
  0xf4   : > { %721 = vadd.xlane.f32.xlu0 %v720_v33  ;;  %v725_v38 = vadd.f32 %v724_v31, %v717_v29  ;;  %v11749_v46 = vld [vmem:[%s13594_s29 + $0x64] ss:$16 sps:$4 sm:$0xff]   ;;  %v11753_v48 = vld [vmem:[%s13594_s29 + $0x60] ss:$16 sps:$4 sm:$0xff]  }
  0xf5   : > { %1592 = vmatpush1.bf16.msra.mxu1 %v11742_v41  ;;  %v11751_v47 = vld [vmem:[%s13594_s29 + $0x264] ss:$16 sps:$4 sm:$0xff]   ;;  %v11754_v49 = vld [vmem:[%s13594_s29 + $0x260] ss:$16 sps:$4 sm:$0xff]  }
  0xf6   : > { %1593 = vmatprep.subr.bf16.mxu1 %v11745_v43  ;;  %1551 = vmatpush1.bf16.msra.mxu0 %v11747_v44  ;;  %v11755_v50 = vld [vmem:[%s13594_s29 + $0x44] ss:$16 sps:$4 sm:$0xff]   ;;  %v11759_v52 = vld [vmem:[%s13594_s29 + $0x40] ss:$16 sps:$4 sm:$0xff]  }
  0xf7   : > { %1552 = vmatprep.subr.bf16.mxu0 %v11749_v46  ;;  %v11757_v51 = vld [vmem:[%s13594_s29 + $0x244] ss:$16 sps:$4 sm:$0xff]   ;;  %v11760_v53 = vld [vmem:[%s13594_s29 + $0x240] ss:$16 sps:$4 sm:$0xff]  }
  0xf8   : > { %726 = vadd.xlane.f32.xlu0 %v725_v38  ;;  %v11761_v54 = vld [vmem:[%s13594_s29 + $0x24] ss:$16 sps:$4 sm:$0xff]   ;;  %v11765_v56 = vld [vmem:[%s13594_s29 + $0x20] ss:$16 sps:$4 sm:$0xff]   ;;  %v11823_v38 = vld [vmem:[%s13594_s29 + $0xec] ss:$16 sps:$4 sm:$0xff]  }
  0xf9   : > { %1594 = vmatpush1.bf16.msra.mxu1 %v11748_v45  ;;  %v11763_v55 = vld [vmem:[%s13594_s29 + $0x224] ss:$16 sps:$4 sm:$0xff]   ;;  %v11766_v57 = vld [vmem:[%s13594_s29 + $0x220] ss:$16 sps:$4 sm:$0xff]   ;;  %v744_v45 = vlaneseq }
  0xfa   : > { %1595 = vmatprep.subr.bf16.mxu1 %v11751_v47  ;;  %1553 = vmatpush1.bf16.msra.mxu0 %v11753_v48  ;;  %v11767_v58 = vld [vmem:[%s13594_s29 + $0x4] ss:$16 sps:$4 sm:$0xff]   ;;  %v11771_v60 = vld [vmem:[%s13594_s29] ss:$16 sps:$4 sm:$0xff]  }
  0xfb   : > { %1554 = vmatprep.subr.bf16.mxu0 %v11755_v50  ;;  %v11769_v59 = vld [vmem:[%s13594_s29 + $0x204] ss:$16 sps:$4 sm:$0xff]   ;;  %v11772_v61 = vld [vmem:[%s13594_s29 + $0x200] ss:$16 sps:$4 sm:$0xff]   ;;  %v745_v47 = vshrl.u32 %v744_v45, 7 }
  0xfc   : > { %v11773_v62 = vld [vmem:[%s13594_s29 + $0x1e4] ss:$16 sps:$4 sm:$0xff]   ;;  %v11777_v0 = vld [vmem:[%s13594_s29 + $0x1e0] ss:$16 sps:$4 sm:$0xff]   ;;  %v11871_v45 = vld [vmem:[%s13594_s29 + $0x1ec] ss:$16 sps:$4 sm:$0xff]  }
  0xfd   : > { %1596 = vmatpush1.bf16.msra.mxu1 %v11754_v49  ;;  %v11775_v63 = vld [vmem:[%s13594_s29 + $0x3e4] ss:$16 sps:$4 sm:$0xff]   ;;  %v11778_v1 = vld [vmem:[%s13594_s29 + $0x3e0] ss:$16 sps:$4 sm:$0xff]   ;;  %v13751_v48 = vsub.s32 1, %v745_v47  ;;  %v13753_v49 = vsub.s32 3, %v745_v47 }
  0xfe   : > { %1597 = vmatprep.subr.bf16.mxu1 %v11757_v51  ;;  %1555 = vmatpush1.bf16.msra.mxu0 %v11759_v52  ;;  %v11779_v2 = vld [vmem:[%s13594_s29 + $0x1c4] ss:$16 sps:$4 sm:$0xff]   ;;  %v11783_v4 = vld [vmem:[%s13594_s29 + $0x1c0] ss:$16 sps:$4 sm:$0xff]   ;;  %v13755_v50 = vsub.s32 0, %v745_v47  ;;  %v13757_v51 = vsub.s32 2, %v745_v47 }
  0xff   : > { %1556 = vmatprep.subr.bf16.mxu0 %v11761_v54  ;;  %v11781_v3 = vld [vmem:[%s13594_s29 + $0x3c4] ss:$16 sps:$4 sm:$0xff]   ;;  %v11784_v5 = vld [vmem:[%s13594_s29 + $0x3c0] ss:$16 sps:$4 sm:$0xff]   ;;  %15498 = vst [vmem:[#allocation21_spill] sm:$0xff] %v13751_v48  ;;  %15499 = vst [vmem:[#allocation22_spill] sm:$0xff] %v13753_v49 }
 0x100   : > { %v11785_v6 = vld [vmem:[%s13594_s29 + $0x1a4] ss:$16 sps:$4 sm:$0xff]   ;;  %v11789_v12 = vld [vmem:[%s13594_s29 + $0x1a0] ss:$16 sps:$4 sm:$0xff]   ;;  %15500 = vst [vmem:[#allocation23_spill] sm:$0xff] %v13755_v50  ;;  %15501 = vst [vmem:[#allocation24_spill] sm:$0xff] %v13757_v51 }
 0x101   : > { %1598 = vmatpush1.bf16.msra.mxu1 %v11760_v53  ;;  %v11787_v7 = vld [vmem:[%s13594_s29 + $0x3a4] ss:$16 sps:$4 sm:$0xff]   ;;  %v11790_v13 = vld [vmem:[%s13594_s29 + $0x3a0] ss:$16 sps:$4 sm:$0xff]   ;;  %v11869_v47 = vld [vmem:[%s13594_s29 + $0x1e8] ss:$16 sps:$4 sm:$0xff]  }
 0x102   : > { %1599 = vmatprep.subr.bf16.mxu1 %v11763_v55  ;;  %1557 = vmatpush1.bf16.msra.mxu0 %v11765_v56  ;;  %v11791_v14 = vld [vmem:[%s13594_s29 + $0x184] ss:$16 sps:$4 sm:$0xff]   ;;  %v11795_v20 = vld [vmem:[%s13594_s29 + $0x180] ss:$16 sps:$4 sm:$0xff]  }
 0x103   : > { %1558 = vmatprep.subr.bf16.mxu0 %v11767_v58  ;;  %v11793_v19 = vld [vmem:[%s13594_s29 + $0x384] ss:$16 sps:$4 sm:$0xff]   ;;  %v11796_v21 = vld [vmem:[%s13594_s29 + $0x380] ss:$16 sps:$4 sm:$0xff]  }
 0x104   : > { %v11797_v22 = vld [vmem:[%s13594_s29 + $0x164] ss:$16 sps:$4 sm:$0xff]   ;;  %v11801_v24 = vld [vmem:[%s13594_s29 + $0x160] ss:$16 sps:$4 sm:$0xff]  }
 0x105   : > { %1600 = vmatpush1.bf16.msra.mxu1 %v11766_v57  ;;  %v11799_v23 = vld [vmem:[%s13594_s29 + $0x364] ss:$16 sps:$4 sm:$0xff]   ;;  %v11802_v25 = vld [vmem:[%s13594_s29 + $0x360] ss:$16 sps:$4 sm:$0xff]  }
 0x106   : > { %1601 = vmatprep.subr.bf16.mxu1 %v11769_v59  ;;  %1559 = vmatpush1.bf16.msra.mxu0 %v11771_v60  ;;  %v11803_v26 = vld [vmem:[%s13594_s29 + $0x144] ss:$16 sps:$4 sm:$0xff]   ;;  %v11807_v28 = vld [vmem:[%s13594_s29 + $0x140] ss:$16 sps:$4 sm:$0xff]  }
 0x107   : > { %1560 = vmatprep.subr.bf16.mxu0 %v11773_v62  ;;  %v11805_v27 = vld [vmem:[%s13594_s29 + $0x344] ss:$16 sps:$4 sm:$0xff]   ;;  %v11808_v29 = vld [vmem:[%s13594_s29 + $0x340] ss:$16 sps:$4 sm:$0xff]  }
 0x108   : > { %v11809_v30 = vld [vmem:[%s13594_s29 + $0x124] ss:$16 sps:$4 sm:$0xff]   ;;  %v11813_v32 = vld [vmem:[%s13594_s29 + $0x120] ss:$16 sps:$4 sm:$0xff]  }
 0x109   : > { %1602 = vmatpush1.bf16.msra.mxu1 %v11772_v61  ;;  %v11811_v31 = vld [vmem:[%s13594_s29 + $0x324] ss:$16 sps:$4 sm:$0xff]   ;;  %v11814_v33 = vld [vmem:[%s13594_s29 + $0x320] ss:$16 sps:$4 sm:$0xff]  }
 0x10a   : > { %1603 = vmatprep.subr.bf16.mxu1 %v11775_v63  ;;  %1561 = vmatpush2.bf16.msra.mxu0 %v11777_v0  ;;  %v11815_v34 = vld [vmem:[%s13594_s29 + $0x104] ss:$16 sps:$4 sm:$0xff]   ;;  %v11819_v36 = vld [vmem:[%s13594_s29 + $0x100] ss:$16 sps:$4 sm:$0xff]  }
 0x10b   : > { %1562 = vmatprep.subr.bf16.mxu0 %v11779_v2  ;;  %v11817_v35 = vld [vmem:[%s13594_s29 + $0x304] ss:$16 sps:$4 sm:$0xff]   ;;  %v11820_v37 = vld [vmem:[%s13594_s29 + $0x300] ss:$16 sps:$4 sm:$0xff]  }
 0x10c   : > { %v709_v52 = vld [vmem:[%s13621_s11] sm:$0xf] }
 0x10d   : > { %1604 = vmatpush2.bf16.msra.mxu1 %v11778_v1  ;;  %v751_v54 = vrot.slane %v709_v52, %v13751_v48  ;;  %v759_v55 = vrot.slane %v709_v52, %v13753_v49  ;;  %v747_v56 = vrot.slane %v709_v52, %v13755_v50  ;;  %v755_v57 = vrot.slane %v709_v52, %v13757_v51  ;;  %v11872_v52 = vld [vmem:[%s13594_s29 + $0x3e8] ss:$16 sps:$4 sm:$0xff]  }
 0x10e   : > { %1605 = vmatprep.subr.bf16.mxu1 %v11781_v3  ;;  %1563 = vmatpush2.bf16.msra.mxu0 %v11783_v4 }
 0x10f   : > { %1564 = vmatprep.subr.bf16.mxu0 %v11785_v6  ;;  %v11824_v6 = vld [vmem:[%s13594_s29 + $0x2e8] ss:$16 sps:$4 sm:$0xff]  }
 0x111   : > { %1606 = vmatpush2.bf16.msra.mxu1 %v11784_v5 }
 0x112   : > { %1607 = vmatprep.subr.bf16.mxu1 %v11787_v7  ;;  %1565 = vmatpush2.bf16.msra.mxu0 %v11789_v12 }
 0x113   : > { %1566 = vmatprep.subr.bf16.mxu0 %v11791_v14  ;;  %v11827_v14 = vld [vmem:[%s13594_s29 + $0xc8] ss:$16 sps:$4 sm:$0xff]  }
 0x115   : > { %1608 = vmatpush2.bf16.msra.mxu1 %v11790_v13  ;;  %v11829_v13 = vld [vmem:[%s13594_s29 + $0xcc] ss:$16 sps:$4 sm:$0xff]  }
 0x116   : > { %1609 = vmatprep.subr.bf16.mxu1 %v11793_v19  ;;  %1567 = vmatpush2.bf16.msra.mxu0 %v11795_v20  ;;  %v11830_v19 = vld [vmem:[%s13594_s29 + $0x2c8] ss:$16 sps:$4 sm:$0xff]   ;;  %v11832_v20 = vld [vmem:[%s13594_s29 + $0x2cc] ss:$16 sps:$4 sm:$0xff]  }
 0x117   : > { %1568 = vmatprep.subr.bf16.mxu0 %v11797_v22  ;;  %v11838_v22 = vld [vmem:[%s13594_s29 + $0x2ac] ss:$16 sps:$4 sm:$0xff]  }
 0x119   : > { %1610 = vmatpush2.bf16.msra.mxu1 %v11796_v21  ;;  %v11835_v21 = vld [vmem:[%s13594_s29 + $0xac] ss:$16 sps:$4 sm:$0xff]  }
 0x11a   : > { %1611 = vmatprep.subr.bf16.mxu1 %v11799_v23  ;;  %1569 = vmatpush2.bf16.msra.mxu0 %v11801_v24  ;;  %v11833_v23 = vld [vmem:[%s13594_s29 + $0xa8] ss:$16 sps:$4 sm:$0xff]  }
 0x11b   : > { %1570 = vmatprep.subr.bf16.mxu0 %v11803_v26  ;;  %v11836_v24 = vld [vmem:[%s13594_s29 + $0x2a8] ss:$16 sps:$4 sm:$0xff]   ;;  %v11844_v26 = vld [vmem:[%s13594_s29 + $0x28c] ss:$16 sps:$4 sm:$0xff]  }
 0x11d   : > { %1612 = vmatpush2.bf16.msra.mxu1 %v11802_v25  ;;  %v11841_v25 = vld [vmem:[%s13594_s29 + $0x8c] ss:$16 sps:$4 sm:$0xff]  }
 0x11e   : > { %1613 = vmatprep.subr.bf16.mxu1 %v11805_v27  ;;  %1571 = vmatpush2.bf16.msra.mxu0 %v11807_v28  ;;  %v11839_v27 = vld [vmem:[%s13594_s29 + $0x88] ss:$16 sps:$4 sm:$0xff]  }
 0x11f   : > { %1572 = vmatprep.subr.bf16.mxu0 %v11809_v30  ;;  %v11842_v28 = vld [vmem:[%s13594_s29 + $0x288] ss:$16 sps:$4 sm:$0xff]   ;;  %v11850_v30 = vld [vmem:[%s13594_s29 + $0x26c] ss:$16 sps:$4 sm:$0xff]  }
 0x121   : > { %1614 = vmatpush2.bf16.msra.mxu1 %v11808_v29  ;;  %v11847_v29 = vld [vmem:[%s13594_s29 + $0x6c] ss:$16 sps:$4 sm:$0xff]  }
 0x122   : > { %1615 = vmatprep.subr.bf16.mxu1 %v11811_v31  ;;  %1573 = vmatpush2.bf16.msra.mxu0 %v11813_v32  ;;  %v11845_v31 = vld [vmem:[%s13594_s29 + $0x68] ss:$16 sps:$4 sm:$0xff]  }
 0x123   : > { %1574 = vmatprep.subr.bf16.mxu0 %v11815_v34  ;;  %v11848_v32 = vld [vmem:[%s13594_s29 + $0x268] ss:$16 sps:$4 sm:$0xff]   ;;  %v11856_v34 = vld [vmem:[%s13594_s29 + $0x24c] ss:$16 sps:$4 sm:$0xff]  }
 0x125   : > { %1616 = vmatpush2.bf16.msra.mxu1 %v11814_v33  ;;  %v11853_v33 = vld [vmem:[%s13594_s29 + $0x4c] ss:$16 sps:$4 sm:$0xff]  }
 0x126   : > { %1617 = vmatprep.subr.bf16.mxu1 %v11817_v35  ;;  %1575 = vmatpush2.bf16.msra.mxu0 %v11819_v36  ;;  %v11851_v35 = vld [vmem:[%s13594_s29 + $0x48] ss:$16 sps:$4 sm:$0xff]  }
 0x127   : > { %1630 = vmatprep.subr.bf16.mxu0 %v11823_v38  ;;  %v11854_v36 = vld [vmem:[%s13594_s29 + $0x248] ss:$16 sps:$4 sm:$0xff]   ;;  %v11862_v38 = vld [vmem:[%s13594_s29 + $0x22c] ss:$16 sps:$4 sm:$0xff]  }
 0x129   : > { %1618 = vmatpush2.bf16.msra.mxu1 %v11820_v37  ;;  %v11859_v37 = vld [vmem:[%s13594_s29 + $0x2c] ss:$16 sps:$4 sm:$0xff]  }
 0x12a   : > { %1673 = vmatprep.subr.bf16.mxu1 %v11826_v39  ;;  %v11857_v39 = vld [vmem:[%s13594_s29 + $0x28] ss:$16 sps:$4 sm:$0xff]  }
 0x17d   : > { %v722_v40 = vpop.xlane.xlu0 %721 }
 0x17e   : > { %v729_v41 = vmul.f32 0.001953125, %v722_v40  ;;  %v11860_v40 = vld [vmem:[%s13594_s29 + $0x228] ss:$16 sps:$4 sm:$0xff]  }
 0x180   : > { %v731_v42 = vadd.f32 1e-06, %v729_v41  ;;  %v11865_v41 = vld [vmem:[%s13594_s29 + $0xc] ss:$16 sps:$4 sm:$0xff]  }
 0x181   : > { %v727_v43 = vpop.xlane.xlu0 %726 }
 0x182   : > { %12877 = vrsqrt.f32 %v731_v42  ;;  %v730_v44 = vmul.f32 0.001953125, %v727_v43  ;;  %v11868_v42 = vld [vmem:[%s13594_s29 + $0x20c] ss:$16 sps:$4 sm:$0xff]   ;;  %v11863_v43 = vld [vmem:[%s13594_s29 + $0x8] ss:$16 sps:$4 sm:$0xff]  }
 0x184   : > { %v732_v46 = vadd.f32 1e-06, %v730_v44  ;;  %v11866_v44 = vld [vmem:[%s13594_s29 + $0x208] ss:$16 sps:$4 sm:$0xff]  }
 0x186   : > { %12879 = vrsqrt.f32 %v732_v46  ;;  %v11874_v46 = vld [vmem:[%s13594_s29 + $0x3ec] ss:$16 sps:$4 sm:$0xff]  }
 0x18f   : > { %v12878_v53 = vpop.eup %12877 }
 0x190   : > { %v736_v58 = vmul.f32 %v12878_v53, %v13639_v9  ;;  %v738_v59 = vmul.f32 %v12878_v53, %v13643_v11  ;;  %v735_v60 = vmul.f32 %v12878_v53, %v13637_v8  ;;  %v737_v61 = vmul.f32 %v12878_v53, %v13641_v10  ;;  %v11821_v10 = vld [vmem:[%s13594_s29 + $0xe8] ss:$16 sps:$4 sm:$0xff]   ;;  %v11877_v53 = vld [vmem:[%s13594_s29 + $0x1cc] ss:$16 sps:$4 sm:$0xff]  }
 0x192   : > { %v765_v3 = vmul.f32 %v751_v54, %v736_v58  ;;  %v767_v4 = vmul.f32 %v759_v55, %v738_v59  ;;  %v764_v9 = vmul.f32 %v747_v56, %v735_v60  ;;  %v766_v11 = vmul.f32 %v755_v57, %v737_v61  ;;  %v11886_v58 = vld [vmem:[%s13594_s29 + $0x3ac] ss:$16 sps:$4 sm:$0xff]   ;;  %v11881_v59 = vld [vmem:[%s13594_s29 + $0x1a8] ss:$16 sps:$4 sm:$0xff]  }
 0x193   : > { %v12880_v62 = vpop.eup %12879  ;;  %v11884_v60 = vld [vmem:[%s13594_s29 + $0x3a8] ss:$16 sps:$4 sm:$0xff]   ;;  %v11889_v61 = vld [vmem:[%s13594_s29 + $0x18c] ss:$16 sps:$4 sm:$0xff]  }
 0x194   : > { %v740_v63 = vmul.f32 %v12880_v62, %v13659_v16  ;;  %v742_v0 = vmul.f32 %v12880_v62, %v13665_v18  ;;  %v739_v1 = vmul.f32 %v12880_v62, %v13657_v15  ;;  %v741_v2 = vmul.f32 %v12880_v62, %v13663_v17  ;;  %v11892_v62 = vld [vmem:[%s13594_s29 + $0x38c] ss:$16 sps:$4 sm:$0xff]  }
 0x196   : > { %v769_v8 = vmul.f32 %v751_v54, %v740_v63  ;;  %v771_v5 = vmul.f32 %v759_v55, %v742_v0  ;;  %v768_v16 = vmul.f32 %v747_v56, %v739_v1  ;;  %v770_v18 = vmul.f32 %v755_v57, %v741_v2  ;;  %v11880_v54 = vld [vmem:[%s13594_s29 + $0x3cc] ss:$16 sps:$4 sm:$0xff]   ;;  %v11875_v55 = vld [vmem:[%s13594_s29 + $0x1c8] ss:$16 sps:$4 sm:$0xff]  }
 0x197   : > { %v11878_v56 = vld [vmem:[%s13594_s29 + $0x3c8] ss:$16 sps:$4 sm:$0xff]   ;;  %v11883_v57 = vld [vmem:[%s13594_s29 + $0x1ac] ss:$16 sps:$4 sm:$0xff]  }
 0x198   : > { %v13774_v7 = vpack.c.bf16 %v769_v8, %v765_v3  ;;  %v13776_v15 = vpack.c.bf16 %v771_v5, %v767_v4  ;;  %v13778_v17 = vpack.c.bf16 %v768_v16, %v764_v9  ;;  %v13780_v12 = vpack.c.bf16 %v770_v18, %v766_v11  ;;  %v11887_v63 = vld [vmem:[%s13594_s29 + $0x188] ss:$16 sps:$4 sm:$0xff]   ;;  %v11895_v1 = vld [vmem:[%s13594_s29 + $0x16c] ss:$16 sps:$4 sm:$0xff]  }
 0x199   : > { %v11890_v0 = vld [vmem:[%s13594_s29 + $0x388] ss:$16 sps:$4 sm:$0xff]   ;;  %v11898_v2 = vld [vmem:[%s13594_s29 + $0x36c] ss:$16 sps:$4 sm:$0xff]  }
 0x19a   : > { %1576 = vmatprep.mubr.bf16.mxu0 %v13774_v7  ;;  %1619 = vmatprep.mubr.bf16.mxu1 %v13776_v15  ;;  %v11893_v3 = vld [vmem:[%s13594_s29 + $0x168] ss:$16 sps:$4 sm:$0xff]   ;;  %v11901_v9 = vld [vmem:[%s13594_s29 + $0x14c] ss:$16 sps:$4 sm:$0xff]  }
 0x19b   : > { %1577 = vmatmul.mubr.bf16.vlgmr.msra.gmra.mxu0 %v13778_v17  ;;  %1620 = vmatmul.mubr.bf16.vlgmr.msra.gmra.mxu1 %v13780_v12  ;;  %v11896_v4 = vld [vmem:[%s13594_s29 + $0x368] ss:$16 sps:$4 sm:$0xff]   ;;  %v11904_v11 = vld [vmem:[%s13594_s29 + $0x34c] ss:$16 sps:$4 sm:$0xff]  }
 0x19c   : > { %1631 = vmatpush1.bf16.msra.mxu0 %v11821_v10  ;;  %1674 = vmatpush1.bf16.msra.mxu1 %v11824_v6  ;;  %v11899_v8 = vld [vmem:[%s13594_s29 + $0x148] ss:$16 sps:$4 sm:$0xff]   ;;  %v11907_v10 = vld [vmem:[%s13594_s29 + $0x12c] ss:$16 sps:$4 sm:$0xff]  }
 0x19d   : > { %1662 = vmatprep.mubr.bf16.mxu0 %v13774_v7  ;;  %1705 = vmatprep.mubr.bf16.mxu1 %v13776_v15  ;;  %v11902_v5 = vld [vmem:[%s13594_s29 + $0x348] ss:$16 sps:$4 sm:$0xff]   ;;  %v11910_v6 = vld [vmem:[%s13594_s29 + $0x32c] ss:$16 sps:$4 sm:$0xff]  }
 0x19e   : > { %1632 = vmatprep.subr.bf16.mxu0 %v11829_v13  ;;  %1675 = vmatprep.subr.bf16.mxu1 %v11832_v20  ;;  %v11905_v16 = vld [vmem:[%s13594_s29 + $0x128] ss:$16 sps:$4 sm:$0xff]   ;;  %v11913_v13 = vld [vmem:[%s13594_s29 + $0x10c] ss:$16 sps:$4 sm:$0xff]  }
 0x19f   : > { %v11908_v18 = vld [vmem:[%s13594_s29 + $0x328] ss:$16 sps:$4 sm:$0xff]  }
 0x1a0   : > { %1633 = vmatpush1.bf16.msra.mxu0 %v11827_v14  ;;  %1676 = vmatpush1.bf16.msra.mxu1 %v11830_v19  ;;  %v11916_v14 = vld [vmem:[%s13594_s29 + $0x30c] ss:$16 sps:$4 sm:$0xff]   ;;  %v11911_v19 = vld [vmem:[%s13594_s29 + $0x108] ss:$16 sps:$4 sm:$0xff]  }
 0x1a1   : > { %1634 = vmatprep.subr.bf16.mxu0 %v11835_v21  ;;  %1677 = vmatprep.subr.bf16.mxu1 %v11838_v22  ;;  %v11914_v20 = vld [vmem:[%s13594_s29 + $0x308] ss:$16 sps:$4 sm:$0xff]   ;;  %v11919_v21 = vld [vmem:[%s13600_s26 + $0xe4] ss:$16 sps:$4 sm:$0xff]  }
 0x1a2   : > { %v11922_v22 = vld [vmem:[%s13600_s26 + $0x2e4] ss:$16 sps:$4 sm:$0xff]  }
 0x1a4   : > { %1635 = vmatpush1.bf16.msra.mxu0 %v11833_v23  ;;  %1678 = vmatpush1.bf16.msra.mxu1 %v11836_v24  ;;  %v11917_v23 = vld [vmem:[%s13600_s26 + $0xe0] ss:$16 sps:$4 sm:$0xff]  }
 0x1a5   : > { %1636 = vmatprep.subr.bf16.mxu0 %v11841_v25  ;;  %1679 = vmatprep.subr.bf16.mxu1 %v11844_v26  ;;  %v11920_v24 = vld [vmem:[%s13600_s26 + $0x2e0] ss:$16 sps:$4 sm:$0xff]   ;;  %v11925_v25 = vld [vmem:[%s13600_s26 + $0xc4] ss:$16 sps:$4 sm:$0xff]  }
 0x1a6   : > { %v11928_v26 = vld [vmem:[%s13600_s26 + $0x2c4] ss:$16 sps:$4 sm:$0xff]  }
 0x1a8   : > { %1637 = vmatpush1.bf16.msra.mxu0 %v11839_v27  ;;  %1680 = vmatpush1.bf16.msra.mxu1 %v11842_v28  ;;  %v11923_v27 = vld [vmem:[%s13600_s26 + $0xc0] ss:$16 sps:$4 sm:$0xff]  }
 0x1a9   : > { %1638 = vmatprep.subr.bf16.mxu0 %v11847_v29  ;;  %1681 = vmatprep.subr.bf16.mxu1 %v11850_v30  ;;  %v11926_v28 = vld [vmem:[%s13600_s26 + $0x2c0] ss:$16 sps:$4 sm:$0xff]   ;;  %v11931_v29 = vld [vmem:[%s13600_s26 + $0xa4] ss:$16 sps:$4 sm:$0xff]  }
 0x1aa   : > { %v11929_v30 = vld [vmem:[%s13600_s26 + $0xa0] ss:$16 sps:$4 sm:$0xff]  }
 0x1ac   : > { %1639 = vmatpush1.bf16.msra.mxu0 %v11845_v31  ;;  %1682 = vmatpush1.bf16.msra.mxu1 %v11848_v32  ;;  %v11934_v31 = vld [vmem:[%s13600_s26 + $0x2a4] ss:$16 sps:$4 sm:$0xff]   ;;  %v11932_v32 = vld [vmem:[%s13600_s26 + $0x2a0] ss:$16 sps:$4 sm:$0xff]  }
 0x1ad   : > { %1640 = vmatprep.subr.bf16.mxu0 %v11853_v33  ;;  %1683 = vmatprep.subr.bf16.mxu1 %v11856_v34  ;;  %v11937_v33 = vld [vmem:[%s13600_s26 + $0x84] ss:$16 sps:$4 sm:$0xff]  }
 0x1ae   : > { %v11940_v34 = vld [vmem:[%s13600_s26 + $0x284] ss:$16 sps:$4 sm:$0xff]  }
 0x1b0   : > { %1641 = vmatpush1.bf16.msra.mxu0 %v11851_v35  ;;  %1684 = vmatpush1.bf16.msra.mxu1 %v11854_v36  ;;  %v11935_v35 = vld [vmem:[%s13600_s26 + $0x80] ss:$16 sps:$4 sm:$0xff]  }
 0x1b1   : > { %1642 = vmatprep.subr.bf16.mxu0 %v11859_v37  ;;  %1685 = vmatprep.subr.bf16.mxu1 %v11862_v38  ;;  %v11938_v36 = vld [vmem:[%s13600_s26 + $0x280] ss:$16 sps:$4 sm:$0xff]   ;;  %v11943_v37 = vld [vmem:[%s13600_s26 + $0x64] ss:$16 sps:$4 sm:$0xff]  }
 0x1b2   : > { %v11941_v38 = vld [vmem:[%s13600_s26 + $0x60] ss:$16 sps:$4 sm:$0xff]  }
 0x1b4   : > { %1643 = vmatpush1.bf16.msra.mxu0 %v11857_v39  ;;  %1686 = vmatpush1.bf16.msra.mxu1 %v11860_v40  ;;  %v11946_v39 = vld [vmem:[%s13600_s26 + $0x264] ss:$16 sps:$4 sm:$0xff]   ;;  %v11944_v40 = vld [vmem:[%s13600_s26 + $0x260] ss:$16 sps:$4 sm:$0xff]  }
 0x1b5   : > { %1644 = vmatprep.subr.bf16.mxu0 %v11865_v41  ;;  %1687 = vmatprep.subr.bf16.mxu1 %v11868_v42  ;;  %v11949_v41 = vld [vmem:[%s13600_s26 + $0x44] ss:$16 sps:$4 sm:$0xff]   ;;  %v11947_v42 = vld [vmem:[%s13600_s26 + $0x40] ss:$16 sps:$4 sm:$0xff]  }
 0x1b8   : > { %1645 = vmatpush1.bf16.msra.mxu0 %v11863_v43  ;;  %1688 = vmatpush1.bf16.msra.mxu1 %v11866_v44  ;;  %v11952_v43 = vld [vmem:[%s13600_s26 + $0x244] ss:$16 sps:$4 sm:$0xff]   ;;  %v11950_v44 = vld [vmem:[%s13600_s26 + $0x240] ss:$16 sps:$4 sm:$0xff]  }
 0x1b9   : > { %1646 = vmatprep.subr.bf16.mxu0 %v11871_v45  ;;  %1689 = vmatprep.subr.bf16.mxu1 %v11874_v46  ;;  %v11955_v45 = vld [vmem:[%s13600_s26 + $0x24] ss:$16 sps:$4 sm:$0xff]   ;;  %v11953_v46 = vld [vmem:[%s13600_s26 + $0x20] ss:$16 sps:$4 sm:$0xff]  }
 0x1bc   : > { %1647 = vmatpush2.bf16.msra.mxu0 %v11869_v47  ;;  %1690 = vmatpush2.bf16.msra.mxu1 %v11872_v52  ;;  %v11958_v47 = vld [vmem:[%s13600_s26 + $0x224] ss:$16 sps:$4 sm:$0xff]   ;;  %v11956_v52 = vld [vmem:[%s13600_s26 + $0x220] ss:$16 sps:$4 sm:$0xff]  }
 0x1bd   : > { %1648 = vmatprep.subr.bf16.mxu0 %v11877_v53  ;;  %1691 = vmatprep.subr.bf16.mxu1 %v11880_v54  ;;  %v11961_v53 = vld [vmem:[%s13600_s26 + $0x4] ss:$16 sps:$4 sm:$0xff]   ;;  %v11959_v54 = vld [vmem:[%s13600_s26] ss:$16 sps:$4 sm:$0xff]  }
 0x1c0   : > { %1649 = vmatpush2.bf16.msra.mxu0 %v11875_v55  ;;  %1692 = vmatpush2.bf16.msra.mxu1 %v11878_v56  ;;  %v11964_v55 = vld [vmem:[%s13600_s26 + $0x204] ss:$16 sps:$4 sm:$0xff]   ;;  %v11962_v56 = vld [vmem:[%s13600_s26 + $0x200] ss:$16 sps:$4 sm:$0xff]  }
 0x1c1   : > { %1650 = vmatprep.subr.bf16.mxu0 %v11883_v57  ;;  %1693 = vmatprep.subr.bf16.mxu1 %v11886_v58  ;;  %v11967_v57 = vld [vmem:[%s13600_s26 + $0x1e4] ss:$16 sps:$4 sm:$0xff]   ;;  %v11965_v58 = vld [vmem:[%s13600_s26 + $0x1e0] ss:$16 sps:$4 sm:$0xff]  }
 0x1c4   : > { %1651 = vmatpush2.bf16.msra.mxu0 %v11881_v59  ;;  %1694 = vmatpush2.bf16.msra.mxu1 %v11884_v60  ;;  %v11970_v59 = vld [vmem:[%s13600_s26 + $0x3e4] ss:$16 sps:$4 sm:$0xff]   ;;  %v11968_v60 = vld [vmem:[%s13600_s26 + $0x3e0] ss:$16 sps:$4 sm:$0xff]  }
 0x1c5   : > { %1652 = vmatprep.subr.bf16.mxu0 %v11889_v61  ;;  %1695 = vmatprep.subr.bf16.mxu1 %v11892_v62  ;;  %v11973_v61 = vld [vmem:[%s13600_s26 + $0x1c4] ss:$16 sps:$4 sm:$0xff]   ;;  %v11971_v62 = vld [vmem:[%s13600_s26 + $0x1c0] ss:$16 sps:$4 sm:$0xff]  }
 0x1c8   : > { %1653 = vmatpush2.bf16.msra.mxu0 %v11887_v63  ;;  %1696 = vmatpush2.bf16.msra.mxu1 %v11890_v0  ;;  %v11976_v63 = vld [vmem:[%s13600_s26 + $0x3c4] ss:$16 sps:$4 sm:$0xff]   ;;  %v11974_v0 = vld [vmem:[%s13600_s26 + $0x3c0] ss:$16 sps:$4 sm:$0xff]  }
 0x1c9   : > { %1654 = vmatprep.subr.bf16.mxu0 %v11895_v1  ;;  %1697 = vmatprep.subr.bf16.mxu1 %v11898_v2  ;;  %v11979_v1 = vld [vmem:[%s13600_s26 + $0x1a4] ss:$16 sps:$4 sm:$0xff]   ;;  %v11977_v2 = vld [vmem:[%s13600_s26 + $0x1a0] ss:$16 sps:$4 sm:$0xff]  }
 0x1cc   : > { %1655 = vmatpush2.bf16.msra.mxu0 %v11893_v3  ;;  %1698 = vmatpush2.bf16.msra.mxu1 %v11896_v4  ;;  %v11982_v3 = vld [vmem:[%s13600_s26 + $0x3a4] ss:$16 sps:$4 sm:$0xff]   ;;  %v11980_v4 = vld [vmem:[%s13600_s26 + $0x3a0] ss:$16 sps:$4 sm:$0xff]  }
 0x1cd   : > { %1656 = vmatprep.subr.bf16.mxu0 %v11901_v9  ;;  %1699 = vmatprep.subr.bf16.mxu1 %v11904_v11  ;;  %v11985_v9 = vld [vmem:[%s13600_s26 + $0x184] ss:$16 sps:$4 sm:$0xff]   ;;  %v11983_v11 = vld [vmem:[%s13600_s26 + $0x180] ss:$16 sps:$4 sm:$0xff]  }
 0x1d0   : > { %1657 = vmatpush2.bf16.msra.mxu0 %v11899_v8  ;;  %1700 = vmatpush2.bf16.msra.mxu1 %v11902_v5  ;;  %v11988_v8 = vld [vmem:[%s13600_s26 + $0x384] ss:$16 sps:$4 sm:$0xff]   ;;  %v11986_v5 = vld [vmem:[%s13600_s26 + $0x380] ss:$16 sps:$4 sm:$0xff]  }
 0x1d1   : > { %1658 = vmatprep.subr.bf16.mxu0 %v11907_v10  ;;  %1701 = vmatprep.subr.bf16.mxu1 %v11910_v6  ;;  %v11991_v10 = vld [vmem:[%s13600_s26 + $0x164] ss:$16 sps:$4 sm:$0xff]   ;;  %v11989_v6 = vld [vmem:[%s13600_s26 + $0x160] ss:$16 sps:$4 sm:$0xff]  }
 0x1d4   : > { %1659 = vmatpush2.bf16.msra.mxu0 %v11905_v16  ;;  %1702 = vmatpush2.bf16.msra.mxu1 %v11908_v18  ;;  %v11994_v16 = vld [vmem:[%s13600_s26 + $0x364] ss:$16 sps:$4 sm:$0xff]   ;;  %v11992_v18 = vld [vmem:[%s13600_s26 + $0x360] ss:$16 sps:$4 sm:$0xff]  }
 0x1d5   : > { %1660 = vmatprep.subr.bf16.mxu0 %v11913_v13  ;;  %1703 = vmatprep.subr.bf16.mxu1 %v11916_v14  ;;  %v11997_v13 = vld [vmem:[%s13600_s26 + $0x144] ss:$16 sps:$4 sm:$0xff]   ;;  %v11995_v14 = vld [vmem:[%s13600_s26 + $0x140] ss:$16 sps:$4 sm:$0xff]  }
 0x1d8   : > { %1661 = vmatpush2.bf16.msra.mxu0 %v11911_v19  ;;  %1704 = vmatpush2.bf16.msra.mxu1 %v11914_v20  ;;  %v12000_v19 = vld [vmem:[%s13600_s26 + $0x344] ss:$16 sps:$4 sm:$0xff]   ;;  %v11998_v20 = vld [vmem:[%s13600_s26 + $0x340] ss:$16 sps:$4 sm:$0xff]  }
 0x1d9   : > { %2484 = vmatprep.subr.bf16.mxu0 %v11919_v21  ;;  %2527 = vmatprep.subr.bf16.mxu1 %v11922_v22  ;;  %v12003_v21 = vld [vmem:[%s13600_s26 + $0x124] ss:$16 sps:$4 sm:$0xff]   ;;  %v12001_v22 = vld [vmem:[%s13600_s26 + $0x120] ss:$16 sps:$4 sm:$0xff]  }
 0x1db   : > { %1663 = vmatmul.mubr.bf16.vlgmr.msra.gmra.mxu0 %v13778_v17  ;;  %1706 = vmatmul.mubr.bf16.vlgmr.msra.gmra.mxu1 %v13780_v12 }
 0x1dc   : > { %2485 = vmatpush1.bf16.msra.mxu0 %v11917_v23  ;;  %2516 = vmatprep.mubr.bf16.mxu0 %v13774_v7  ;;  %v12006_v23 = vld [vmem:[%s13600_s26 + $0x324] ss:$16 sps:$4 sm:$0xff]  }
 0x1dd   : > { %2528 = vmatpush1.bf16.msra.mxu1 %v11920_v24  ;;  %2559 = vmatprep.mubr.bf16.mxu1 %v13776_v15  ;;  %v12004_v24 = vld [vmem:[%s13600_s26 + $0x320] ss:$16 sps:$4 sm:$0xff]  }
 0x1de   : > { %2486 = vmatprep.subr.bf16.mxu0 %v11925_v25  ;;  %2529 = vmatprep.subr.bf16.mxu1 %v11928_v26  ;;  %v12009_v25 = vld [vmem:[%s13600_s26 + $0x104] ss:$16 sps:$4 sm:$0xff]   ;;  %v12007_v26 = vld [vmem:[%s13600_s26 + $0x100] ss:$16 sps:$4 sm:$0xff]  }
 0x1e0   : > { %2487 = vmatpush1.bf16.msra.mxu0 %v11923_v27  ;;  %v12012_v27 = vld [vmem:[%s13600_s26 + $0x304] ss:$16 sps:$4 sm:$0xff]  }
 0x1e1   : > { %2530 = vmatpush1.bf16.msra.mxu1 %v11926_v28  ;;  %2488 = vmatprep.subr.bf16.mxu0 %v11931_v29  ;;  %v12010_v28 = vld [vmem:[%s13600_s26 + $0x300] ss:$16 sps:$4 sm:$0xff]   ;;  %v12015_v29 = vld [vmem:[%s13600_s26 + $0xec] ss:$16 sps:$4 sm:$0xff]  }
 0x1e2   : > { %2531 = vmatprep.subr.bf16.mxu1 %v11934_v31  ;;  %v12013_v31 = vld [vmem:[%s13600_s26 + $0xe8] ss:$16 sps:$4 sm:$0xff]  }
 0x1e4   : > { %2489 = vmatpush1.bf16.msra.mxu0 %v11929_v30  ;;  %v12018_v30 = vld [vmem:[%s13600_s26 + $0x2ec] ss:$16 sps:$4 sm:$0xff]  }
 0x1e5   : > { %2532 = vmatpush1.bf16.msra.mxu1 %v11932_v32  ;;  %2490 = vmatprep.subr.bf16.mxu0 %v11937_v33  ;;  %v12016_v32 = vld [vmem:[%s13600_s26 + $0x2e8] ss:$16 sps:$4 sm:$0xff]   ;;  %v12021_v33 = vld [vmem:[%s13600_s26 + $0xcc] ss:$16 sps:$4 sm:$0xff]  }
 0x1e6   : > { %2533 = vmatprep.subr.bf16.mxu1 %v11940_v34  ;;  %v12019_v34 = vld [vmem:[%s13600_s26 + $0xc8] ss:$16 sps:$4 sm:$0xff]  }
 0x1e8   : > { %2491 = vmatpush1.bf16.msra.mxu0 %v11935_v35  ;;  %v12022_v35 = vld [vmem:[%s13600_s26 + $0x2c8] ss:$16 sps:$4 sm:$0xff]  }
 0x1e9   : > { %2534 = vmatpush1.bf16.msra.mxu1 %v11938_v36  ;;  %2492 = vmatprep.subr.bf16.mxu0 %v11943_v37  ;;  %v12024_v36 = vld [vmem:[%s13600_s26 + $0x2cc] ss:$16 sps:$4 sm:$0xff]  }
 0x1ea   : > { %2535 = vmatprep.subr.bf16.mxu1 %v11946_v39  ;;  %v12027_v37 = vld [vmem:[%s13600_s26 + $0xac] ss:$16 sps:$4 sm:$0xff]   ;;  %v12025_v39 = vld [vmem:[%s13600_s26 + $0xa8] ss:$16 sps:$4 sm:$0xff]  }
 0x1ec   : > { %2493 = vmatpush1.bf16.msra.mxu0 %v11941_v38  ;;  %v12030_v38 = vld [vmem:[%s13600_s26 + $0x2ac] ss:$16 sps:$4 sm:$0xff]  }
 0x1ed   : > { %2536 = vmatpush1.bf16.msra.mxu1 %v11944_v40  ;;  %2494 = vmatprep.subr.bf16.mxu0 %v11949_v41  ;;  %v12028_v40 = vld [vmem:[%s13600_s26 + $0x2a8] ss:$16 sps:$4 sm:$0xff]   ;;  %v12033_v41 = vld [vmem:[%s13600_s26 + $0x8c] ss:$16 sps:$4 sm:$0xff]  }
 0x1ee   : > { %2537 = vmatprep.subr.bf16.mxu1 %v11952_v43  ;;  %v12031_v43 = vld [vmem:[%s13600_s26 + $0x88] ss:$16 sps:$4 sm:$0xff]  }
 0x1f0   : > { %2495 = vmatpush1.bf16.msra.mxu0 %v11947_v42  ;;  %v12036_v42 = vld [vmem:[%s13600_s26 + $0x28c] ss:$16 sps:$4 sm:$0xff]  }
 0x1f1   : > { %2538 = vmatpush1.bf16.msra.mxu1 %v11950_v44  ;;  %2496 = vmatprep.subr.bf16.mxu0 %v11955_v45  ;;  %v12034_v44 = vld [vmem:[%s13600_s26 + $0x288] ss:$16 sps:$4 sm:$0xff]   ;;  %v12039_v45 = vld [vmem:[%s13600_s26 + $0x6c] ss:$16 sps:$4 sm:$0xff]  }
 0x1f2   : > { %2539 = vmatprep.subr.bf16.mxu1 %v11958_v47  ;;  %v12042_v47 = vld [vmem:[%s13600_s26 + $0x26c] ss:$16 sps:$4 sm:$0xff]  }
 0x1f4   : > { %2497 = vmatpush1.bf16.msra.mxu0 %v11953_v46  ;;  %v12037_v46 = vld [vmem:[%s13600_s26 + $0x68] ss:$16 sps:$4 sm:$0xff]  }
 0x1f5   : > { %2540 = vmatpush1.bf16.msra.mxu1 %v11956_v52  ;;  %2498 = vmatprep.subr.bf16.mxu0 %v11961_v53  ;;  %v12040_v52 = vld [vmem:[%s13600_s26 + $0x268] ss:$16 sps:$4 sm:$0xff]   ;;  %v12045_v53 = vld [vmem:[%s13600_s26 + $0x4c] ss:$16 sps:$4 sm:$0xff]  }
 0x1f6   : > { %2541 = vmatprep.subr.bf16.mxu1 %v11964_v55  ;;  %v12048_v55 = vld [vmem:[%s13600_s26 + $0x24c] ss:$16 sps:$4 sm:$0xff]  }
 0x1f8   : > { %2499 = vmatpush1.bf16.msra.mxu0 %v11959_v54  ;;  %v12043_v54 = vld [vmem:[%s13600_s26 + $0x48] ss:$16 sps:$4 sm:$0xff]  }
 0x1f9   : > { %2542 = vmatpush1.bf16.msra.mxu1 %v11962_v56  ;;  %2500 = vmatprep.subr.bf16.mxu0 %v11967_v57  ;;  %v12046_v56 = vld [vmem:[%s13600_s26 + $0x248] ss:$16 sps:$4 sm:$0xff]   ;;  %v12051_v57 = vld [vmem:[%s13600_s26 + $0x2c] ss:$16 sps:$4 sm:$0xff]  }
 0x1fa   : > { %2543 = vmatprep.subr.bf16.mxu1 %v11970_v59  ;;  %v12054_v59 = vld [vmem:[%s13600_s26 + $0x22c] ss:$16 sps:$4 sm:$0xff]  }
 0x1fc   : > { %2501 = vmatpush2.bf16.msra.mxu0 %v11965_v58  ;;  %v12049_v58 = vld [vmem:[%s13600_s26 + $0x28] ss:$16 sps:$4 sm:$0xff]  }
 0x1fd   : > { %2544 = vmatpush2.bf16.msra.mxu1 %v11968_v60  ;;  %2502 = vmatprep.subr.bf16.mxu0 %v11973_v61  ;;  %v12052_v60 = vld [vmem:[%s13600_s26 + $0x228] ss:$16 sps:$4 sm:$0xff]   ;;  %v12057_v61 = vld [vmem:[%s13600_s26 + $0xc] ss:$16 sps:$4 sm:$0xff]  }
 0x1fe   : > { %2545 = vmatprep.subr.bf16.mxu1 %v11976_v63  ;;  %v12060_v63 = vld [vmem:[%s13600_s26 + $0x20c] ss:$16 sps:$4 sm:$0xff]  }
 0x200   : > { %2503 = vmatpush2.bf16.msra.mxu0 %v11971_v62  ;;  %v12055_v62 = vld [vmem:[%s13600_s26 + $0x8] ss:$16 sps:$4 sm:$0xff]  }
 0x201   : > { %2546 = vmatpush2.bf16.msra.mxu1 %v11974_v0  ;;  %2504 = vmatprep.subr.bf16.mxu0 %v11979_v1  ;;  %v12058_v0 = vld [vmem:[%s13600_s26 + $0x208] ss:$16 sps:$4 sm:$0xff]   ;;  %v12063_v1 = vld [vmem:[%s13600_s26 + $0x1ec] ss:$16 sps:$4 sm:$0xff]  }
 0x202   : > { %2547 = vmatprep.subr.bf16.mxu1 %v11982_v3  ;;  %v12066_v3 = vld [vmem:[%s13600_s26 + $0x3ec] ss:$16 sps:$4 sm:$0xff]  }
 0x204   : > { %2505 = vmatpush2.bf16.msra.mxu0 %v11977_v2  ;;  %v12061_v2 = vld [vmem:[%s13600_s26 + $0x1e8] ss:$16 sps:$4 sm:$0xff]  }
 0x205   : > { %2548 = vmatpush2.bf16.msra.mxu1 %v11980_v4  ;;  %2506 = vmatprep.subr.bf16.mxu0 %v11985_v9  ;;  %v12064_v4 = vld [vmem:[%s13600_s26 + $0x3e8] ss:$16 sps:$4 sm:$0xff]   ;;  %v12069_v9 = vld [vmem:[%s13600_s26 + $0x1cc] ss:$16 sps:$4 sm:$0xff]  }
 0x206   : > { %2549 = vmatprep.subr.bf16.mxu1 %v11988_v8  ;;  %v12072_v8 = vld [vmem:[%s13600_s26 + $0x3cc] ss:$16 sps:$4 sm:$0xff]  }
 0x208   : > { %2507 = vmatpush2.bf16.msra.mxu0 %v11983_v11  ;;  %v12067_v11 = vld [vmem:[%s13600_s26 + $0x1c8] ss:$16 sps:$4 sm:$0xff]  }
 0x209   : > { %2550 = vmatpush2.bf16.msra.mxu1 %v11986_v5  ;;  %2508 = vmatprep.subr.bf16.mxu0 %v11991_v10  ;;  %v12070_v5 = vld [vmem:[%s13600_s26 + $0x3c8] ss:$16 sps:$4 sm:$0xff]   ;;  %v12075_v10 = vld [vmem:[%s13600_s26 + $0x1ac] ss:$16 sps:$4 sm:$0xff]  }
 0x20a   : > { %2551 = vmatprep.subr.bf16.mxu1 %v11994_v16  ;;  %v12078_v16 = vld [vmem:[%s13600_s26 + $0x3ac] ss:$16 sps:$4 sm:$0xff]  }
 0x20c   : > { %2509 = vmatpush2.bf16.msra.mxu0 %v11989_v6  ;;  %v12073_v6 = vld [vmem:[%s13600_s26 + $0x1a8] ss:$16 sps:$4 sm:$0xff]  }
 0x20d   : > { %2552 = vmatpush2.bf16.msra.mxu1 %v11992_v18  ;;  %2510 = vmatprep.subr.bf16.mxu0 %v11997_v13  ;;  %v12076_v18 = vld [vmem:[%s13600_s26 + $0x3a8] ss:$16 sps:$4 sm:$0xff]   ;;  %v12081_v13 = vld [vmem:[%s13600_s26 + $0x18c] ss:$16 sps:$4 sm:$0xff]  }
 0x20e   : > { %2553 = vmatprep.subr.bf16.mxu1 %v12000_v19  ;;  %v12084_v19 = vld [vmem:[%s13600_s26 + $0x38c] ss:$16 sps:$4 sm:$0xff]  }
 0x210   : > { %2511 = vmatpush2.bf16.msra.mxu0 %v11995_v14  ;;  %v12079_v14 = vld [vmem:[%s13600_s26 + $0x188] ss:$16 sps:$4 sm:$0xff]  }
 0x211   : > { %2554 = vmatpush2.bf16.msra.mxu1 %v11998_v20  ;;  %2512 = vmatprep.subr.bf16.mxu0 %v12003_v21  ;;  %v12082_v20 = vld [vmem:[%s13600_s26 + $0x388] ss:$16 sps:$4 sm:$0xff]   ;;  %v12087_v21 = vld [vmem:[%s13600_s26 + $0x16c] ss:$16 sps:$4 sm:$0xff]  }
 0x212   : > { %2555 = vmatprep.subr.bf16.mxu1 %v12006_v23  ;;  %v12090_v23 = vld [vmem:[%s13600_s26 + $0x36c] ss:$16 sps:$4 sm:$0xff]  }
 0x214   : > { %2513 = vmatpush2.bf16.msra.mxu0 %v12001_v22  ;;  %v12085_v22 = vld [vmem:[%s13600_s26 + $0x168] ss:$16 sps:$4 sm:$0xff]  }
 0x215   : > { %2556 = vmatpush2.bf16.msra.mxu1 %v12004_v24  ;;  %2514 = vmatprep.subr.bf16.mxu0 %v12009_v25  ;;  %v12088_v24 = vld [vmem:[%s13600_s26 + $0x368] ss:$16 sps:$4 sm:$0xff]   ;;  %v12093_v25 = vld [vmem:[%s13600_s26 + $0x14c] ss:$16 sps:$4 sm:$0xff]  }
 0x216   : > { %2557 = vmatprep.subr.bf16.mxu1 %v12012_v27  ;;  %v12096_v27 = vld [vmem:[%s13600_s26 + $0x34c] ss:$16 sps:$4 sm:$0xff]  }
 0x218   : > { %2515 = vmatpush2.bf16.msra.mxu0 %v12007_v26  ;;  %v12091_v26 = vld [vmem:[%s13600_s26 + $0x148] ss:$16 sps:$4 sm:$0xff]  }
 0x219   : > { %2558 = vmatpush2.bf16.msra.mxu1 %v12010_v28  ;;  %2570 = vmatprep.subr.bf16.mxu0 %v12015_v29  ;;  %v12094_v28 = vld [vmem:[%s13600_s26 + $0x348] ss:$16 sps:$4 sm:$0xff]   ;;  %v12099_v29 = vld [vmem:[%s13600_s26 + $0x12c] ss:$16 sps:$4 sm:$0xff]  }
 0x21a   : > { %2613 = vmatprep.subr.bf16.mxu1 %v12018_v30  ;;  %v12097_v30 = vld [vmem:[%s13600_s26 + $0x128] ss:$16 sps:$4 sm:$0xff]  }
 0x21b   : > { %2517 = vmatmul.mubr.bf16.vlgmr.msra.gmra.mxu0 %v13778_v17 }
 0x21c   : > { %2560 = vmatmul.mubr.bf16.vlgmr.msra.gmra.mxu1 %v13780_v12  ;;  %2571 = vmatpush1.bf16.msra.mxu0 %v12013_v31  ;;  %v12102_v31 = vld [vmem:[%s13600_s26 + $0x32c] ss:$16 sps:$4 sm:$0xff]  }
 0x21d   : > { %2602 = vmatprep.mubr.bf16.mxu0 %v13774_v7  ;;  %2614 = vmatpush1.bf16.msra.mxu1 %v12016_v32  ;;  %v12100_v32 = vld [vmem:[%s13600_s26 + $0x328] ss:$16 sps:$4 sm:$0xff]  }
 0x21e   : > { %2645 = vmatprep.mubr.bf16.mxu1 %v13776_v15  ;;  %2572 = vmatprep.subr.bf16.mxu0 %v12021_v33  ;;  %v12105_v33 = vld [vmem:[%s13600_s26 + $0x10c] ss:$16 sps:$4 sm:$0xff]  }
 0x21f   : > { %2615 = vmatprep.subr.bf16.mxu1 %v12024_v36  ;;  %v12106_v36 = vld [vmem:[%s13600_s26 + $0x308] ss:$16 sps:$4 sm:$0xff]  }
 0x220   : > { %2573 = vmatpush1.bf16.msra.mxu0 %v12019_v34  ;;  %v12103_v34 = vld [vmem:[%s13600_s26 + $0x108] ss:$16 sps:$4 sm:$0xff]  }
 0x221   : > { %2616 = vmatpush1.bf16.msra.mxu1 %v12022_v35  ;;  %2574 = vmatprep.subr.bf16.mxu0 %v12027_v37  ;;  %v12108_v35 = vld [vmem:[%s13600_s26 + $0x30c] ss:$16 sps:$4 sm:$0xff]   ;;  %v12111_v37 = vld [vmem:[%s13602_s19 + $0xe4] ss:$16 sps:$4 sm:$0xff]  }
 0x222   : > { %2617 = vmatprep.subr.bf16.mxu1 %v12030_v38  ;;  %v12114_v38 = vld [vmem:[%s13602_s19 + $0x2e4] ss:$16 sps:$4 sm:$0xff]  }
 0x224   : > { %2575 = vmatpush1.bf16.msra.mxu0 %v12025_v39  ;;  %v12109_v39 = vld [vmem:[%s13602_s19 + $0xe0] ss:$16 sps:$4 sm:$0xff]  }
 0x225   : > { %2618 = vmatpush1.bf16.msra.mxu1 %v12028_v40  ;;  %2576 = vmatprep.subr.bf16.mxu0 %v12033_v41  ;;  %v12112_v40 = vld [vmem:[%s13602_s19 + $0x2e0] ss:$16 sps:$4 sm:$0xff]   ;;  %v12117_v41 = vld [vmem:[%s13602_s19 + $0xc4] ss:$16 sps:$4 sm:$0xff]  }
 0x226   : > { %2619 = vmatprep.subr.bf16.mxu1 %v12036_v42  ;;  %v12120_v42 = vld [vmem:[%s13602_s19 + $0x2c4] ss:$16 sps:$4 sm:$0xff]  }
 0x228   : > { %2577 = vmatpush1.bf16.msra.mxu0 %v12031_v43  ;;  %v12115_v43 = vld [vmem:[%s13602_s19 + $0xc0] ss:$16 sps:$4 sm:$0xff]  }
 0x229   : > { %2620 = vmatpush1.bf16.msra.mxu1 %v12034_v44  ;;  %2578 = vmatprep.subr.bf16.mxu0 %v12039_v45  ;;  %v12118_v44 = vld [vmem:[%s13602_s19 + $0x2c0] ss:$16 sps:$4 sm:$0xff]   ;;  %v12123_v45 = vld [vmem:[%s13602_s19 + $0xa4] ss:$16 sps:$4 sm:$0xff]  }
 0x22a   : > { %2621 = vmatprep.subr.bf16.mxu1 %v12042_v47  ;;  %v12121_v47 = vld [vmem:[%s13602_s19 + $0xa0] ss:$16 sps:$4 sm:$0xff]  }
 0x22c   : > { %2579 = vmatpush1.bf16.msra.mxu0 %v12037_v46  ;;  %v12126_v46 = vld [vmem:[%s13602_s19 + $0x2a4] ss:$16 sps:$4 sm:$0xff]  }
 0x22d   : > { %2622 = vmatpush1.bf16.msra.mxu1 %v12040_v52  ;;  %2580 = vmatprep.subr.bf16.mxu0 %v12045_v53  ;;  %v12124_v52 = vld [vmem:[%s13602_s19 + $0x2a0] ss:$16 sps:$4 sm:$0xff]   ;;  %v12129_v53 = vld [vmem:[%s13602_s19 + $0x84] ss:$16 sps:$4 sm:$0xff]  }
 0x22e   : > { %2623 = vmatprep.subr.bf16.mxu1 %v12048_v55  ;;  %v12127_v55 = vld [vmem:[%s13602_s19 + $0x80] ss:$16 sps:$4 sm:$0xff]  }
 0x230   : > { %2581 = vmatpush1.bf16.msra.mxu0 %v12043_v54  ;;  %v12132_v54 = vld [vmem:[%s13602_s19 + $0x284] ss:$16 sps:$4 sm:$0xff]  }
 0x231   : > { %2624 = vmatpush1.bf16.msra.mxu1 %v12046_v56  ;;  %2582 = vmatprep.subr.bf16.mxu0 %v12051_v57  ;;  %v12130_v56 = vld [vmem:[%s13602_s19 + $0x280] ss:$16 sps:$4 sm:$0xff]   ;;  %v12135_v57 = vld [vmem:[%s13602_s19 + $0x64] ss:$16 sps:$4 sm:$0xff]  }
 0x232   : > { %2625 = vmatprep.subr.bf16.mxu1 %v12054_v59  ;;  %v12133_v59 = vld [vmem:[%s13602_s19 + $0x60] ss:$16 sps:$4 sm:$0xff]  }
 0x234   : > { %2583 = vmatpush1.bf16.msra.mxu0 %v12049_v58  ;;  %v12138_v58 = vld [vmem:[%s13602_s19 + $0x264] ss:$16 sps:$4 sm:$0xff]  }
 0x235   : > { %2626 = vmatpush1.bf16.msra.mxu1 %v12052_v60  ;;  %2584 = vmatprep.subr.bf16.mxu0 %v12057_v61  ;;  %v12136_v60 = vld [vmem:[%s13602_s19 + $0x260] ss:$16 sps:$4 sm:$0xff]   ;;  %v12141_v61 = vld [vmem:[%s13602_s19 + $0x44] ss:$16 sps:$4 sm:$0xff]  }
 0x236   : > { %2627 = vmatprep.subr.bf16.mxu1 %v12060_v63  ;;  %v12139_v63 = vld [vmem:[%s13602_s19 + $0x40] ss:$16 sps:$4 sm:$0xff]  }
 0x238   : > { %2585 = vmatpush1.bf16.msra.mxu0 %v12055_v62  ;;  %v12144_v62 = vld [vmem:[%s13602_s19 + $0x244] ss:$16 sps:$4 sm:$0xff]  }
 0x239   : > { %2628 = vmatpush1.bf16.msra.mxu1 %v12058_v0  ;;  %2586 = vmatprep.subr.bf16.mxu0 %v12063_v1  ;;  %v12142_v0 = vld [vmem:[%s13602_s19 + $0x240] ss:$16 sps:$4 sm:$0xff]   ;;  %v12147_v1 = vld [vmem:[%s13602_s19 + $0x24] ss:$16 sps:$4 sm:$0xff]  }
 0x23a   : > { %2629 = vmatprep.subr.bf16.mxu1 %v12066_v3  ;;  %v12145_v3 = vld [vmem:[%s13602_s19 + $0x20] ss:$16 sps:$4 sm:$0xff]  }
 0x23c   : > { %2587 = vmatpush2.bf16.msra.mxu0 %v12061_v2  ;;  %v12150_v2 = vld [vmem:[%s13602_s19 + $0x224] ss:$16 sps:$4 sm:$0xff]  }
 0x23d   : > { %2630 = vmatpush2.bf16.msra.mxu1 %v12064_v4  ;;  %2588 = vmatprep.subr.bf16.mxu0 %v12069_v9  ;;  %v12148_v4 = vld [vmem:[%s13602_s19 + $0x220] ss:$16 sps:$4 sm:$0xff]   ;;  %v12153_v9 = vld [vmem:[%s13602_s19 + $0x4] ss:$16 sps:$4 sm:$0xff]  }
 0x23e   : > { %2631 = vmatprep.subr.bf16.mxu1 %v12072_v8  ;;  %v12151_v8 = vld [vmem:[%s13602_s19] ss:$16 sps:$4 sm:$0xff]  }
 0x240   : > { %2589 = vmatpush2.bf16.msra.mxu0 %v12067_v11  ;;  %v12156_v11 = vld [vmem:[%s13602_s19 + $0x204] ss:$16 sps:$4 sm:$0xff]  }
 0x241   : > { %2632 = vmatpush2.bf16.msra.mxu1 %v12070_v5  ;;  %2590 = vmatprep.subr.bf16.mxu0 %v12075_v10  ;;  %v12154_v5 = vld [vmem:[%s13602_s19 + $0x200] ss:$16 sps:$4 sm:$0xff]   ;;  %v12159_v10 = vld [vmem:[%s13602_s19 + $0x1e4] ss:$16 sps:$4 sm:$0xff]  }
 0x242   : > { %2633 = vmatprep.subr.bf16.mxu1 %v12078_v16  ;;  %v12157_v16 = vld [vmem:[%s13602_s19 + $0x1e0] ss:$16 sps:$4 sm:$0xff]  }
 0x244   : > { %2591 = vmatpush2.bf16.msra.mxu0 %v12073_v6  ;;  %v12162_v6 = vld [vmem:[%s13602_s19 + $0x3e4] ss:$16 sps:$4 sm:$0xff]  }
 0x245   : > { %2634 = vmatpush2.bf16.msra.mxu1 %v12076_v18  ;;  %2592 = vmatprep.subr.bf16.mxu0 %v12081_v13  ;;  %v12160_v18 = vld [vmem:[%s13602_s19 + $0x3e0] ss:$16 sps:$4 sm:$0xff]   ;;  %v12165_v13 = vld [vmem:[%s13602_s19 + $0x1c4] ss:$16 sps:$4 sm:$0xff]  }
 0x246   : > { %2635 = vmatprep.subr.bf16.mxu1 %v12084_v19  ;;  %v12163_v19 = vld [vmem:[%s13602_s19 + $0x1c0] ss:$16 sps:$4 sm:$0xff]  }
 0x248   : > { %2593 = vmatpush2.bf16.msra.mxu0 %v12079_v14  ;;  %v12168_v14 = vld [vmem:[%s13602_s19 + $0x3c4] ss:$16 sps:$4 sm:$0xff]  }
 0x249   : > { %2636 = vmatpush2.bf16.msra.mxu1 %v12082_v20  ;;  %2594 = vmatprep.subr.bf16.mxu0 %v12087_v21  ;;  %v12166_v20 = vld [vmem:[%s13602_s19 + $0x3c0] ss:$16 sps:$4 sm:$0xff]   ;;  %v12171_v21 = vld [vmem:[%s13602_s19 + $0x1a4] ss:$16 sps:$4 sm:$0xff]  }
 0x24a   : > { %2637 = vmatprep.subr.bf16.mxu1 %v12090_v23  ;;  %v12169_v23 = vld [vmem:[%s13602_s19 + $0x1a0] ss:$16 sps:$4 sm:$0xff]  }
 0x24c   : > { %2595 = vmatpush2.bf16.msra.mxu0 %v12085_v22  ;;  %v12174_v22 = vld [vmem:[%s13602_s19 + $0x3a4] ss:$16 sps:$4 sm:$0xff]  }
 0x24d   : > { %2638 = vmatpush2.bf16.msra.mxu1 %v12088_v24  ;;  %2596 = vmatprep.subr.bf16.mxu0 %v12093_v25  ;;  %v12172_v24 = vld [vmem:[%s13602_s19 + $0x3a0] ss:$16 sps:$4 sm:$0xff]   ;;  %v12177_v25 = vld [vmem:[%s13602_s19 + $0x184] ss:$16 sps:$4 sm:$0xff]  }
 0x24e   : > { %2639 = vmatprep.subr.bf16.mxu1 %v12096_v27  ;;  %v12175_v27 = vld [vmem:[%s13602_s19 + $0x180] ss:$16 sps:$4 sm:$0xff]  }
 0x250   : > { %2597 = vmatpush2.bf16.msra.mxu0 %v12091_v26  ;;  %v12180_v26 = vld [vmem:[%s13602_s19 + $0x384] ss:$16 sps:$4 sm:$0xff]  }
 0x251   : > { %2640 = vmatpush2.bf16.msra.mxu1 %v12094_v28  ;;  %2598 = vmatprep.subr.bf16.mxu0 %v12099_v29  ;;  %v12178_v28 = vld [vmem:[%s13602_s19 + $0x380] ss:$16 sps:$4 sm:$0xff]   ;;  %v12183_v29 = vld [vmem:[%s13602_s19 + $0x164] ss:$16 sps:$4 sm:$0xff]  }
 0x252   : > { %2641 = vmatprep.subr.bf16.mxu1 %v12102_v31  ;;  %v12181_v31 = vld [vmem:[%s13602_s19 + $0x160] ss:$16 sps:$4 sm:$0xff]  }
 0x254   : > { %2599 = vmatpush2.bf16.msra.mxu0 %v12097_v30  ;;  %v12186_v30 = vld [vmem:[%s13602_s19 + $0x364] ss:$16 sps:$4 sm:$0xff]  }
 0x255   : > { %2642 = vmatpush2.bf16.msra.mxu1 %v12100_v32  ;;  %2600 = vmatprep.subr.bf16.mxu0 %v12105_v33  ;;  %v12184_v32 = vld [vmem:[%s13602_s19 + $0x360] ss:$16 sps:$4 sm:$0xff]   ;;  %v12189_v33 = vld [vmem:[%s13602_s19 + $0x144] ss:$16 sps:$4 sm:$0xff]  }
 0x256   : > { %2643 = vmatprep.subr.bf16.mxu1 %v12108_v35  ;;  %v12187_v35 = vld [vmem:[%s13602_s19 + $0x140] ss:$16 sps:$4 sm:$0xff]  }
 0x258   : > { %2601 = vmatpush2.bf16.msra.mxu0 %v12103_v34  ;;  %v12192_v34 = vld [vmem:[%s13602_s19 + $0x344] ss:$16 sps:$4 sm:$0xff]  }
 0x259   : > { %2644 = vmatpush2.bf16.msra.mxu1 %v12106_v36  ;;  %3424 = vmatprep.subr.bf16.mxu0 %v12111_v37 }
 0x25a   : > { %3467 = vmatprep.subr.bf16.mxu1 %v12114_v38  ;;  %v12190_v38 = vld [vmem:[%s13602_s19 + $0x340] ss:$16 sps:$4 sm:$0xff]  }
 0x25b   : > { %2603 = vmatmul.mubr.bf16.vlgmr.msra.gmra.mxu0 %v13778_v17  ;;  %v14043_v36 = vpop.f32.mrf.mxu0  ;;  %v14045_v37 = vpop.f32.mrf.mxu1 }
 0x25c   : > { %2646 = vmatmul.mubr.bf16.vlgmr.msra.gmra.mxu1 %v13780_v12  ;;  %3425 = vmatpush1.bf16.msra.mxu0 %v12109_v39  ;;  %v12195_v39 = vld [vmem:[%s13602_s19 + $0x124] ss:$16 sps:$4 sm:$0xff]  }
 0x25d   : > { %3456 = vmatprep.mubr.bf16.mxu0 %v13774_v7  ;;  %3468 = vmatpush1.bf16.msra.mxu1 %v12112_v40  ;;  %v12198_v40 = vld [vmem:[%s13602_s19 + $0x324] ss:$16 sps:$4 sm:$0xff]  }
 0x25e   : > { %3499 = vmatprep.mubr.bf16.mxu1 %v13776_v15  ;;  %3426 = vmatprep.subr.bf16.mxu0 %v12117_v41  ;;  %v12193_v41 = vld [vmem:[%s13602_s19 + $0x120] ss:$16 sps:$4 sm:$0xff]  }
 0x25f   : > { %3469 = vmatprep.subr.bf16.mxu1 %v12120_v42  ;;  %v14051_v42 = vpop.f32.mrf.mxu0 }
 0x260   : > { %3427 = vmatpush1.bf16.msra.mxu0 %v12115_v43  ;;  %v14053_v43 = vpop.f32.mrf.mxu1 }
 0x261   : > { %3470 = vmatpush1.bf16.msra.mxu1 %v12118_v44  ;;  %3428 = vmatprep.subr.bf16.mxu0 %v12123_v45  ;;  %v12196_v44 = vld [vmem:[%s13602_s19 + $0x320] ss:$16 sps:$4 sm:$0xff]   ;;  %v12201_v45 = vld [vmem:[%s13602_s19 + $0x104] ss:$16 sps:$4 sm:$0xff]  }
 0x262   : > { %3471 = vmatprep.subr.bf16.mxu1 %v12126_v46  ;;  %v12204_v46 = vld [vmem:[%s13602_s19 + $0x304] ss:$16 sps:$4 sm:$0xff]  }
 0x264   : > { %3429 = vmatpush1.bf16.msra.mxu0 %v12121_v47  ;;  %v12199_v47 = vld [vmem:[%s13602_s19 + $0x100] ss:$16 sps:$4 sm:$0xff]  }
 0x265   : > { %3472 = vmatpush1.bf16.msra.mxu1 %v12124_v52  ;;  %3430 = vmatprep.subr.bf16.mxu0 %v12129_v53  ;;  %v14059_v52 = vpop.f32.mrf.mxu0  ;;  %v14061_v53 = vpop.f32.mrf.mxu1 }
 0x266   : > { %3473 = vmatprep.subr.bf16.mxu1 %v12132_v54  ;;  %v12202_v54 = vld [vmem:[%s13602_s19 + $0x300] ss:$16 sps:$4 sm:$0xff]  }
 0x268   : > { %3431 = vmatpush1.bf16.msra.mxu0 %v12127_v55  ;;  %v12207_v55 = vld [vmem:[%s13602_s19 + $0xec] ss:$16 sps:$4 sm:$0xff]  }
 0x269   : > { %3474 = vmatpush1.bf16.msra.mxu1 %v12130_v56  ;;  %3432 = vmatprep.subr.bf16.mxu0 %v12135_v57  ;;  %v12210_v56 = vld [vmem:[%s13602_s19 + $0x2ec] ss:$16 sps:$4 sm:$0xff]   ;;  %v12205_v57 = vld [vmem:[%s13602_s19 + $0xe8] ss:$16 sps:$4 sm:$0xff]  }
 0x26a   : > { %3475 = vmatprep.subr.bf16.mxu1 %v12138_v58  ;;  %v14067_v58 = vpop.f32.mrf.mxu0 }
 0x26c   : > { %3433 = vmatpush1.bf16.msra.mxu0 %v12133_v59  ;;  %v14069_v59 = vpop.f32.mrf.mxu1 }
 0x26d   : > { %3476 = vmatpush1.bf16.msra.mxu1 %v12136_v60  ;;  %3434 = vmatprep.subr.bf16.mxu0 %v12141_v61  ;;  %v12208_v60 = vld [vmem:[%s13602_s19 + $0x2e8] ss:$16 sps:$4 sm:$0xff]   ;;  %v12213_v61 = vld [vmem:[%s13602_s19 + $0xcc] ss:$16 sps:$4 sm:$0xff]  }
 0x26e   : > { %3477 = vmatprep.subr.bf16.mxu1 %v12144_v62 }
 0x270   : > { %3435 = vmatpush1.bf16.msra.mxu0 %v12139_v63 }
 0x271   : > { %3478 = vmatpush1.bf16.msra.mxu1 %v12142_v0  ;;  %3436 = vmatprep.subr.bf16.mxu0 %v12147_v1  ;;  %v12216_v0 = vld [vmem:[%s13602_s19 + $0x2cc] ss:$16 sps:$4 sm:$0xff]  }
 0x272   : > { %3479 = vmatprep.subr.bf16.mxu1 %v12150_v2  ;;  %v12211_v2 = vld [vmem:[%s13602_s19 + $0xc8] ss:$16 sps:$4 sm:$0xff]  }
 0x274   : > { %3437 = vmatpush1.bf16.msra.mxu0 %v12145_v3 }
 0x275   : > { %3480 = vmatpush1.bf16.msra.mxu1 %v12148_v4  ;;  %3438 = vmatprep.subr.bf16.mxu0 %v12153_v9  ;;  %v12214_v9 = vld [vmem:[%s13602_s19 + $0x2c8] ss:$16 sps:$4 sm:$0xff]  }
 0x276   : > { %3481 = vmatprep.subr.bf16.mxu1 %v12156_v11  ;;  %v12219_v11 = vld [vmem:[%s13602_s19 + $0xac] ss:$16 sps:$4 sm:$0xff]  }
 0x278   : > { %3439 = vmatpush1.bf16.msra.mxu0 %v12151_v8 }
 0x279   : > { %3482 = vmatpush1.bf16.msra.mxu1 %v12154_v5  ;;  %3440 = vmatprep.subr.bf16.mxu0 %v12159_v10  ;;  %v12222_v5 = vld [vmem:[%s13602_s19 + $0x2ac] ss:$16 sps:$4 sm:$0xff]  }
 0x27a   : > { %3483 = vmatprep.subr.bf16.mxu1 %v12162_v6 }
 0x27c   : > { %3441 = vmatpush2.bf16.msra.mxu0 %v12157_v16  ;;  %v12217_v16 = vld [vmem:[%s13602_s19 + $0xa8] ss:$16 sps:$4 sm:$0xff]  }
 0x27d   : > { %3484 = vmatpush2.bf16.msra.mxu1 %v12160_v18  ;;  %3442 = vmatprep.subr.bf16.mxu0 %v12165_v13  ;;  %v12225_v18 = vld [vmem:[%s13602_s19 + $0x8c] ss:$16 sps:$4 sm:$0xff]  }
 0x27e   : > { %3485 = vmatprep.subr.bf16.mxu1 %v12168_v14 }
 0x280   : > { %3443 = vmatpush2.bf16.msra.mxu0 %v12163_v19  ;;  %v12228_v19 = vld [vmem:[%s13602_s19 + $0x28c] ss:$16 sps:$4 sm:$0xff]  }
 0x281   : > { %3486 = vmatpush2.bf16.msra.mxu1 %v12166_v20  ;;  %3444 = vmatprep.subr.bf16.mxu0 %v12171_v21  ;;  %v12223_v20 = vld [vmem:[%s13602_s19 + $0x88] ss:$16 sps:$4 sm:$0xff]  }
 0x282   : > { %3487 = vmatprep.subr.bf16.mxu1 %v12174_v22  ;;  %v12226_v21 = vld [vmem:[%s13602_s19 + $0x288] ss:$16 sps:$4 sm:$0xff]   ;;  %v12231_v22 = vld [vmem:[%s13602_s19 + $0x6c] ss:$16 sps:$4 sm:$0xff]  }
 0x284   : > { %3445 = vmatpush2.bf16.msra.mxu0 %v12169_v23  ;;  %v12234_v23 = vld [vmem:[%s13602_s19 + $0x26c] ss:$16 sps:$4 sm:$0xff]  }
 0x285   : > { %3488 = vmatpush2.bf16.msra.mxu1 %v12172_v24  ;;  %3446 = vmatprep.subr.bf16.mxu0 %v12177_v25  ;;  %v12229_v24 = vld [vmem:[%s13602_s19 + $0x68] ss:$16 sps:$4 sm:$0xff]  }
 0x286   : > { %3489 = vmatprep.subr.bf16.mxu1 %v12180_v26  ;;  %v12232_v25 = vld [vmem:[%s13602_s19 + $0x268] ss:$16 sps:$4 sm:$0xff]   ;;  %v12237_v26 = vld [vmem:[%s13602_s19 + $0x4c] ss:$16 sps:$4 sm:$0xff]  }
 0x288   : > { %3447 = vmatpush2.bf16.msra.mxu0 %v12175_v27  ;;  %v12240_v27 = vld [vmem:[%s13602_s19 + $0x24c] ss:$16 sps:$4 sm:$0xff]  }
 0x289   : > { %3490 = vmatpush2.bf16.msra.mxu1 %v12178_v28  ;;  %3448 = vmatprep.subr.bf16.mxu0 %v12183_v29  ;;  %v12235_v28 = vld [vmem:[%s13602_s19 + $0x48] ss:$16 sps:$4 sm:$0xff]  }
 0x28a   : > { %3491 = vmatprep.subr.bf16.mxu1 %v12186_v30  ;;  %v12238_v29 = vld [vmem:[%s13602_s19 + $0x248] ss:$16 sps:$4 sm:$0xff]   ;;  %v12243_v30 = vld [vmem:[%s13602_s19 + $0x2c] ss:$16 sps:$4 sm:$0xff]  }
 0x28c   : > { %3449 = vmatpush2.bf16.msra.mxu0 %v12181_v31  ;;  %v12246_v31 = vld [vmem:[%s13602_s19 + $0x22c] ss:$16 sps:$4 sm:$0xff]  }
 0x28d   : > { %3492 = vmatpush2.bf16.msra.mxu1 %v12184_v32  ;;  %3450 = vmatprep.subr.bf16.mxu0 %v12189_v33  ;;  %v12241_v32 = vld [vmem:[%s13602_s19 + $0x28] ss:$16 sps:$4 sm:$0xff]  }
 0x28e   : > { %3493 = vmatprep.subr.bf16.mxu1 %v12192_v34  ;;  %v12244_v33 = vld [vmem:[%s13602_s19 + $0x228] ss:$16 sps:$4 sm:$0xff]   ;;  %v12249_v34 = vld [vmem:[%s13602_s19 + $0xc] ss:$16 sps:$4 sm:$0xff]  }
 0x290   : > { %3451 = vmatpush2.bf16.msra.mxu0 %v12187_v35  ;;  %v12252_v35 = vld [vmem:[%s13602_s19 + $0x20c] ss:$16 sps:$4 sm:$0xff]  }
 0x291   : > { %3494 = vmatpush2.bf16.msra.mxu1 %v12190_v38  ;;  %3452 = vmatprep.subr.bf16.mxu0 %v12195_v39  ;;  %v12247_v38 = vld [vmem:[%s13602_s19 + $0x8] ss:$16 sps:$4 sm:$0xff]  }
 0x292   : > { %3495 = vmatprep.subr.bf16.mxu1 %v12198_v40  ;;  %v12250_v39 = vld [vmem:[%s13602_s19 + $0x208] ss:$16 sps:$4 sm:$0xff]   ;;  %v12255_v40 = vld [vmem:[%s13602_s19 + $0x1ec] ss:$16 sps:$4 sm:$0xff]  }
 0x294   : > { %3453 = vmatpush2.bf16.msra.mxu0 %v12193_v41  ;;  %v12258_v41 = vld [vmem:[%s13602_s19 + $0x3ec] ss:$16 sps:$4 sm:$0xff]  }
 0x295   : > { %3496 = vmatpush2.bf16.msra.mxu1 %v12196_v44  ;;  %3454 = vmatprep.subr.bf16.mxu0 %v12201_v45  ;;  %v12253_v44 = vld [vmem:[%s13602_s19 + $0x1e8] ss:$16 sps:$4 sm:$0xff]  }
 0x296   : > { %3497 = vmatprep.subr.bf16.mxu1 %v12204_v46  ;;  %v12256_v45 = vld [vmem:[%s13602_s19 + $0x3e8] ss:$16 sps:$4 sm:$0xff]   ;;  %v12261_v46 = vld [vmem:[%s13602_s19 + $0x1cc] ss:$16 sps:$4 sm:$0xff]  }
 0x298   : > { %3455 = vmatpush2.bf16.msra.mxu0 %v12199_v47  ;;  %v12264_v47 = vld [vmem:[%s13602_s19 + $0x3cc] ss:$16 sps:$4 sm:$0xff]  }
 0x299   : > { %3498 = vmatpush2.bf16.msra.mxu1 %v12202_v54  ;;  %3510 = vmatprep.subr.bf16.mxu0 %v12207_v55  ;;  %v12259_v54 = vld [vmem:[%s13602_s19 + $0x1c8] ss:$16 sps:$4 sm:$0xff]  }
 0x29a   : > { %3553 = vmatprep.subr.bf16.mxu1 %v12210_v56  ;;  %v12262_v55 = vld [vmem:[%s13602_s19 + $0x3c8] ss:$16 sps:$4 sm:$0xff]   ;;  %v12267_v56 = vld [vmem:[%s13602_s19 + $0x1ac] ss:$16 sps:$4 sm:$0xff]  }
 0x29b   : > { %v1664_v62 = vpop.f32.mrf.mxu0  ;;  %v1707_v63 = vpop.f32.mrf.mxu1  ;;  %3457 = vmatmul.mubr.bf16.vlgmr.msra.gmra.mxu0 %v13778_v17 }
 0x29c   : > { %v14075_v1 = vadd.f32 %v1707_v63, %v1664_v62  ;;  %3500 = vmatmul.mubr.bf16.vlgmr.msra.gmra.mxu1 %v13780_v12  ;;  %3511 = vmatpush1.bf16.msra.mxu0 %v12205_v57  ;;  %v12270_v57 = vld [vmem:[%s13602_s19 + $0x3ac] ss:$16 sps:$4 sm:$0xff]  }
 0x29d   : > { %3542 = vmatprep.mubr.bf16.mxu0 %v13774_v7  ;;  %3554 = vmatpush1.bf16.msra.mxu1 %v12208_v60  ;;  %v1666_v3 = vpop.f32.mrf.mxu0  ;;  %v1709_v4 = vpop.f32.mrf.mxu1  ;;  %v12265_v60 = vld [vmem:[%s13602_s19 + $0x1a8] ss:$16 sps:$4 sm:$0xff]   ;;  %v12273_v62 = vld [vmem:[%s13602_s19 + $0x18c] ss:$16 sps:$4 sm:$0xff]  }
 0x29e   : > { %3585 = vmatprep.mubr.bf16.mxu1 %v13776_v15  ;;  %v14083_v8 = vadd.f32 %v1709_v4, %v1666_v3  ;;  %3512 = vmatprep.subr.bf16.mxu0 %v12213_v61  ;;  %v12220_v15 = vld [vmem:[%s13602_s19 + $0x2a8] ss:$16 sps:$4 sm:$0xff]   ;;  %v12276_v63 = vld [vmem:[%s13602_s19 + $0x38c] ss:$16 sps:$4 sm:$0xff]  }
 0x29f   : > { %v1668_v10 = vpop.f32.mrf.mxu0  ;;  %v1711_v6 = vpop.f32.mrf.mxu1  ;;  %3555 = vmatprep.subr.bf16.mxu1 %v12216_v0  ;;  %v12268_v61 = vld [vmem:[%s13602_s19 + $0x3a8] ss:$16 sps:$4 sm:$0xff]   ;;  %v12279_v3 = vld [vmem:[%s13602_s19 + $0x16c] ss:$16 sps:$4 sm:$0xff]  }
 0x2a0   : > { %v14086_v7 = vadd.f32 %v1711_v6, %v1668_v10  ;;  %3513 = vmatpush1.bf16.msra.mxu0 %v12211_v2  ;;  %v12271_v0 = vld [vmem:[%s13602_s19 + $0x188] ss:$16 sps:$4 sm:$0xff]   ;;  %v12282_v4 = vld [vmem:[%s13602_s19 + $0x36c] ss:$16 sps:$4 sm:$0xff]  }
 0x2a1   : > { %3556 = vmatpush1.bf16.msra.mxu1 %v12214_v9  ;;  %3514 = vmatprep.subr.bf16.mxu0 %v12219_v11  ;;  %v12274_v2 = vld [vmem:[%s13602_s19 + $0x388] ss:$16 sps:$4 sm:$0xff]   ;;  %v12288_v10 = vld [vmem:[%s13602_s19 + $0x34c] ss:$16 sps:$4 sm:$0xff]  }
 0x2a2   : > { %v11690_v13 = vpack.i.bf16 %v14086_v7, %v14075_v1  ;;  %v3632_v14 = vpack.c.bf16 %v14086_v7, %v14075_v1  ;;  %3557 = vmatprep.subr.bf16.mxu1 %v12222_v5  ;;  %v12277_v9 = vld [vmem:[%s13602_s19 + $0x168] ss:$16 sps:$4 sm:$0xff]   ;;  %v12285_v5 = vld [vmem:[%s13602_s19 + $0x14c] ss:$16 sps:$4 sm:$0xff]  }
 0x2a3   : > { %v12280_v11 = vld [vmem:[%s13602_s19 + $0x368] ss:$16 sps:$4 sm:$0xff]  }
 0x2a4   : > { %3515 = vmatpush1.bf16.msra.mxu0 %v12217_v16  ;;  %v12283_v6 = vld [vmem:[%s13602_s19 + $0x148] ss:$16 sps:$4 sm:$0xff]  }
 0x2a5   : > { %3558 = vmatpush1.bf16.msra.mxu1 %v12220_v15  ;;  %3516 = vmatprep.subr.bf16.mxu0 %v12225_v18  ;;  %v12286_v16 = vld [vmem:[%s13602_s19 + $0x348] ss:$16 sps:$4 sm:$0xff]   ;;  %v12291_v15 = vld [vmem:[%s13602_s19 + $0x12c] ss:$16 sps:$4 sm:$0xff]  }
 0x2a6   : > { %3559 = vmatprep.subr.bf16.mxu1 %v12228_v19  ;;  %v12294_v18 = vld [vmem:[%s13602_s19 + $0x32c] ss:$16 sps:$4 sm:$0xff]   ;;  %v12289_v19 = vld [vmem:[%s13602_s19 + $0x128] ss:$16 sps:$4 sm:$0xff]  }
 0x2a8   : > { %3517 = vmatpush1.bf16.msra.mxu0 %v12223_v20  ;;  %v12292_v20 = vld [vmem:[%s13602_s19 + $0x328] ss:$16 sps:$4 sm:$0xff]  }
 0x2a9   : > { %3560 = vmatpush1.bf16.msra.mxu1 %v12226_v21  ;;  %3518 = vmatprep.subr.bf16.mxu0 %v12231_v22  ;;  %v12297_v21 = vld [vmem:[%s13602_s19 + $0x10c] ss:$16 sps:$4 sm:$0xff]  }
 0x2aa   : > { %3561 = vmatprep.subr.bf16.mxu1 %v12234_v23  ;;  %v12300_v22 = vld [vmem:[%s13602_s19 + $0x30c] ss:$16 sps:$4 sm:$0xff]   ;;  %v12295_v23 = vld [vmem:[%s13602_s19 + $0x108] ss:$16 sps:$4 sm:$0xff]  }
 0x2ac   : > { %3519 = vmatpush1.bf16.msra.mxu0 %v12229_v24  ;;  %v12298_v24 = vld [vmem:[%s13602_s19 + $0x308] ss:$16 sps:$4 sm:$0xff]  }
 0x2ad   : > { %3562 = vmatpush1.bf16.msra.mxu1 %v12232_v25  ;;  %3520 = vmatprep.subr.bf16.mxu0 %v12237_v26  ;;  %v14146_v25 = vpop.f32.mrf.mxu0  ;;  %v13214_v26 = vmov 0.0  }
 0x2ae   : > { %3563 = vmatprep.subr.bf16.mxu1 %v12240_v27  ;;  %v14149_v27 = vpop.f32.mrf.mxu1 }
 0x2b0   : > { %3521 = vmatpush1.bf16.msra.mxu0 %v12235_v28 }
 0x2b1   : > { %3564 = vmatpush1.bf16.msra.mxu1 %v12238_v29  ;;  %3522 = vmatprep.subr.bf16.mxu0 %v12243_v30 }
 0x2b2   : > { %3565 = vmatprep.subr.bf16.mxu1 %v12246_v31 }
 0x2b4   : > { %3523 = vmatpush1.bf16.msra.mxu0 %v12241_v32 }
 0x2b5   : > { %3566 = vmatpush1.bf16.msra.mxu1 %v12244_v33  ;;  %3524 = vmatprep.subr.bf16.mxu0 %v12249_v34 }
 0x2b6   : > { %3567 = vmatprep.subr.bf16.mxu1 %v12252_v35 }
 0x2b8   : > { %3525 = vmatpush1.bf16.msra.mxu0 %v12247_v38 }
 0x2b9   : > { %3568 = vmatpush1.bf16.msra.mxu1 %v12250_v39  ;;  %3526 = vmatprep.subr.bf16.mxu0 %v12255_v40 }
 0x2ba   : > { %3569 = vmatprep.subr.bf16.mxu1 %v12258_v41 }
 0x2bc   : > { %3527 = vmatpush2.bf16.msra.mxu0 %v12253_v44 }
 0x2bd   : > { %3570 = vmatpush2.bf16.msra.mxu1 %v12256_v45  ;;  %3528 = vmatprep.subr.bf16.mxu0 %v12261_v46  ;;  %v1622_v45 = vadd.f32 %v14045_v37, %v14043_v36 }
 0x2be   : > { %3571 = vmatprep.subr.bf16.mxu1 %v12264_v47 }
 0x2c0   : > { %3529 = vmatpush2.bf16.msra.mxu0 %v12259_v54 }
 0x2c1   : > { %3572 = vmatpush2.bf16.msra.mxu1 %v12262_v55  ;;  %3530 = vmatprep.subr.bf16.mxu0 %v12267_v56 }
 0x2c2   : > { %3573 = vmatprep.subr.bf16.mxu1 %v12270_v57 }
 0x2c4   : > { %3531 = vmatpush2.bf16.msra.mxu0 %v12265_v60 }
 0x2c5   : > { %3574 = vmatpush2.bf16.msra.mxu1 %v12268_v61  ;;  %3532 = vmatprep.subr.bf16.mxu0 %v12273_v62 }
 0x2c6   : > { %3575 = vmatprep.subr.bf16.mxu1 %v12276_v63 }
 0x2c8   : > { %3533 = vmatpush2.bf16.msra.mxu0 %v12271_v0 }
 0x2c9   : > { %3576 = vmatpush2.bf16.msra.mxu1 %v12274_v2  ;;  %3534 = vmatprep.subr.bf16.mxu0 %v12279_v3 }
 0x2ca   : > { %3577 = vmatprep.subr.bf16.mxu1 %v12282_v4 }
 0x2cc   : > { %3535 = vmatpush2.bf16.msra.mxu0 %v12277_v9 }
 0x2cd   : > { %3578 = vmatpush2.bf16.msra.mxu1 %v12280_v11  ;;  %3536 = vmatprep.subr.bf16.mxu0 %v12285_v5 }
 0x2ce   : > { %3579 = vmatprep.subr.bf16.mxu1 %v12288_v10 }
 0x2d0   : > { %3537 = vmatpush2.bf16.msra.mxu0 %v12283_v6  ;;  %v1714_v6 = vadd.f32 %v14149_v27, %v14146_v25 }
 0x2d1   : > { %3580 = vmatpush2.bf16.msra.mxu1 %v12286_v16  ;;  %3538 = vmatprep.subr.bf16.mxu0 %v12291_v15 }
 0x2d2   : > { %3581 = vmatprep.subr.bf16.mxu1 %v12294_v18  ;;  %v11700_v18 = vpack.i.bf16 %v1714_v6, %v14083_v8 }
 0x2d4   : > { %3539 = vmatpush2.bf16.msra.mxu0 %v12289_v19 }
 0x2d5   : > { %3582 = vmatpush2.bf16.msra.mxu1 %v12292_v20  ;;  %3540 = vmatprep.subr.bf16.mxu0 %v12297_v21 }
 0x2d6   : > { %3583 = vmatprep.subr.bf16.mxu1 %v12300_v22 }
 0x2d8   : > { %3541 = vmatpush2.bf16.msra.mxu0 %v12295_v23 }
 0x2d9   : > { %3584 = vmatpush2.bf16.msra.mxu1 %v12298_v24  ;;  %11486 = vmatprep.subr.bf16.mxu0 %v13214_v26 }
 0x2da   : > { %11492 = vmatprep.subr.bf16.mxu1 %v13214_v26 }
 0x2db   : > { %v2518_v28 = vpop.f32.mrf.mxu0  ;;  %3543 = vmatmul.mubr.bf16.vlgmr.msra.gmra.mxu0 %v13778_v17  ;;  %v1626_v17 = vadd.f32 %v14061_v53, %v14059_v52  ;;  %v1628_v52 = vadd.f32 %v14069_v59, %v14067_v58  ;;  %v1624_v53 = vadd.f32 %v14053_v43, %v14051_v42 }
 0x2dc   : > { %v2561_v29 = vpop.f32.mrf.mxu1  ;;  %3586 = vmatmul.mubr.bf16.vlgmr.msra.gmra.mxu1 %v13780_v12  ;;  %11488 = vmatprep.mubr.msk.bf16.mxu0 %vm13215_vm0, %v13214_v26 }
 0x2dd   : > { %v2520_v30 = vpop.f32.mrf.mxu0  ;;  %11494 = vmatprep.mubr.msk.bf16.mxu1 %vm13215_vm0, %v13214_v26  ;;  %v2562_v34 = vadd.f32 %v2561_v29, %v2518_v28  ;;  %v11670_v54 = vpack.i.bf16 %v1626_v17, %v1622_v45  ;;  %v3628_v36 = vpack.c.bf16 %v1626_v17, %v1622_v45  ;;  %v11680_v37 = vpack.i.bf16 %v1628_v52, %v1624_v53 }
 0x2de   : > { %v2563_v31 = vpop.f32.mrf.mxu1  ;;  %v3630_v58 = vpack.c.bf16 %v1628_v52, %v1624_v53 }
 0x2df   : > { %v2522_v32 = vpop.f32.mrf.mxu0  ;;  %v2564_v12 = vadd.f32 %v2563_v31, %v2520_v30 }
 0x2e0   : > { %v2565_v33 = vpop.f32.mrf.mxu1 }
 0x2e1   : > { %v2566_v35 = vadd.f32 %v2565_v33, %v2522_v32  ;;  %v2524_v38 = vpop.f32.mrf.mxu0 }
 0x2e2   : > { %v2567_v39 = vpop.f32.mrf.mxu1 }
 0x2e3   : > { %v3668_v40 = vpack.c.bf16 %v2566_v35, %v2562_v34  ;;  %v2568_v41 = vadd.f32 %v2567_v39, %v2524_v38  ;;  %v11665_v44 = vpack.i.bf16 %v2566_v35, %v2562_v34 }
 0x2e5   : > { %v11675_v46 = vpack.i.bf16 %v2568_v41, %v2564_v12  ;;  %11666 = vrot.lane.b32.xlu1 %v11665_v44, %s13216_s1  ;;  %v3737_v47 = vsel %vm3732_vm1, %v3668_v40, 0  ;;  %v3670_v55 = vpack.c.bf16 %v2568_v41, %v2564_v12 }
 0x2e6   : > { %11487 = vmatpush3.bf16.xpose.msra.mxu0 %v3737_v47 }
 0x2e7   : > { %11676 = vrot.lane.b32.xlu0 %v11675_v46, %s13216_s1  ;;  %11498 = vmatprep.subr.bf16.mxu0 %v13214_v26  ;;  %v3831_v56 = vsel %vm3732_vm1, %v3670_v55, 0 }
 0x2e9   : > { %11671 = vrot.lane.b32.xlu1 %v11670_v54, %s13216_s1 }
 0x2ed   : > { %11489 = vmatmul.mubr.msk.bf16.vlgmr.msra.gmra.mxu0 %vm3732_vm1, %v3628_v36  ;;  %11681 = vrot.lane.b32.xlu1 %v11680_v37, %s13216_s1 }
 0x2ee   : > { %11499 = vmatpush3.bf16.xpose.msra.mxu0 %v3831_v56  ;;  %11500 = vmatprep.mubr.msk.bf16.mxu0 %vm13215_vm0, %v13214_v26 }
 0x2ef   : > { %11510 = vmatprep.subr.bf16.mxu0 %v13214_v26 }
 0x2f5   : > { %11501 = vmatmul.mubr.msk.bf16.vlgmr.msra.gmra.mxu0 %vm3732_vm1, %v3630_v58 }
 0x2f6   : > { %11512 = vmatprep.mubr.msk.bf16.mxu0 %vm13215_vm0, %v13214_v26 }
 0x31b   : > { %v2604_v42 = vpop.f32.mrf.mxu0 }
 0x31c   : > { %v2647_v43 = vpop.f32.mrf.mxu1 }
 0x31d   : > { %v2606_v59 = vpop.f32.mrf.mxu0  ;;  %v2648_v62 = vadd.f32 %v2647_v43, %v2604_v42 }
 0x31e   : > { %v2649_v57 = vpop.f32.mrf.mxu1 }
 0x31f   : > { %v2608_v60 = vpop.f32.mrf.mxu0  ;;  %v2650_v5 = vadd.f32 %v2649_v57, %v2606_v59 }
 0x320   : > { %v2651_v61 = vpop.f32.mrf.mxu1 }
 0x321   : > { %v2652_v63 = vadd.f32 %v2651_v61, %v2608_v60  ;;  %v2610_v0 = vpop.f32.mrf.mxu0 }
 0x322   : > { %v2653_v2 = vpop.f32.mrf.mxu1 }
 0x323   : > { %v11685_v3 = vpack.i.bf16 %v2652_v63, %v2648_v62  ;;  %v3672_v4 = vpack.c.bf16 %v2652_v63, %v2648_v62  ;;  %v2654_v9 = vadd.f32 %v2653_v2, %v2610_v0 }
 0x325   : > { %11686 = vrot.lane.b32.xlu1 %v11685_v3, %s13216_s1  ;;  %v3925_v11 = vsel %vm3732_vm1, %v3672_v4, 0  ;;  %v3674_v10 = vpack.c.bf16 %v2654_v9, %v2650_v5  ;;  %v11695_v16 = vpack.i.bf16 %v2654_v9, %v2650_v5 }
 0x326   : > { %11511 = vmatpush3.bf16.xpose.msra.mxu0 %v3925_v11 }
 0x327   : > { %11522 = vmatprep.subr.bf16.mxu0 %v13214_v26  ;;  %v4019_v15 = vsel %vm3732_vm1, %v3674_v10, 0 }
 0x329   : > { %11691 = vrot.lane.b32.xlu1 %v11690_v13, %s13216_s1  ;;  %v3634_v13 = vpack.c.bf16 %v1714_v6, %v14083_v8 }
 0x32d   : > { %11696 = vrot.lane.b32.xlu1 %v11695_v16, %s13216_s1  ;;  %11513 = vmatmul.mubr.msk.bf16.vlgmr.msra.gmra.mxu0 %vm3732_vm1, %v3632_v14 }
 0x32e   : > { %11523 = vmatpush3.bf16.xpose.msra.mxu0 %v4019_v15  ;;  %11524 = vmatprep.mubr.msk.bf16.mxu0 %vm13215_vm0, %v13214_v26 }
 0x32f   : > { %11534 = vmatprep.subr.bf16.mxu0 %v13214_v26 }
 0x331   : > { %11701 = vrot.lane.b32.xlu1 %v11700_v18, %s13216_s1 }
 0x335   : > { %11525 = vmatmul.mubr.msk.bf16.vlgmr.msra.gmra.mxu0 %vm3732_vm1, %v3634_v13 }
 0x336   : > { %11536 = vmatprep.mubr.msk.bf16.mxu0 %vm13215_vm0, %v13214_v26 }
 0x357   : > { %v11667_v1 = vpop.permute.xlu1 %11666 }
 0x358   : > { %v11669_v7 = vunpack.i.h.bf16 %v11667_v1  ;;  %v11668_v14 = vunpack.i.l.bf16 %v11667_v1 }
 0x359   : > { %v11677_v19 = vpop.permute.xlu0 %11676 }
 0x35a   : > { %v3669_v20 = vpack.c.bf16 %v11669_v7, %v11668_v14  ;;  %v11679_v23 = vunpack.i.h.bf16 %v11677_v19  ;;  %v11678_v24 = vunpack.i.l.bf16 %v11677_v19 }
 0x35b   : > { %v11672_v21 = vpop.permute.xlu1 %11671  ;;  %v3458_v22 = vpop.f32.mrf.mxu0 }
 0x35c   : > { %v3501_v25 = vpop.f32.mrf.mxu1  ;;  %v3784_v27 = vsel %vm3732_vm1, %v3669_v20, 0  ;;  %v11674_v8 = vunpack.i.h.bf16 %v11672_v21  ;;  %v11673_v29 = vunpack.i.l.bf16 %v11672_v21  ;;  %v3671_v33 = vpack.c.bf16 %v11679_v23, %v11678_v24 }
 0x35d   : > { %11493 = vmatpush3.bf16.xpose.msra.mxu1 %v3784_v27  ;;  %v3460_v28 = vpop.f32.mrf.mxu0  ;;  %v14208_v35 = vadd.f32 %v3501_v25, %v3458_v22  ;;  %v3716_v25 = vld [vmem:[%s15502_s18] sm:$0xff] }
 0x35e   : > { %v3503_v30 = vpop.f32.mrf.mxu1  ;;  %11504 = vmatprep.subr.bf16.mxu1 %v13214_v26  ;;  %v3629_v39 = vpack.c.bf16 %v11674_v8, %v11673_v29  ;;  %v3878_v46 = vsel %vm3732_vm1, %v3671_v33, 0  ;;  %v3717_v29 = vld [vmem:[%s15502_s18 + $0x8] sm:$0xff] }
 0x35f   : > { %v14206_v31 = vadd.f32 %v3503_v30, %v3460_v28  ;;  %v3462_v32 = vpop.f32.mrf.mxu0  ;;  %v11682_v40 = vpop.permute.xlu1 %11681 }
 0x360   : > { %v3505_v34 = vpop.f32.mrf.mxu1  ;;  %v11684_v52 = vunpack.i.h.bf16 %v11682_v40  ;;  %v11683_v53 = vunpack.i.l.bf16 %v11682_v40 }
 0x361   : > { %v14210_v38 = vadd.f32 %v3505_v34, %v3462_v32  ;;  %v3464_v17 = vpop.f32.mrf.mxu0 }
 0x362   : > { %v3507_v12 = vpop.f32.mrf.mxu1  ;;  %v3631_v55 = vpack.c.bf16 %v11684_v52, %v11683_v53 }
 0x363   : > { %v11705_v41 = vpack.i.bf16 %v14210_v38, %v14208_v35  ;;  %v3708_v44 = vpack.c.bf16 %v14210_v38, %v14208_v35  ;;  %v14216_v45 = vadd.f32 %v3507_v12, %v3464_v17 }
 0x364   : > { %11495 = vmatmul.mubr.msk.bf16.vlgmr.msra.gmra.mxu1 %vm3732_vm1, %v3629_v39 }
 0x365   : > { %v11710_v47 = vpack.i.bf16 %v14216_v45, %v14206_v31  ;;  %v3710_v54 = vpack.c.bf16 %v14216_v45, %v14206_v31  ;;  %11505 = vmatpush3.bf16.xpose.msra.mxu1 %v3878_v46  ;;  %11535 = vmatpush3.bf16.msra.mxu0 %v3708_v44 }
 0x366   : > { %11506 = vmatprep.mubr.msk.bf16.mxu1 %vm13215_vm0, %v13214_v26  ;;  %11516 = vmatprep.subr.bf16.mxu1 %v13214_v26 }
 0x367   : > { %11546 = vmatprep.subr.bf16.mxu0 %v13214_v26 }
 0x36c   : > { %11507 = vmatmul.mubr.msk.bf16.vlgmr.msra.gmra.mxu1 %vm3732_vm1, %v3631_v55 }
 0x36d   : > { %11518 = vmatprep.mubr.msk.bf16.mxu1 %vm13215_vm0, %v13214_v26 }
 0x397   : > { %v11687_v36 = vpop.permute.xlu1 %11686 }
 0x398   : > { %v11689_v37 = vunpack.i.h.bf16 %v11687_v36  ;;  %v11688_v56 = vunpack.i.l.bf16 %v11687_v36 }
 0x39a   : > { %v3673_v58 = vpack.c.bf16 %v11689_v37, %v11688_v56 }
 0x39b   : > { %v11692_v42 = vpop.permute.xlu1 %11691  ;;  %v3544_v43 = vpop.f32.mrf.mxu0 }
 0x39c   : > { %v3587_v59 = vpop.f32.mrf.mxu1  ;;  %v3972_v57 = vsel %vm3732_vm1, %v3673_v58, 0  ;;  %v11694_v62 = vunpack.i.h.bf16 %v11692_v42  ;;  %v11693_v63 = vunpack.i.l.bf16 %v11692_v42  ;;  %v3718_v42 = vld [vmem:[%s15502_s18 + $0x10] sm:$0xff] }
 0x39d   : > { %v14232_v60 = vadd.f32 %v3587_v59, %v3544_v43  ;;  %11517 = vmatpush3.bf16.xpose.msra.mxu1 %v3972_v57  ;;  %v3546_v61 = vpop.f32.mrf.mxu0  ;;  %v3720_v43 = vld [vmem:[%s15502_s18 + $0x20] sm:$0xff] }
 0x39e   : > { %v3589_v0 = vpop.f32.mrf.mxu1  ;;  %11528 = vmatprep.subr.bf16.mxu1 %v13214_v26  ;;  %v3633_v16 = vpack.c.bf16 %v11694_v62, %v11693_v63  ;;  %v3719_v62 = vld [vmem:[%s15502_s18 + $0x18] sm:$0xff] }
 0x39f   : > { %v14235_v2 = vadd.f32 %v3589_v0, %v3546_v61  ;;  %v11697_v3 = vpop.permute.xlu1 %11696  ;;  %v3548_v4 = vpop.f32.mrf.mxu0 }
 0x3a0   : > { %v11699_v9 = vunpack.i.h.bf16 %v11697_v3  ;;  %v11698_v11 = vunpack.i.l.bf16 %v11697_v3  ;;  %v3591_v5 = vpop.f32.mrf.mxu1  ;;  %v3721_v3 = vld [vmem:[%s15502_s18 + $0x28] sm:$0xff] }
 0x3a1   : > { %v14237_v10 = vadd.f32 %v3591_v5, %v3548_v4  ;;  %v3550_v6 = vpop.f32.mrf.mxu0  ;;  %v3722_v5 = vld [vmem:[%s15502_s18 + $0x30] sm:$0xff] }
 0x3a2   : > { %v3675_v15 = vpack.c.bf16 %v11699_v9, %v11698_v11  ;;  %v3593_v18 = vpop.f32.mrf.mxu1 }
 0x3a3   : > { %v11715_v13 = vpack.i.bf16 %v14237_v10, %v14232_v60  ;;  %v3712_v1 = vpack.c.bf16 %v14237_v10, %v14232_v60  ;;  %v14243_v7 = vadd.f32 %v3593_v18, %v3550_v6  ;;  %v11702_v14 = vpop.permute.xlu1 %11701  ;;  %v3724_v18 = vld [vmem:[%s15502_s18 + $0x40] sm:$0xff] }
 0x3a4   : > { %11519 = vmatmul.mubr.msk.bf16.vlgmr.msra.gmra.mxu1 %vm3732_vm1, %v3633_v16  ;;  %v4066_v19 = vsel %vm3732_vm1, %v3675_v15, 0  ;;  %v11704_v22 = vunpack.i.h.bf16 %v11702_v14  ;;  %v11703_v23 = vunpack.i.l.bf16 %v11702_v14 }
 0x3a5   : > { %v11720_v20 = vpack.i.bf16 %v14243_v7, %v14235_v2  ;;  %v3714_v21 = vpack.c.bf16 %v14243_v7, %v14235_v2  ;;  %11529 = vmatpush3.bf16.xpose.msra.mxu1 %v4066_v19  ;;  %11530 = vmatprep.mubr.msk.bf16.mxu1 %vm13215_vm0, %v13214_v26 }
 0x3a6   : > { %11540 = vmatprep.subr.bf16.mxu1 %v13214_v26  ;;  %v3635_v24 = vpack.c.bf16 %v11704_v22, %v11703_v23  ;;  %v3723_v23 = vld [vmem:[%s15502_s18 + $0x38] sm:$0xff] }
 0x3ac   : > { %11531 = vmatmul.mubr.msk.bf16.vlgmr.msra.gmra.mxu1 %vm3732_vm1, %v3635_v24 }
 0x3ad   : > { %v3773_v27 = vpop.f32.mrf.mxu0  ;;  %11542 = vmatprep.mubr.msk.bf16.mxu1 %vm13215_vm0, %v13214_v26 }
 0x3ae   : > { %v14260_v28 = vadd.f32 %v3773_v27, %v3716_v25 }
 0x3af   : > { %v11490_v8 = vpop.f32.mrf.mxu0 }
 0x3b0   : > { %v4110_v30 = vsel %vm4109_vm2, %v14260_v28, -inf  ;;  %v3725_v8 = vld [vmem:[%s15502_s18 + $0x48] sm:$0xff] }
 0x3b1   : > { %v3776_v32 = vpop.f32.mrf.mxu0  ;;  %4111 = vmax.xlane.f32.xlu1 %v4110_v30 }
 0x3b2   : > { %v3777_v33 = vadd.f32 %v3776_v32, %v3717_v29 }
 0x3b3   : > { %v11491_v34 = vpop.f32.mrf.mxu0 }
 0x3b4   : > { %v4113_v17 = vsel %vm4109_vm2, %v3777_v33, -inf }
 0x3b5   : > { %4114 = vmax.xlane.f32.xlu0 %v4113_v17  ;;  %v3867_v39 = vpop.f32.mrf.mxu0 }
 0x3b6   : > { %v14283_v63 = vadd.f32 %v3867_v39, %v3720_v43 }
 0x3b7   : > { %v11502_v12 = vpop.f32.mrf.mxu0 }
 0x3b8   : > { %v4122_v15 = vsel %vm4109_vm2, %v14283_v63, -inf }
 0x3b9   : > { %v3870_v40 = vpop.f32.mrf.mxu0 }
 0x3ba   : > { %v14295_v6 = vadd.f32 %v3870_v40, %v3721_v3 }
 0x3bb   : > { %v11503_v44 = vpop.f32.mrf.mxu0 }
 0x3bc   : > { %v4125_v27 = vsel %vm4109_vm2, %v14295_v6, -inf }
 0x3ed   : > { %v3961_v46 = vpop.f32.mrf.mxu0 }
 0x3ee   : > { %v14309_v24 = vadd.f32 %v3961_v46, %v3724_v18 }
 0x3ef   : > { %v11514_v52 = vpop.f32.mrf.mxu0 }
 0x3f0   : > { %v4134_v39 = vsel %vm4109_vm2, %v14309_v24, -inf }
 0x3f1   : > { %v3964_v53 = vpop.f32.mrf.mxu0 }
 0x3f2   : > { %v14320_v34 = vadd.f32 %v3964_v53, %v3725_v8 }
 0x3f3   : > { %v11515_v55 = vpop.f32.mrf.mxu0 }
 0x3f4   : > { %v4137_v12 = vsel %vm4109_vm2, %v14320_v34, -inf }
 0x3f5   : > { %v14268_v36 = vpop.f32.mrf.mxu0 }
 0x3f7   : > { %v11526_v37 = vpop.f32.mrf.mxu0 }
 0x3f8   : > { %v3726_v37 = vld [vmem:[%s15502_s18 + $0x50] sm:$0xff] }
 0x3f9   : > { %v14270_v56 = vpop.f32.mrf.mxu0 }
 0x3fb   : > { %v11527_v58 = vpop.f32.mrf.mxu0 }
 0x424   : > { %v3820_v59 = vpop.f32.mrf.mxu1 }
 0x425   : > { %v14278_v57 = vadd.f32 %v3820_v59, %v3718_v42  ;;  %v3727_v59 = vld [vmem:[%s15502_s18 + $0x58] sm:$0xff] }
 0x426   : > { %v11496_v61 = vpop.f32.mrf.mxu1 }
 0x427   : > { %v4116_v0 = vsel %vm4109_vm2, %v14278_v57, -inf }
 0x428   : > { %v3823_v4 = vpop.f32.mrf.mxu1  ;;  %4117 = vmax.xlane.f32.xlu0 %v4116_v0 }
 0x429   : > { %v14290_v9 = vadd.f32 %v3823_v4, %v3719_v62 }
 0x42a   : > { %v11497_v11 = vpop.f32.mrf.mxu1 }
 0x42b   : > { %v4119_v16 = vsel %vm4109_vm2, %v14290_v9, -inf }
 0x42c   : > { %4120 = vmax.xlane.f32.xlu1 %v4119_v16  ;;  %v3914_v14 = vpop.f32.mrf.mxu1  ;;  %4123 = vmax.xlane.f32.xlu0 %v4122_v15  ;;  %v3729_v15 = vld [vmem:[%s15502_s18 + $0x68] sm:$0xff] }
 0x42d   : > { %v14304_v19 = vadd.f32 %v3914_v14, %v3722_v5 }
 0x42e   : > { %v11508_v22 = vpop.f32.mrf.mxu1 }
 0x42f   : > { %v4128_v25 = vsel %vm4109_vm2, %v14304_v19, -inf  ;;  %v14359_v22 = vadd.f32 %v14270_v56, %v3729_v15 }
 0x430   : > { %v3917_v29 = vpop.f32.mrf.mxu1  ;;  %4129 = vmax.xlane.f32.xlu0 %v4128_v25  ;;  %4126 = vmax.xlane.f32.xlu1 %v4125_v27 }
 0x431   : > { %v14318_v30 = vadd.f32 %v3917_v29, %v3723_v23  ;;  %v4149_v8 = vsel %vm4109_vm2, %v14359_v22, -inf }
 0x432   : > { %v11509_v32 = vpop.f32.mrf.mxu1 }
 0x433   : > { %v4131_v17 = vsel %vm4109_vm2, %v14318_v30, -inf }
 0x434   : > { %4132 = vmax.xlane.f32.xlu1 %v4131_v17  ;;  %4135 = vmax.xlane.f32.xlu0 %v4134_v39 }
 0x438   : > { %4138 = vmax.xlane.f32.xlu1 %v4137_v12 }
 0x43a   : > { %v4112_v40 = vpop.xlane.xlu1 %4111 }
 0x43b   : > { %v4158_v44 = vsub.f32 %v14260_v28, %v4112_v40 }
 0x43d   : > { %v4174_v52 = vmul.f32 1.442695, %v4158_v44 }
 0x43e   : > { %v4115_v46 = vpop.xlane.xlu0 %4114 }
 0x43f   : > { %v4159_v55 = vsub.f32 %v3777_v33, %v4115_v46  ;;  %12881 = vpow2.f32 %v4174_v52  ;;  %v3728_v33 = vld [vmem:[%s15502_s18 + $0x60] sm:$0xff] }
 0x440   : > { %v14347_v4 = vadd.f32 %v14268_v36, %v3728_v33 }
 0x441   : > { %v4176_v53 = vmul.f32 1.442695, %v4159_v55 }
 0x442   : > { %v4146_v23 = vsel %vm4109_vm2, %v14347_v4, -inf }
 0x443   : > { %12883 = vpow2.f32 %v4176_v53 }
 0x44c   : > { %v14339_v61 = vpop.eup %12881 }
 0x44d   : > { %v4206_v11 = vsel %vm4109_vm2, %v14339_v61, 0.0 }
 0x450   : > { %v14353_v16 = vpop.eup %12883 }
 0x451   : > { %v4209_v36 = vsel %vm4109_vm2, %v14353_v16, 0.0 }
 0x464   : > { %v4008_v58 = vpop.f32.mrf.mxu1 }
 0x465   : > { %v14332_v42 = vadd.f32 %v4008_v58, %v3726_v37 }
 0x466   : > { %v11520_v43 = vpop.f32.mrf.mxu1 }
 0x467   : > { %v4140_v28 = vsel %vm4109_vm2, %v14332_v42, -inf }
 0x468   : > { %v4011_v62 = vpop.f32.mrf.mxu1  ;;  %4141 = vmax.xlane.f32.xlu0 %v4140_v28 }
 0x469   : > { %v14344_v0 = vadd.f32 %v4011_v62, %v3727_v59 }
 0x46a   : > { %v11521_v3 = vpop.f32.mrf.mxu1 }
 0x46b   : > { %v4143_v5 = vsel %vm4109_vm2, %v14344_v0, -inf }
 0x46c   : > { %v4102_v18 = vpop.f32.mrf.mxu1  ;;  %4207 = vadd.xlane.f32.xlu0 %v4206_v11  ;;  %4144 = vmax.xlane.f32.xlu1 %v4143_v5 }
 0x46e   : > { %v11532_v14 = vpop.f32.mrf.mxu1 }
 0x470   : > { %v4105_v25 = vpop.f32.mrf.mxu1  ;;  %4210 = vadd.xlane.f32.xlu1 %v4209_v36  ;;  %4147 = vmax.xlane.f32.xlu0 %v4146_v23 }
 0x472   : > { %v11533_v27 = vpop.f32.mrf.mxu1 }
 0x474   : > { %4150 = vmax.xlane.f32.xlu1 %v4149_v8 }
 0x4b1   : > { %v4118_v29 = vpop.xlane.xlu0 %4117 }
 0x4b2   : > { %v4160_v12 = vsub.f32 %v14278_v57, %v4118_v29  ;;  %v3730_v57 = vld [vmem:[%s15502_s18 + $0x70] sm:$0xff] }
 0x4b3   : > { %v14378_v62 = vadd.f32 %v4102_v18, %v3730_v57 }
 0x4b4   : > { %v4178_v55 = vmul.f32 1.442695, %v4160_v12 }
 0x4b5   : > { %v4121_v32 = vpop.xlane.xlu1 %4120  ;;  %v4124_v17 = vpop.xlane.xlu0 %4123 }
 0x4b6   : > { %v4162_v56 = vsub.f32 %v14283_v63, %v4124_v17  ;;  %v4161_v43 = vsub.f32 %v14290_v9, %v4121_v32 }
 0x4b8   : > { %v4182_v39 = vmul.f32 1.442695, %v4162_v56  ;;  %v4180_v28 = vmul.f32 1.442695, %v4161_v43 }
 0x4b9   : > { %v4130_v40 = vpop.xlane.xlu0 %4129  ;;  %v4127_v44 = vpop.xlane.xlu1 %4126 }
 0x4ba   : > { %v4163_v46 = vsub.f32 %v14295_v6, %v4127_v44  ;;  %12885 = vpow2.f32 %v4182_v39  ;;  %v4164_v9 = vsub.f32 %v14304_v19, %v4130_v40 }
 0x4bc   : > { %v4184_v52 = vmul.f32 1.442695, %v4163_v46  ;;  %v4186_v18 = vmul.f32 1.442695, %v4164_v9 }
 0x4bd   : > { %v4133_v53 = vpop.xlane.xlu1 %4132  ;;  %v4136_v37 = vpop.xlane.xlu0 %4135 }
 0x4be   : > { %v4166_v58 = vsub.f32 %v14309_v24, %v4136_v37  ;;  %12887 = vpow2.f32 %v4184_v52  ;;  %v3731_v24 = vld [vmem:[%s15502_s18 + $0x78] sm:$0xff]  ;;  %v4165_v14 = vsub.f32 %v14318_v30, %v4133_v53 }
 0x4bf   : > { %12889 = vpow2.f32 %v4178_v55  ;;  %v14388_v15 = vadd.f32 %v4105_v25, %v3731_v24 }
 0x4c0   : > { %v4190_v59 = vmul.f32 1.442695, %v4166_v58  ;;  %v4188_v23 = vmul.f32 1.442695, %v4165_v14 }
 0x4c1   : > { %v4139_v63 = vpop.xlane.xlu1 %4138  ;;  %v4155_v27 = vsel %vm4109_vm2, %v14388_v15, -inf }
 0x4c2   : > { %12891 = vpow2.f32 %v4190_v59  ;;  %v4167_v6 = vsub.f32 %v14320_v34, %v4139_v63  ;;  %v4152_v34 = vsel %vm4109_vm2, %v14378_v62, -inf }
 0x4c3   : > { %12893 = vpow2.f32 %v4180_v28 }
 0x4c4   : > { %v4192_v3 = vmul.f32 1.442695, %v4167_v6 }
 0x4c6   : > { %12895 = vpow2.f32 %v4192_v3 }
 0x4c7   : > { %v14376_v33 = vpop.eup %12885  ;;  %12897 = vpow2.f32 %v4186_v18 }
 0x4c8   : > { %v4218_v11 = vsel %vm4109_vm2, %v14376_v33, 0.0  ;;  %12899 = vpow2.f32 %v4188_v23 }
 0x4c9   : > { %4219 = vadd.xlane.f32.xlu0 %v4218_v11 }
 0x4cb   : > { %v14386_v5 = vpop.eup %12887 }
 0x4cc   : > { %v4221_v36 = vsel %vm4109_vm2, %v14386_v5, 0.0  ;;  %v14395_v19 = vpop.eup %12889 }
 0x4cd   : > { %4153 = vmax.xlane.f32.xlu0 %v4152_v34  ;;  %4222 = vadd.xlane.f32.xlu1 %v4221_v36  ;;  %v4212_v25 = vsel %vm4109_vm2, %v14395_v19, 0.0 }
 0x4cf   : > { %v14401_v8 = vpop.eup %12891 }
 0x4d0   : > { %v4230_v30 = vsel %vm4109_vm2, %v14401_v8, 0.0  ;;  %v14405_v29 = vpop.eup %12893 }
 0x4d1   : > { %4213 = vadd.xlane.f32.xlu0 %v4212_v25  ;;  %4156 = vmax.xlane.f32.xlu1 %v4155_v27  ;;  %v4215_v32 = vsel %vm4109_vm2, %v14405_v29, 0.0 }
 0x4d3   : > { %v14409_v17 = vpop.eup %12895 }
 0x4d4   : > { %v4233_v56 = vsel %vm4109_vm2, %v14409_v17, 0.0  ;;  %v14413_v39 = vpop.eup %12897 }
 0x4d5   : > { %4231 = vadd.xlane.f32.xlu1 %v4230_v30  ;;  %v4224_v12 = vsel %vm4109_vm2, %v14413_v39, 0.0  ;;  %v14417_v40 = vpop.eup %12899 }
 0x4d6   : > { %v4227_v44 = vsel %vm4109_vm2, %v14417_v40, 0.0 }
 0x4d9   : > { %4216 = vadd.xlane.f32.xlu1 %v4215_v32 }
 0x4dd   : > { %4234 = vadd.xlane.f32.xlu1 %v4233_v56 }
 0x4e1   : > { %4225 = vadd.xlane.f32.xlu1 %v4224_v12 }
 0x4e5   : > { %4228 = vadd.xlane.f32.xlu1 %v4227_v44 }
 0x4e7   : > { %11706 = vrot.lane.b32.xlu0 %v11705_v41, %s13216_s1 }
 0x4f1   : > { %v4142_v46 = vpop.xlane.xlu0 %4141 }
 0x4f2   : > { %v4168_v52 = vsub.f32 %v14332_v42, %v4142_v46 }
 0x4f4   : > { %v4194_v55 = vmul.f32 1.442695, %v4168_v52 }
 0x4f5   : > { %v4208_v53 = vpop.xlane.xlu0 %4207  ;;  %v4145_v37 = vpop.xlane.xlu1 %4144 }
 0x4f6   : > { %12901 = vpow2.f32 %v4194_v55  ;;  %11711 = vrot.lane.b32.xlu1 %v11710_v47, %s13216_s1  ;;  %v4169_v63 = vsub.f32 %v14344_v0, %v4145_v37 }
 0x4f7   : > { %12903 = vrcp.f32 %v4208_v53 }
 0x4f8   : > { %v4196_v6 = vmul.f32 1.442695, %v4169_v63 }
 0x4f9   : > { %v4211_v58 = vpop.xlane.xlu1 %4210  ;;  %v4148_v43 = vpop.xlane.xlu0 %4147 }
 0x4fa   : > { %v4170_v59 = vsub.f32 %v14347_v4, %v4148_v43  ;;  %12905 = vrcp.f32 %v4211_v58 }
 0x4fc   : > { %v4198_v35 = vmul.f32 1.442695, %v4170_v59 }
 0x4fd   : > { %v4151_v38 = vpop.xlane.xlu1 %4150 }
 0x4fe   : > { %12907 = vpow2.f32 %v4198_v35  ;;  %v4171_v41 = vsub.f32 %v14359_v22, %v4151_v38 }
 0x500   : > { %v4200_v42 = vmul.f32 1.442695, %v4171_v41 }
 0x502   : > { %12909 = vpow2.f32 %v4200_v42 }
 0x503   : > { %v14433_v57 = vpop.eup %12901  ;;  %12911 = vpow2.f32 %v4196_v6 }
 0x504   : > { %v4236_v47 = vsel %vm4109_vm2, %v14433_v57, 0.0  ;;  %v12904_v28 = vpop.eup %12903 }
 0x505   : > { %v4270_v4 = vmul.f32 %v12904_v28, %v14339_v61 }
 0x506   : > { %4237 = vadd.xlane.f32.xlu0 %v4236_v47 }
 0x507   : > { %v12906_v24 = vpop.eup %12905 }
 0x508   : > { %v4271_v9 = vmul.f32 %v12906_v24, %v14353_v16 }
 0x50a   : > { %v4286_v22 = vpack.c.bf16 %v4271_v9, %v4270_v4  ;;  %v12303_v9 = vld [vmem:[%s13608_s3 + $0x64] ss:$16 sps:$4 sm:$0xff]  }
 0x50b   : > { %v14439_v3 = vpop.eup %12907 }
 0x50c   : > { %v4242_v0 = vsel %vm4109_vm2, %v14439_v3, 0.0  ;;  %11537 = vmatmul.mubr.msk.bf16.vlgmr.msra.gmra.mxu0 %vm4109_vm2, %v4286_v22 }
 0x50d   : > { %4243 = vadd.xlane.f32.xlu0 %v4242_v0  ;;  %11547 = vmatpush3.bf16.msra.mxu0 %v3710_v54 }
 0x50e   : > { %11548 = vmatprep.mubr.msk.bf16.mxu0 %vm13215_vm0, %v13214_v26  ;;  %11558 = vmatprep.subr.bf16.mxu0 %v13214_v26 }
 0x50f   : > { %v14449_v61 = vpop.eup %12909 }
 0x510   : > { %v4245_v16 = vsel %vm4109_vm2, %v14449_v61, 0.0  ;;  %v14454_v11 = vpop.eup %12911 }
 0x511   : > { %4246 = vadd.xlane.f32.xlu0 %v4245_v16  ;;  %v4239_v34 = vsel %vm4109_vm2, %v14454_v11, 0.0 }
 0x51a   : > { %4240 = vadd.xlane.f32.xlu1 %v4239_v34 }
 0x527   : > { %11716 = vrot.lane.b32.xlu0 %v11715_v13, %s13216_s1 }
 0x552   : > { %v4220_v31 = vpop.xlane.xlu0 %4219 }
 0x553   : > { %12913 = vrcp.f32 %v4220_v31 }
 0x556   : > { %v4154_v45 = vpop.xlane.xlu0 %4153  ;;  %v4223_v54 = vpop.xlane.xlu1 %4222 }
 0x557   : > { %v4172_v18 = vsub.f32 %v14378_v62, %v4154_v45  ;;  %12915 = vrcp.f32 %v4223_v54 }
 0x559   : > { %v4202_v14 = vmul.f32 1.442695, %v4172_v18 }
 0x55a   : > { %v4214_v36 = vpop.xlane.xlu0 %4213  ;;  %v4157_v23 = vpop.xlane.xlu1 %4156 }
 0x55b   : > { %12917 = vpow2.f32 %v4202_v14  ;;  %v4173_v25 = vsub.f32 %v14388_v15, %v4157_v23  ;;  %v12301_v14 = vld [vmem:[%s13608_s3 + $0x60] ss:$16 sps:$4 sm:$0xff]   ;;  %v12306_v23 = vld [vmem:[%s13608_s3 + $0x44] ss:$16 sps:$4 sm:$0xff]  }
 0x55d   : > { %v4204_v27 = vmul.f32 1.442695, %v4173_v25  ;;  %v12304_v25 = vld [vmem:[%s13608_s3 + $0x40] ss:$16 sps:$4 sm:$0xff]  }
 0x55e   : > { %v11707_v30 = vpop.permute.xlu0 %11706  ;;  %v4232_v32 = vpop.xlane.xlu1 %4231 }
 0x55f   : > { %12919 = vpow2.f32 %v4204_v27  ;;  %v11709_v56 = vunpack.i.h.bf16 %v11707_v30  ;;  %v11708_v12 = vunpack.i.l.bf16 %v11707_v30  ;;  %v13217_v27 = vmov 0   ;;  %v12309_v30 = vld [vmem:[%s13608_s3 + $0x24] ss:$16 sps:$4 sm:$0xff]  }
 0x560   : > { %12921 = vrcp.f32 %v4214_v36  ;;  %v12914_v44 = vpop.eup %12913 }
 0x561   : > { %v3709_v13 = vpack.c.bf16 %v11709_v56, %v11708_v12  ;;  %v4274_v52 = vmul.f32 %v12914_v44, %v14376_v33 }
 0x562   : > { %v4217_v46 = vpop.xlane.xlu1 %4216 }
 0x563   : > { %12923 = vrcp.f32 %v4217_v46  ;;  %11541 = vmatpush3.bf16.msra.mxu1 %v3709_v13  ;;  %v12312_v13 = vld [vmem:[%s13608_s3 + $0x4] ss:$16 sps:$4 sm:$0xff]   ;;  %v12310_v46 = vld [vmem:[%s13608_s3] ss:$16 sps:$4 sm:$0xff]  }
 0x564   : > { %v12916_v62 = vpop.eup %12915  ;;  %11552 = vmatprep.subr.bf16.mxu1 %v13214_v26  ;;  %12925 = vrcp.f32 %v4232_v32 }
 0x565   : > { %v4275_v15 = vmul.f32 %v12916_v62, %v14386_v5  ;;  %v12327_v62 = vld [vmem:[%s13608_s3 + $0xe4] ss:$16 sps:$4 sm:$0xff]  }
 0x566   : > { %v4235_v55 = vpop.xlane.xlu1 %4234 }
 0x567   : > { %12927 = vrcp.f32 %v4235_v55  ;;  %v4288_v53 = vpack.c.bf16 %v4275_v15, %v4274_v52  ;;  %v12325_v15 = vld [vmem:[%s13608_s3 + $0xe0] ss:$16 sps:$4 sm:$0xff]  }
 0x568   : > { %v14467_v37 = vpop.eup %12917 }
 0x569   : > { %11549 = vmatmul.mubr.msk.bf16.vlgmr.msra.gmra.mxu0 %vm4109_vm2, %v4288_v53  ;;  %v4248_v58 = vsel %vm4109_vm2, %v14467_v37, 0.0  ;;  %v12333_v53 = vld [vmem:[%s13608_s3 + $0xc4] ss:$16 sps:$4 sm:$0xff]  }
 0x56a   : > { %11559 = vmatpush3.bf16.msra.mxu0 %v3712_v1  ;;  %4249 = vadd.xlane.f32.xlu1 %v4248_v58  ;;  %v4226_v43 = vpop.xlane.xlu1 %4225 }
 0x56b   : > { %11560 = vmatprep.mubr.msk.bf16.mxu0 %vm13215_vm0, %v13214_v26  ;;  %11570 = vmatprep.subr.bf16.mxu0 %v13214_v26  ;;  %12929 = vrcp.f32 %v4226_v43  ;;  %v12331_v43 = vld [vmem:[%s13608_s3 + $0xc0] ss:$16 sps:$4 sm:$0xff]  }
 0x56c   : > { %v14478_v33 = vpop.eup %12919 }
 0x56d   : > { %v4251_v5 = vsel %vm4109_vm2, %v14478_v33, 0.0  ;;  %v12922_v59 = vpop.eup %12921 }
 0x56e   : > { %4252 = vadd.xlane.f32.xlu1 %v4251_v5  ;;  %v4229_v35 = vpop.xlane.xlu1 %4228  ;;  %v4272_v60 = vmul.f32 %v12922_v59, %v14395_v19  ;;  %v12337_v5 = vld [vmem:[%s13608_s3 + $0xa0] ss:$16 sps:$4 sm:$0xff]   ;;  %v12345_v59 = vld [vmem:[%s13608_s3 + $0x84] ss:$16 sps:$4 sm:$0xff]  }
 0x56f   : > { %12931 = vrcp.f32 %v4229_v35  ;;  %v12343_v35 = vld [vmem:[%s13608_s3 + $0x80] ss:$16 sps:$4 sm:$0xff]  }
 0x570   : > { %v12924_v38 = vpop.eup %12923 }
 0x571   : > { %v4273_v10 = vmul.f32 %v12924_v38, %v14405_v29  ;;  %v12926_v1 = vpop.eup %12925  ;;  %v12351_v38 = vld [vmem:[%s13608_s3 + $0x164] ss:$16 sps:$4 sm:$0xff]  }
 0x572   : > { %v11712_v41 = vpop.permute.xlu1 %11711  ;;  %v4278_v24 = vmul.f32 %v12926_v1, %v14401_v8 }
 0x573   : > { %v11714_v42 = vunpack.i.h.bf16 %v11712_v41  ;;  %v11713_v63 = vunpack.i.l.bf16 %v11712_v41  ;;  %v4287_v47 = vpack.c.bf16 %v4273_v10, %v4272_v60 }
 0x574   : > { %v12928_v28 = vpop.eup %12927 }
 0x575   : > { %v3711_v6 = vpack.c.bf16 %v11714_v42, %v11713_v63  ;;  %11543 = vmatmul.mubr.msk.bf16.vlgmr.msra.gmra.mxu1 %vm4109_vm2, %v4287_v47  ;;  %v4279_v4 = vmul.f32 %v12928_v28, %v14409_v17  ;;  %v12315_v63 = vld [vmem:[%s13608_s3 + $0x6c] ss:$16 sps:$4 sm:$0xff]  }
 0x576   : > { %11554 = vmatprep.mubr.msk.bf16.mxu1 %vm13215_vm0, %v13214_v26 }
 0x577   : > { %11553 = vmatpush3.bf16.msra.mxu1 %v3711_v6  ;;  %v4290_v19 = vpack.c.bf16 %v4279_v4, %v4278_v24 }
 0x578   : > { %11564 = vmatprep.subr.bf16.mxu1 %v13214_v26  ;;  %v12930_v29 = vpop.eup %12929 }
 0x579   : > { %11561 = vmatmul.mubr.msk.bf16.vlgmr.msra.gmra.mxu0 %vm4109_vm2, %v4290_v19  ;;  %v4276_v17 = vmul.f32 %v12930_v29, %v14413_v39  ;;  %v12313_v19 = vld [vmem:[%s13608_s3 + $0x68] ss:$16 sps:$4 sm:$0xff]   ;;  %v12318_v29 = vld [vmem:[%s13608_s3 + $0x4c] ss:$16 sps:$4 sm:$0xff]  }
 0x57a   : > { %11571 = vmatpush3.bf16.msra.mxu0 %v3714_v21  ;;  %11572 = vmatprep.mubr.msk.bf16.mxu0 %vm13215_vm0, %v13214_v26 }
 0x57b   : > { %4873 = vmatprep.subr.bf16.mxu0 %v12303_v9 }
 0x57c   : > { %v12932_v8 = vpop.eup %12931 }
 0x57d   : > { %v4277_v22 = vmul.f32 %v12932_v8, %v14417_v40  ;;  %v12316_v8 = vld [vmem:[%s13608_s3 + $0x48] ss:$16 sps:$4 sm:$0xff]  }
 0x57f   : > { %11721 = vrot.lane.b32.xlu1 %v11720_v20, %s13216_s1  ;;  %v4289_v0 = vpack.c.bf16 %v4277_v22, %v4276_v17  ;;  %v12321_v17 = vld [vmem:[%s13608_s3 + $0x2c] ss:$16 sps:$4 sm:$0xff]   ;;  %v12322_v22 = vld [vmem:[%s13608_s3 + $0x8] ss:$16 sps:$4 sm:$0xff]  }
 0x581   : > { %11555 = vmatmul.mubr.msk.bf16.vlgmr.msra.gmra.mxu1 %vm4109_vm2, %v4289_v0  ;;  %v12330_v0 = vld [vmem:[%s13608_s3 + $0xec] ss:$16 sps:$4 sm:$0xff]  }
 0x582   : > { %11566 = vmatprep.mubr.msk.bf16.mxu1 %vm13215_vm0, %v13214_v26 }
 0x58f   : > { %v4238_v21 = vpop.xlane.xlu0 %4237 }
 0x596   : > { %v4244_v16 = vpop.xlane.xlu0 %4243 }
 0x597   : > { %12933 = vrcp.f32 %v4244_v16  ;;  %v12336_v16 = vld [vmem:[%s13608_s3 + $0xcc] ss:$16 sps:$4 sm:$0xff]  }
 0x59a   : > { %v4247_v34 = vpop.xlane.xlu0 %4246 }
 0x59b   : > { %12935 = vrcp.f32 %v4247_v34  ;;  %v12334_v34 = vld [vmem:[%s13608_s3 + $0xc8] ss:$16 sps:$4 sm:$0xff]  }
 0x59c   : > { %12937 = vrcp.f32 %v4238_v21  ;;  %v12328_v21 = vld [vmem:[%s13608_s3 + $0xe8] ss:$16 sps:$4 sm:$0xff]  }
 0x59e   : > { %v11717_v39 = vpop.permute.xlu0 %11716 }
 0x59f   : > { %v11719_v40 = vunpack.i.h.bf16 %v11717_v39  ;;  %v11718_v31 = vunpack.i.l.bf16 %v11717_v39  ;;  %v12342_v39 = vld [vmem:[%s13608_s3 + $0xac] ss:$16 sps:$4 sm:$0xff]  }
 0x5a1   : > { %v3713_v45 = vpack.c.bf16 %v11719_v40, %v11718_v31  ;;  %v12340_v40 = vld [vmem:[%s13608_s3 + $0xa8] ss:$16 sps:$4 sm:$0xff]   ;;  %v12348_v31 = vld [vmem:[%s13608_s3 + $0x8c] ss:$16 sps:$4 sm:$0xff]  }
 0x5a3   : > { %11565 = vmatpush3.bf16.msra.mxu1 %v3713_v45  ;;  %v4241_v2 = vpop.xlane.xlu1 %4240  ;;  %v12346_v45 = vld [vmem:[%s13608_s3 + $0x88] ss:$16 sps:$4 sm:$0xff]  }
 0x5a4   : > { %11576 = vmatprep.subr.bf16.mxu1 %v13214_v26  ;;  %12939 = vrcp.f32 %v4241_v2  ;;  %v12934_v7 = vpop.eup %12933  ;;  %v12354_v2 = vld [vmem:[%s13608_s3 + $0x16c] ss:$16 sps:$4 sm:$0xff]  }
 0x5a5   : > { %v4282_v54 = vmul.f32 %v12934_v7, %v14439_v3  ;;  %v12307_v3 = vld [vmem:[%s13608_s3 + $0x20] ss:$16 sps:$4 sm:$0xff]  }
 0x5a8   : > { %v12936_v20 = vpop.eup %12935 }
 0x5a9   : > { %v4283_v18 = vmul.f32 %v12936_v20, %v14449_v61  ;;  %v12938_v32 = vpop.eup %12937 }
 0x5aa   : > { %v4280_v61 = vmul.f32 %v12938_v32, %v14433_v57  ;;  %v12352_v32 = vld [vmem:[%s13608_s3 + $0x168] ss:$16 sps:$4 sm:$0xff]  }
 0x5ab   : > { %v4292_v36 = vpack.c.bf16 %v4283_v18, %v4282_v54 }
 0x5ad   : > { %11573 = vmatmul.mubr.msk.bf16.vlgmr.msra.gmra.mxu0 %vm4109_vm2, %v4292_v36 }
 0x5ae   : > { %4874 = vmatpush1.bf16.msra.mxu0 %v12301_v14  ;;  %4897 = vmatprep.mubr.bf16.mxu0 %v13217_v27 }
 0x5af   : > { %4875 = vmatprep.subr.bf16.mxu0 %v12306_v23 }
 0x5b1   : > { %v12940_v56 = vpop.eup %12939 }
 0x5b2   : > { %4876 = vmatpush1.bf16.msra.mxu0 %v12304_v25  ;;  %v4281_v12 = vmul.f32 %v12940_v56, %v14454_v11 }
 0x5b3   : > { %4877 = vmatprep.subr.bf16.mxu0 %v12309_v30  ;;  %v12349_v30 = vld [vmem:[%s13608_s3 + $0x160] ss:$16 sps:$4 sm:$0xff]  }
 0x5b4   : > { %v4291_v44 = vpack.c.bf16 %v4281_v12, %v4280_v61  ;;  %v12360_v61 = vld [vmem:[%s13608_s3 + $0x14c] ss:$16 sps:$4 sm:$0xff]  }
 0x5b6   : > { %4878 = vmatpush1.bf16.msra.mxu0 %v12307_v3  ;;  %11567 = vmatmul.mubr.msk.bf16.vlgmr.msra.gmra.mxu1 %vm4109_vm2, %v4291_v44  ;;  %v12357_v3 = vld [vmem:[%s13608_s3 + $0x144] ss:$16 sps:$4 sm:$0xff]  }
 0x5b7   : > { %4879 = vmatprep.subr.bf16.mxu0 %v12312_v13  ;;  %11578 = vmatprep.mubr.msk.bf16.mxu1 %vm13215_vm0, %v13214_v26  ;;  %v12339_v26 = vld [vmem:[%s13608_s3 + $0xa4] ss:$16 sps:$4 sm:$0xff]  }
 0x5ba   : > { %4880 = vmatpush1.bf16.msra.mxu0 %v12310_v46  ;;  %v12355_v46 = vld [vmem:[%s13608_s3 + $0x140] ss:$16 sps:$4 sm:$0xff]  }
 0x5bb   : > { %5042 = vmatprep.subr.bf16.mxu0 %v12327_v62  ;;  %v12358_v62 = vld [vmem:[%s13608_s3 + $0x148] ss:$16 sps:$4 sm:$0xff]  }
 0x5cc   : > { %v4331_v57 = vpop.f32.mrf.mxu0 }
 0x5ce   : > { %v11538_v11 = vpop.f32.mrf.mxu0 }
 0x5cf   : > { %v12366_v11 = vld [vmem:[%s13608_s3 + $0x12c] ss:$16 sps:$4 sm:$0xff]  }
 0x5d0   : > { %v4334_v52 = vpop.f32.mrf.mxu0 }
 0x5d1   : > { %v4646_v55 = vpack.c.bf16 %v4334_v52, %v4331_v57  ;;  %v12363_v57 = vld [vmem:[%s13608_s3 + $0x124] ss:$16 sps:$4 sm:$0xff]  }
 0x5d2   : > { %v11539_v58 = vpop.f32.mrf.mxu0 }
 0x5d3   : > { %10804 = vmatmul.mubr.msk.bf16.vlgmr.msra.gmra.mxu0 %vm3732_vm1, %v4646_v55  ;;  %v12369_v58 = vld [vmem:[%s13608_s3 + $0x104] ss:$16 sps:$4 sm:$0xff]  }
 0x5d4   : > { %5043 = vmatpush1.bf16.msra.mxu0 %v12325_v15  ;;  %5066 = vmatprep.mubr.bf16.mxu0 %v13217_v27 }
 0x5d5   : > { %5044 = vmatprep.subr.bf16.mxu0 %v12333_v53  ;;  %v12364_v53 = vld [vmem:[%s13608_s3 + $0x128] ss:$16 sps:$4 sm:$0xff]  }
 0x5d8   : > { %5045 = vmatpush1.bf16.msra.mxu0 %v12331_v43  ;;  %v12372_v43 = vld [vmem:[%s13608_s3 + $0x10c] ss:$16 sps:$4 sm:$0xff]  }
 0x5d9   : > { %5046 = vmatprep.subr.bf16.mxu0 %v12339_v26 }
 0x5dc   : > { %5047 = vmatpush1.bf16.msra.mxu0 %v12337_v5 }
 0x5dd   : > { %5048 = vmatprep.subr.bf16.mxu0 %v12345_v59  ;;  %v12367_v59 = vld [vmem:[%s13608_s3 + $0x100] ss:$16 sps:$4 sm:$0xff]  }
 0x5e0   : > { %5049 = vmatpush1.bf16.msra.mxu0 %v12343_v35  ;;  %v12370_v35 = vld [vmem:[%s13608_s3 + $0x108] ss:$16 sps:$4 sm:$0xff]  }
 0x5e1   : > { %5211 = vmatprep.subr.bf16.mxu0 %v12351_v38  ;;  %v12375_v38 = vld [vmem:[%s13608_s3 + $0x1e4] ss:$16 sps:$4 sm:$0xff]  }
 0x5f3   : > { %v4250_v60 = vpop.xlane.xlu1 %4249 }
 0x5f4   : > { %12941 = vrcp.f32 %v4250_v60  ;;  %v12378_v60 = vld [vmem:[%s13608_s3 + $0x1ec] ss:$16 sps:$4 sm:$0xff]  }
 0x5f7   : > { %v4253_v10 = vpop.xlane.xlu1 %4252 }
 0x5f8   : > { %12943 = vrcp.f32 %v4253_v10 }
 0x5fb   : > { %v11722_v1 = vpop.permute.xlu1 %11721 }
 0x5fc   : > { %v11724_v41 = vunpack.i.h.bf16 %v11722_v1  ;;  %v11723_v42 = vunpack.i.l.bf16 %v11722_v1  ;;  %v12373_v1 = vld [vmem:[%s13608_s3 + $0x1e0] ss:$16 sps:$4 sm:$0xff]  }
 0x5fe   : > { %v3715_v47 = vpack.c.bf16 %v11724_v41, %v11723_v42  ;;  %v12376_v41 = vld [vmem:[%s13608_s3 + $0x1e8] ss:$16 sps:$4 sm:$0xff]  }
 0x600   : > { %11577 = vmatpush3.bf16.msra.mxu1 %v3715_v47  ;;  %v12384_v47 = vld [vmem:[%s13608_s3 + $0x1cc] ss:$16 sps:$4 sm:$0xff]  }
 0x601   : > { %4916 = vmatprep.subr.bf16.mxu1 %v12315_v63  ;;  %v12942_v28 = vpop.eup %12941  ;;  %v12381_v63 = vld [vmem:[%s13608_s3 + $0x1c4] ss:$16 sps:$4 sm:$0xff]  }
 0x602   : > { %v4284_v24 = vmul.f32 %v12942_v28, %v14467_v37  ;;  %v12319_v37 = vld [vmem:[%s13608_s3 + $0x28] ss:$16 sps:$4 sm:$0xff]   ;;  %v12379_v28 = vld [vmem:[%s13608_s3 + $0x1c0] ss:$16 sps:$4 sm:$0xff]  }
 0x605   : > { %v12944_v6 = vpop.eup %12943 }
 0x606   : > { %v4285_v4 = vmul.f32 %v12944_v6, %v14478_v33  ;;  %v12324_v33 = vld [vmem:[%s13608_s3 + $0xc] ss:$16 sps:$4 sm:$0xff]   ;;  %v12382_v6 = vld [vmem:[%s13608_s3 + $0x1c8] ss:$16 sps:$4 sm:$0xff]  }
 0x608   : > { %v4293_v9 = vpack.c.bf16 %v4285_v4, %v4284_v24  ;;  %v12387_v24 = vld [vmem:[%s13608_s3 + $0x1a4] ss:$16 sps:$4 sm:$0xff]   ;;  %v12390_v4 = vld [vmem:[%s13608_s3 + $0x1ac] ss:$16 sps:$4 sm:$0xff]  }
 0x60a   : > { %11579 = vmatmul.mubr.msk.bf16.vlgmr.msra.gmra.mxu1 %vm4109_vm2, %v4293_v9  ;;  %v12388_v9 = vld [vmem:[%s13608_s3 + $0x1a8] ss:$16 sps:$4 sm:$0xff]  }
 0x60b   : > { %4917 = vmatpush1.bf16.msra.mxu1 %v12313_v19  ;;  %4940 = vmatprep.mubr.bf16.mxu1 %v13217_v27  ;;  %v12385_v19 = vld [vmem:[%s13608_s3 + $0x1a0] ss:$16 sps:$4 sm:$0xff]  }
 0x60c   : > { %4918 = vmatprep.subr.bf16.mxu1 %v12318_v29  ;;  %v12393_v29 = vld [vmem:[%s13608_s3 + $0x184] ss:$16 sps:$4 sm:$0xff]  }
 0x60f   : > { %4919 = vmatpush1.bf16.msra.mxu1 %v12316_v8  ;;  %v12396_v8 = vld [vmem:[%s13608_s3 + $0x18c] ss:$16 sps:$4 sm:$0xff]  }
 0x610   : > { %4920 = vmatprep.subr.bf16.mxu1 %v12321_v17  ;;  %v12391_v17 = vld [vmem:[%s13608_s3 + $0x180] ss:$16 sps:$4 sm:$0xff]  }
 0x613   : > { %4921 = vmatpush1.bf16.msra.mxu1 %v12319_v37  ;;  %v12394_v37 = vld [vmem:[%s13608_s3 + $0x188] ss:$16 sps:$4 sm:$0xff]  }
 0x614   : > { %4922 = vmatprep.subr.bf16.mxu1 %v12324_v33  ;;  %v12399_v33 = vld [vmem:[%s13608_s3 + $0x264] ss:$16 sps:$4 sm:$0xff]  }
 0x617   : > { %4923 = vmatpush1.bf16.msra.mxu1 %v12322_v22  ;;  %v12402_v22 = vld [vmem:[%s13608_s3 + $0x26c] ss:$16 sps:$4 sm:$0xff]  }
 0x618   : > { %5085 = vmatprep.subr.bf16.mxu1 %v12330_v0  ;;  %v12397_v0 = vld [vmem:[%s13608_s3 + $0x260] ss:$16 sps:$4 sm:$0xff]  }
 0x61a   : > { %10805 = vmatmul.mubr.msk.bf16.vlgmr.msra.gmra.mxu1 %vm3732_vm1, %v4646_v55  ;;  %v12361_v55 = vld [vmem:[%s13608_s3 + $0x120] ss:$16 sps:$4 sm:$0xff]  }
 0x61b   : > { %5086 = vmatpush1.bf16.msra.mxu1 %v12328_v21  ;;  %5109 = vmatprep.mubr.bf16.mxu1 %v13217_v27  ;;  %v12400_v21 = vld [vmem:[%s13608_s3 + $0x268] ss:$16 sps:$4 sm:$0xff]  }
 0x61c   : > { %5087 = vmatprep.subr.bf16.mxu1 %v12336_v16 }
 0x61f   : > { %5088 = vmatpush1.bf16.msra.mxu1 %v12334_v34  ;;  %v12405_v34 = vld [vmem:[%s13608_s3 + $0x244] ss:$16 sps:$4 sm:$0xff]  }
 0x620   : > { %5089 = vmatprep.subr.bf16.mxu1 %v12342_v39  ;;  %v12408_v39 = vld [vmem:[%s13608_s3 + $0x24c] ss:$16 sps:$4 sm:$0xff]  }
 0x623   : > { %5090 = vmatpush1.bf16.msra.mxu1 %v12340_v40  ;;  %v12403_v40 = vld [vmem:[%s13608_s3 + $0x240] ss:$16 sps:$4 sm:$0xff]  }
 0x624   : > { %5091 = vmatprep.subr.bf16.mxu1 %v12348_v31  ;;  %v12406_v31 = vld [vmem:[%s13608_s3 + $0x248] ss:$16 sps:$4 sm:$0xff]  }
 0x627   : > { %5092 = vmatpush1.bf16.msra.mxu1 %v12346_v45  ;;  %v12411_v45 = vld [vmem:[%s13608_s3 + $0x224] ss:$16 sps:$4 sm:$0xff]  }
 0x628   : > { %5254 = vmatprep.subr.bf16.mxu1 %v12354_v2  ;;  %v12414_v2 = vld [vmem:[%s13608_s3 + $0x22c] ss:$16 sps:$4 sm:$0xff]  }
 0x629   : > { %v4419_v7 = vpop.f32.mrf.mxu0 }
 0x62b   : > { %v11550_v20 = vpop.f32.mrf.mxu0 }
 0x62c   : > { %v12412_v20 = vld [vmem:[%s13608_s3 + $0x228] ss:$16 sps:$4 sm:$0xff]  }
 0x62d   : > { %v4422_v54 = vpop.f32.mrf.mxu0 }
 0x62e   : > { %v4648_v42 = vpack.c.bf16 %v4422_v54, %v4419_v7  ;;  %v12409_v7 = vld [vmem:[%s13608_s3 + $0x220] ss:$16 sps:$4 sm:$0xff]   ;;  %v12417_v54 = vld [vmem:[%s13608_s3 + $0x204] ss:$16 sps:$4 sm:$0xff]  }
 0x62f   : > { %v11551_v18 = vpop.f32.mrf.mxu0 }
 0x630   : > { %v12420_v18 = vld [vmem:[%s13608_s3 + $0x20c] ss:$16 sps:$4 sm:$0xff]  }
 0x635   : > { %v4375_v14 = vpop.f32.mrf.mxu1 }
 0x637   : > { %v11544_v36 = vpop.f32.mrf.mxu1 }
 0x638   : > { %v12418_v36 = vld [vmem:[%s13608_s3 + $0x208] ss:$16 sps:$4 sm:$0xff]  }
 0x639   : > { %v4378_v23 = vpop.f32.mrf.mxu1  ;;  %v14557_v25 = vpop.f32.mrf.mxu0 }
 0x63a   : > { %v4647_v56 = vpack.c.bf16 %v4378_v23, %v4375_v14  ;;  %v12415_v14 = vld [vmem:[%s13608_s3 + $0x200] ss:$16 sps:$4 sm:$0xff]   ;;  %v12423_v23 = vld [vmem:[%s13608_s3 + $0x2e4] ss:$16 sps:$4 sm:$0xff]  }
 0x63b   : > { %v11545_v12 = vpop.f32.mrf.mxu1  ;;  %v11562_v13 = vpop.f32.mrf.mxu0 }
 0x63c   : > { %10822 = vmatmul.mubr.msk.bf16.vlgmr.msra.gmra.mxu0 %vm3732_vm1, %v4647_v56  ;;  %10823 = vmatmul.mubr.msk.bf16.vlgmr.msra.gmra.mxu1 %vm3732_vm1, %v4647_v56  ;;  %v12424_v56 = vld [vmem:[%s13608_s3 + $0x2e8] ss:$16 sps:$4 sm:$0xff]   ;;  %v12432_v12 = vld [vmem:[%s13608_s3 + $0x2cc] ss:$16 sps:$4 sm:$0xff]  }
 0x63d   : > { %5212 = vmatpush1.bf16.msra.mxu0 %v12349_v30  ;;  %5255 = vmatpush1.bf16.msra.mxu1 %v12352_v32  ;;  %v14565_v44 = vpop.f32.mrf.mxu0  ;;  %v12426_v30 = vld [vmem:[%s13608_s3 + $0x2ec] ss:$16 sps:$4 sm:$0xff]   ;;  %v12421_v32 = vld [vmem:[%s13608_s3 + $0x2e0] ss:$16 sps:$4 sm:$0xff]  }
 0x63e   : > { %5213 = vmatprep.subr.bf16.mxu0 %v12357_v3  ;;  %5256 = vmatprep.subr.bf16.mxu1 %v12360_v61  ;;  %v4650_v3 = vpack.c.bf16 %v14565_v44, %v14557_v25  ;;  %v12429_v61 = vld [vmem:[%s13608_s3 + $0x2c4] ss:$16 sps:$4 sm:$0xff]   ;;  %v12438_v44 = vld [vmem:[%s13608_s3 + $0x2ac] ss:$16 sps:$4 sm:$0xff]  }
 0x63f   : > { %v11563_v52 = vpop.f32.mrf.mxu0  ;;  %5235 = vmatprep.mubr.bf16.mxu0 %v13217_v27  ;;  %5278 = vmatprep.mubr.bf16.mxu1 %v13217_v27  ;;  %v12435_v25 = vld [vmem:[%s13608_s3 + $0x2a4] ss:$16 sps:$4 sm:$0xff]  }
 0x640   : > { %v12433_v52 = vld [vmem:[%s13608_s3 + $0x2a0] ss:$16 sps:$4 sm:$0xff]  }
 0x641   : > { %5214 = vmatpush1.bf16.msra.mxu0 %v12355_v46  ;;  %5257 = vmatpush1.bf16.msra.mxu1 %v12358_v62  ;;  %v4463_v15 = vpop.f32.mrf.mxu1  ;;  %v12427_v46 = vld [vmem:[%s13608_s3 + $0x2c0] ss:$16 sps:$4 sm:$0xff]   ;;  %v12430_v62 = vld [vmem:[%s13608_s3 + $0x2c8] ss:$16 sps:$4 sm:$0xff]  }
 0x642   : > { %5215 = vmatprep.subr.bf16.mxu0 %v12363_v57  ;;  %5258 = vmatprep.subr.bf16.mxu1 %v12366_v11 }
 0x643   : > { %v11556_v26 = vpop.f32.mrf.mxu1 }
 0x644   : > { %v12442_v26 = vld [vmem:[%s13608_s3 + $0x288] ss:$16 sps:$4 sm:$0xff]  }
 0x645   : > { %5216 = vmatpush1.bf16.msra.mxu0 %v12361_v55  ;;  %5259 = vmatpush1.bf16.msra.mxu1 %v12364_v53  ;;  %v4466_v5 = vpop.f32.mrf.mxu1  ;;  %v12441_v53 = vld [vmem:[%s13608_s3 + $0x284] ss:$16 sps:$4 sm:$0xff]  }
 0x646   : > { %5217 = vmatprep.subr.bf16.mxu0 %v12369_v58  ;;  %5260 = vmatprep.subr.bf16.mxu1 %v12372_v43  ;;  %v4649_v16 = vpack.c.bf16 %v4466_v5, %v4463_v15  ;;  %v12436_v15 = vld [vmem:[%s13608_s3 + $0x2a8] ss:$16 sps:$4 sm:$0xff]   ;;  %v12444_v58 = vld [vmem:[%s13608_s3 + $0x28c] ss:$16 sps:$4 sm:$0xff]   ;;  %v12439_v43 = vld [vmem:[%s13608_s3 + $0x280] ss:$16 sps:$4 sm:$0xff]  }
 0x647   : > { %v11557_v10 = vpop.f32.mrf.mxu1 }
 0x648   : > { %v12445_v10 = vld [vmem:[%s13608_s3 + $0x360] ss:$16 sps:$4 sm:$0xff]  }
 0x649   : > { %5218 = vmatpush1.bf16.msra.mxu0 %v12367_v59  ;;  %5261 = vmatpush1.bf16.msra.mxu1 %v12370_v35  ;;  %v12447_v59 = vld [vmem:[%s13608_s3 + $0x364] ss:$16 sps:$4 sm:$0xff]   ;;  %v12450_v35 = vld [vmem:[%s13608_s3 + $0x36c] ss:$16 sps:$4 sm:$0xff]  }
 0x64a   : > { %5380 = vmatprep.subr.bf16.mxu0 %v12375_v38  ;;  %5423 = vmatprep.subr.bf16.mxu1 %v12378_v60 }
 0x64c   : > { %10840 = vmatmul.mubr.msk.bf16.vlgmr.msra.gmra.mxu0 %vm3732_vm1, %v4648_v42  ;;  %10841 = vmatmul.mubr.msk.bf16.vlgmr.msra.gmra.mxu1 %vm3732_vm1, %v4648_v42  ;;  %v12453_v42 = vld [vmem:[%s13608_s3 + $0x344] ss:$16 sps:$4 sm:$0xff]  }
 0x64d   : > { %5381 = vmatpush1.bf16.msra.mxu0 %v12373_v1  ;;  %5424 = vmatpush1.bf16.msra.mxu1 %v12376_v41  ;;  %v12448_v1 = vld [vmem:[%s13608_s3 + $0x368] ss:$16 sps:$4 sm:$0xff]  }
 0x64e   : > { %5382 = vmatprep.subr.bf16.mxu0 %v12381_v63  ;;  %5425 = vmatprep.subr.bf16.mxu1 %v12384_v47  ;;  %v12456_v63 = vld [vmem:[%s13608_s3 + $0x34c] ss:$16 sps:$4 sm:$0xff]  }
 0x64f   : > { %5404 = vmatprep.mubr.bf16.mxu0 %v13217_v27  ;;  %5447 = vmatprep.mubr.bf16.mxu1 %v13217_v27 }
 0x651   : > { %5383 = vmatpush1.bf16.msra.mxu0 %v12379_v28  ;;  %5426 = vmatpush1.bf16.msra.mxu1 %v12382_v6  ;;  %v12451_v28 = vld [vmem:[%s13608_s3 + $0x340] ss:$16 sps:$4 sm:$0xff]   ;;  %v12454_v6 = vld [vmem:[%s13608_s3 + $0x348] ss:$16 sps:$4 sm:$0xff]  }
 0x652   : > { %5384 = vmatprep.subr.bf16.mxu0 %v12387_v24  ;;  %5427 = vmatprep.subr.bf16.mxu1 %v12390_v4  ;;  %v12459_v24 = vld [vmem:[%s13608_s3 + $0x324] ss:$16 sps:$4 sm:$0xff]   ;;  %v12462_v4 = vld [vmem:[%s13608_s3 + $0x32c] ss:$16 sps:$4 sm:$0xff]  }
 0x655   : > { %5385 = vmatpush1.bf16.msra.mxu0 %v12385_v19  ;;  %5428 = vmatpush1.bf16.msra.mxu1 %v12388_v9  ;;  %v12457_v19 = vld [vmem:[%s13608_s3 + $0x320] ss:$16 sps:$4 sm:$0xff]   ;;  %v12460_v9 = vld [vmem:[%s13608_s3 + $0x328] ss:$16 sps:$4 sm:$0xff]  }
 0x656   : > { %5386 = vmatprep.subr.bf16.mxu0 %v12393_v29  ;;  %5429 = vmatprep.subr.bf16.mxu1 %v12396_v8  ;;  %v12465_v29 = vld [vmem:[%s13608_s3 + $0x304] ss:$16 sps:$4 sm:$0xff]   ;;  %v12468_v8 = vld [vmem:[%s13608_s3 + $0x30c] ss:$16 sps:$4 sm:$0xff]  }
 0x659   : > { %5387 = vmatpush1.bf16.msra.mxu0 %v12391_v17  ;;  %5430 = vmatpush1.bf16.msra.mxu1 %v12394_v37  ;;  %v12463_v17 = vld [vmem:[%s13608_s3 + $0x300] ss:$16 sps:$4 sm:$0xff]   ;;  %v12466_v37 = vld [vmem:[%s13608_s3 + $0x308] ss:$16 sps:$4 sm:$0xff]  }
 0x65a   : > { %5549 = vmatprep.subr.bf16.mxu0 %v12399_v33  ;;  %5592 = vmatprep.subr.bf16.mxu1 %v12402_v22  ;;  %v12471_v33 = vld [vmem:[%s13608_s3 + $0x3e4] ss:$16 sps:$4 sm:$0xff]   ;;  %v12474_v22 = vld [vmem:[%s13608_s3 + $0x3ec] ss:$16 sps:$4 sm:$0xff]  }
 0x65c   : > { %10858 = vmatmul.mubr.msk.bf16.vlgmr.msra.gmra.mxu0 %vm3732_vm1, %v4649_v16  ;;  %10859 = vmatmul.mubr.msk.bf16.vlgmr.msra.gmra.mxu1 %vm3732_vm1, %v4649_v16 }
 0x65d   : > { %5550 = vmatpush1.bf16.msra.mxu0 %v12397_v0  ;;  %5593 = vmatpush1.bf16.msra.mxu1 %v12400_v21  ;;  %v12469_v0 = vld [vmem:[%s13608_s3 + $0x3e0] ss:$16 sps:$4 sm:$0xff]   ;;  %v12472_v21 = vld [vmem:[%s13608_s3 + $0x3e8] ss:$16 sps:$4 sm:$0xff]  }
 0x65e   : > { %5551 = vmatprep.subr.bf16.mxu0 %v12405_v34  ;;  %5594 = vmatprep.subr.bf16.mxu1 %v12408_v39  ;;  %v12477_v34 = vld [vmem:[%s13608_s3 + $0x3c4] ss:$16 sps:$4 sm:$0xff]   ;;  %v12480_v39 = vld [vmem:[%s13608_s3 + $0x3cc] ss:$16 sps:$4 sm:$0xff]  }
 0x65f   : > { %5573 = vmatprep.mubr.bf16.mxu0 %v13217_v27  ;;  %5616 = vmatprep.mubr.bf16.mxu1 %v13217_v27 }
 0x661   : > { %5552 = vmatpush1.bf16.msra.mxu0 %v12403_v40  ;;  %5595 = vmatpush1.bf16.msra.mxu1 %v12406_v31  ;;  %v12475_v40 = vld [vmem:[%s13608_s3 + $0x3c0] ss:$16 sps:$4 sm:$0xff]   ;;  %v12478_v31 = vld [vmem:[%s13608_s3 + $0x3c8] ss:$16 sps:$4 sm:$0xff]  }
 0x662   : > { %5553 = vmatprep.subr.bf16.mxu0 %v12411_v45  ;;  %5596 = vmatprep.subr.bf16.mxu1 %v12414_v2  ;;  %v12483_v45 = vld [vmem:[%s13608_s3 + $0x3a4] ss:$16 sps:$4 sm:$0xff]   ;;  %v12486_v2 = vld [vmem:[%s13608_s3 + $0x3ac] ss:$16 sps:$4 sm:$0xff]  }
 0x665   : > { %5554 = vmatpush1.bf16.msra.mxu0 %v12409_v7  ;;  %5597 = vmatpush1.bf16.msra.mxu1 %v12412_v20  ;;  %v12481_v7 = vld [vmem:[%s13608_s3 + $0x3a0] ss:$16 sps:$4 sm:$0xff]   ;;  %v12484_v20 = vld [vmem:[%s13608_s3 + $0x3a8] ss:$16 sps:$4 sm:$0xff]  }
 0x666   : > { %5555 = vmatprep.subr.bf16.mxu0 %v12417_v54  ;;  %5598 = vmatprep.subr.bf16.mxu1 %v12420_v18  ;;  %v12489_v54 = vld [vmem:[%s13608_s3 + $0x384] ss:$16 sps:$4 sm:$0xff]   ;;  %v12492_v18 = vld [vmem:[%s13608_s3 + $0x38c] ss:$16 sps:$4 sm:$0xff]  }
 0x669   : > { %5556 = vmatpush1.bf16.msra.mxu0 %v12415_v14  ;;  %5599 = vmatpush1.bf16.msra.mxu1 %v12418_v36  ;;  %v12487_v14 = vld [vmem:[%s13608_s3 + $0x380] ss:$16 sps:$4 sm:$0xff]   ;;  %v12490_v36 = vld [vmem:[%s13608_s3 + $0x388] ss:$16 sps:$4 sm:$0xff]  }
 0x66a   : > { %5718 = vmatprep.subr.bf16.mxu0 %v12423_v23  ;;  %5761 = vmatprep.subr.bf16.mxu1 %v12426_v30 }
 0x66c   : > { %10876 = vmatmul.mubr.msk.bf16.vlgmr.msra.gmra.mxu0 %vm3732_vm1, %v4650_v3  ;;  %10877 = vmatmul.mubr.msk.bf16.vlgmr.msra.gmra.mxu1 %vm3732_vm1, %v4650_v3  ;;  %v6320_v3 = vld [vmem:[%s13610_s27 + $0x1c0] sm:$0xff] }
 0x66d   : > { %v14629_v13 = vpop.f32.mrf.mxu0  ;;  %5719 = vmatpush1.bf16.msra.mxu0 %v12421_v32  ;;  %5762 = vmatpush1.bf16.msra.mxu1 %v12424_v56 }
 0x66e   : > { %5720 = vmatprep.subr.bf16.mxu0 %v12429_v61  ;;  %5763 = vmatprep.subr.bf16.mxu1 %v12432_v12  ;;  %v6324_v61 = vld [vmem:[%s13610_s27 + $0x1e0] sm:$0xff] }
 0x66f   : > { %v11574_v57 = vpop.f32.mrf.mxu0  ;;  %5742 = vmatprep.mubr.bf16.mxu0 %v13217_v27  ;;  %5785 = vmatprep.mubr.bf16.mxu1 %v13217_v27  ;;  %v6448_v12 = vld [vmem:[%s13610_s27 + $0x5c0] sm:$0xff] }
 0x670   : > { %v6312_v57 = vld [vmem:[%s13610_s27 + $0x180] sm:$0xff] }
 0x671   : > { %v14637_v11 = vpop.f32.mrf.mxu0  ;;  %5721 = vmatpush1.bf16.msra.mxu0 %v12427_v46  ;;  %5764 = vmatpush1.bf16.msra.mxu1 %v12430_v62  ;;  %v10989_v46 = vcombine.high %v6320_v3, %v6324_v61  ;;  %v6452_v62 = vld [vmem:[%s13610_s27 + $0x5e0] sm:$0xff] }
 0x672   : > { %5722 = vmatprep.subr.bf16.mxu0 %v12435_v25  ;;  %5765 = vmatprep.subr.bf16.mxu1 %v12438_v44  ;;  %v4652_v16 = vpack.c.bf16 %v14637_v11, %v14629_v13  ;;  %v10988_v13 = vcombine.low %v6320_v3, %v6324_v61  ;;  %v6316_v25 = vld [vmem:[%s13610_s27 + $0x1a0] sm:$0xff]  ;;  %v11116_v44 = vcombine.low %v6448_v12, %v6452_v62 }
 0x673   : > { %v11575_v55 = vpop.f32.mrf.mxu0  ;;  %v11117_v11 = vcombine.high %v6448_v12, %v6452_v62  ;;  %v6264_v3 = vld [vmem:[%s13610_s27] sm:$0xff] }
 0x674   : > { %v6444_v55 = vld [vmem:[%s13610_s27 + $0x5a0] sm:$0xff] }
 0x675   : > { %5723 = vmatpush1.bf16.msra.mxu0 %v12433_v52  ;;  %5766 = vmatpush1.bf16.msra.mxu1 %v12436_v15  ;;  %v10981_v52 = vcombine.high %v6312_v57, %v6316_v25  ;;  %v6440_v15 = vld [vmem:[%s13610_s27 + $0x580] sm:$0xff] }
 0x676   : > { %v4551_v5 = vpop.f32.mrf.mxu1  ;;  %5724 = vmatprep.subr.bf16.mxu0 %v12441_v53  ;;  %5767 = vmatprep.subr.bf16.mxu1 %v12444_v58  ;;  %v6304_v53 = vld [vmem:[%s13610_s27 + $0x140] sm:$0xff]  ;;  %v11109_v58 = vcombine.high %v6440_v15, %v6444_v55 }
 0x677   : > { %v6268_v61 = vld [vmem:[%s13610_s27 + $0x20] sm:$0xff] }
 0x678   : > { %v11568_v38 = vpop.f32.mrf.mxu1  ;;  %v6396_v62 = vld [vmem:[%s13610_s27 + $0x420] sm:$0xff] }
 0x679   : > { %5725 = vmatpush1.bf16.msra.mxu0 %v12439_v43  ;;  %5768 = vmatpush1.bf16.msra.mxu1 %v12442_v26  ;;  %v6308_v43 = vld [vmem:[%s13610_s27 + $0x160] sm:$0xff] }
 0x67a   : > { %v4554_v60 = vpop.f32.mrf.mxu1  ;;  %5887 = vmatprep.subr.bf16.mxu0 %v12447_v59  ;;  %5930 = vmatprep.subr.bf16.mxu1 %v12450_v35  ;;  %v6432_v26 = vld [vmem:[%s13610_s27 + $0x540] sm:$0xff]  ;;  %v10980_v59 = vcombine.low %v6312_v57, %v6316_v25  ;;  %v11108_v35 = vcombine.low %v6440_v15, %v6444_v55  ;;  %v10973_v38 = vcombine.high %v6304_v53, %v6308_v43 }
 0x67b   : > { %v4651_v41 = vpack.c.bf16 %v4554_v60, %v4551_v5  ;;  %v6436_v5 = vld [vmem:[%s13610_s27 + $0x560] sm:$0xff] }
 0x67c   : > { %v11569_v47 = vpop.f32.mrf.mxu1  ;;  %v11101_v60 = vcombine.high %v6432_v26, %v6436_v5  ;;  %v6384_v55 = vld [vmem:[%s13610_s27 + $0x3c0] sm:$0xff] }
 0x67d   : > { %10894 = vmatmul.mubr.msk.bf16.vlgmr.msra.gmra.mxu0 %vm3732_vm1, %v4651_v41  ;;  %10895 = vmatmul.mubr.msk.bf16.vlgmr.msra.gmra.mxu1 %vm3732_vm1, %v4651_v41  ;;  %v6424_v41 = vld [vmem:[%s13610_s27 + $0x500] sm:$0xff]  ;;  %v11100_v47 = vcombine.low %v6432_v26, %v6436_v5  ;;  %v10932_v26 = vcombine.low %v6264_v3, %v6268_v61 }
 0x67e   : > { %5888 = vmatpush1.bf16.msra.mxu0 %v12445_v10  ;;  %5931 = vmatpush1.bf16.msra.mxu1 %v12448_v1  ;;  %v6296_v10 = vld [vmem:[%s13610_s27 + $0x100] sm:$0xff] }
 0x67f   : > { %5889 = vmatprep.subr.bf16.mxu0 %v12453_v42  ;;  %5932 = vmatprep.subr.bf16.mxu1 %v12456_v63  ;;  %v6300_v1 = vld [vmem:[%s13610_s27 + $0x120] sm:$0xff]  ;;  %v10972_v63 = vcombine.low %v6304_v53, %v6308_v43 }
 0x680   : > { %5911 = vmatprep.mubr.bf16.mxu0 %v13217_v27  ;;  %5954 = vmatprep.mubr.bf16.mxu1 %v13217_v27  ;;  %v6428_v42 = vld [vmem:[%s13610_s27 + $0x520] sm:$0xff] }
 0x681   : > { %v6388_v53 = vld [vmem:[%s13610_s27 + $0x3e0] sm:$0xff] }
 0x682   : > { %5890 = vmatpush1.bf16.msra.mxu0 %v12451_v28  ;;  %5933 = vmatpush1.bf16.msra.mxu1 %v12454_v6  ;;  %v10965_v28 = vcombine.high %v6296_v10, %v6300_v1  ;;  %v11093_v6 = vcombine.high %v6424_v41, %v6428_v42  ;;  %v6516_v43 = vld [vmem:[%s13610_s27 + $0x7e0] sm:$0xff] }
 0x683   : > { %5891 = vmatprep.subr.bf16.mxu0 %v12459_v24  ;;  %5934 = vmatprep.subr.bf16.mxu1 %v12462_v4  ;;  %v6288_v24 = vld [vmem:[%s13610_s27 + $0xc0] sm:$0xff] }
 0x684   : > { %v6292_v4 = vld [vmem:[%s13610_s27 + $0xe0] sm:$0xff] }
 0x686   : > { %5892 = vmatpush1.bf16.msra.mxu0 %v12457_v19  ;;  %5935 = vmatpush1.bf16.msra.mxu1 %v12460_v9 }
 0x687   : > { %5893 = vmatprep.subr.bf16.mxu0 %v12465_v29  ;;  %5936 = vmatprep.subr.bf16.mxu1 %v12468_v8  ;;  %v6416_v29 = vld [vmem:[%s13610_s27 + $0x4c0] sm:$0xff] }
 0x688   : > { %v6420_v8 = vld [vmem:[%s13610_s27 + $0x4e0] sm:$0xff] }
 0x68a   : > { %5894 = vmatpush1.bf16.msra.mxu0 %v12463_v17  ;;  %5937 = vmatpush1.bf16.msra.mxu1 %v12466_v37  ;;  %v10964_v17 = vcombine.low %v6296_v10, %v6300_v1  ;;  %v11092_v37 = vcombine.low %v6424_v41, %v6428_v42  ;;  %v11052_v10 = vcombine.low %v6384_v55, %v6388_v53 }
 0x68b   : > { %6056 = vmatprep.subr.bf16.mxu0 %v12471_v33  ;;  %6099 = vmatprep.subr.bf16.mxu1 %v12474_v22  ;;  %v10957_v33 = vcombine.high %v6288_v24, %v6292_v4  ;;  %v11085_v22 = vcombine.high %v6416_v29, %v6420_v8 }
 0x68d   : > { %10912 = vmatmul.mubr.msk.bf16.vlgmr.msra.gmra.mxu0 %vm3732_vm1, %v4652_v16  ;;  %10913 = vmatmul.mubr.msk.bf16.vlgmr.msra.gmra.mxu1 %vm3732_vm1, %v4652_v16 }
 0x68e   : > { %6057 = vmatpush1.bf16.msra.mxu0 %v12469_v0  ;;  %6100 = vmatpush1.bf16.msra.mxu1 %v12472_v21  ;;  %v6280_v0 = vld [vmem:[%s13610_s27 + $0x80] sm:$0xff] }
 0x68f   : > { %6058 = vmatprep.subr.bf16.mxu0 %v12477_v34  ;;  %6101 = vmatprep.subr.bf16.mxu1 %v12480_v39  ;;  %v6284_v21 = vld [vmem:[%s13610_s27 + $0xa0] sm:$0xff] }
 0x690   : > { %6080 = vmatprep.mubr.bf16.mxu0 %v13217_v27  ;;  %6123 = vmatprep.mubr.bf16.mxu1 %v13217_v27  ;;  %v6408_v39 = vld [vmem:[%s13610_s27 + $0x480] sm:$0xff] }
 0x692   : > { %6059 = vmatpush1.bf16.msra.mxu0 %v12475_v40  ;;  %6102 = vmatpush1.bf16.msra.mxu1 %v12478_v31  ;;  %v6412_v40 = vld [vmem:[%s13610_s27 + $0x4a0] sm:$0xff]  ;;  %v10956_v31 = vcombine.low %v6288_v24, %v6292_v4 }
 0x693   : > { %6060 = vmatprep.subr.bf16.mxu0 %v12483_v45  ;;  %6103 = vmatprep.subr.bf16.mxu1 %v12486_v2  ;;  %v14707_v19 = vpop.f32.mrf.mxu0  ;;  %v11084_v45 = vcombine.low %v6416_v29, %v6420_v8  ;;  %v10949_v2 = vcombine.high %v6280_v0, %v6284_v21 }
 0x695   : > { %v14715_v16 = vpop.f32.mrf.mxu0 }
 0x696   : > { %6061 = vmatpush1.bf16.msra.mxu0 %v12481_v7  ;;  %6104 = vmatpush1.bf16.msra.mxu1 %v12484_v20  ;;  %v11077_v7 = vcombine.high %v6408_v39, %v6412_v40  ;;  %v6272_v20 = vld [vmem:[%s13610_s27 + $0x40] sm:$0xff] }
 0x697   : > { %6062 = vmatprep.subr.bf16.mxu0 %v12489_v54  ;;  %6105 = vmatprep.subr.bf16.mxu1 %v12492_v18  ;;  %v6276_v54 = vld [vmem:[%s13610_s27 + $0x60] sm:$0xff]  ;;  %v14723_v18 = vpop.f32.mrf.mxu0 }
 0x698   : > { %v10940_v57 = vcombine.low %v6272_v20, %v6276_v54 }
 0x699   : > { %v14731_v12 = vpop.f32.mrf.mxu0 }
 0x69a   : > { %6063 = vmatpush1.bf16.msra.mxu0 %v12487_v14  ;;  %6106 = vmatpush1.bf16.msra.mxu1 %v12490_v36  ;;  %v6400_v36 = vld [vmem:[%s13610_s27 + $0x440] sm:$0xff] }
 0x69b   : > { %7800 = vmatprep.subr.bf16.mxu0 %v10989_v46  ;;  %7843 = vmatprep.subr.bf16.mxu1 %v11117_v11  ;;  %v6392_v46 = vld [vmem:[%s13610_s27 + $0x400] sm:$0xff] }
 0x69c   : > { %v11061_v15 = vcombine.high %v6392_v46, %v6396_v62 }
 0x6ca   : > { %v4639_v27 = vpop.f32.mrf.mxu1 }
 0x6cc   : > { %v11580_v23 = vpop.f32.mrf.mxu1 }
 0x6cd   : > { %v10948_v23 = vcombine.low %v6280_v0, %v6284_v21 }
 0x6ce   : > { %v4642_v30 = vpop.f32.mrf.mxu1 }
 0x6cf   : > { %v4653_v32 = vpack.c.bf16 %v4642_v30, %v4639_v27  ;;  %v6404_v27 = vld [vmem:[%s13610_s27 + $0x460] sm:$0xff]  ;;  %v11076_v30 = vcombine.low %v6408_v39, %v6412_v40 }
 0x6d0   : > { %v11581_v56 = vpop.f32.mrf.mxu1  ;;  %v11068_v11 = vcombine.low %v6400_v36, %v6404_v27 }
 0x6d1   : > { %10930 = vmatmul.mubr.msk.bf16.vlgmr.msra.gmra.mxu0 %vm3732_vm1, %v4653_v32  ;;  %10931 = vmatmul.mubr.msk.bf16.vlgmr.msra.gmra.mxu1 %vm3732_vm1, %v4653_v32  ;;  %v10941_v32 = vcombine.high %v6272_v20, %v6276_v54  ;;  %v11069_v56 = vcombine.high %v6400_v36, %v6404_v27 }
 0x6d2   : > { %7801 = vmatpush1.bf16.msra.mxu0 %v10988_v13  ;;  %7844 = vmatpush1.bf16.msra.mxu1 %v11116_v44 }
 0x6d3   : > { %7802 = vmatprep.subr.bf16.mxu0 %v10981_v52  ;;  %7845 = vmatprep.subr.bf16.mxu1 %v11109_v58  ;;  %v10933_v52 = vcombine.high %v6264_v3, %v6268_v61  ;;  %v6512_v58 = vld [vmem:[%s13610_s27 + $0x7c0] sm:$0xff] }
 0x6d4   : > { %v11180_v42 = vcombine.low %v6512_v58, %v6516_v43 }
 0x6d6   : > { %7803 = vmatpush1.bf16.msra.mxu0 %v10980_v59  ;;  %7846 = vmatpush1.bf16.msra.mxu1 %v11108_v35  ;;  %v11060_v35 = vcombine.low %v6392_v46, %v6396_v62 }
 0x6d7   : > { %7804 = vmatprep.subr.bf16.mxu0 %v10973_v38  ;;  %7847 = vmatprep.subr.bf16.mxu1 %v11101_v60  ;;  %v11053_v38 = vcombine.high %v6384_v55, %v6388_v53  ;;  %v11181_v60 = vcombine.high %v6512_v58, %v6516_v43 }
 0x6da   : > { %v14709_v9 = vpop.f32.mrf.mxu1  ;;  %7805 = vmatpush1.bf16.msra.mxu0 %v10972_v63  ;;  %7848 = vmatpush1.bf16.msra.mxu1 %v11100_v47 }
 0x6db   : > { %7806 = vmatprep.subr.bf16.mxu0 %v10965_v28  ;;  %7849 = vmatprep.subr.bf16.mxu1 %v11093_v6 }
 0x6dc   : > { %v14717_v34 = vpop.f32.mrf.mxu1 }
 0x6de   : > { %7807 = vmatpush1.bf16.msra.mxu0 %v10964_v17  ;;  %7850 = vmatpush1.bf16.msra.mxu1 %v11092_v37  ;;  %v14725_v14 = vpop.f32.mrf.mxu1 }
 0x6df   : > { %7808 = vmatprep.subr.bf16.mxu0 %v10957_v33  ;;  %7851 = vmatprep.subr.bf16.mxu1 %v11085_v22 }
 0x6e0   : > { %v14733_v13 = vpop.f32.mrf.mxu1 }
 0x6e2   : > { %7809 = vmatpush1.bf16.msra.mxu0 %v10956_v31  ;;  %7852 = vmatpush1.bf16.msra.mxu1 %v11084_v45 }
 0x6e3   : > { %7810 = vmatprep.subr.bf16.mxu0 %v10949_v2  ;;  %7853 = vmatprep.subr.bf16.mxu1 %v11077_v7 }
 0x6e6   : > { %7811 = vmatpush1.bf16.msra.mxu0 %v10948_v23  ;;  %7854 = vmatpush1.bf16.msra.mxu1 %v11076_v30 }
 0x6e7   : > { %7812 = vmatprep.subr.bf16.mxu0 %v10941_v32  ;;  %7855 = vmatprep.subr.bf16.mxu1 %v11069_v56 }
 0x6ea   : > { %7813 = vmatpush1.bf16.msra.mxu0 %v10940_v57  ;;  %7856 = vmatpush1.bf16.msra.mxu1 %v11068_v11 }
 0x6eb   : > { %7814 = vmatprep.subr.bf16.mxu0 %v10933_v52  ;;  %7857 = vmatprep.subr.bf16.mxu1 %v11061_v15 }
 0x6ee   : > { %7815 = vmatpush1.bf16.msra.mxu0 %v10932_v26  ;;  %7858 = vmatpush1.bf16.msra.mxu1 %v11060_v35 }
 0x6ef   : > { %7816 = vmatprep.subr.bf16.mxu0 %v11053_v38  ;;  %7859 = vmatprep.subr.bf16.mxu1 %v11181_v60 }
 0x6f2   : > { %7817 = vmatpush2.bf16.msra.mxu0 %v11052_v10  ;;  %7860 = vmatpush2.bf16.msra.mxu1 %v11180_v42 }
 0x6fc   : > { %v14737_v25 = vpop.f32.mrf.mxu0  ;;  %v14739_v44 = vpop.f32.mrf.mxu1 }
 0x6fd   : > { %v6134_v55 = vadd.f32 %v14737_v25, %v14707_v19  ;;  %v6148_v53 = vadd.f32 %v14739_v44, %v14709_v9 }
 0x6fe   : > { %v5070_v5 = vpop.f32.mrf.mxu0  ;;  %v5113_v59 = vpop.f32.mrf.mxu1 }
 0x6ff   : > { %v6141_v26 = vadd.f32 %v5070_v5, %v14715_v16  ;;  %v6155_v35 = vadd.f32 %v5113_v59, %v14717_v34 }
 0x700   : > { %v5072_v1 = vpop.f32.mrf.mxu0  ;;  %v5115_v41 = vpop.f32.mrf.mxu1 }
 0x701   : > { %v6162_v10 = vadd.f32 %v5072_v1, %v14723_v18  ;;  %v6176_v48 = vadd.f32 %v5115_v41, %v14725_v14 }
 0x702   : > { %v5074_v63 = vpop.f32.mrf.mxu0  ;;  %v5117_v47 = vpop.f32.mrf.mxu1 }
 0x703   : > { %v6169_v19 = vadd.f32 %v5074_v63, %v14731_v12  ;;  %v6183_v9 = vadd.f32 %v5117_v47, %v14733_v13 }
 0x70c   : > { %v5237_v28 = vpop.f32.mrf.mxu0  ;;  %v5280_v6 = vpop.f32.mrf.mxu1 }
 0x70d   : > { %v6135_v38 = vadd.f32 %v6134_v55, %v5237_v28  ;;  %v6149_v60 = vadd.f32 %v6148_v53, %v5280_v6 }
 0x70e   : > { %v5239_v24 = vpop.f32.mrf.mxu0  ;;  %v5282_v4 = vpop.f32.mrf.mxu1 }
 0x70f   : > { %v6142_v42 = vadd.f32 %v6141_v26, %v5239_v24  ;;  %v6156_v51 = vadd.f32 %v6155_v35, %v5282_v4  ;;  %v12952_v26 = vld [vmem:[%s13631_s15 + $0x18] sm:$0xff] }
 0x710   : > { %v5241_v29 = vpop.f32.mrf.mxu0  ;;  %v5284_v8 = vpop.f32.mrf.mxu1 }
 0x711   : > { %v6163_v25 = vadd.f32 %v6162_v10, %v5241_v29  ;;  %v6177_v6 = vadd.f32 %v6176_v48, %v5284_v8 }
 0x712   : > { %v5243_v17 = vpop.f32.mrf.mxu0  ;;  %v5286_v37 = vpop.f32.mrf.mxu1 }
 0x713   : > { %v6170_v55 = vadd.f32 %v6169_v19, %v5243_v17  ;;  %v6184_v18 = vadd.f32 %v6183_v9, %v5286_v37  ;;  %v12953_v19 = vld [vmem:[%s13631_s15 + $0x20] sm:$0xff] }
 0x71c   : > { %v5406_v33 = vpop.f32.mrf.mxu0  ;;  %v5449_v22 = vpop.f32.mrf.mxu1 }
 0x71d   : > { %v6136_v50 = vadd.f32 %v6135_v38, %v5406_v33  ;;  %v6150_v49 = vadd.f32 %v6149_v60, %v5449_v22 }
 0x71e   : > { %v5408_v0 = vpop.f32.mrf.mxu0  ;;  %v5451_v21 = vpop.f32.mrf.mxu1 }
 0x71f   : > { %v6143_v16 = vadd.f32 %v6142_v42, %v5408_v0  ;;  %v6157_v34 = vadd.f32 %v6156_v51, %v5451_v21 }
 0x720   : > { %v5410_v39 = vpop.f32.mrf.mxu0  ;;  %v5453_v40 = vpop.f32.mrf.mxu1 }
 0x721   : > { %v6164_v1 = vadd.f32 %v6163_v25, %v5410_v39  ;;  %v6178_v14 = vadd.f32 %v6177_v6, %v5453_v40 }
 0x722   : > { %v5412_v31 = vpop.f32.mrf.mxu0  ;;  %v5455_v45 = vpop.f32.mrf.mxu1 }
 0x723   : > { %v6171_v41 = vadd.f32 %v6170_v55, %v5412_v31  ;;  %v6185_v12 = vadd.f32 %v6184_v18, %v5455_v45 }
 0x72c   : > { %v5575_v2 = vpop.f32.mrf.mxu0  ;;  %v5618_v7 = vpop.f32.mrf.mxu1 }
 0x72d   : > { %v6137_v59 = vadd.f32 %v6136_v50, %v5575_v2  ;;  %v6151_v28 = vadd.f32 %v6150_v49, %v5618_v7 }
 0x72e   : > { %v5577_v20 = vpop.f32.mrf.mxu0  ;;  %v5620_v54 = vpop.f32.mrf.mxu1 }
 0x72f   : > { %v6144_v24 = vadd.f32 %v6143_v16, %v5577_v20  ;;  %v6158_v4 = vadd.f32 %v6157_v34, %v5620_v54  ;;  %v12955_v34 = vld [vmem:[%s13631_s15 + $0x28] sm:$0xff] }
 0x730   : > { %v5579_v36 = vpop.f32.mrf.mxu0  ;;  %v5622_v27 = vpop.f32.mrf.mxu1 }
 0x731   : > { %v6165_v63 = vadd.f32 %v6164_v1, %v5579_v36  ;;  %v6179_v50 = vadd.f32 %v6178_v14, %v5622_v27  ;;  %v12949_v27 = vld [vmem:[%s13631_s15] sm:$0xff] }
 0x732   : > { %v5581_v23 = vpop.f32.mrf.mxu0  ;;  %v5624_v30 = vpop.f32.mrf.mxu1 }
 0x733   : > { %v6172_v48 = vadd.f32 %v6171_v41, %v5581_v23  ;;  %v6186_v49 = vadd.f32 %v6185_v12, %v5624_v30 }
 0x73d   : > { %v5744_v32 = vpop.f32.mrf.mxu0  ;;  %v5787_v56 = vpop.f32.mrf.mxu1 }
 0x73e   : > { %v6138_v33 = vadd.f32 %v6137_v59, %v5744_v32  ;;  %v6152_v22 = vadd.f32 %v6151_v28, %v5787_v56 }
 0x73f   : > { %v5746_v3 = vpop.f32.mrf.mxu0  ;;  %v5789_v61 = vpop.f32.mrf.mxu1 }
 0x740   : > { %v6145_v29 = vadd.f32 %v6144_v24, %v5746_v3  ;;  %v6159_v53 = vadd.f32 %v6158_v4, %v5789_v61  ;;  %v12956_v24 = vld [vmem:[%s13631_s15 + $0x38] sm:$0xff] }
 0x741   : > { %v5748_v46 = vpop.f32.mrf.mxu0  ;;  %v5791_v62 = vpop.f32.mrf.mxu1 }
 0x742   : > { %v6166_v8 = vadd.f32 %v6165_v63, %v5748_v46  ;;  %v6180_v31 = vadd.f32 %v6179_v50, %v5791_v62 }
 0x743   : > { %v5750_v57 = vpop.f32.mrf.mxu0  ;;  %v5793_v11 = vpop.f32.mrf.mxu1 }
 0x744   : > { %v6173_v45 = vadd.f32 %v6172_v48, %v5750_v57  ;;  %v6187_v7 = vadd.f32 %v6186_v49, %v5793_v11  ;;  %v12951_v57 = vld [vmem:[%s13631_s15 + $0x8] sm:$0xff] }
 0x74d   : > { %v5913_v52 = vpop.f32.mrf.mxu0  ;;  %v5956_v15 = vpop.f32.mrf.mxu1 }
 0x74e   : > { %v6139_v0 = vadd.f32 %v6138_v33, %v5913_v52  ;;  %v6153_v51 = vadd.f32 %v6152_v22, %v5956_v15  ;;  %v12950_v15 = vld [vmem:[%s13631_s15 + $0x10] sm:$0xff] }
 0x74f   : > { %v5915_v58 = vpop.f32.mrf.mxu0  ;;  %v5958_v43 = vpop.f32.mrf.mxu1 }
 0x750   : > { %v6146_v21 = vadd.f32 %v6145_v29, %v5915_v58  ;;  %v6160_v39 = vadd.f32 %v6159_v53, %v5958_v43  ;;  %v6380_v29 = vld [vmem:[%s13610_s27 + $0x3a0] sm:$0xff] }
 0x751   : > { %v5917_v44 = vpop.f32.mrf.mxu0  ;;  %v5960_v5 = vpop.f32.mrf.mxu1  ;;  %v6504_v53 = vld [vmem:[%s13610_s27 + $0x780] sm:$0xff] }
 0x752   : > { %v6167_v36 = vadd.f32 %v6166_v8, %v5917_v44  ;;  %v6181_v56 = vadd.f32 %v6180_v31, %v5960_v5  ;;  %v12954_v5 = vld [vmem:[%s13631_s15 + $0x30] sm:$0xff]  ;;  %v6368_v8 = vld [vmem:[%s13610_s27 + $0x340] sm:$0xff] }
 0x753   : > { %v5919_v13 = vpop.f32.mrf.mxu0  ;;  %v5962_v47 = vpop.f32.mrf.mxu1 }
 0x754   : > { %v6174_v3 = vadd.f32 %v6173_v45, %v5919_v13  ;;  %v6188_v52 = vadd.f32 %v6187_v7, %v5962_v47  ;;  %v6376_v47 = vld [vmem:[%s13610_s27 + $0x380] sm:$0xff] }
 0x755   : > { %v11044_v50 = vcombine.low %v6376_v47, %v6380_v29  ;;  %v6360_v45 = vld [vmem:[%s13610_s27 + $0x300] sm:$0xff] }
 0x756   : > { %v6364_v7 = vld [vmem:[%s13610_s27 + $0x320] sm:$0xff] }
 0x791   : > { %v6082_v17 = vpop.f32.mrf.mxu0  ;;  %v6125_v37 = vpop.f32.mrf.mxu1 }
 0x792   : > { %v6140_v2 = vadd.f32 %v6139_v0, %v6082_v17  ;;  %v6154_v40 = vadd.f32 %v6153_v51, %v6125_v37  ;;  %v11045_v0 = vcombine.high %v6376_v47, %v6380_v29  ;;  %v6508_v51 = vld [vmem:[%s13610_s27 + $0x7a0] sm:$0xff]  ;;  %v6321_v47 = vld [vmem:[%s13610_s27 + $0x1c8] sm:$0xff] }
 0x793   : > { %v6084_v20 = vpop.f32.mrf.mxu0  ;;  %v6127_v54 = vpop.f32.mrf.mxu1  ;;  %v11172_v48 = vcombine.low %v6504_v53, %v6508_v51  ;;  %v11173_v49 = vcombine.high %v6504_v53, %v6508_v51  ;;  %v6372_v17 = vld [vmem:[%s13610_s27 + $0x360] sm:$0xff]  ;;  %v6325_v29 = vld [vmem:[%s13610_s27 + $0x1e8] sm:$0xff] }
 0x794   : > { %v14756_v32 = vadd.f32 %v12949_v27, %v6140_v2  ;;  %v6147_v23 = vadd.f32 %v6146_v21, %v6084_v20  ;;  %v6161_v30 = vadd.f32 %v6160_v39, %v6127_v54  ;;  %v14759_v62 = vadd.f32 %v12950_v15, %v6154_v40  ;;  %7818 = vmatprep.subr.bf16.mxu0 %v11045_v0  ;;  %v6496_v37 = vld [vmem:[%s13610_s27 + $0x740] sm:$0xff]  ;;  %v6449_v53 = vld [vmem:[%s13610_s27 + $0x5c8] sm:$0xff] }
 0x795   : > { %v6086_v61 = vpop.f32.mrf.mxu0  ;;  %v6129_v46 = vpop.f32.mrf.mxu1  ;;  %7861 = vmatprep.subr.bf16.mxu1 %v11173_v49  ;;  %7819 = vmatpush2.bf16.msra.mxu0 %v11044_v50  ;;  %v11037_v21 = vcombine.high %v6368_v8, %v6372_v17  ;;  %v6500_v39 = vld [vmem:[%s13610_s27 + $0x760] sm:$0xff]  ;;  %v11036_v2 = vcombine.low %v6368_v8, %v6372_v17  ;;  %v11029_v54 = vcombine.high %v6360_v45, %v6364_v7  ;;  %v6453_v51 = vld [vmem:[%s13610_s27 + $0x5e8] sm:$0xff] }
 0x796   : > { %v14762_v11 = vadd.f32 %v12951_v57, %v6147_v23  ;;  %v6168_v58 = vadd.f32 %v6167_v36, %v6086_v61  ;;  %v6199_v43 = vmul.f32 %v14756_v32, %v14756_v32  ;;  %v14767_v35 = vadd.f32 %v12952_v26, %v6161_v30  ;;  %7862 = vmatpush2.bf16.msra.mxu1 %v11172_v48  ;;  %v6488_v20 = vld [vmem:[%s13610_s27 + $0x700] sm:$0xff] }
 0x797   : > { %v6182_v38 = vadd.f32 %v6181_v56, %v6129_v46  ;;  %v6088_v60 = vpop.f32.mrf.mxu0  ;;  %v6131_v10 = vpop.f32.mrf.mxu1  ;;  %v6201_v28 = vmul.f32 %v14759_v62, %v14759_v62  ;;  %v11164_v40 = vcombine.low %v6496_v37, %v6500_v39  ;;  %v11165_v31 = vcombine.high %v6496_v37, %v6500_v39  ;;  %7820 = vmatprep.subr.bf16.mxu0 %v11037_v21  ;;  %v6492_v36 = vld [vmem:[%s13610_s27 + $0x720] sm:$0xff] }
 0x798   : > { %v6200_v42 = vmul.f32 %v14762_v11, %v14762_v11  ;;  %v14772_v9 = vadd.f32 %v12953_v19, %v6168_v58  ;;  %v6175_v25 = vadd.f32 %v6174_v3, %v6088_v60  ;;  %v6189_v44 = vadd.f32 %v6188_v52, %v6131_v10  ;;  %v6352_v56 = vld [vmem:[%s13610_s27 + $0x2c0] sm:$0xff] }
 0x799   : > { %v14775_v16 = vadd.f32 %v12954_v5, %v6182_v38  ;;  %v6202_v55 = vmul.f32 %v14767_v35, %v14767_v35  ;;  %7863 = vmatprep.subr.bf16.mxu1 %v11165_v31  ;;  %7821 = vmatpush2.bf16.msra.mxu0 %v11036_v2  ;;  %v11028_v27 = vcombine.low %v6360_v45, %v6364_v7  ;;  %v6356_v3 = vld [vmem:[%s13610_s27 + $0x2e0] sm:$0xff] }
 0x79a   : > { %v14778_v59 = vadd.f32 %v12955_v34, %v6175_v25  ;;  %v6207_v6 = vadd.f32 %v6200_v42, %v6199_v43  ;;  %v6203_v18 = vmul.f32 %v14772_v9, %v14772_v9  ;;  %v14789_v4 = vadd.f32 %v12956_v24, %v6189_v44  ;;  %7864 = vmatpush2.bf16.msra.mxu1 %v11164_v40  ;;  %v6480_v61 = vld [vmem:[%s13610_s27 + $0x6c0] sm:$0xff] }
 0x79b   : > { %v6205_v14 = vmul.f32 %v14775_v16, %v14775_v16  ;;  %v11156_v23 = vcombine.low %v6488_v20, %v6492_v36  ;;  %v11157_v30 = vcombine.high %v6488_v20, %v6492_v36  ;;  %7822 = vmatprep.subr.bf16.mxu0 %v11029_v54  ;;  %v11021_v46 = vcombine.high %v6352_v56, %v6356_v3  ;;  %v6484_v52 = vld [vmem:[%s13610_s27 + $0x6e0] sm:$0xff]  ;;  %v15504_v20 = vld [vmem:[#allocation22_spill] sm:$0xff]  ;;  %v15505_v36 = vld [vmem:[#allocation23_spill] sm:$0xff] }
 0x79c   : > { %v6204_v1 = vmul.f32 %v14778_v59, %v14778_v59  ;;  %v6208_v33 = vadd.f32 %v6207_v6, %v6201_v28  ;;  %v6206_v12 = vmul.f32 %v14789_v4, %v14789_v4  ;;  %v6344_v15 = vld [vmem:[%s13610_s27 + $0x280] sm:$0xff]  ;;  %v11020_v58 = vcombine.low %v6352_v56, %v6356_v3 }
 0x79d   : > { %v6348_v57 = vld [vmem:[%s13610_s27 + $0x2a0] sm:$0xff]  ;;  %7865 = vmatprep.subr.bf16.mxu1 %v11157_v30  ;;  %7823 = vmatpush2.bf16.msra.mxu0 %v11028_v27  ;;  %v11149_v43 = vcombine.high %v6480_v61, %v6484_v52  ;;  %v11148_v60 = vcombine.low %v6480_v61, %v6484_v52  ;;  %v10991_v0 = vcombine.high %v6321_v47, %v6325_v29 }
 0x79e   : > { %v6209_v22 = vadd.f32 %v6208_v33, %v6202_v55  ;;  %v6212_v41 = vadd.f32 %v6204_v1, %v6203_v18  ;;  %v6472_v26 = vld [vmem:[%s13610_s27 + $0x680] sm:$0xff]  ;;  %7866 = vmatpush2.bf16.msra.mxu1 %v11156_v23  ;;  %7824 = vmatprep.subr.bf16.mxu0 %v11021_v46  ;;  %v11013_v10 = vcombine.high %v6344_v15, %v6348_v57  ;;  %v15506_v23 = vld [vmem:[#allocation24_spill] sm:$0xff] }
 0x79f   : > { %v6476_v38 = vld [vmem:[%s13610_s27 + $0x6a0] sm:$0xff]  ;;  %7867 = vmatprep.subr.bf16.mxu1 %v11149_v43  ;;  %v11012_v34 = vcombine.low %v6344_v15, %v6348_v57  ;;  %v10990_v50 = vcombine.low %v6321_v47, %v6325_v29  ;;  %v11118_v48 = vcombine.low %v6449_v53, %v6453_v51  ;;  %v11119_v49 = vcombine.high %v6449_v53, %v6453_v51  ;;  %v6301_v51 = vld [vmem:[%s13610_s27 + $0x128] sm:$0xff] }
 0x7a0   : > { %6210 = vadd.xlane.f32.xlu0 %v6209_v22  ;;  %v6213_v63 = vadd.f32 %v6212_v41, %v6205_v14  ;;  %v11141_v42 = vcombine.high %v6472_v26, %v6476_v38  ;;  %v6336_v19 = vld [vmem:[%s13610_s27 + $0x240] sm:$0xff]  ;;  %v11140_v28 = vcombine.low %v6472_v26, %v6476_v38 }
 0x7a1   : > { %v6340_v25 = vld [vmem:[%s13610_s27 + $0x260] sm:$0xff]  ;;  %7825 = vmatpush2.bf16.msra.mxu0 %v11020_v58 }
 0x7a2   : > { %v6214_v13 = vadd.f32 %v6213_v63, %v6206_v12  ;;  %v6464_v44 = vld [vmem:[%s13610_s27 + $0x640] sm:$0xff]  ;;  %7868 = vmatpush2.bf16.msra.mxu1 %v11148_v60  ;;  %7826 = vmatprep.subr.bf16.mxu0 %v11013_v10  ;;  %v11005_v6 = vcombine.high %v6336_v19, %v6340_v25  ;;  %v11004_v22 = vcombine.low %v6336_v19, %v6340_v25 }
 0x7a3   : > { %v6468_v5 = vld [vmem:[%s13610_s27 + $0x660] sm:$0xff]  ;;  %7869 = vmatprep.subr.bf16.mxu1 %v11141_v42 }
 0x7a4   : > { %6215 = vadd.xlane.f32.xlu1 %v6214_v13  ;;  %v11133_v55 = vcombine.high %v6464_v44, %v6468_v5  ;;  %v6328_v18 = vld [vmem:[%s13610_s27 + $0x200] sm:$0xff]  ;;  %v11132_v14 = vcombine.low %v6464_v44, %v6468_v5  ;;  %v6313_v5 = vld [vmem:[%s13610_s27 + $0x188] sm:$0xff] }
 0x7a5   : > { %v6332_v1 = vld [vmem:[%s13610_s27 + $0x220] sm:$0xff]  ;;  %7827 = vmatpush2.bf16.msra.mxu0 %v11012_v34  ;;  %v6317_v34 = vld [vmem:[%s13610_s27 + $0x1a8] sm:$0xff] }
 0x7a6   : > { %v6456_v24 = vld [vmem:[%s13610_s27 + $0x600] sm:$0xff]  ;;  %7870 = vmatpush2.bf16.msra.mxu1 %v11140_v28  ;;  %7828 = vmatprep.subr.bf16.mxu0 %v11005_v6  ;;  %v10997_v41 = vcombine.high %v6328_v18, %v6332_v1  ;;  %v10996_v63 = vcombine.low %v6328_v18, %v6332_v1  ;;  %v6441_v28 = vld [vmem:[%s13610_s27 + $0x588] sm:$0xff] }
 0x7a7   : > { %v6460_v33 = vld [vmem:[%s13610_s27 + $0x620] sm:$0xff]  ;;  %7871 = vmatprep.subr.bf16.mxu1 %v11133_v55  ;;  %v6445_v6 = vld [vmem:[%s13610_s27 + $0x5a8] sm:$0xff] }
 0x7a8   : > { %v11125_v12 = vcombine.high %v6456_v24, %v6460_v33  ;;  %v11124_v13 = vcombine.low %v6456_v24, %v6460_v33  ;;  %v6198_v40 = vld [vmem:[%s13626_s13] sm:$0xf]  ;;  %v6305_v33 = vld [vmem:[%s13610_s27 + $0x148] sm:$0xff]  ;;  %v11110_v47 = vcombine.low %v6441_v28, %v6445_v6 }
 0x7a9   : > { %7829 = vmatpush2.bf16.msra.mxu0 %v11004_v22  ;;  %v15503_v45 = vld [vmem:[#allocation21_spill] sm:$0xff]  ;;  %v6247_v54 = vrot.slane %v6198_v40, %v15504_v20  ;;  %v6235_v27 = vrot.slane %v6198_v40, %v15505_v36  ;;  %v6243_v30 = vrot.slane %v6198_v40, %v15506_v23  ;;  %v10983_v22 = vcombine.high %v6313_v5, %v6317_v34  ;;  %v6285_v36 = vld [vmem:[%s13610_s27 + $0xa8] sm:$0xff] }
 0x7aa   : > { %7872 = vmatpush2.bf16.msra.mxu1 %v11132_v14  ;;  %7830 = vmatprep.subr.bf16.mxu0 %v10997_v41  ;;  %v6239_v7 = vrot.slane %v6198_v40, %v15503_v45  ;;  %v11111_v14 = vcombine.high %v6441_v28, %v6445_v6  ;;  %v6309_v41 = vld [vmem:[%s13610_s27 + $0x168] sm:$0xff] }
 0x7ab   : > { %7873 = vmatprep.subr.bf16.mxu1 %v11125_v12  ;;  %v6433_v12 = vld [vmem:[%s13610_s27 + $0x548] sm:$0xff]  ;;  %v10975_v29 = vcombine.high %v6305_v33, %v6309_v41 }
 0x7ac   : > { %v6421_v40 = vld [vmem:[%s13610_s27 + $0x4e8] sm:$0xff] }
 0x7ad   : > { %7831 = vmatpush2.bf16.msra.mxu0 %v10996_v63  ;;  %v6437_v63 = vld [vmem:[%s13610_s27 + $0x568] sm:$0xff] }
 0x7ae   : > { %7874 = vmatpush2.bf16.msra.mxu1 %v11124_v13  ;;  %7886 = vmatprep.subr.bf16.mxu0 %v10991_v0  ;;  %v10982_v13 = vcombine.low %v6313_v5, %v6317_v34  ;;  %v11103_v53 = vcombine.high %v6433_v12, %v6437_v63  ;;  %v6297_v0 = vld [vmem:[%s13610_s27 + $0x108] sm:$0xff] }
 0x7af   : > { %7929 = vmatprep.subr.bf16.mxu1 %v11119_v49  ;;  %v6425_v49 = vld [vmem:[%s13610_s27 + $0x508] sm:$0xff] }
 0x7b0   : > { %v6413_v23 = vld [vmem:[%s13610_s27 + $0x4a8] sm:$0xff] }
 0x7b1   : > { %v6385_v28 = vld [vmem:[%s13610_s27 + $0x3c8] sm:$0xff] }
 0x7b2   : > { %v6389_v6 = vld [vmem:[%s13610_s27 + $0x3e8] sm:$0xff] }
 0x829   : > { %v6211_v8 = vpop.xlane.xlu0 %6210 }
 0x82a   : > { %v6217_v17 = vmul.f32 0.001953125, %v6211_v8  ;;  %v6429_v8 = vld [vmem:[%s13610_s27 + $0x528] sm:$0xff] }
 0x82b   : > { %v11094_v45 = vcombine.low %v6425_v49, %v6429_v8 }
 0x82c   : > { %v6219_v37 = vadd.f32 1e-06, %v6217_v17  ;;  %v10967_v17 = vcombine.high %v6297_v0, %v6301_v51 }
 0x82d   : > { %v6216_v21 = vpop.xlane.xlu1 %6215 }
 0x82e   : > { %12945 = vrsqrt.f32 %v6219_v37  ;;  %v6218_v39 = vmul.f32 0.001953125, %v6216_v21  ;;  %v11095_v37 = vcombine.high %v6425_v49, %v6429_v8  ;;  %v6289_v21 = vld [vmem:[%s13610_s27 + $0xc8] sm:$0xff] }
 0x830   : > { %v6220_v2 = vadd.f32 1e-06, %v6218_v39  ;;  %v6293_v39 = vld [vmem:[%s13610_s27 + $0xe8] sm:$0xff] }
 0x832   : > { %12947 = vrsqrt.f32 %v6220_v2  ;;  %v6417_v2 = vld [vmem:[%s13610_s27 + $0x4c8] sm:$0xff] }
 0x833   : > { %v11087_v20 = vcombine.high %v6417_v2, %v6421_v40 }
 0x83b   : > { %v12946_v31 = vpop.eup %12945 }
 0x83c   : > { %v6224_v56 = vmul.f32 %v12946_v31, %v14762_v11  ;;  %v6226_v3 = vmul.f32 %v12946_v31, %v14767_v35  ;;  %v6223_v61 = vmul.f32 %v12946_v31, %v14756_v32  ;;  %v6225_v46 = vmul.f32 %v12946_v31, %v14759_v62 }
 0x83d   : > { %v10966_v31 = vcombine.low %v6297_v0, %v6301_v51  ;;  %v11054_v0 = vcombine.low %v6385_v28, %v6389_v6 }
 0x83e   : > { %v6253_v26 = vmul.f32 %v6239_v7, %v6224_v56  ;;  %v6255_v38 = vmul.f32 %v6247_v54, %v6226_v3  ;;  %v6252_v60 = vmul.f32 %v6235_v27, %v6223_v61  ;;  %v6254_v10 = vmul.f32 %v6243_v30, %v6225_v46  ;;  %v6273_v46 = vld [vmem:[%s13610_s27 + $0x48] sm:$0xff] }
 0x83f   : > { %v12948_v52 = vpop.eup %12947  ;;  %v11086_v56 = vcombine.low %v6417_v2, %v6421_v40 }
 0x840   : > { %v6228_v15 = vmul.f32 %v12948_v52, %v14778_v59  ;;  %v6230_v57 = vmul.f32 %v12948_v52, %v14789_v4  ;;  %v6227_v58 = vmul.f32 %v12948_v52, %v14772_v9  ;;  %v6229_v43 = vmul.f32 %v12948_v52, %v14775_v16  ;;  %v6277_v52 = vld [vmem:[%s13610_s27 + $0x68] sm:$0xff] }
 0x842   : > { %v6257_v42 = vmul.f32 %v6239_v7, %v6228_v15  ;;  %v6259_v19 = vmul.f32 %v6247_v54, %v6230_v57  ;;  %v6256_v25 = vmul.f32 %v6235_v27, %v6227_v58  ;;  %v6258_v44 = vmul.f32 %v6243_v30, %v6229_v43  ;;  %v6281_v54 = vld [vmem:[%s13610_s27 + $0x88] sm:$0xff] }
 0x843   : > { %v10959_v7 = vcombine.high %v6289_v21, %v6293_v39  ;;  %v6409_v27 = vld [vmem:[%s13610_s27 + $0x488] sm:$0xff]  ;;  %v10958_v30 = vcombine.low %v6289_v21, %v6293_v39  ;;  %v10951_v3 = vcombine.high %v6281_v54, %v6285_v36  ;;  %v10950_v58 = vcombine.low %v6281_v54, %v6285_v36 }
 0x844   : > { %v14844_v55 = vpack.c.bf16 %v6257_v42, %v6253_v26  ;;  %v14846_v18 = vpack.c.bf16 %v6259_v19, %v6255_v38  ;;  %v14848_v1 = vpack.c.bf16 %v6256_v25, %v6252_v60  ;;  %v14850_v24 = vpack.c.bf16 %v6258_v44, %v6254_v10  ;;  %v6401_v15 = vld [vmem:[%s13610_s27 + $0x448] sm:$0xff] }
 0x845   : > { %v11079_v61 = vcombine.high %v6409_v27, %v6413_v23  ;;  %v6405_v57 = vld [vmem:[%s13610_s27 + $0x468] sm:$0xff]  ;;  %v11078_v43 = vcombine.low %v6409_v27, %v6413_v23  ;;  %v10943_v26 = vcombine.high %v6273_v46, %v6277_v52  ;;  %v10942_v25 = vcombine.low %v6273_v46, %v6277_v52 }
 0x846   : > { %7832 = vmatprep.mubr.bf16.mxu0 %v14844_v55  ;;  %7875 = vmatprep.mubr.bf16.mxu1 %v14846_v18  ;;  %v11071_v38 = vcombine.high %v6401_v15, %v6405_v57  ;;  %v6265_v60 = vld [vmem:[%s13610_s27 + $0x8] sm:$0xff]  ;;  %v11070_v44 = vcombine.low %v6401_v15, %v6405_v57 }
 0x847   : > { %7833 = vmatmul.mubr.bf16.vlgmr.msra.gmra.mxu0 %v14848_v1  ;;  %7876 = vmatmul.mubr.bf16.vlgmr.msra.gmra.mxu1 %v14850_v24  ;;  %v6269_v10 = vld [vmem:[%s13610_s27 + $0x28] sm:$0xff] }
 0x848   : > { %7887 = vmatpush1.bf16.msra.mxu0 %v10990_v50  ;;  %7930 = vmatpush1.bf16.msra.mxu1 %v11118_v48  ;;  %v10974_v50 = vcombine.low %v6305_v33, %v6309_v41  ;;  %v11102_v48 = vcombine.low %v6433_v12, %v6437_v63  ;;  %v6393_v42 = vld [vmem:[%s13610_s27 + $0x408] sm:$0xff]  ;;  %v10935_v5 = vcombine.high %v6265_v60, %v6269_v10 }
 0x849   : > { %7918 = vmatprep.mubr.bf16.mxu0 %v14844_v55  ;;  %7961 = vmatprep.mubr.bf16.mxu1 %v14846_v18  ;;  %v6397_v19 = vld [vmem:[%s13610_s27 + $0x428] sm:$0xff]  ;;  %v11055_v12 = vcombine.high %v6385_v28, %v6389_v6 }
 0x84a   : > { %7888 = vmatprep.subr.bf16.mxu0 %v10983_v22  ;;  %7931 = vmatprep.subr.bf16.mxu1 %v11111_v14  ;;  %v11063_v34 = vcombine.high %v6393_v42, %v6397_v19  ;;  %v6513_v33 = vld [vmem:[%s13610_s27 + $0x7c8] sm:$0xff]  ;;  %v10934_v14 = vcombine.low %v6265_v60, %v6269_v10  ;;  %v11062_v41 = vcombine.low %v6393_v42, %v6397_v19 }
 0x84b   : > { %v6517_v22 = vld [vmem:[%s13610_s27 + $0x7e8] sm:$0xff] }
 0x84c   : > { %7889 = vmatpush1.bf16.msra.mxu0 %v10982_v13  ;;  %7932 = vmatpush1.bf16.msra.mxu1 %v11110_v47  ;;  %v11183_v63 = vcombine.high %v6513_v33, %v6517_v22  ;;  %v6377_v13 = vld [vmem:[%s13610_s27 + $0x388] sm:$0xff]  ;;  %v11182_v51 = vcombine.low %v6513_v33, %v6517_v22 }
 0x84d   : > { %7890 = vmatprep.subr.bf16.mxu0 %v10975_v29  ;;  %7933 = vmatprep.subr.bf16.mxu1 %v11103_v53  ;;  %v6381_v47 = vld [vmem:[%s13610_s27 + $0x3a8] sm:$0xff] }
 0x84e   : > { %v6505_v29 = vld [vmem:[%s13610_s27 + $0x788] sm:$0xff]  ;;  %v11047_v49 = vcombine.high %v6377_v13, %v6381_v47  ;;  %v11046_v21 = vcombine.low %v6377_v13, %v6381_v47 }
 0x84f   : > { %v6509_v53 = vld [vmem:[%s13610_s27 + $0x7a8] sm:$0xff] }
 0x850   : > { %7891 = vmatpush1.bf16.msra.mxu0 %v10974_v50  ;;  %7934 = vmatpush1.bf16.msra.mxu1 %v11102_v48  ;;  %v11175_v8 = vcombine.high %v6505_v29, %v6509_v53  ;;  %v6369_v50 = vld [vmem:[%s13610_s27 + $0x348] sm:$0xff]  ;;  %v11174_v39 = vcombine.low %v6505_v29, %v6509_v53 }
 0x851   : > { %7892 = vmatprep.subr.bf16.mxu0 %v10967_v17  ;;  %7935 = vmatprep.subr.bf16.mxu1 %v11095_v37  ;;  %v6373_v48 = vld [vmem:[%s13610_s27 + $0x368] sm:$0xff] }
 0x852   : > { %v6497_v17 = vld [vmem:[%s13610_s27 + $0x748] sm:$0xff]  ;;  %v11039_v2 = vcombine.high %v6369_v50, %v6373_v48  ;;  %v11038_v54 = vcombine.low %v6369_v50, %v6373_v48 }
 0x853   : > { %v6501_v37 = vld [vmem:[%s13610_s27 + $0x768] sm:$0xff] }
 0x854   : > { %7893 = vmatpush1.bf16.msra.mxu0 %v10966_v31  ;;  %7936 = vmatpush1.bf16.msra.mxu1 %v11094_v45  ;;  %v11167_v40 = vcombine.high %v6497_v17, %v6501_v37  ;;  %v6361_v31 = vld [vmem:[%s13610_s27 + $0x308] sm:$0xff]  ;;  %v11166_v36 = vcombine.low %v6497_v17, %v6501_v37 }
 0x855   : > { %7894 = vmatprep.subr.bf16.mxu0 %v10959_v7  ;;  %7937 = vmatprep.subr.bf16.mxu1 %v11087_v20  ;;  %v6365_v45 = vld [vmem:[%s13610_s27 + $0x328] sm:$0xff] }
 0x856   : > { %v6489_v7 = vld [vmem:[%s13610_s27 + $0x708] sm:$0xff]  ;;  %v11031_v27 = vcombine.high %v6361_v31, %v6365_v45  ;;  %v11030_v46 = vcombine.low %v6361_v31, %v6365_v45 }
 0x857   : > { %v6493_v20 = vld [vmem:[%s13610_s27 + $0x728] sm:$0xff] }
 0x858   : > { %7895 = vmatpush1.bf16.msra.mxu0 %v10958_v30  ;;  %7938 = vmatpush1.bf16.msra.mxu1 %v11086_v56  ;;  %v11159_v23 = vcombine.high %v6489_v7, %v6493_v20  ;;  %v6353_v30 = vld [vmem:[%s13610_s27 + $0x2c8] sm:$0xff]  ;;  %v11158_v52 = vcombine.low %v6489_v7, %v6493_v20 }
 0x859   : > { %7896 = vmatprep.subr.bf16.mxu0 %v10951_v3  ;;  %7939 = vmatprep.subr.bf16.mxu1 %v11079_v61  ;;  %v6357_v56 = vld [vmem:[%s13610_s27 + $0x2e8] sm:$0xff] }
 0x85a   : > { %v6481_v3 = vld [vmem:[%s13610_s27 + $0x6c8] sm:$0xff]  ;;  %v11023_v15 = vcombine.high %v6353_v30, %v6357_v56  ;;  %v11022_v60 = vcombine.low %v6353_v30, %v6357_v56 }
 0x85b   : > { %v6485_v61 = vld [vmem:[%s13610_s27 + $0x6e8] sm:$0xff] }
 0x85c   : > { %7897 = vmatpush1.bf16.msra.mxu0 %v10950_v58  ;;  %7940 = vmatpush1.bf16.msra.mxu1 %v11078_v43  ;;  %v11151_v57 = vcombine.high %v6481_v3, %v6485_v61  ;;  %v6345_v58 = vld [vmem:[%s13610_s27 + $0x288] sm:$0xff]  ;;  %v11150_v10 = vcombine.low %v6481_v3, %v6485_v61 }
 0x85d   : > { %7898 = vmatprep.subr.bf16.mxu0 %v10943_v26  ;;  %7941 = vmatprep.subr.bf16.mxu1 %v11071_v38  ;;  %v6349_v43 = vld [vmem:[%s13610_s27 + $0x2a8] sm:$0xff] }
 0x85e   : > { %v6473_v26 = vld [vmem:[%s13610_s27 + $0x688] sm:$0xff]  ;;  %v11015_v42 = vcombine.high %v6345_v58, %v6349_v43  ;;  %v11014_v28 = vcombine.low %v6345_v58, %v6349_v43 }
 0x85f   : > { %v6477_v38 = vld [vmem:[%s13610_s27 + $0x6a8] sm:$0xff] }
 0x860   : > { %7899 = vmatpush1.bf16.msra.mxu0 %v10942_v25  ;;  %7942 = vmatpush1.bf16.msra.mxu1 %v11070_v44  ;;  %v11143_v19 = vcombine.high %v6473_v26, %v6477_v38  ;;  %v6337_v25 = vld [vmem:[%s13610_s27 + $0x248] sm:$0xff]  ;;  %v11142_v6 = vcombine.low %v6473_v26, %v6477_v38 }
 0x861   : > { %7900 = vmatprep.subr.bf16.mxu0 %v10935_v5  ;;  %7943 = vmatprep.subr.bf16.mxu1 %v11063_v34  ;;  %v6341_v44 = vld [vmem:[%s13610_s27 + $0x268] sm:$0xff] }
 0x862   : > { %v6465_v5 = vld [vmem:[%s13610_s27 + $0x648] sm:$0xff]  ;;  %v11007_v33 = vcombine.high %v6337_v25, %v6341_v44  ;;  %v11006_v13 = vcombine.low %v6337_v25, %v6341_v44 }
 0x863   : > { %v6469_v34 = vld [vmem:[%s13610_s27 + $0x668] sm:$0xff] }
 0x864   : > { %7901 = vmatpush1.bf16.msra.mxu0 %v10934_v14  ;;  %7944 = vmatpush1.bf16.msra.mxu1 %v11062_v41  ;;  %v11135_v22 = vcombine.high %v6465_v5, %v6469_v34  ;;  %v6329_v14 = vld [vmem:[%s13610_s27 + $0x208] sm:$0xff]  ;;  %v11134_v47 = vcombine.low %v6465_v5, %v6469_v34 }
 0x865   : > { %7902 = vmatprep.subr.bf16.mxu0 %v11055_v12  ;;  %7945 = vmatprep.subr.bf16.mxu1 %v11183_v63  ;;  %v6333_v41 = vld [vmem:[%s13610_s27 + $0x228] sm:$0xff] }
 0x866   : > { %v6457_v12 = vld [vmem:[%s13610_s27 + $0x608] sm:$0xff]  ;;  %v10999_v29 = vcombine.high %v6329_v14, %v6333_v41  ;;  %v10998_v50 = vcombine.low %v6329_v14, %v6333_v41 }
 0x867   : > { %v6461_v63 = vld [vmem:[%s13610_s27 + $0x628] sm:$0xff] }
 0x868   : > { %7903 = vmatpush2.bf16.msra.mxu0 %v11054_v0  ;;  %7946 = vmatpush2.bf16.msra.mxu1 %v11182_v51  ;;  %v11127_v53 = vcombine.high %v6457_v12, %v6461_v63  ;;  %v6322_v0 = vld [vmem:[%s13610_s27 + $0x1d0] sm:$0xff]  ;;  %v11126_v48 = vcombine.low %v6457_v12, %v6461_v63 }
 0x869   : > { %7904 = vmatprep.subr.bf16.mxu0 %v11047_v49  ;;  %7947 = vmatprep.subr.bf16.mxu1 %v11175_v8  ;;  %v6326_v51 = vld [vmem:[%s13610_s27 + $0x1f0] sm:$0xff] }
 0x86a   : > { %v6450_v49 = vld [vmem:[%s13610_s27 + $0x5d0] sm:$0xff]  ;;  %v10993_v17 = vcombine.high %v6322_v0, %v6326_v51  ;;  %v10992_v31 = vcombine.low %v6322_v0, %v6326_v51 }
 0x86b   : > { %v6454_v8 = vld [vmem:[%s13610_s27 + $0x5f0] sm:$0xff] }
 0x86c   : > { %7905 = vmatpush2.bf16.msra.mxu0 %v11046_v21  ;;  %7948 = vmatpush2.bf16.msra.mxu1 %v11174_v39  ;;  %v11121_v37 = vcombine.high %v6450_v49, %v6454_v8  ;;  %v6314_v21 = vld [vmem:[%s13610_s27 + $0x190] sm:$0xff]  ;;  %v11120_v45 = vcombine.low %v6450_v49, %v6454_v8 }
 0x86d   : > { %7906 = vmatprep.subr.bf16.mxu0 %v11039_v2  ;;  %7949 = vmatprep.subr.bf16.mxu1 %v11167_v40  ;;  %v6318_v39 = vld [vmem:[%s13610_s27 + $0x1b0] sm:$0xff] }
 0x86e   : > { %v6442_v2 = vld [vmem:[%s13610_s27 + $0x590] sm:$0xff]  ;;  %v10985_v7 = vcombine.high %v6314_v21, %v6318_v39  ;;  %v10984_v30 = vcombine.low %v6314_v21, %v6318_v39 }
 0x86f   : > { %v6446_v40 = vld [vmem:[%s13610_s27 + $0x5b0] sm:$0xff] }
 0x870   : > { %7907 = vmatpush2.bf16.msra.mxu0 %v11038_v54  ;;  %7950 = vmatpush2.bf16.msra.mxu1 %v11166_v36  ;;  %v11113_v20 = vcombine.high %v6442_v2, %v6446_v40  ;;  %v6306_v54 = vld [vmem:[%s13610_s27 + $0x150] sm:$0xff]  ;;  %v11112_v56 = vcombine.low %v6442_v2, %v6446_v40 }
 0x871   : > { %7908 = vmatprep.subr.bf16.mxu0 %v11031_v27  ;;  %7951 = vmatprep.subr.bf16.mxu1 %v11159_v23  ;;  %v6310_v36 = vld [vmem:[%s13610_s27 + $0x170] sm:$0xff] }
 0x872   : > { %v6434_v27 = vld [vmem:[%s13610_s27 + $0x550] sm:$0xff]  ;;  %v10977_v3 = vcombine.high %v6306_v54, %v6310_v36  ;;  %v10976_v58 = vcombine.low %v6306_v54, %v6310_v36 }
 0x873   : > { %v6438_v23 = vld [vmem:[%s13610_s27 + $0x570] sm:$0xff] }
 0x874   : > { %7909 = vmatpush2.bf16.msra.mxu0 %v11030_v46  ;;  %7952 = vmatpush2.bf16.msra.mxu1 %v11158_v52  ;;  %v11105_v61 = vcombine.high %v6434_v27, %v6438_v23  ;;  %v6298_v46 = vld [vmem:[%s13610_s27 + $0x110] sm:$0xff]  ;;  %v11104_v43 = vcombine.low %v6434_v27, %v6438_v23 }
 0x875   : > { %7910 = vmatprep.subr.bf16.mxu0 %v11023_v15  ;;  %7953 = vmatprep.subr.bf16.mxu1 %v11151_v57  ;;  %v6302_v52 = vld [vmem:[%s13610_s27 + $0x130] sm:$0xff] }
 0x876   : > { %v6426_v15 = vld [vmem:[%s13610_s27 + $0x510] sm:$0xff]  ;;  %v10969_v26 = vcombine.high %v6298_v46, %v6302_v52  ;;  %v10968_v25 = vcombine.low %v6298_v46, %v6302_v52 }
 0x877   : > { %v6430_v57 = vld [vmem:[%s13610_s27 + $0x530] sm:$0xff] }
 0x878   : > { %7911 = vmatpush2.bf16.msra.mxu0 %v11022_v60  ;;  %7954 = vmatpush2.bf16.msra.mxu1 %v11150_v10  ;;  %v11097_v38 = vcombine.high %v6426_v15, %v6430_v57  ;;  %v6290_v60 = vld [vmem:[%s13610_s27 + $0xd0] sm:$0xff]  ;;  %v11096_v44 = vcombine.low %v6426_v15, %v6430_v57 }
 0x879   : > { %7912 = vmatprep.subr.bf16.mxu0 %v11015_v42  ;;  %7955 = vmatprep.subr.bf16.mxu1 %v11143_v19  ;;  %v6294_v10 = vld [vmem:[%s13610_s27 + $0xf0] sm:$0xff] }
 0x87a   : > { %v6418_v42 = vld [vmem:[%s13610_s27 + $0x4d0] sm:$0xff]  ;;  %v10961_v5 = vcombine.high %v6290_v60, %v6294_v10  ;;  %v10960_v14 = vcombine.low %v6290_v60, %v6294_v10 }
 0x87b   : > { %v6422_v19 = vld [vmem:[%s13610_s27 + $0x4f0] sm:$0xff] }
 0x87c   : > { %7913 = vmatpush2.bf16.msra.mxu0 %v11014_v28  ;;  %7956 = vmatpush2.bf16.msra.mxu1 %v11142_v6  ;;  %v11089_v34 = vcombine.high %v6418_v42, %v6422_v19  ;;  %v6282_v28 = vld [vmem:[%s13610_s27 + $0x90] sm:$0xff]  ;;  %v11088_v41 = vcombine.low %v6418_v42, %v6422_v19 }
 0x87d   : > { %7914 = vmatprep.subr.bf16.mxu0 %v11007_v33  ;;  %7957 = vmatprep.subr.bf16.mxu1 %v11135_v22  ;;  %v6286_v6 = vld [vmem:[%s13610_s27 + $0xb0] sm:$0xff] }
 0x87e   : > { %v6410_v33 = vld [vmem:[%s13610_s27 + $0x490] sm:$0xff]  ;;  %v10953_v12 = vcombine.high %v6282_v28, %v6286_v6  ;;  %v10952_v0 = vcombine.low %v6282_v28, %v6286_v6 }
 0x87f   : > { %v6414_v22 = vld [vmem:[%s13610_s27 + $0x4b0] sm:$0xff] }
 0x880   : > { %7915 = vmatpush2.bf16.msra.mxu0 %v11006_v13  ;;  %7958 = vmatpush2.bf16.msra.mxu1 %v11134_v47  ;;  %v11081_v63 = vcombine.high %v6410_v33, %v6414_v22  ;;  %v6274_v13 = vld [vmem:[%s13610_s27 + $0x50] sm:$0xff]  ;;  %v11080_v51 = vcombine.low %v6410_v33, %v6414_v22 }
 0x881   : > { %7916 = vmatprep.subr.bf16.mxu0 %v10999_v29  ;;  %7959 = vmatprep.subr.bf16.mxu1 %v11127_v53  ;;  %v6278_v47 = vld [vmem:[%s13610_s27 + $0x70] sm:$0xff] }
 0x882   : > { %v6402_v29 = vld [vmem:[%s13610_s27 + $0x450] sm:$0xff]  ;;  %v10945_v49 = vcombine.high %v6274_v13, %v6278_v47  ;;  %v10944_v21 = vcombine.low %v6274_v13, %v6278_v47 }
 0x883   : > { %v6406_v53 = vld [vmem:[%s13610_s27 + $0x470] sm:$0xff] }
 0x884   : > { %7917 = vmatpush2.bf16.msra.mxu0 %v10998_v50  ;;  %7960 = vmatpush2.bf16.msra.mxu1 %v11126_v48  ;;  %v11073_v8 = vcombine.high %v6402_v29, %v6406_v53  ;;  %v6266_v50 = vld [vmem:[%s13610_s27 + $0x10] sm:$0xff]  ;;  %v11072_v39 = vcombine.low %v6402_v29, %v6406_v53 }
 0x885   : > { %7972 = vmatprep.subr.bf16.mxu0 %v10993_v17  ;;  %8015 = vmatprep.subr.bf16.mxu1 %v11121_v37  ;;  %v6270_v48 = vld [vmem:[%s13610_s27 + $0x30] sm:$0xff] }
 0x886   : > { %v6394_v17 = vld [vmem:[%s13610_s27 + $0x410] sm:$0xff]  ;;  %v10937_v2 = vcombine.high %v6266_v50, %v6270_v48  ;;  %v10936_v54 = vcombine.low %v6266_v50, %v6270_v48 }
 0x887   : > { %7919 = vmatmul.mubr.bf16.vlgmr.msra.gmra.mxu0 %v14848_v1  ;;  %7962 = vmatmul.mubr.bf16.vlgmr.msra.gmra.mxu1 %v14850_v24  ;;  %v6398_v37 = vld [vmem:[%s13610_s27 + $0x430] sm:$0xff] }
 0x888   : > { %7973 = vmatpush1.bf16.msra.mxu0 %v10992_v31  ;;  %8004 = vmatprep.mubr.bf16.mxu0 %v14844_v55  ;;  %v11065_v40 = vcombine.high %v6394_v17, %v6398_v37  ;;  %v6386_v31 = vld [vmem:[%s13610_s27 + $0x3d0] sm:$0xff]  ;;  %v11064_v36 = vcombine.low %v6394_v17, %v6398_v37 }
 0x889   : > { %8016 = vmatpush1.bf16.msra.mxu1 %v11120_v45  ;;  %8047 = vmatprep.mubr.bf16.mxu1 %v14846_v18  ;;  %v6390_v45 = vld [vmem:[%s13610_s27 + $0x3f0] sm:$0xff] }
 0x88a   : > { %7974 = vmatprep.subr.bf16.mxu0 %v10985_v7  ;;  %8017 = vmatprep.subr.bf16.mxu1 %v11113_v20  ;;  %v6514_v7 = vld [vmem:[%s13610_s27 + $0x7d0] sm:$0xff]  ;;  %v11057_v27 = vcombine.high %v6386_v31, %v6390_v45  ;;  %v11056_v46 = vcombine.low %v6386_v31, %v6390_v45 }
 0x88b   : > { %v6518_v20 = vld [vmem:[%s13610_s27 + $0x7f0] sm:$0xff] }
 0x88c   : > { %7975 = vmatpush1.bf16.msra.mxu0 %v10984_v30  ;;  %v11185_v23 = vcombine.high %v6514_v7, %v6518_v20  ;;  %v6378_v30 = vld [vmem:[%s13610_s27 + $0x390] sm:$0xff]  ;;  %v11184_v52 = vcombine.low %v6514_v7, %v6518_v20 }
 0x88d   : > { %8018 = vmatpush1.bf16.msra.mxu1 %v11112_v56  ;;  %7976 = vmatprep.subr.bf16.mxu0 %v10977_v3  ;;  %v6382_v56 = vld [vmem:[%s13610_s27 + $0x3b0] sm:$0xff] }
 0x88e   : > { %8019 = vmatprep.subr.bf16.mxu1 %v11105_v61  ;;  %v6506_v3 = vld [vmem:[%s13610_s27 + $0x790] sm:$0xff]  ;;  %v11049_v15 = vcombine.high %v6378_v30, %v6382_v56  ;;  %v11048_v60 = vcombine.low %v6378_v30, %v6382_v56 }
 0x88f   : > { %v6510_v61 = vld [vmem:[%s13610_s27 + $0x7b0] sm:$0xff] }
 0x890   : > { %7977 = vmatpush1.bf16.msra.mxu0 %v10976_v58  ;;  %v11177_v57 = vcombine.high %v6506_v3, %v6510_v61  ;;  %v6370_v58 = vld [vmem:[%s13610_s27 + $0x350] sm:$0xff]  ;;  %v11176_v10 = vcombine.low %v6506_v3, %v6510_v61 }
 0x891   : > { %8020 = vmatpush1.bf16.msra.mxu1 %v11104_v43  ;;  %7978 = vmatprep.subr.bf16.mxu0 %v10969_v26  ;;  %v6374_v43 = vld [vmem:[%s13610_s27 + $0x370] sm:$0xff] }
 0x892   : > { %8021 = vmatprep.subr.bf16.mxu1 %v11097_v38  ;;  %v6498_v26 = vld [vmem:[%s13610_s27 + $0x750] sm:$0xff]  ;;  %v11041_v42 = vcombine.high %v6370_v58, %v6374_v43  ;;  %v11040_v28 = vcombine.low %v6370_v58, %v6374_v43 }
 0x893   : > { %v6502_v38 = vld [vmem:[%s13610_s27 + $0x770] sm:$0xff] }
 0x894   : > { %7979 = vmatpush1.bf16.msra.mxu0 %v10968_v25  ;;  %v11169_v19 = vcombine.high %v6498_v26, %v6502_v38  ;;  %v6362_v25 = vld [vmem:[%s13610_s27 + $0x310] sm:$0xff]  ;;  %v11168_v6 = vcombine.low %v6498_v26, %v6502_v38 }
 0x895   : > { %8022 = vmatpush1.bf16.msra.mxu1 %v11096_v44  ;;  %7980 = vmatprep.subr.bf16.mxu0 %v10961_v5  ;;  %v6366_v44 = vld [vmem:[%s13610_s27 + $0x330] sm:$0xff] }
 0x896   : > { %8023 = vmatprep.subr.bf16.mxu1 %v11089_v34  ;;  %v6490_v5 = vld [vmem:[%s13610_s27 + $0x710] sm:$0xff]  ;;  %v11033_v33 = vcombine.high %v6362_v25, %v6366_v44  ;;  %v11032_v13 = vcombine.low %v6362_v25, %v6366_v44  ;;  %v6447_v25 = vld [vmem:[%s13610_s27 + $0x5b8] sm:$0xff] }
 0x897   : > { %v6494_v34 = vld [vmem:[%s13610_s27 + $0x730] sm:$0xff] }
 0x898   : > { %7981 = vmatpush1.bf16.msra.mxu0 %v10960_v14  ;;  %v11161_v22 = vcombine.high %v6490_v5, %v6494_v34  ;;  %v6354_v14 = vld [vmem:[%s13610_s27 + $0x2d0] sm:$0xff]  ;;  %v11160_v47 = vcombine.low %v6490_v5, %v6494_v34  ;;  %v6307_v34 = vld [vmem:[%s13610_s27 + $0x158] sm:$0xff] }
 0x899   : > { %8024 = vmatpush1.bf16.msra.mxu1 %v11088_v41  ;;  %7982 = vmatprep.subr.bf16.mxu0 %v10953_v12  ;;  %v6358_v41 = vld [vmem:[%s13610_s27 + $0x2f0] sm:$0xff] }
 0x89a   : > { %8025 = vmatprep.subr.bf16.mxu1 %v11081_v63  ;;  %v6482_v12 = vld [vmem:[%s13610_s27 + $0x6d0] sm:$0xff]  ;;  %v11025_v29 = vcombine.high %v6354_v14, %v6358_v41  ;;  %v11024_v50 = vcombine.low %v6354_v14, %v6358_v41 }
 0x89b   : > { %v6486_v63 = vld [vmem:[%s13610_s27 + $0x6f0] sm:$0xff] }
 0x89c   : > { %7983 = vmatpush1.bf16.msra.mxu0 %v10952_v0  ;;  %v11153_v53 = vcombine.high %v6482_v12, %v6486_v63  ;;  %v6346_v0 = vld [vmem:[%s13610_s27 + $0x290] sm:$0xff]  ;;  %v11152_v48 = vcombine.low %v6482_v12, %v6486_v63 }
 0x89d   : > { %8026 = vmatpush1.bf16.msra.mxu1 %v11080_v51  ;;  %7984 = vmatprep.subr.bf16.mxu0 %v10945_v49  ;;  %v6350_v51 = vld [vmem:[%s13610_s27 + $0x2b0] sm:$0xff] }
 0x89e   : > { %8027 = vmatprep.subr.bf16.mxu1 %v11073_v8  ;;  %v6474_v49 = vld [vmem:[%s13610_s27 + $0x690] sm:$0xff]  ;;  %v11017_v17 = vcombine.high %v6346_v0, %v6350_v51  ;;  %v11016_v31 = vcombine.low %v6346_v0, %v6350_v51 }
 0x89f   : > { %v6478_v8 = vld [vmem:[%s13610_s27 + $0x6b0] sm:$0xff] }
 0x8a0   : > { %7985 = vmatpush1.bf16.msra.mxu0 %v10944_v21  ;;  %v11145_v37 = vcombine.high %v6474_v49, %v6478_v8  ;;  %v6338_v21 = vld [vmem:[%s13610_s27 + $0x250] sm:$0xff]  ;;  %v11144_v45 = vcombine.low %v6474_v49, %v6478_v8  ;;  %v6291_v49 = vld [vmem:[%s13610_s27 + $0xd8] sm:$0xff] }
 0x8a1   : > { %8028 = vmatpush1.bf16.msra.mxu1 %v11072_v39  ;;  %7986 = vmatprep.subr.bf16.mxu0 %v10937_v2  ;;  %v6342_v39 = vld [vmem:[%s13610_s27 + $0x270] sm:$0xff]  ;;  %v6295_v8 = vld [vmem:[%s13610_s27 + $0xf8] sm:$0xff] }
 0x8a2   : > { %8029 = vmatprep.subr.bf16.mxu1 %v11065_v40  ;;  %v6466_v2 = vld [vmem:[%s13610_s27 + $0x650] sm:$0xff]  ;;  %v11009_v7 = vcombine.high %v6338_v21, %v6342_v39  ;;  %v11008_v30 = vcombine.low %v6338_v21, %v6342_v39  ;;  %v10963_v21 = vcombine.high %v6291_v49, %v6295_v8 }
 0x8a3   : > { %v6470_v40 = vld [vmem:[%s13610_s27 + $0x670] sm:$0xff] }
 0x8a4   : > { %7987 = vmatpush1.bf16.msra.mxu0 %v10936_v54  ;;  %v11137_v20 = vcombine.high %v6466_v2, %v6470_v40  ;;  %v6330_v54 = vld [vmem:[%s13610_s27 + $0x210] sm:$0xff]  ;;  %v11136_v56 = vcombine.low %v6466_v2, %v6470_v40  ;;  %v6283_v2 = vld [vmem:[%s13610_s27 + $0x98] sm:$0xff] }
 0x8a5   : > { %8030 = vmatpush1.bf16.msra.mxu1 %v11064_v36  ;;  %7988 = vmatprep.subr.bf16.mxu0 %v11057_v27  ;;  %v6334_v36 = vld [vmem:[%s13610_s27 + $0x230] sm:$0xff]  ;;  %v6287_v40 = vld [vmem:[%s13610_s27 + $0xb8] sm:$0xff] }
 0x8a6   : > { %8031 = vmatprep.subr.bf16.mxu1 %v11185_v23  ;;  %v6458_v27 = vld [vmem:[%s13610_s27 + $0x610] sm:$0xff]  ;;  %v11001_v3 = vcombine.high %v6330_v54, %v6334_v36  ;;  %v11000_v58 = vcombine.low %v6330_v54, %v6334_v36  ;;  %v10955_v54 = vcombine.high %v6283_v2, %v6287_v40 }
 0x8a7   : > { %v6462_v23 = vld [vmem:[%s13610_s27 + $0x630] sm:$0xff] }
 0x8a8   : > { %7989 = vmatpush2.bf16.msra.mxu0 %v11056_v46  ;;  %v11129_v61 = vcombine.high %v6458_v27, %v6462_v23  ;;  %v6323_v46 = vld [vmem:[%s13610_s27 + $0x1d8] sm:$0xff]  ;;  %v11128_v43 = vcombine.low %v6458_v27, %v6462_v23 }
 0x8a9   : > { %8032 = vmatpush2.bf16.msra.mxu1 %v11184_v52  ;;  %7990 = vmatprep.subr.bf16.mxu0 %v11049_v15  ;;  %v6327_v52 = vld [vmem:[%s13610_s27 + $0x1f8] sm:$0xff] }
 0x8aa   : > { %8033 = vmatprep.subr.bf16.mxu1 %v11177_v57  ;;  %v6451_v15 = vld [vmem:[%s13610_s27 + $0x5d8] sm:$0xff]  ;;  %v10995_v26 = vcombine.high %v6323_v46, %v6327_v52 }
 0x8ab   : > { %v6455_v57 = vld [vmem:[%s13610_s27 + $0x5f8] sm:$0xff] }
 0x8ac   : > { %7991 = vmatpush2.bf16.msra.mxu0 %v11048_v60  ;;  %v11123_v38 = vcombine.high %v6451_v15, %v6455_v57  ;;  %v6315_v60 = vld [vmem:[%s13610_s27 + $0x198] sm:$0xff]  ;;  %v11122_v44 = vcombine.low %v6451_v15, %v6455_v57 }
 0x8ad   : > { %8034 = vmatpush2.bf16.msra.mxu1 %v11176_v10  ;;  %7992 = vmatprep.subr.bf16.mxu0 %v11041_v42  ;;  %v6319_v10 = vld [vmem:[%s13610_s27 + $0x1b8] sm:$0xff]  ;;  %v10994_v42 = vcombine.low %v6323_v46, %v6327_v52 }
 0x8ae   : > { %8035 = vmatprep.subr.bf16.mxu1 %v11169_v19  ;;  %v6443_v19 = vld [vmem:[%s13610_s27 + $0x598] sm:$0xff]  ;;  %v10987_v5 = vcombine.high %v6315_v60, %v6319_v10  ;;  %v10986_v14 = vcombine.low %v6315_v60, %v6319_v10 }
 0x8af   : > { %v11114_v41 = vcombine.low %v6443_v19, %v6447_v25  ;;  %v6275_v27 = vld [vmem:[%s13610_s27 + $0x58] sm:$0xff] }
 0x8b0   : > { %7993 = vmatpush2.bf16.msra.mxu0 %v11040_v28  ;;  %v6311_v28 = vld [vmem:[%s13610_s27 + $0x178] sm:$0xff] }
 0x8b1   : > { %8036 = vmatpush2.bf16.msra.mxu1 %v11168_v6  ;;  %7994 = vmatprep.subr.bf16.mxu0 %v11033_v33  ;;  %v11115_v6 = vcombine.high %v6443_v19, %v6447_v25  ;;  %v6435_v33 = vld [vmem:[%s13610_s27 + $0x558] sm:$0xff]  ;;  %v10979_v12 = vcombine.high %v6307_v34, %v6311_v28  ;;  %v10978_v0 = vcombine.low %v6307_v34, %v6311_v28 }
 0x8b2   : > { %8037 = vmatprep.subr.bf16.mxu1 %v11161_v22  ;;  %v6439_v22 = vld [vmem:[%s13610_s27 + $0x578] sm:$0xff] }
 0x8b3   : > { %v11107_v63 = vcombine.high %v6435_v33, %v6439_v22  ;;  %v6279_v23 = vld [vmem:[%s13610_s27 + $0x78] sm:$0xff] }
 0x8b4   : > { %7995 = vmatpush2.bf16.msra.mxu0 %v11032_v13  ;;  %v6299_v13 = vld [vmem:[%s13610_s27 + $0x118] sm:$0xff]  ;;  %v10947_v46 = vcombine.high %v6275_v27, %v6279_v23 }
 0x8b5   : > { %8038 = vmatpush2.bf16.msra.mxu1 %v11160_v47  ;;  %7996 = vmatprep.subr.bf16.mxu0 %v11025_v29  ;;  %v6303_v47 = vld [vmem:[%s13610_s27 + $0x138] sm:$0xff] }
 0x8b6   : > { %8039 = vmatprep.subr.bf16.mxu1 %v11153_v53  ;;  %v6427_v29 = vld [vmem:[%s13610_s27 + $0x518] sm:$0xff]  ;;  %v10971_v51 = vcombine.high %v6299_v13, %v6303_v47 }
 0x8b7   : > { %v6431_v53 = vld [vmem:[%s13610_s27 + $0x538] sm:$0xff] }
 0x8b8   : > { %7997 = vmatpush2.bf16.msra.mxu0 %v11024_v50  ;;  %v6419_v50 = vld [vmem:[%s13610_s27 + $0x4d8] sm:$0xff] }
 0x8b9   : > { %8040 = vmatpush2.bf16.msra.mxu1 %v11152_v48  ;;  %7998 = vmatprep.subr.bf16.mxu0 %v11017_v17  ;;  %v6423_v48 = vld [vmem:[%s13610_s27 + $0x4f8] sm:$0xff]  ;;  %v10970_v17 = vcombine.low %v6299_v13, %v6303_v47 }
 0x8ba   : > { %8041 = vmatprep.subr.bf16.mxu1 %v11145_v37  ;;  %v11098_v37 = vcombine.low %v6427_v29, %v6431_v53  ;;  %v11091_v39 = vcombine.high %v6419_v50, %v6423_v48  ;;  %v6267_v15 = vld [vmem:[%s13610_s27 + $0x18] sm:$0xff] }
 0x8bb   : > { %v6271_v57 = vld [vmem:[%s13610_s27 + $0x38] sm:$0xff] }
 0x8bc   : > { %7999 = vmatpush2.bf16.msra.mxu0 %v11016_v31  ;;  %v6411_v31 = vld [vmem:[%s13610_s27 + $0x498] sm:$0xff]  ;;  %v10939_v60 = vcombine.high %v6267_v15, %v6271_v57 }
 0x8bd   : > { %8042 = vmatpush2.bf16.msra.mxu1 %v11144_v45  ;;  %8000 = vmatprep.subr.bf16.mxu0 %v11009_v7  ;;  %v6415_v45 = vld [vmem:[%s13610_s27 + $0x4b8] sm:$0xff]  ;;  %v10962_v7 = vcombine.low %v6291_v49, %v6295_v8 }
 0x8be   : > { %8043 = vmatprep.subr.bf16.mxu1 %v11137_v20  ;;  %v11090_v20 = vcombine.low %v6419_v50, %v6423_v48  ;;  %v11083_v36 = vcombine.high %v6411_v31, %v6415_v45  ;;  %v6391_v19 = vld [vmem:[%s13610_s27 + $0x3f8] sm:$0xff] }
 0x8bf   : > { %v6515_v25 = vld [vmem:[%s13610_s27 + $0x7d8] sm:$0xff] }
 0x8c0   : > { %8001 = vmatpush2.bf16.msra.mxu0 %v11008_v30  ;;  %v6403_v30 = vld [vmem:[%s13610_s27 + $0x458] sm:$0xff] }
 0x8c1   : > { %8044 = vmatpush2.bf16.msra.mxu1 %v11136_v56  ;;  %8002 = vmatprep.subr.bf16.mxu0 %v11001_v3  ;;  %v6407_v56 = vld [vmem:[%s13610_s27 + $0x478] sm:$0xff]  ;;  %v10954_v3 = vcombine.low %v6283_v2, %v6287_v40 }
 0x8c2   : > { %8045 = vmatprep.subr.bf16.mxu1 %v11129_v61  ;;  %v11082_v61 = vcombine.low %v6411_v31, %v6415_v45  ;;  %v11075_v52 = vcombine.high %v6403_v30, %v6407_v56  ;;  %v6363_v50 = vld [vmem:[%s13610_s27 + $0x318] sm:$0xff] }
 0x8c3   : > { %v6367_v48 = vld [vmem:[%s13610_s27 + $0x338] sm:$0xff] }
 0x8c4   : > { %8003 = vmatpush2.bf16.msra.mxu0 %v11000_v58  ;;  %v6395_v58 = vld [vmem:[%s13610_s27 + $0x418] sm:$0xff]  ;;  %v11035_v2 = vcombine.high %v6363_v50, %v6367_v48 }
 0x8c5   : > { %8046 = vmatpush2.bf16.msra.mxu1 %v11128_v43  ;;  %8058 = vmatprep.subr.bf16.mxu0 %v10995_v26  ;;  %v6399_v43 = vld [vmem:[%s13610_s27 + $0x438] sm:$0xff]  ;;  %v10946_v26 = vcombine.low %v6275_v27, %v6279_v23 }
 0x8c6   : > { %8101 = vmatprep.subr.bf16.mxu1 %v11123_v38  ;;  %v11074_v38 = vcombine.low %v6403_v30, %v6407_v56  ;;  %v11067_v10 = vcombine.high %v6395_v58, %v6399_v43  ;;  %v11066_v34 = vcombine.low %v6395_v58, %v6399_v43  ;;  %v6355_v31 = vld [vmem:[%s13610_s27 + $0x2d8] sm:$0xff] }
 0x8c7   : > { %8005 = vmatmul.mubr.bf16.vlgmr.msra.gmra.mxu0 %v14848_v1  ;;  %v6359_v45 = vld [vmem:[%s13610_s27 + $0x2f8] sm:$0xff] }
 0x8c8   : > { %8048 = vmatmul.mubr.bf16.vlgmr.msra.gmra.mxu1 %v14850_v24  ;;  %8059 = vmatpush1.bf16.msra.mxu0 %v10994_v42  ;;  %v6387_v42 = vld [vmem:[%s13610_s27 + $0x3d8] sm:$0xff]  ;;  %v11027_v27 = vcombine.high %v6355_v31, %v6359_v45 }
 0x8c9   : > { %8090 = vmatprep.mubr.bf16.mxu0 %v14844_v55  ;;  %8102 = vmatpush1.bf16.msra.mxu1 %v11122_v44  ;;  %v11106_v55 = vcombine.low %v6435_v33, %v6439_v22  ;;  %v6519_v44 = vld [vmem:[%s13610_s27 + $0x7f8] sm:$0xff]  ;;  %v11059_v28 = vcombine.high %v6387_v42, %v6391_v19 }
 0x8ca   : > { %8133 = vmatprep.mubr.bf16.mxu1 %v14846_v18  ;;  %8060 = vmatprep.subr.bf16.mxu0 %v10987_v5  ;;  %v11099_v18 = vcombine.high %v6427_v29, %v6431_v53  ;;  %v10938_v5 = vcombine.low %v6267_v15, %v6271_v57  ;;  %v6379_v33 = vld [vmem:[%s13610_s27 + $0x398] sm:$0xff] }
 0x8cb   : > { %8103 = vmatprep.subr.bf16.mxu1 %v11115_v6  ;;  %v11187_v6 = vcombine.high %v6515_v25, %v6519_v44  ;;  %v6383_v22 = vld [vmem:[%s13610_s27 + $0x3b8] sm:$0xff] }
 0x8cc   : > { %8061 = vmatpush1.bf16.msra.mxu0 %v10986_v14  ;;  %v6507_v14 = vld [vmem:[%s13610_s27 + $0x798] sm:$0xff]  ;;  %v11051_v13 = vcombine.high %v6379_v33, %v6383_v22 }
 0x8cd   : > { %8104 = vmatpush1.bf16.msra.mxu1 %v11114_v41  ;;  %8062 = vmatprep.subr.bf16.mxu0 %v10979_v12  ;;  %v6511_v41 = vld [vmem:[%s13610_s27 + $0x7b8] sm:$0xff]  ;;  %v11058_v12 = vcombine.low %v6387_v42, %v6391_v19 }
 0x8ce   : > { %8105 = vmatprep.subr.bf16.mxu1 %v11107_v63  ;;  %v11186_v63 = vcombine.low %v6515_v25, %v6519_v44  ;;  %v11179_v47 = vcombine.high %v6507_v14, %v6511_v41  ;;  %v6371_v29 = vld [vmem:[%s13610_s27 + $0x358] sm:$0xff] }
 0x8cf   : > { %v6375_v53 = vld [vmem:[%s13610_s27 + $0x378] sm:$0xff] }
 0x8d0   : > { %8063 = vmatpush1.bf16.msra.mxu0 %v10978_v0  ;;  %v6499_v0 = vld [vmem:[%s13610_s27 + $0x758] sm:$0xff]  ;;  %v11043_v49 = vcombine.high %v6371_v29, %v6375_v53 }
 0x8d1   : > { %8106 = vmatpush1.bf16.msra.mxu1 %v11106_v55  ;;  %8064 = vmatprep.subr.bf16.mxu0 %v10971_v51  ;;  %v6503_v55 = vld [vmem:[%s13610_s27 + $0x778] sm:$0xff]  ;;  %v11050_v51 = vcombine.low %v6379_v33, %v6383_v22 }
 0x8d2   : > { %8107 = vmatprep.subr.bf16.mxu1 %v11099_v18  ;;  %v11178_v18 = vcombine.low %v6507_v14, %v6511_v41  ;;  %v11171_v8 = vcombine.high %v6499_v0, %v6503_v55  ;;  %v6347_v30 = vld [vmem:[%s13610_s27 + $0x298] sm:$0xff] }
 0x8d3   : > { %v6351_v56 = vld [vmem:[%s13610_s27 + $0x2b8] sm:$0xff] }
 0x8d4   : > { %8065 = vmatpush1.bf16.msra.mxu0 %v10970_v17  ;;  %v6491_v17 = vld [vmem:[%s13610_s27 + $0x718] sm:$0xff]  ;;  %v11019_v15 = vcombine.high %v6347_v30, %v6351_v56 }
 0x8d5   : > { %8108 = vmatpush1.bf16.msra.mxu1 %v11098_v37  ;;  %8066 = vmatprep.subr.bf16.mxu0 %v10963_v21  ;;  %v6495_v37 = vld [vmem:[%s13610_s27 + $0x738] sm:$0xff]  ;;  %v11042_v21 = vcombine.low %v6371_v29, %v6375_v53  ;;  %v12505_v29 = vld [vmem:[%s13633_s24 + $0x2e0] ss:$16 sps:$4 sm:$0xff]   ;;  %v12513_v53 = vld [vmem:[%s13633_s24 + $0x2c4] ss:$16 sps:$4 sm:$0xff]  }
 0x8d6   : > { %8109 = vmatprep.subr.bf16.mxu1 %v11091_v39  ;;  %v11170_v39 = vcombine.low %v6499_v0, %v6503_v55  ;;  %v11163_v40 = vcombine.high %v6491_v17, %v6495_v37  ;;  %v6339_v58 = vld [vmem:[%s13610_s27 + $0x258] sm:$0xff] }
 0x8d7   : > { %v6343_v43 = vld [vmem:[%s13610_s27 + $0x278] sm:$0xff] }
 0x8d8   : > { %8067 = vmatpush1.bf16.msra.mxu0 %v10962_v7  ;;  %v6483_v7 = vld [vmem:[%s13610_s27 + $0x6d8] sm:$0xff]  ;;  %v11011_v42 = vcombine.high %v6339_v58, %v6343_v43 }
 0x8d9   : > { %8110 = vmatpush1.bf16.msra.mxu1 %v11090_v20  ;;  %8068 = vmatprep.subr.bf16.mxu0 %v10955_v54  ;;  %v6487_v20 = vld [vmem:[%s13610_s27 + $0x6f8] sm:$0xff]  ;;  %v11034_v54 = vcombine.low %v6363_v50, %v6367_v48  ;;  %v12511_v50 = vld [vmem:[%s13633_s24 + $0x2c0] ss:$16 sps:$4 sm:$0xff]  }
 0x8da   : > { %8111 = vmatprep.subr.bf16.mxu1 %v11083_v36  ;;  %v11162_v36 = vcombine.low %v6491_v17, %v6495_v37  ;;  %v11155_v23 = vcombine.high %v6483_v7, %v6487_v20  ;;  %v6331_v25 = vld [vmem:[%s13610_s27 + $0x218] sm:$0xff] }
 0x8db   : > { %v6335_v44 = vld [vmem:[%s13610_s27 + $0x238] sm:$0xff] }
 0x8dc   : > { %8069 = vmatpush1.bf16.msra.mxu0 %v10954_v3  ;;  %v6475_v3 = vld [vmem:[%s13610_s27 + $0x698] sm:$0xff]  ;;  %v11003_v33 = vcombine.high %v6331_v25, %v6335_v44  ;;  %v11002_v14 = vcombine.low %v6331_v25, %v6335_v44  ;;  %v12555_v25 = vld [vmem:[%s13633_s24 + $0x3e4] ss:$16 sps:$4 sm:$0xff]   ;;  %v12532_v44 = vld [vmem:[%s13633_s24 + $0x1e0] ss:$16 sps:$4 sm:$0xff]  }
 0x8dd   : > { %8112 = vmatpush1.bf16.msra.mxu1 %v11082_v61  ;;  %8070 = vmatprep.subr.bf16.mxu0 %v10947_v46  ;;  %v6479_v61 = vld [vmem:[%s13610_s27 + $0x6b8] sm:$0xff]  ;;  %v11026_v46 = vcombine.low %v6355_v31, %v6359_v45  ;;  %v12525_v45 = vld [vmem:[%s13633_s24 + $0x284] ss:$16 sps:$4 sm:$0xff]  }
 0x8de   : > { %8113 = vmatprep.subr.bf16.mxu1 %v11075_v52  ;;  %v11154_v52 = vcombine.low %v6483_v7, %v6487_v20  ;;  %v11147_v57 = vcombine.high %v6475_v3, %v6479_v61 }
 0x8e0   : > { %8071 = vmatpush1.bf16.msra.mxu0 %v10946_v26  ;;  %v6467_v26 = vld [vmem:[%s13610_s27 + $0x658] sm:$0xff] }
 0x8e1   : > { %8114 = vmatpush1.bf16.msra.mxu1 %v11074_v38  ;;  %8072 = vmatprep.subr.bf16.mxu0 %v10939_v60  ;;  %v6471_v38 = vld [vmem:[%s13610_s27 + $0x678] sm:$0xff]  ;;  %v11018_v60 = vcombine.low %v6347_v30, %v6351_v56  ;;  %v12531_v30 = vld [vmem:[%s13633_s24 + $0x264] ss:$16 sps:$4 sm:$0xff]   ;;  %v12508_v56 = vld [vmem:[%s13633_s24 + $0x60] ss:$16 sps:$4 sm:$0xff]  }
 0x8e2   : > { %8115 = vmatprep.subr.bf16.mxu1 %v11067_v10  ;;  %v11146_v10 = vcombine.low %v6475_v3, %v6479_v61  ;;  %v11139_v19 = vcombine.high %v6467_v26, %v6471_v38  ;;  %v12516_v3 = vld [vmem:[%s13633_s24 + $0x44] ss:$16 sps:$4 sm:$0xff]   ;;  %v12529_v61 = vld [vmem:[%s13633_s24 + $0x260] ss:$16 sps:$4 sm:$0xff]  }
 0x8e4   : > { %8073 = vmatpush1.bf16.msra.mxu0 %v10938_v5  ;;  %v6459_v5 = vld [vmem:[%s13610_s27 + $0x618] sm:$0xff] }
 0x8e5   : > { %8116 = vmatpush1.bf16.msra.mxu1 %v11066_v34  ;;  %8074 = vmatprep.subr.bf16.mxu0 %v11059_v28  ;;  %v6463_v34 = vld [vmem:[%s13610_s27 + $0x638] sm:$0xff]  ;;  %v11010_v28 = vcombine.low %v6339_v58, %v6343_v43  ;;  %v12543_v58 = vld [vmem:[%s13633_s24 + $0x224] ss:$16 sps:$4 sm:$0xff]   ;;  %v12520_v43 = vld [vmem:[%s13633_s24 + $0x20] ss:$16 sps:$4 sm:$0xff]   ;;  %s15507_s27 = sld [smem:[#allocation29_spill]] (!%p11444_p12) }
 0x8e6   : > { %8117 = vmatprep.subr.bf16.mxu1 %v11187_v6  ;;  %v11138_v6 = vcombine.low %v6467_v26, %v6471_v38  ;;  %v11131_v22 = vcombine.high %v6459_v5, %v6463_v34  ;;  %v11130_v41 = vcombine.low %v6459_v5, %v6463_v34  ;;  %v12528_v26 = vld [vmem:[%s13633_s24 + $0x4] ss:$16 sps:$4 sm:$0xff]   ;;  %v12541_v38 = vld [vmem:[%s13633_s24 + $0x220] ss:$16 sps:$4 sm:$0xff]  }
 0x8e7   : > { %v12540_v5 = vld [vmem:[%s13633_s24 + $0x1c4] ss:$16 sps:$4 sm:$0xff]   ;;  %v12553_v34 = vld [vmem:[%s13633_s24 + $0x3e0] ss:$16 sps:$4 sm:$0xff]  }
 0x8e8   : > { %8075 = vmatpush2.bf16.msra.mxu0 %v11058_v12  ;;  %v12495_v12 = vld [vmem:[%s13633_s24 + $0xe4] ss:$16 sps:$4 sm:$0xff]  }
 0x8e9   : > { %8118 = vmatpush2.bf16.msra.mxu1 %v11186_v63  ;;  %8076 = vmatprep.subr.bf16.mxu0 %v11051_v13  ;;  %v12507_v63 = vld [vmem:[%s13633_s24 + $0x2e4] ss:$16 sps:$4 sm:$0xff]   ;;  %v12493_v13 = vld [vmem:[%s13633_s24 + $0xe0] ss:$16 sps:$4 sm:$0xff]  }
 0x8ea   : > { %8119 = vmatprep.subr.bf16.mxu1 %v11179_v47  ;;  %v12498_v47 = vld [vmem:[%s13633_s24 + $0xc4] ss:$16 sps:$4 sm:$0xff]  }
 0x8ec   : > { %8077 = vmatpush2.bf16.msra.mxu0 %v11050_v51  ;;  %v12496_v51 = vld [vmem:[%s13633_s24 + $0xc0] ss:$16 sps:$4 sm:$0xff]  }
 0x8ed   : > { %8120 = vmatpush2.bf16.msra.mxu1 %v11178_v18  ;;  %8078 = vmatprep.subr.bf16.mxu0 %v11043_v49 }
 0x8ee   : > { %8121 = vmatprep.subr.bf16.mxu1 %v11171_v8  ;;  %v12501_v8 = vld [vmem:[%s13633_s24 + $0xa4] ss:$16 sps:$4 sm:$0xff]  }
 0x8f0   : > { %8079 = vmatpush2.bf16.msra.mxu0 %v11042_v21 }
 0x8f1   : > { %8122 = vmatpush2.bf16.msra.mxu1 %v11170_v39  ;;  %8080 = vmatprep.subr.bf16.mxu0 %v11035_v2  ;;  %v12504_v2 = vld [vmem:[%s13633_s24 + $0x84] ss:$16 sps:$4 sm:$0xff]  }
 0x8f2   : > { %8123 = vmatprep.subr.bf16.mxu1 %v11163_v40  ;;  %v12517_v40 = vld [vmem:[%s13633_s24 + $0x2a0] ss:$16 sps:$4 sm:$0xff]  }
 0x8f4   : > { %8081 = vmatpush2.bf16.msra.mxu0 %v11034_v54  ;;  %v12502_v54 = vld [vmem:[%s13633_s24 + $0x80] ss:$16 sps:$4 sm:$0xff]  }
 0x8f5   : > { %8124 = vmatpush2.bf16.msra.mxu1 %v11162_v36  ;;  %8082 = vmatprep.subr.bf16.mxu0 %v11027_v27  ;;  %v12510_v36 = vld [vmem:[%s13633_s24 + $0x64] ss:$16 sps:$4 sm:$0xff]   ;;  %v12523_v27 = vld [vmem:[%s13633_s24 + $0x280] ss:$16 sps:$4 sm:$0xff]  }
 0x8f6   : > { %8125 = vmatprep.subr.bf16.mxu1 %v11155_v23 }
 0x8f8   : > { %8083 = vmatpush2.bf16.msra.mxu0 %v11026_v46  ;;  %v12537_v46 = vld [vmem:[%s13633_s24 + $0x244] ss:$16 sps:$4 sm:$0xff]  }
 0x8f9   : > { %8126 = vmatpush2.bf16.msra.mxu1 %v11154_v52  ;;  %8084 = vmatprep.subr.bf16.mxu0 %v11019_v15  ;;  %v12514_v52 = vld [vmem:[%s13633_s24 + $0x40] ss:$16 sps:$4 sm:$0xff]   ;;  %v12522_v15 = vld [vmem:[%s13633_s24 + $0x24] ss:$16 sps:$4 sm:$0xff]  }
 0x8fa   : > { %8127 = vmatprep.subr.bf16.mxu1 %v11147_v57  ;;  %v12535_v57 = vld [vmem:[%s13633_s24 + $0x240] ss:$16 sps:$4 sm:$0xff]  }
 0x8fc   : > { %8085 = vmatpush2.bf16.msra.mxu0 %v11018_v60  ;;  %v12549_v60 = vld [vmem:[%s13633_s24 + $0x204] ss:$16 sps:$4 sm:$0xff]  }
 0x8fd   : > { %8128 = vmatpush2.bf16.msra.mxu1 %v11146_v10  ;;  %8086 = vmatprep.subr.bf16.mxu0 %v11011_v42  ;;  %v12526_v10 = vld [vmem:[%s13633_s24] ss:$16 sps:$4 sm:$0xff]   ;;  %v12534_v42 = vld [vmem:[%s13633_s24 + $0x1e4] ss:$16 sps:$4 sm:$0xff]  }
 0x8fe   : > { %8129 = vmatprep.subr.bf16.mxu1 %v11139_v19  ;;  %v12547_v19 = vld [vmem:[%s13633_s24 + $0x200] ss:$16 sps:$4 sm:$0xff]  }
 0x900   : > { %8087 = vmatpush2.bf16.msra.mxu0 %v11010_v28  ;;  %v12561_v28 = vld [vmem:[%s13633_s24 + $0x3c4] ss:$16 sps:$4 sm:$0xff]  }
 0x901   : > { %8130 = vmatpush2.bf16.msra.mxu1 %v11138_v6  ;;  %8088 = vmatprep.subr.bf16.mxu0 %v11003_v33  ;;  %v12538_v6 = vld [vmem:[%s13633_s24 + $0x1c0] ss:$16 sps:$4 sm:$0xff]   ;;  %v12546_v33 = vld [vmem:[%s13633_s24 + $0x1a4] ss:$16 sps:$4 sm:$0xff]  }
 0x902   : > { %8131 = vmatprep.subr.bf16.mxu1 %v11131_v22  ;;  %v12559_v22 = vld [vmem:[%s13633_s24 + $0x3c0] ss:$16 sps:$4 sm:$0xff]  }
 0x904   : > { %8089 = vmatpush2.bf16.msra.mxu0 %v11002_v14  ;;  %v12567_v14 = vld [vmem:[%s13633_s24 + $0x3a4] ss:$16 sps:$4 sm:$0xff]  }
 0x905   : > { %8132 = vmatpush2.bf16.msra.mxu1 %v11130_v41  ;;  %9704 = vmatprep.subr.bf16.mxu0 %v12495_v12  ;;  %v12544_v41 = vld [vmem:[%s13633_s24 + $0x1a0] ss:$16 sps:$4 sm:$0xff]   ;;  %v12552_v12 = vld [vmem:[%s13633_s24 + $0x184] ss:$16 sps:$4 sm:$0xff]  }
 0x906   : > { %9747 = vmatprep.subr.bf16.mxu1 %v12507_v63  ;;  %v12565_v63 = vld [vmem:[%s13633_s24 + $0x3a0] ss:$16 sps:$4 sm:$0xff]  }
 0x907   : > { %8091 = vmatmul.mubr.bf16.vlgmr.msra.gmra.mxu0 %v14848_v1  ;;  %v15057_v0 = vpop.f32.mrf.mxu0  ;;  %v15059_v55 = vpop.f32.mrf.mxu1  ;;  %v12519_v1 = vld [vmem:[%s13633_s24 + $0x2a4] ss:$16 sps:$4 sm:$0xff]  }
 0x908   : > { %8134 = vmatmul.mubr.bf16.vlgmr.msra.gmra.mxu1 %v14850_v24  ;;  %9705 = vmatpush1.bf16.msra.mxu0 %v12493_v13  ;;  %v12499_v24 = vld [vmem:[%s13633_s24 + $0xa0] ss:$16 sps:$4 sm:$0xff]   ;;  %v12573_v13 = vld [vmem:[%s13633_s24 + $0x384] ss:$16 sps:$4 sm:$0xff]  }
 0x909   : > { %v7836_v18 = vpop.f32.mrf.mxu0  ;;  %v7879_v49 = vpop.f32.mrf.mxu1  ;;  %9706 = vmatprep.subr.bf16.mxu0 %v12498_v47  ;;  %9748 = vmatpush1.bf16.msra.mxu1 %v12505_v29  ;;  %v12550_v47 = vld [vmem:[%s13633_s24 + $0x180] ss:$16 sps:$4 sm:$0xff]   ;;  %v12558_v29 = vld [vmem:[%s13633_s24 + $0x164] ss:$16 sps:$4 sm:$0xff]  }
 0x90a   : > { %9749 = vmatprep.subr.bf16.mxu1 %v12513_v53  ;;  %v7880_v37 = vadd.f32 %v7879_v49, %v7836_v18  ;;  %v12571_v53 = vld [vmem:[%s13633_s24 + $0x380] ss:$16 sps:$4 sm:$0xff]   ;;  %v12564_v49 = vld [vmem:[%s13633_s24 + $0x144] ss:$16 sps:$4 sm:$0xff]  }
 0x90b   : > { %v15066_v48 = vpop.f32.mrf.mxu0  ;;  %v15068_v17 = vpop.f32.mrf.mxu1  ;;  %v12556_v18 = vld [vmem:[%s13633_s24 + $0x160] ss:$16 sps:$4 sm:$0xff]  }
 0x90c   : > { %9707 = vmatpush1.bf16.msra.mxu0 %v12496_v51  ;;  %v8145_v7 = vmax.f32 %v7880_v37, 0.0  ;;  %v12579_v51 = vld [vmem:[%s13633_s24 + $0x364] ss:$16 sps:$4 sm:$0xff]  }
 0x90d   : > { %v7840_v21 = vpop.f32.mrf.mxu0  ;;  %v7883_v39 = vpop.f32.mrf.mxu1  ;;  %9708 = vmatprep.subr.bf16.mxu0 %v12501_v8  ;;  %9750 = vmatpush1.bf16.msra.mxu1 %v12511_v50  ;;  %v12577_v8 = vld [vmem:[%s13633_s24 + $0x360] ss:$16 sps:$4 sm:$0xff]   ;;  %v12582_v50 = vld [vmem:[%s13633_s24 + $0x344] ss:$16 sps:$4 sm:$0xff]  }
 0x90e   : > { %v7884_v31 = vadd.f32 %v7883_v39, %v7840_v21  ;;  %9751 = vmatprep.subr.bf16.mxu1 %v12519_v1  ;;  %v12562_v1 = vld [vmem:[%s13633_s24 + $0x140] ss:$16 sps:$4 sm:$0xff]   ;;  %v12570_v37 = vld [vmem:[%s13633_s24 + $0x124] ss:$16 sps:$4 sm:$0xff]  }
 0x90f   : > { %v12585_v21 = vld [vmem:[%s13633_s24 + $0x324] ss:$16 sps:$4 sm:$0xff]   ;;  %v12568_v39 = vld [vmem:[%s13633_s24 + $0x120] ss:$16 sps:$4 sm:$0xff]  }
 0x910   : > { %v8153_v20 = vmax.f32 %v7884_v31, 0.0  ;;  %9709 = vmatpush1.bf16.msra.mxu0 %v12499_v24  ;;  %v12580_v24 = vld [vmem:[%s13633_s24 + $0x340] ss:$16 sps:$4 sm:$0xff]  }
 0x911   : > { %9710 = vmatprep.subr.bf16.mxu0 %v12504_v2  ;;  %9752 = vmatpush1.bf16.msra.mxu1 %v12517_v40  ;;  %v7882_v2 = vadd.f32 %v15068_v17, %v15066_v48  ;;  %v12576_v40 = vld [vmem:[%s13633_s24 + $0x104] ss:$16 sps:$4 sm:$0xff]   ;;  %v12583_v31 = vld [vmem:[%s13633_s24 + $0x320] ss:$16 sps:$4 sm:$0xff]  }
 0x912   : > { %v15077_v23 = vpack.c.bf16 %v8153_v20, %v8145_v7  ;;  %9753 = vmatprep.subr.bf16.mxu1 %v12525_v45  ;;  %v12588_v45 = vld [vmem:[%s13633_s24 + $0x304] ss:$16 sps:$4 sm:$0xff]   ;;  %v7878_v7 = vadd.f32 %v15059_v55, %v15057_v0  ;;  %v12574_v20 = vld [vmem:[%s13633_s24 + $0x100] ss:$16 sps:$4 sm:$0xff]  }
 0x913   : > { %v12591_v48 = vld [vmem:[%s13633_s24 + $0x4e4] ss:$16 sps:$4 sm:$0xff]  }
 0x914   : > { %9711 = vmatpush1.bf16.msra.mxu0 %v12502_v54  ;;  %9736 = vmatprep.mubr.bf16.mxu0 %v15077_v23  ;;  %v8152_v54 = vmax.f32 %v7882_v2, 0.0  ;;  %v12639_v17 = vld [vmem:[%s13633_s24 + $0x6e4] ss:$16 sps:$4 sm:$0xff]  }
 0x915   : > { %9712 = vmatprep.subr.bf16.mxu0 %v12510_v36  ;;  %9754 = vmatpush1.bf16.msra.mxu1 %v12523_v27  ;;  %v12586_v36 = vld [vmem:[%s13633_s24 + $0x300] ss:$16 sps:$4 sm:$0xff]   ;;  %v8144_v27 = vmax.f32 %v7878_v7, 0.0  ;;  %v12594_v0 = vld [vmem:[%s13633_s24 + $0x4c4] ss:$16 sps:$4 sm:$0xff]  }
 0x916   : > { %9755 = vmatprep.subr.bf16.mxu1 %v12531_v30  ;;  %v12589_v30 = vld [vmem:[%s13633_s24 + $0x4e0] ss:$16 sps:$4 sm:$0xff]   ;;  %v12669_v2 = vld [vmem:[%s13633_s24 + $0x644] ss:$16 sps:$4 sm:$0xff]  }
 0x917   : > { %v12675_v7 = vld [vmem:[%s13633_s24 + $0x624] ss:$16 sps:$4 sm:$0xff]  }
 0x918   : > { %9713 = vmatpush1.bf16.msra.mxu0 %v12508_v56  ;;  %v15134_v56 = vpack.c.bf16 %v8152_v54, %v8144_v27  ;;  %v12621_v54 = vld [vmem:[%s13633_s24 + $0x5a4] ss:$16 sps:$4 sm:$0xff]  }
 0x919   : > { %9714 = vmatprep.subr.bf16.mxu0 %v12516_v3  ;;  %9756 = vmatpush1.bf16.msra.mxu1 %v12529_v61  ;;  %v12592_v61 = vld [vmem:[%s13633_s24 + $0x4c0] ss:$16 sps:$4 sm:$0xff]   ;;  %v12624_v27 = vld [vmem:[%s13633_s24 + $0x584] ss:$16 sps:$4 sm:$0xff]  }
 0x91a   : > { %9757 = vmatprep.subr.bf16.mxu1 %v12537_v46 }
 0x91c   : > { %9715 = vmatpush1.bf16.msra.mxu0 %v12514_v52 }
 0x91d   : > { %9716 = vmatprep.subr.bf16.mxu0 %v12522_v15  ;;  %9758 = vmatpush1.bf16.msra.mxu1 %v12535_v57  ;;  %v12597_v15 = vld [vmem:[%s13633_s24 + $0x4a4] ss:$16 sps:$4 sm:$0xff]  }
 0x91e   : > { %9759 = vmatprep.subr.bf16.mxu1 %v12543_v58 }
 0x920   : > { %9717 = vmatpush1.bf16.msra.mxu0 %v12520_v43 }
 0x921   : > { %9718 = vmatprep.subr.bf16.mxu0 %v12528_v26  ;;  %9760 = vmatpush1.bf16.msra.mxu1 %v12541_v38  ;;  %v12595_v38 = vld [vmem:[%s13633_s24 + $0x4a0] ss:$16 sps:$4 sm:$0xff]  }
 0x922   : > { %9761 = vmatprep.subr.bf16.mxu1 %v12549_v60 }
 0x924   : > { %9719 = vmatpush1.bf16.msra.mxu0 %v12526_v10 }
 0x925   : > { %9720 = vmatprep.subr.bf16.mxu0 %v12534_v42  ;;  %9762 = vmatpush1.bf16.msra.mxu1 %v12547_v19  ;;  %v12600_v19 = vld [vmem:[%s13633_s24 + $0x484] ss:$16 sps:$4 sm:$0xff]  }
 0x926   : > { %9763 = vmatprep.subr.bf16.mxu1 %v12555_v25 }
 0x928   : > { %9721 = vmatpush2.bf16.msra.mxu0 %v12532_v44 }
 0x929   : > { %9722 = vmatprep.subr.bf16.mxu0 %v12540_v5  ;;  %9764 = vmatpush2.bf16.msra.mxu1 %v12553_v34 }
 0x92a   : > { %9765 = vmatprep.subr.bf16.mxu1 %v12561_v28  ;;  %v12598_v28 = vld [vmem:[%s13633_s24 + $0x480] ss:$16 sps:$4 sm:$0xff]  }
 0x92c   : > { %9723 = vmatpush2.bf16.msra.mxu0 %v12538_v6 }
 0x92d   : > { %9724 = vmatprep.subr.bf16.mxu0 %v12546_v33  ;;  %9766 = vmatpush2.bf16.msra.mxu1 %v12559_v22  ;;  %v12603_v33 = vld [vmem:[%s13633_s24 + $0x464] ss:$16 sps:$4 sm:$0xff]  }
 0x92e   : > { %9767 = vmatprep.subr.bf16.mxu1 %v12567_v14  ;;  %v12637_v14 = vld [vmem:[%s13633_s24 + $0x6e0] ss:$16 sps:$4 sm:$0xff]  }
 0x930   : > { %9725 = vmatpush2.bf16.msra.mxu0 %v12544_v41 }
 0x931   : > { %9726 = vmatprep.subr.bf16.mxu0 %v12552_v12  ;;  %9768 = vmatpush2.bf16.msra.mxu1 %v12565_v63  ;;  %v12645_v12 = vld [vmem:[%s13633_s24 + $0x6c4] ss:$16 sps:$4 sm:$0xff]   ;;  %v12601_v63 = vld [vmem:[%s13633_s24 + $0x460] ss:$16 sps:$4 sm:$0xff]  }
 0x932   : > { %9769 = vmatprep.subr.bf16.mxu1 %v12573_v13  ;;  %v12606_v13 = vld [vmem:[%s13633_s24 + $0x444] ss:$16 sps:$4 sm:$0xff]  }
 0x934   : > { %9727 = vmatpush2.bf16.msra.mxu0 %v12550_v47  ;;  %v12643_v47 = vld [vmem:[%s13633_s24 + $0x6c0] ss:$16 sps:$4 sm:$0xff]  }
 0x935   : > { %9728 = vmatprep.subr.bf16.mxu0 %v12558_v29  ;;  %9770 = vmatpush2.bf16.msra.mxu1 %v12571_v53  ;;  %v12651_v29 = vld [vmem:[%s13633_s24 + $0x6a4] ss:$16 sps:$4 sm:$0xff]   ;;  %v12604_v53 = vld [vmem:[%s13633_s24 + $0x440] ss:$16 sps:$4 sm:$0xff]  }
 0x936   : > { %9771 = vmatprep.subr.bf16.mxu1 %v12579_v51  ;;  %v12609_v51 = vld [vmem:[%s13633_s24 + $0x424] ss:$16 sps:$4 sm:$0xff]  }
 0x938   : > { %9729 = vmatpush2.bf16.msra.mxu0 %v12556_v18  ;;  %v12649_v18 = vld [vmem:[%s13633_s24 + $0x6a0] ss:$16 sps:$4 sm:$0xff]  }
 0x939   : > { %9730 = vmatprep.subr.bf16.mxu0 %v12564_v49  ;;  %9772 = vmatpush2.bf16.msra.mxu1 %v12577_v8  ;;  %v12657_v49 = vld [vmem:[%s13633_s24 + $0x684] ss:$16 sps:$4 sm:$0xff]   ;;  %v12607_v8 = vld [vmem:[%s13633_s24 + $0x420] ss:$16 sps:$4 sm:$0xff]  }
 0x93a   : > { %9773 = vmatprep.subr.bf16.mxu1 %v12582_v50  ;;  %v12612_v50 = vld [vmem:[%s13633_s24 + $0x404] ss:$16 sps:$4 sm:$0xff]  }
 0x93c   : > { %9731 = vmatpush2.bf16.msra.mxu0 %v12562_v1  ;;  %v12655_v1 = vld [vmem:[%s13633_s24 + $0x680] ss:$16 sps:$4 sm:$0xff]  }
 0x93d   : > { %9732 = vmatprep.subr.bf16.mxu0 %v12570_v37  ;;  %9774 = vmatpush2.bf16.msra.mxu1 %v12580_v24  ;;  %v12663_v37 = vld [vmem:[%s13633_s24 + $0x664] ss:$16 sps:$4 sm:$0xff]   ;;  %v12610_v24 = vld [vmem:[%s13633_s24 + $0x400] ss:$16 sps:$4 sm:$0xff]  }
 0x93e   : > { %9775 = vmatprep.subr.bf16.mxu1 %v12585_v21  ;;  %v12615_v21 = vld [vmem:[%s13633_s24 + $0x5e4] ss:$16 sps:$4 sm:$0xff]  }
 0x940   : > { %9733 = vmatpush2.bf16.msra.mxu0 %v12568_v39  ;;  %v12661_v39 = vld [vmem:[%s13633_s24 + $0x660] ss:$16 sps:$4 sm:$0xff]  }
 0x941   : > { %9734 = vmatprep.subr.bf16.mxu0 %v12576_v40  ;;  %9776 = vmatpush2.bf16.msra.mxu1 %v12583_v31  ;;  %v12613_v40 = vld [vmem:[%s13633_s24 + $0x5e0] ss:$16 sps:$4 sm:$0xff]   ;;  %v12618_v31 = vld [vmem:[%s13633_s24 + $0x5c4] ss:$16 sps:$4 sm:$0xff]  }
 0x942   : > { %9777 = vmatprep.subr.bf16.mxu1 %v12588_v45  ;;  %v12667_v45 = vld [vmem:[%s13633_s24 + $0x640] ss:$16 sps:$4 sm:$0xff]  }
 0x944   : > { %9735 = vmatpush2.bf16.msra.mxu0 %v12574_v20  ;;  %v12616_v20 = vld [vmem:[%s13633_s24 + $0x5c0] ss:$16 sps:$4 sm:$0xff]  }
 0x945   : > { %9778 = vmatpush2.bf16.msra.mxu1 %v12586_v36  ;;  %9790 = vmatprep.subr.bf16.mxu0 %v12591_v48  ;;  %v12673_v36 = vld [vmem:[%s13633_s24 + $0x620] ss:$16 sps:$4 sm:$0xff]   ;;  %v12681_v48 = vld [vmem:[%s13633_s24 + $0x604] ss:$16 sps:$4 sm:$0xff]  }
 0x946   : > { %9833 = vmatprep.subr.bf16.mxu1 %v12639_v17  ;;  %v12619_v17 = vld [vmem:[%s13633_s24 + $0x5a0] ss:$16 sps:$4 sm:$0xff]  }
 0x947   : > { %v7920_v55 = vpop.f32.mrf.mxu0  ;;  %v7963_v3 = vpop.f32.mrf.mxu1  ;;  %9737 = vmatmul.mubr.bf16.vlgmr.msra.gmra.mxu0 %v15134_v56 }
 0x948   : > { %9791 = vmatpush1.bf16.msra.mxu0 %v12589_v30  ;;  %v7964_v60 = vadd.f32 %v7963_v3, %v7920_v55  ;;  %v12679_v30 = vld [vmem:[%s13633_s24 + $0x600] ss:$16 sps:$4 sm:$0xff]   ;;  %v12627_v3 = vld [vmem:[%s13633_s24 + $0x564] ss:$16 sps:$4 sm:$0xff]  }
 0x949   : > { %v7922_v46 = vpop.f32.mrf.mxu0  ;;  %v7965_v52 = vpop.f32.mrf.mxu1  ;;  %9792 = vmatprep.subr.bf16.mxu0 %v12594_v0  ;;  %v12687_v0 = vld [vmem:[%s13633_s24 + $0x7e4] ss:$16 sps:$4 sm:$0xff]   ;;  %v12622_v55 = vld [vmem:[%s13633_s24 + $0x580] ss:$16 sps:$4 sm:$0xff]  }
 0x94a   : > { %v7966_v43 = vadd.f32 %v7965_v52, %v7922_v46  ;;  %v8146_v6 = vmax.f32 %v7964_v60, 0.0  ;;  %v12693_v46 = vld [vmem:[%s13633_s24 + $0x7c4] ss:$16 sps:$4 sm:$0xff]   ;;  %v12625_v52 = vld [vmem:[%s13633_s24 + $0x560] ss:$16 sps:$4 sm:$0xff]  }
 0x94b   : > { %v7924_v57 = vpop.f32.mrf.mxu0  ;;  %v7967_v58 = vpop.f32.mrf.mxu1  ;;  %v12705_v60 = vld [vmem:[%s13633_s24 + $0x784] ss:$16 sps:$4 sm:$0xff]  }
 0x94c   : > { %v7968_v26 = vadd.f32 %v7967_v58, %v7924_v57  ;;  %9793 = vmatpush1.bf16.msra.mxu0 %v12592_v61  ;;  %v8147_v5 = vmax.f32 %v7966_v43, 0.0  ;;  %v12685_v61 = vld [vmem:[%s13633_s24 + $0x7e0] ss:$16 sps:$4 sm:$0xff]   ;;  %v12699_v58 = vld [vmem:[%s13633_s24 + $0x7a4] ss:$16 sps:$4 sm:$0xff]  }
 0x94d   : > { %v7926_v10 = vpop.f32.mrf.mxu0  ;;  %v7969_v42 = vpop.f32.mrf.mxu1  ;;  %9794 = vmatprep.subr.bf16.mxu0 %v12597_v15  ;;  %v12630_v15 = vld [vmem:[%s13633_s24 + $0x544] ss:$16 sps:$4 sm:$0xff]   ;;  %v12691_v57 = vld [vmem:[%s13633_s24 + $0x7c0] ss:$16 sps:$4 sm:$0xff]  }
 0x94e   : > { %v7970_v25 = vadd.f32 %v7969_v42, %v7926_v10  ;;  %v8154_v44 = vmax.f32 %v7968_v26, 0.0  ;;  %v12628_v43 = vld [vmem:[%s13633_s24 + $0x540] ss:$16 sps:$4 sm:$0xff]   ;;  %v12633_v26 = vld [vmem:[%s13633_s24 + $0x524] ss:$16 sps:$4 sm:$0xff]  }
 0x94f   : > { %v12631_v10 = vld [vmem:[%s13633_s24 + $0x520] ss:$16 sps:$4 sm:$0xff]   ;;  %v12636_v42 = vld [vmem:[%s13633_s24 + $0x504] ss:$16 sps:$4 sm:$0xff]  }
 0x950   : > { %v8155_v34 = vmax.f32 %v7970_v25, 0.0  ;;  %9795 = vmatpush1.bf16.msra.mxu0 %v12595_v38  ;;  %v15147_v41 = vpack.c.bf16 %v8154_v44, %v8146_v6  ;;  %v12697_v38 = vld [vmem:[%s13633_s24 + $0x7a0] ss:$16 sps:$4 sm:$0xff]   ;;  %v12711_v25 = vld [vmem:[%s13633_s24 + $0x764] ss:$16 sps:$4 sm:$0xff]  }
 0x951   : > { %9796 = vmatprep.subr.bf16.mxu0 %v12600_v19  ;;  %v12703_v19 = vld [vmem:[%s13633_s24 + $0x780] ss:$16 sps:$4 sm:$0xff]  }
 0x952   : > { %v15144_v22 = vpack.c.bf16 %v8155_v34, %v8147_v5  ;;  %v12634_v44 = vld [vmem:[%s13633_s24 + $0x500] ss:$16 sps:$4 sm:$0xff]   ;;  %v12642_v5 = vld [vmem:[%s13633_s24 + $0xec] ss:$16 sps:$4 sm:$0xff]  }
 0x953   : > { %v12709_v34 = vld [vmem:[%s13633_s24 + $0x760] ss:$16 sps:$4 sm:$0xff]  }
 0x954   : > { %9779 = vmatprep.mubr.bf16.mxu1 %v15144_v22  ;;  %9797 = vmatpush1.bf16.msra.mxu0 %v12598_v28  ;;  %v12717_v28 = vld [vmem:[%s13633_s24 + $0x744] ss:$16 sps:$4 sm:$0xff]   ;;  %v12715_v6 = vld [vmem:[%s13633_s24 + $0x740] ss:$16 sps:$4 sm:$0xff]  }
 0x955   : > { %9780 = vmatmul.mubr.bf16.vlgmr.msra.gmra.mxu1 %v15147_v41  ;;  %9798 = vmatprep.subr.bf16.mxu0 %v12603_v33 }
 0x956   : > { %9834 = vmatpush1.bf16.msra.mxu1 %v12637_v14  ;;  %v12723_v14 = vld [vmem:[%s13633_s24 + $0x724] ss:$16 sps:$4 sm:$0xff]  }
 0x957   : > { %9835 = vmatprep.subr.bf16.mxu1 %v12645_v12 }
 0x958   : > { %9799 = vmatpush1.bf16.msra.mxu0 %v12601_v63 }
 0x959   : > { %9800 = vmatprep.subr.bf16.mxu0 %v12606_v13 }
 0x95a   : > { %9836 = vmatpush1.bf16.msra.mxu1 %v12643_v47  ;;  %v12721_v47 = vld [vmem:[%s13633_s24 + $0x720] ss:$16 sps:$4 sm:$0xff]  }
 0x95b   : > { %9837 = vmatprep.subr.bf16.mxu1 %v12651_v29 }
 0x95c   : > { %9801 = vmatpush1.bf16.msra.mxu0 %v12604_v53  ;;  %v12729_v53 = vld [vmem:[%s13633_s24 + $0x704] ss:$16 sps:$4 sm:$0xff]  }
 0x95d   : > { %9802 = vmatprep.subr.bf16.mxu0 %v12609_v51 }
 0x95e   : > { %9838 = vmatpush1.bf16.msra.mxu1 %v12649_v18 }
 0x95f   : > { %9839 = vmatprep.subr.bf16.mxu1 %v12657_v49 }
 0x960   : > { %9803 = vmatpush1.bf16.msra.mxu0 %v12607_v8 }
 0x961   : > { %9804 = vmatprep.subr.bf16.mxu0 %v12612_v50 }
 0x962   : > { %9840 = vmatpush1.bf16.msra.mxu1 %v12655_v1 }
 0x963   : > { %9841 = vmatprep.subr.bf16.mxu1 %v12663_v37  ;;  %v12727_v37 = vld [vmem:[%s13633_s24 + $0x700] ss:$16 sps:$4 sm:$0xff]  }
 0x964   : > { %9805 = vmatpush1.bf16.msra.mxu0 %v12610_v24 }
 0x965   : > { %9806 = vmatprep.subr.bf16.mxu0 %v12615_v21  ;;  %v12735_v21 = vld [vmem:[%s13633_s24 + $0x2ec] ss:$16 sps:$4 sm:$0xff]  }
 0x966   : > { %9842 = vmatpush1.bf16.msra.mxu1 %v12661_v39 }
 0x967   : > { %9843 = vmatprep.subr.bf16.mxu1 %v12669_v2 }
 0x968   : > { %9807 = vmatpush2.bf16.msra.mxu0 %v12613_v40 }
 0x969   : > { %9808 = vmatprep.subr.bf16.mxu0 %v12618_v31 }
 0x96a   : > { %9844 = vmatpush1.bf16.msra.mxu1 %v12667_v45 }
 0x96b   : > { %9845 = vmatprep.subr.bf16.mxu1 %v12675_v7  ;;  %v12640_v7 = vld [vmem:[%s13633_s24 + $0xe8] ss:$16 sps:$4 sm:$0xff]  }
 0x96c   : > { %9809 = vmatpush2.bf16.msra.mxu0 %v12616_v20 }
 0x96d   : > { %9810 = vmatprep.subr.bf16.mxu0 %v12621_v54  ;;  %v12648_v54 = vld [vmem:[%s13633_s24 + $0xcc] ss:$16 sps:$4 sm:$0xff]  }
 0x96e   : > { %9846 = vmatpush1.bf16.msra.mxu1 %v12673_v36  ;;  %v12646_v36 = vld [vmem:[%s13633_s24 + $0xc8] ss:$16 sps:$4 sm:$0xff]  }
 0x96f   : > { %9847 = vmatprep.subr.bf16.mxu1 %v12681_v48  ;;  %v12654_v48 = vld [vmem:[%s13633_s24 + $0xac] ss:$16 sps:$4 sm:$0xff]  }
 0x970   : > { %9811 = vmatpush2.bf16.msra.mxu0 %v12619_v17  ;;  %v12652_v17 = vld [vmem:[%s13633_s24 + $0xa8] ss:$16 sps:$4 sm:$0xff]  }
 0x971   : > { %9812 = vmatprep.subr.bf16.mxu0 %v12624_v27  ;;  %v12660_v27 = vld [vmem:[%s13633_s24 + $0x8c] ss:$16 sps:$4 sm:$0xff]  }
 0x972   : > { %9848 = vmatpush1.bf16.msra.mxu1 %v12679_v30  ;;  %v12658_v30 = vld [vmem:[%s13633_s24 + $0x88] ss:$16 sps:$4 sm:$0xff]  }
 0x973   : > { %9849 = vmatprep.subr.bf16.mxu1 %v12687_v0  ;;  %v12666_v0 = vld [vmem:[%s13633_s24 + $0x6c] ss:$16 sps:$4 sm:$0xff]  }
 0x974   : > { %9813 = vmatpush2.bf16.msra.mxu0 %v12622_v55  ;;  %v12664_v55 = vld [vmem:[%s13633_s24 + $0x68] ss:$16 sps:$4 sm:$0xff]  }
 0x975   : > { %9814 = vmatprep.subr.bf16.mxu0 %v12627_v3  ;;  %v12670_v3 = vld [vmem:[%s13633_s24 + $0x48] ss:$16 sps:$4 sm:$0xff]  }
 0x976   : > { %9850 = vmatpush2.bf16.msra.mxu1 %v12685_v61  ;;  %v12678_v61 = vld [vmem:[%s13633_s24 + $0x2c] ss:$16 sps:$4 sm:$0xff]  }
 0x977   : > { %9851 = vmatprep.subr.bf16.mxu1 %v12693_v46  ;;  %v12676_v46 = vld [vmem:[%s13633_s24 + $0x28] ss:$16 sps:$4 sm:$0xff]  }
 0x978   : > { %9815 = vmatpush2.bf16.msra.mxu0 %v12625_v52  ;;  %v12684_v52 = vld [vmem:[%s13633_s24 + $0xc] ss:$16 sps:$4 sm:$0xff]  }
 0x979   : > { %9816 = vmatprep.subr.bf16.mxu0 %v12630_v15  ;;  %v12682_v15 = vld [vmem:[%s13633_s24 + $0x8] ss:$16 sps:$4 sm:$0xff]  }
 0x97a   : > { %9852 = vmatpush2.bf16.msra.mxu1 %v12691_v57  ;;  %v12690_v57 = vld [vmem:[%s13633_s24 + $0x1ec] ss:$16 sps:$4 sm:$0xff]  }
 0x97b   : > { %9853 = vmatprep.subr.bf16.mxu1 %v12699_v58  ;;  %v12688_v58 = vld [vmem:[%s13633_s24 + $0x1e8] ss:$16 sps:$4 sm:$0xff]  }
 0x97c   : > { %9817 = vmatpush2.bf16.msra.mxu0 %v12628_v43  ;;  %v12696_v43 = vld [vmem:[%s13633_s24 + $0x1cc] ss:$16 sps:$4 sm:$0xff]  }
 0x97d   : > { %9818 = vmatprep.subr.bf16.mxu0 %v12633_v26  ;;  %v12694_v26 = vld [vmem:[%s13633_s24 + $0x1c8] ss:$16 sps:$4 sm:$0xff]  }
 0x97e   : > { %9854 = vmatpush2.bf16.msra.mxu1 %v12697_v38  ;;  %v12702_v38 = vld [vmem:[%s13633_s24 + $0x1ac] ss:$16 sps:$4 sm:$0xff]  }
 0x97f   : > { %9855 = vmatprep.subr.bf16.mxu1 %v12705_v60  ;;  %v12700_v60 = vld [vmem:[%s13633_s24 + $0x1a8] ss:$16 sps:$4 sm:$0xff]  }
 0x980   : > { %9819 = vmatpush2.bf16.msra.mxu0 %v12631_v10  ;;  %v12708_v10 = vld [vmem:[%s13633_s24 + $0x18c] ss:$16 sps:$4 sm:$0xff]  }
 0x981   : > { %9820 = vmatprep.subr.bf16.mxu0 %v12636_v42  ;;  %v12706_v42 = vld [vmem:[%s13633_s24 + $0x188] ss:$16 sps:$4 sm:$0xff]  }
 0x982   : > { %9856 = vmatpush2.bf16.msra.mxu1 %v12703_v19  ;;  %v12714_v19 = vld [vmem:[%s13633_s24 + $0x16c] ss:$16 sps:$4 sm:$0xff]  }
 0x983   : > { %9857 = vmatprep.subr.bf16.mxu1 %v12711_v25  ;;  %v12712_v25 = vld [vmem:[%s13633_s24 + $0x168] ss:$16 sps:$4 sm:$0xff]  }
 0x984   : > { %9821 = vmatpush2.bf16.msra.mxu0 %v12634_v44  ;;  %v12720_v44 = vld [vmem:[%s13633_s24 + $0x14c] ss:$16 sps:$4 sm:$0xff]  }
 0x985   : > { %9876 = vmatprep.subr.bf16.mxu0 %v12642_v5 }
 0x986   : > { %9858 = vmatpush2.bf16.msra.mxu1 %v12709_v34  ;;  %v12718_v34 = vld [vmem:[%s13633_s24 + $0x148] ss:$16 sps:$4 sm:$0xff]  }
 0x987   : > { %v8006_v33 = vpop.f32.mrf.mxu0  ;;  %9859 = vmatprep.subr.bf16.mxu1 %v12717_v28 }
 0x988   : > { %v8049_v12 = vpop.f32.mrf.mxu1 }
 0x989   : > { %v8008_v63 = vpop.f32.mrf.mxu0  ;;  %v8050_v50 = vadd.f32 %v8049_v12, %v8006_v33 }
 0x98a   : > { %v8051_v13 = vpop.f32.mrf.mxu1  ;;  %9860 = vmatpush2.bf16.msra.mxu1 %v12715_v6  ;;  %v12726_v6 = vld [vmem:[%s13633_s24 + $0x12c] ss:$16 sps:$4 sm:$0xff]  }
 0x98b   : > { %v8010_v29 = vpop.f32.mrf.mxu0  ;;  %9861 = vmatprep.subr.bf16.mxu1 %v12723_v14  ;;  %v8052_v18 = vadd.f32 %v8051_v13, %v8008_v63  ;;  %v8148_v31 = vmax.f32 %v8050_v50, 0.0  ;;  %v12724_v63 = vld [vmem:[%s13633_s24 + $0x128] ss:$16 sps:$4 sm:$0xff]  }
 0x98c   : > { %v8053_v51 = vpop.f32.mrf.mxu1  ;;  %v12730_v50 = vld [vmem:[%s13633_s24 + $0x108] ss:$16 sps:$4 sm:$0xff]  }
 0x98d   : > { %v8054_v49 = vadd.f32 %v8053_v51, %v8010_v29  ;;  %v8012_v8 = vpop.f32.mrf.mxu0  ;;  %v8149_v2 = vmax.f32 %v8052_v18, 0.0 }
 0x98e   : > { %v8055_v1 = vpop.f32.mrf.mxu1  ;;  %9862 = vmatpush2.bf16.msra.mxu1 %v12721_v47  ;;  %v12732_v47 = vld [vmem:[%s13633_s24 + $0x10c] ss:$16 sps:$4 sm:$0xff]  }
 0x98f   : > { %v8056_v24 = vadd.f32 %v8055_v1, %v8012_v8  ;;  %9863 = vmatprep.subr.bf16.mxu1 %v12729_v53  ;;  %v8156_v39 = vmax.f32 %v8054_v49, 0.0 }
 0x991   : > { %v8157_v40 = vmax.f32 %v8056_v24, 0.0  ;;  %v15209_v20 = vpack.c.bf16 %v8156_v39, %v8148_v31  ;;  %v12736_v31 = vld [vmem:[%s13633_s24 + $0x4e8] ss:$16 sps:$4 sm:$0xff]  }
 0x992   : > { %9864 = vmatpush2.bf16.msra.mxu1 %v12727_v37  ;;  %v12738_v37 = vld [vmem:[%s13633_s24 + $0x4ec] ss:$16 sps:$4 sm:$0xff]  }
 0x993   : > { %v15206_v45 = vpack.c.bf16 %v8157_v40, %v8149_v2  ;;  %9919 = vmatprep.subr.bf16.mxu1 %v12735_v21  ;;  %v12733_v40 = vld [vmem:[%s13633_s24 + $0x2e8] ss:$16 sps:$4 sm:$0xff]  }
 0x995   : > { %9822 = vmatprep.mubr.bf16.mxu0 %v15206_v45 }
 0x996   : > { %9823 = vmatmul.mubr.bf16.vlgmr.msra.gmra.mxu0 %v15209_v20 }
 0x997   : > { %9877 = vmatpush1.bf16.msra.mxu0 %v12640_v7  ;;  %9908 = vmatprep.mubr.bf16.mxu0 %v15077_v23  ;;  %v12672_v23 = vld [vmem:[%s13633_s24 + $0x4c] ss:$16 sps:$4 sm:$0xff]  }
 0x998   : > { %9878 = vmatprep.subr.bf16.mxu0 %v12648_v54  ;;  %v12741_v54 = vld [vmem:[%s13633_s24 + $0x2cc] ss:$16 sps:$4 sm:$0xff]  }
 0x99b   : > { %9879 = vmatpush1.bf16.msra.mxu0 %v12646_v36  ;;  %v12744_v36 = vld [vmem:[%s13633_s24 + $0x4cc] ss:$16 sps:$4 sm:$0xff]  }
 0x99c   : > { %9880 = vmatprep.subr.bf16.mxu0 %v12654_v48  ;;  %v12739_v48 = vld [vmem:[%s13633_s24 + $0x2c8] ss:$16 sps:$4 sm:$0xff]  }
 0x99f   : > { %9881 = vmatpush1.bf16.msra.mxu0 %v12652_v17  ;;  %v12742_v17 = vld [vmem:[%s13633_s24 + $0x4c8] ss:$16 sps:$4 sm:$0xff]  }
 0x9a0   : > { %9882 = vmatprep.subr.bf16.mxu0 %v12660_v27  ;;  %v12747_v27 = vld [vmem:[%s13633_s24 + $0x2ac] ss:$16 sps:$4 sm:$0xff]  }
 0x9a3   : > { %9883 = vmatpush1.bf16.msra.mxu0 %v12658_v30  ;;  %v12750_v30 = vld [vmem:[%s13633_s24 + $0x4ac] ss:$16 sps:$4 sm:$0xff]  }
 0x9a4   : > { %9884 = vmatprep.subr.bf16.mxu0 %v12666_v0  ;;  %v12748_v0 = vld [vmem:[%s13633_s24 + $0x4a8] ss:$16 sps:$4 sm:$0xff]  }
 0x9a7   : > { %9885 = vmatpush1.bf16.msra.mxu0 %v12664_v55  ;;  %v12753_v55 = vld [vmem:[%s13633_s24 + $0x28c] ss:$16 sps:$4 sm:$0xff]  }
 0x9a8   : > { %9886 = vmatprep.subr.bf16.mxu0 %v12672_v23  ;;  %v12754_v23 = vld [vmem:[%s13633_s24 + $0x488] ss:$16 sps:$4 sm:$0xff]  }
 0x9ab   : > { %9887 = vmatpush1.bf16.msra.mxu0 %v12670_v3  ;;  %v12759_v3 = vld [vmem:[%s13633_s24 + $0x26c] ss:$16 sps:$4 sm:$0xff]  }
 0x9ac   : > { %9888 = vmatprep.subr.bf16.mxu0 %v12678_v61  ;;  %v12762_v61 = vld [vmem:[%s13633_s24 + $0x46c] ss:$16 sps:$4 sm:$0xff]  }
 0x9af   : > { %9889 = vmatpush1.bf16.msra.mxu0 %v12676_v46  ;;  %v12757_v46 = vld [vmem:[%s13633_s24 + $0x268] ss:$16 sps:$4 sm:$0xff]  }
 0x9b0   : > { %9890 = vmatprep.subr.bf16.mxu0 %v12684_v52  ;;  %v12760_v52 = vld [vmem:[%s13633_s24 + $0x468] ss:$16 sps:$4 sm:$0xff]  }
 0x9b3   : > { %9891 = vmatpush1.bf16.msra.mxu0 %v12682_v15  ;;  %v12765_v15 = vld [vmem:[%s13633_s24 + $0x24c] ss:$16 sps:$4 sm:$0xff]  }
 0x9b4   : > { %9892 = vmatprep.subr.bf16.mxu0 %v12690_v57  ;;  %v12768_v57 = vld [vmem:[%s13633_s24 + $0x44c] ss:$16 sps:$4 sm:$0xff]  }
 0x9b7   : > { %9893 = vmatpush2.bf16.msra.mxu0 %v12688_v58  ;;  %v12763_v58 = vld [vmem:[%s13633_s24 + $0x248] ss:$16 sps:$4 sm:$0xff]  }
 0x9b8   : > { %9894 = vmatprep.subr.bf16.mxu0 %v12696_v43  ;;  %v12766_v43 = vld [vmem:[%s13633_s24 + $0x448] ss:$16 sps:$4 sm:$0xff]  }
 0x9bb   : > { %9895 = vmatpush2.bf16.msra.mxu0 %v12694_v26  ;;  %v12771_v26 = vld [vmem:[%s13633_s24 + $0x22c] ss:$16 sps:$4 sm:$0xff]  }
 0x9bc   : > { %9896 = vmatprep.subr.bf16.mxu0 %v12702_v38  ;;  %v12774_v38 = vld [vmem:[%s13633_s24 + $0x42c] ss:$16 sps:$4 sm:$0xff]  }
 0x9bf   : > { %9897 = vmatpush2.bf16.msra.mxu0 %v12700_v60  ;;  %v12769_v60 = vld [vmem:[%s13633_s24 + $0x228] ss:$16 sps:$4 sm:$0xff]  }
 0x9c0   : > { %9898 = vmatprep.subr.bf16.mxu0 %v12708_v10  ;;  %v12772_v10 = vld [vmem:[%s13633_s24 + $0x428] ss:$16 sps:$4 sm:$0xff]  }
 0x9c3   : > { %9899 = vmatpush2.bf16.msra.mxu0 %v12706_v42  ;;  %v12777_v42 = vld [vmem:[%s13633_s24 + $0x20c] ss:$16 sps:$4 sm:$0xff]  }
 0x9c4   : > { %9900 = vmatprep.subr.bf16.mxu0 %v12714_v19  ;;  %v12780_v19 = vld [vmem:[%s13633_s24 + $0x40c] ss:$16 sps:$4 sm:$0xff]  }
 0x9c7   : > { %9901 = vmatpush2.bf16.msra.mxu0 %v12712_v25  ;;  %v8092_v5 = vpop.f32.mrf.mxu0  ;;  %v12775_v25 = vld [vmem:[%s13633_s24 + $0x208] ss:$16 sps:$4 sm:$0xff]  }
 0x9c8   : > { %v8135_v28 = vpop.f32.mrf.mxu1  ;;  %9902 = vmatprep.subr.bf16.mxu0 %v12720_v44  ;;  %v12778_v44 = vld [vmem:[%s13633_s24 + $0x408] ss:$16 sps:$4 sm:$0xff]  }
 0x9c9   : > { %v8094_v33 = vpop.f32.mrf.mxu0  ;;  %v8136_v18 = vadd.f32 %v8135_v28, %v8092_v5  ;;  %v12783_v5 = vld [vmem:[%s13633_s24 + $0x3ec] ss:$16 sps:$4 sm:$0xff]   ;;  %v12781_v28 = vld [vmem:[%s13633_s24 + $0x3e8] ss:$16 sps:$4 sm:$0xff]  }
 0x9ca   : > { %v8137_v14 = vpop.f32.mrf.mxu1 }
 0x9cb   : > { %9903 = vmatpush2.bf16.msra.mxu0 %v12718_v34  ;;  %v8096_v12 = vpop.f32.mrf.mxu0  ;;  %v8138_v29 = vadd.f32 %v8137_v14, %v8094_v33  ;;  %v8150_v39 = vmax.f32 %v8136_v18, 0.0  ;;  %v12786_v34 = vld [vmem:[%s13633_s24 + $0x5ec] ss:$16 sps:$4 sm:$0xff]  }
 0x9cc   : > { %v8139_v13 = vpop.f32.mrf.mxu1  ;;  %9904 = vmatprep.subr.bf16.mxu0 %v12726_v6  ;;  %v12784_v6 = vld [vmem:[%s13633_s24 + $0x5e8] ss:$16 sps:$4 sm:$0xff]   ;;  %v12789_v33 = vld [vmem:[%s13633_s24 + $0x3cc] ss:$16 sps:$4 sm:$0xff]  }
 0x9cd   : > { %v8140_v53 = vadd.f32 %v8139_v13, %v8096_v12  ;;  %v8098_v51 = vpop.f32.mrf.mxu0  ;;  %v8151_v24 = vmax.f32 %v8138_v29, 0.0  ;;  %v12792_v14 = vld [vmem:[%s13633_s24 + $0x5cc] ss:$16 sps:$4 sm:$0xff]   ;;  %v12787_v12 = vld [vmem:[%s13633_s24 + $0x3c8] ss:$16 sps:$4 sm:$0xff]  }
 0x9ce   : > { %v8141_v49 = vpop.f32.mrf.mxu1  ;;  %v12795_v13 = vld [vmem:[%s13633_s24 + $0x3ac] ss:$16 sps:$4 sm:$0xff]   ;;  %v12793_v29 = vld [vmem:[%s13633_s24 + $0x3a8] ss:$16 sps:$4 sm:$0xff]  }
 0x9cf   : > { %v8142_v8 = vadd.f32 %v8141_v49, %v8098_v51  ;;  %9905 = vmatpush2.bf16.msra.mxu0 %v12724_v63  ;;  %v8158_v1 = vmax.f32 %v8140_v53, 0.0  ;;  %v12790_v63 = vld [vmem:[%s13633_s24 + $0x5c8] ss:$16 sps:$4 sm:$0xff]   ;;  %v12801_v51 = vld [vmem:[%s13633_s24 + $0x38c] ss:$16 sps:$4 sm:$0xff]  }
 0x9d0   : > { %9906 = vmatprep.subr.bf16.mxu0 %v12732_v47  ;;  %v12798_v47 = vld [vmem:[%s13633_s24 + $0x5ac] ss:$16 sps:$4 sm:$0xff]   ;;  %v12796_v53 = vld [vmem:[%s13633_s24 + $0x5a8] ss:$16 sps:$4 sm:$0xff]  }
 0x9d1   : > { %v8159_v21 = vmax.f32 %v8142_v8, 0.0  ;;  %v15249_v7 = vpack.c.bf16 %v8158_v1, %v8150_v39  ;;  %v12804_v18 = vld [vmem:[%s13633_s24 + $0x58c] ss:$16 sps:$4 sm:$0xff]   ;;  %v12799_v49 = vld [vmem:[%s13633_s24 + $0x388] ss:$16 sps:$4 sm:$0xff]  }
 0x9d2   : > { %v12802_v8 = vld [vmem:[%s13633_s24 + $0x588] ss:$16 sps:$4 sm:$0xff]   ;;  %v12810_v1 = vld [vmem:[%s13633_s24 + $0x56c] ss:$16 sps:$4 sm:$0xff]  }
 0x9d3   : > { %v15245_v2 = vpack.c.bf16 %v8159_v21, %v8151_v24  ;;  %9907 = vmatpush2.bf16.msra.mxu0 %v12730_v50  ;;  %v12807_v50 = vld [vmem:[%s13633_s24 + $0x36c] ss:$16 sps:$4 sm:$0xff]   ;;  %v12808_v24 = vld [vmem:[%s13633_s24 + $0x568] ss:$16 sps:$4 sm:$0xff]  }
 0x9d4   : > { %9962 = vmatprep.subr.bf16.mxu0 %v12738_v37  ;;  %v12805_v37 = vld [vmem:[%s13633_s24 + $0x368] ss:$16 sps:$4 sm:$0xff]   ;;  %v12813_v21 = vld [vmem:[%s13633_s24 + $0x34c] ss:$16 sps:$4 sm:$0xff]  }
 0x9d5   : > { %9865 = vmatprep.mubr.bf16.mxu1 %v15245_v2  ;;  %v12816_v39 = vld [vmem:[%s13633_s24 + $0x54c] ss:$16 sps:$4 sm:$0xff]  }
 0x9d6   : > { %9909 = vmatmul.mubr.bf16.vlgmr.msra.gmra.mxu0 %v15134_v56  ;;  %9866 = vmatmul.mubr.bf16.vlgmr.msra.gmra.mxu1 %v15249_v7  ;;  %v12745_v56 = vld [vmem:[%s13633_s24 + $0x2a8] ss:$16 sps:$4 sm:$0xff]  }
 0x9d7   : > { %9920 = vmatpush1.bf16.msra.mxu1 %v12733_v40  ;;  %9963 = vmatpush1.bf16.msra.mxu0 %v12736_v31  ;;  %v12811_v40 = vld [vmem:[%s13633_s24 + $0x348] ss:$16 sps:$4 sm:$0xff]  }
 0x9d8   : > { %9994 = vmatprep.mubr.bf16.mxu0 %v15206_v45  ;;  %9951 = vmatprep.mubr.bf16.mxu1 %v15144_v22  ;;  %v12756_v45 = vld [vmem:[%s13633_s24 + $0x48c] ss:$16 sps:$4 sm:$0xff]   ;;  %v12751_v22 = vld [vmem:[%s13633_s24 + $0x288] ss:$16 sps:$4 sm:$0xff]  }
 0x9d9   : > { %9921 = vmatprep.subr.bf16.mxu1 %v12741_v54  ;;  %9964 = vmatprep.subr.bf16.mxu0 %v12744_v36  ;;  %v12814_v31 = vld [vmem:[%s13633_s24 + $0x548] ss:$16 sps:$4 sm:$0xff]   ;;  %v12819_v54 = vld [vmem:[%s13633_s24 + $0x32c] ss:$16 sps:$4 sm:$0xff]  }
 0x9da   : > { %v12822_v36 = vld [vmem:[%s13633_s24 + $0x52c] ss:$16 sps:$4 sm:$0xff]  }
 0x9db   : > { %9922 = vmatpush1.bf16.msra.mxu1 %v12739_v48  ;;  %9965 = vmatpush1.bf16.msra.mxu0 %v12742_v17  ;;  %v12817_v48 = vld [vmem:[%s13633_s24 + $0x328] ss:$16 sps:$4 sm:$0xff]  }
 0x9dc   : > { %9923 = vmatprep.subr.bf16.mxu1 %v12747_v27  ;;  %9966 = vmatprep.subr.bf16.mxu0 %v12750_v30  ;;  %v12820_v17 = vld [vmem:[%s13633_s24 + $0x528] ss:$16 sps:$4 sm:$0xff]   ;;  %v12825_v27 = vld [vmem:[%s13633_s24 + $0x30c] ss:$16 sps:$4 sm:$0xff]  }
 0x9dd   : > { %v12828_v30 = vld [vmem:[%s13633_s24 + $0x50c] ss:$16 sps:$4 sm:$0xff]  }
 0x9df   : > { %9924 = vmatpush1.bf16.msra.mxu1 %v12745_v56  ;;  %9967 = vmatpush1.bf16.msra.mxu0 %v12748_v0  ;;  %v12823_v56 = vld [vmem:[%s13633_s24 + $0x308] ss:$16 sps:$4 sm:$0xff]  }
 0x9e0   : > { %9925 = vmatprep.subr.bf16.mxu1 %v12753_v55  ;;  %9968 = vmatprep.subr.bf16.mxu0 %v12756_v45  ;;  %v12826_v0 = vld [vmem:[%s13633_s24 + $0x508] ss:$16 sps:$4 sm:$0xff]   ;;  %v12831_v55 = vld [vmem:[%s13633_s24 + $0x6ec] ss:$16 sps:$4 sm:$0xff]  }
 0x9e1   : > { %v12829_v45 = vld [vmem:[%s13633_s24 + $0x6e8] ss:$16 sps:$4 sm:$0xff]  }
 0x9e3   : > { %9926 = vmatpush1.bf16.msra.mxu1 %v12751_v22  ;;  %9969 = vmatpush1.bf16.msra.mxu0 %v12754_v23  ;;  %v12834_v22 = vld [vmem:[%s13633_s24 + $0x6cc] ss:$16 sps:$4 sm:$0xff]   ;;  %v12832_v23 = vld [vmem:[%s13633_s24 + $0x6c8] ss:$16 sps:$4 sm:$0xff]  }
 0x9e4   : > { %9927 = vmatprep.subr.bf16.mxu1 %v12759_v3  ;;  %9970 = vmatprep.subr.bf16.mxu0 %v12762_v61  ;;  %v12837_v3 = vld [vmem:[%s13633_s24 + $0x6ac] ss:$16 sps:$4 sm:$0xff]   ;;  %v12835_v61 = vld [vmem:[%s13633_s24 + $0x6a8] ss:$16 sps:$4 sm:$0xff]  }
 0x9e7   : > { %9928 = vmatpush1.bf16.msra.mxu1 %v12757_v46  ;;  %9971 = vmatpush1.bf16.msra.mxu0 %v12760_v52  ;;  %v12840_v46 = vld [vmem:[%s13633_s24 + $0x68c] ss:$16 sps:$4 sm:$0xff]   ;;  %v12841_v52 = vld [vmem:[%s13633_s24 + $0x668] ss:$16 sps:$4 sm:$0xff]  }
 0x9e8   : > { %9929 = vmatprep.subr.bf16.mxu1 %v12765_v15  ;;  %9972 = vmatprep.subr.bf16.mxu0 %v12768_v57  ;;  %v12844_v15 = vld [vmem:[%s13633_s24 + $0x648] ss:$16 sps:$4 sm:$0xff]   ;;  %v12849_v57 = vld [vmem:[%s13633_s24 + $0x62c] ss:$16 sps:$4 sm:$0xff]  }
 0x9eb   : > { %9930 = vmatpush1.bf16.msra.mxu1 %v12763_v58  ;;  %9973 = vmatpush1.bf16.msra.mxu0 %v12766_v43  ;;  %v12847_v58 = vld [vmem:[%s13633_s24 + $0x628] ss:$16 sps:$4 sm:$0xff]   ;;  %v12852_v43 = vld [vmem:[%s13633_s24 + $0x60c] ss:$16 sps:$4 sm:$0xff]  }
 0x9ec   : > { %9931 = vmatprep.subr.bf16.mxu1 %v12771_v26  ;;  %9974 = vmatprep.subr.bf16.mxu0 %v12774_v38  ;;  %v12850_v26 = vld [vmem:[%s13633_s24 + $0x608] ss:$16 sps:$4 sm:$0xff]   ;;  %v12855_v38 = vld [vmem:[%s13633_s24 + $0x7ec] ss:$16 sps:$4 sm:$0xff]  }
 0x9ef   : > { %9932 = vmatpush1.bf16.msra.mxu1 %v12769_v60  ;;  %9975 = vmatpush1.bf16.msra.mxu0 %v12772_v10  ;;  %v12853_v60 = vld [vmem:[%s13633_s24 + $0x7e8] ss:$16 sps:$4 sm:$0xff]   ;;  %v12858_v10 = vld [vmem:[%s13633_s24 + $0x7cc] ss:$16 sps:$4 sm:$0xff]  }
 0x9f0   : > { %9933 = vmatprep.subr.bf16.mxu1 %v12777_v42  ;;  %9976 = vmatprep.subr.bf16.mxu0 %v12780_v19  ;;  %v12856_v42 = vld [vmem:[%s13633_s24 + $0x7c8] ss:$16 sps:$4 sm:$0xff]   ;;  %v12861_v19 = vld [vmem:[%s13633_s24 + $0x7ac] ss:$16 sps:$4 sm:$0xff]  }
 0x9f3   : > { %9934 = vmatpush1.bf16.msra.mxu1 %v12775_v25  ;;  %9977 = vmatpush1.bf16.msra.mxu0 %v12778_v44  ;;  %v12859_v25 = vld [vmem:[%s13633_s24 + $0x7a8] ss:$16 sps:$4 sm:$0xff]   ;;  %v12864_v44 = vld [vmem:[%s13633_s24 + $0x78c] ss:$16 sps:$4 sm:$0xff]  }
 0x9f4   : > { %9935 = vmatprep.subr.bf16.mxu1 %v12783_v5  ;;  %9978 = vmatprep.subr.bf16.mxu0 %v12786_v34  ;;  %v12862_v5 = vld [vmem:[%s13633_s24 + $0x788] ss:$16 sps:$4 sm:$0xff]   ;;  %v12867_v34 = vld [vmem:[%s13633_s24 + $0x76c] ss:$16 sps:$4 sm:$0xff]  }
 0x9f7   : > { %9936 = vmatpush2.bf16.msra.mxu1 %v12781_v28  ;;  %9979 = vmatpush2.bf16.msra.mxu0 %v12784_v6  ;;  %v12865_v28 = vld [vmem:[%s13633_s24 + $0x768] ss:$16 sps:$4 sm:$0xff]   ;;  %v12870_v6 = vld [vmem:[%s13633_s24 + $0x74c] ss:$16 sps:$4 sm:$0xff]  }
 0x9f8   : > { %9937 = vmatprep.subr.bf16.mxu1 %v12789_v33  ;;  %9980 = vmatprep.subr.bf16.mxu0 %v12792_v14  ;;  %v12868_v33 = vld [vmem:[%s13633_s24 + $0x748] ss:$16 sps:$4 sm:$0xff]   ;;  %v12873_v14 = vld [vmem:[%s13633_s24 + $0x72c] ss:$16 sps:$4 sm:$0xff]  }
 0x9fb   : > { %9938 = vmatpush2.bf16.msra.mxu1 %v12787_v12  ;;  %9981 = vmatpush2.bf16.msra.mxu0 %v12790_v63  ;;  %v12871_v12 = vld [vmem:[%s13633_s24 + $0x728] ss:$16 sps:$4 sm:$0xff]   ;;  %v12876_v63 = vld [vmem:[%s13633_s24 + $0x70c] ss:$16 sps:$4 sm:$0xff]  }
 0x9fc   : > { %9939 = vmatprep.subr.bf16.mxu1 %v12795_v13  ;;  %9982 = vmatprep.subr.bf16.mxu0 %v12798_v47  ;;  %v12874_v13 = vld [vmem:[%s13633_s24 + $0x708] ss:$16 sps:$4 sm:$0xff]  }
 0x9ff   : > { %9940 = vmatpush2.bf16.msra.mxu1 %v12793_v29  ;;  %9983 = vmatpush2.bf16.msra.mxu0 %v12796_v53 }
 0xa00   : > { %9941 = vmatprep.subr.bf16.mxu1 %v12801_v51  ;;  %9984 = vmatprep.subr.bf16.mxu0 %v12804_v18 }
 0xa03   : > { %9942 = vmatpush2.bf16.msra.mxu1 %v12799_v49  ;;  %9985 = vmatpush2.bf16.msra.mxu0 %v12802_v8 }
 0xa04   : > { %9943 = vmatprep.subr.bf16.mxu1 %v12807_v50  ;;  %9986 = vmatprep.subr.bf16.mxu0 %v12810_v1 }
 0xa07   : > { %9944 = vmatpush2.bf16.msra.mxu1 %v12805_v37  ;;  %9987 = vmatpush2.bf16.msra.mxu0 %v12808_v24  ;;  %v9738_v47 = vpop.f32.mrf.mxu0 }
 0xa08   : > { %9945 = vmatprep.subr.bf16.mxu1 %v12813_v21  ;;  %9988 = vmatprep.subr.bf16.mxu0 %v12816_v39 }
 0xa09   : > { %v9740_v29 = vpop.f32.mrf.mxu0 }
 0xa0b   : > { %9946 = vmatpush2.bf16.msra.mxu1 %v12811_v40  ;;  %9989 = vmatpush2.bf16.msra.mxu0 %v12814_v31  ;;  %v9742_v53 = vpop.f32.mrf.mxu0 }
 0xa0c   : > { %9947 = vmatprep.subr.bf16.mxu1 %v12819_v54  ;;  %9990 = vmatprep.subr.bf16.mxu0 %v12822_v36 }
 0xa0d   : > { %v9744_v18 = vpop.f32.mrf.mxu0 }
 0xa0f   : > { %9948 = vmatpush2.bf16.msra.mxu1 %v12817_v48  ;;  %9991 = vmatpush2.bf16.msra.mxu0 %v12820_v17 }
 0xa10   : > { %9949 = vmatprep.subr.bf16.mxu1 %v12825_v27  ;;  %9992 = vmatprep.subr.bf16.mxu0 %v12828_v30 }
 0xa13   : > { %9950 = vmatpush2.bf16.msra.mxu1 %v12823_v56  ;;  %9993 = vmatpush2.bf16.msra.mxu0 %v12826_v0 }
 0xa14   : > { %10005 = vmatprep.subr.bf16.mxu1 %v12831_v55 }
 0xa15   : > { %v9781_v51 = vpop.f32.mrf.mxu1 }
 0xa16   : > { %9952 = vmatmul.mubr.bf16.vlgmr.msra.gmra.mxu1 %v15147_v41  ;;  %9995 = vmatmul.mubr.bf16.vlgmr.msra.gmra.mxu0 %v15209_v20  ;;  %v12838_v41 = vld [vmem:[%s13633_s24 + $0x688] ss:$16 sps:$4 sm:$0xff]   ;;  %v12843_v20 = vld [vmem:[%s13633_s24 + $0x66c] ss:$16 sps:$4 sm:$0xff]   ;;  %v9782_v37 = vadd.f32 %v9781_v51, %v9738_v47 }
 0xa17   : > { %10006 = vmatpush1.bf16.msra.mxu1 %v12829_v45  ;;  %10037 = vmatprep.mubr.bf16.mxu1 %v15245_v2  ;;  %v12846_v2 = vld [vmem:[%s13633_s24 + $0x64c] ss:$16 sps:$4 sm:$0xff]   ;;  %v9783_v49 = vpop.f32.mrf.mxu1  ;;  %s15512_s24 = sld [smem:[#allocation31_spill]] (!%p11444_p12) }
 0xa18   : > { %10007 = vmatprep.subr.bf16.mxu1 %v12834_v22  ;;  %v9784_v39 = vadd.f32 %v9783_v49, %v9740_v29 }
 0xa19   : > { %v9785_v50 = vpop.f32.mrf.mxu1 }
 0xa1a   : > { %v9786_v54 = vadd.f32 %v9785_v50, %v9742_v53 }
 0xa1b   : > { %10008 = vmatpush1.bf16.msra.mxu1 %v12832_v23  ;;  %v9787_v24 = vpop.f32.mrf.mxu1 }
 0xa1c   : > { %10009 = vmatprep.subr.bf16.mxu1 %v12837_v3  ;;  %v9788_v27 = vadd.f32 %v9787_v24, %v9744_v18 }
 0xa1d   : > { %s15513_s1 = smov (!%p11444_p12), %s15512_s24 }
 0xa1f   : > { %10010 = vmatpush1.bf16.msra.mxu1 %v12835_v61 }
 0xa20   : > { %10011 = vmatprep.subr.bf16.mxu1 %v12840_v46 }
 0xa23   : > { %10012 = vmatpush1.bf16.msra.mxu1 %v12838_v41 }
 0xa24   : > { %10013 = vmatprep.subr.bf16.mxu1 %v12843_v20 }
 0xa27   : > { %10014 = vmatpush1.bf16.msra.mxu1 %v12841_v52 }
 0xa28   : > { %10015 = vmatprep.subr.bf16.mxu1 %v12846_v2 }
 0xa2b   : > { %10016 = vmatpush1.bf16.msra.mxu1 %v12844_v15 }
 0xa2c   : > { %10017 = vmatprep.subr.bf16.mxu1 %v12849_v57 }
 0xa2f   : > { %10018 = vmatpush1.bf16.msra.mxu1 %v12847_v58 }
 0xa30   : > { %10019 = vmatprep.subr.bf16.mxu1 %v12852_v43 }
 0xa33   : > { %10020 = vmatpush1.bf16.msra.mxu1 %v12850_v26 }
 0xa34   : > { %10021 = vmatprep.subr.bf16.mxu1 %v12855_v38 }
 0xa37   : > { %10022 = vmatpush2.bf16.msra.mxu1 %v12853_v60 }
 0xa38   : > { %10023 = vmatprep.subr.bf16.mxu1 %v12858_v10 }
 0xa3b   : > { %10024 = vmatpush2.bf16.msra.mxu1 %v12856_v42 }
 0xa3c   : > { %10025 = vmatprep.subr.bf16.mxu1 %v12861_v19 }
 0xa3f   : > { %10026 = vmatpush2.bf16.msra.mxu1 %v12859_v25 }
 0xa40   : > { %10027 = vmatprep.subr.bf16.mxu1 %v12864_v44 }
 0xa43   : > { %10028 = vmatpush2.bf16.msra.mxu1 %v12862_v5 }
 0xa44   : > { %10029 = vmatprep.subr.bf16.mxu1 %v12867_v34 }
 0xa47   : > { %10030 = vmatpush2.bf16.msra.mxu1 %v12865_v28 }
 0xa48   : > { %10031 = vmatprep.subr.bf16.mxu1 %v12870_v6 }
 0xa4b   : > { %10032 = vmatpush2.bf16.msra.mxu1 %v12868_v33 }
 0xa4c   : > { %10033 = vmatprep.subr.bf16.mxu1 %v12873_v14 }
 0xa4f   : > { %10034 = vmatpush2.bf16.msra.mxu1 %v12871_v12 }
 0xa50   : > { %10035 = vmatprep.subr.bf16.mxu1 %v12876_v63 }
 0xa53   : > { %10036 = vmatpush2.bf16.msra.mxu1 %v12874_v13 }
 0xa56   : > { %10038 = vmatmul.mubr.bf16.vlgmr.msra.gmra.mxu1 %v15249_v7  ;;  %v9824_v8 = vpop.f32.mrf.mxu0 }
 0xa57   : > { %v9825_v40 = vadd.f32 %v9824_v8, %v9782_v37 }
 0xa58   : > { %v9826_v1 = vpop.f32.mrf.mxu0 }
 0xa59   : > { %v9827_v36 = vadd.f32 %v9826_v1, %v9784_v39 }
 0xa5a   : > { %v9828_v21 = vpop.f32.mrf.mxu0 }
 0xa5b   : > { %v9829_v30 = vadd.f32 %v9828_v21, %v9786_v54 }
 0xa5c   : > { %v9830_v17 = vpop.f32.mrf.mxu0 }
 0xa5d   : > { %v9831_v45 = vadd.f32 %v9830_v17, %v9788_v27 }
 0xa96   : > { %v9867_v31 = vpop.f32.mrf.mxu1  ;;  %v9910_v41 = vpop.f32.mrf.mxu0 }
 0xa97   : > { %v9868_v48 = vadd.f32 %v9867_v31, %v9825_v40 }
 0xa98   : > { %v9869_v7 = vpop.f32.mrf.mxu1  ;;  %v9912_v20 = vpop.f32.mrf.mxu0 }
 0xa99   : > { %v15353_v56 = vadd.f32 %v9868_v48, %v14756_v32  ;;  %v9870_v0 = vadd.f32 %v9869_v7, %v9827_v36 }
 0xa9a   : > { %v9871_v55 = vpop.f32.mrf.mxu1  ;;  %v9914_v52 = vpop.f32.mrf.mxu0 }
 0xa9b   : > { %10056 = vst [vmem:[#allocation2 + $0x30] sm:$0xff] %v15353_v56  ;;  %v15357_v22 = vadd.f32 %v9870_v0, %v14762_v11  ;;  %v9872_v23 = vadd.f32 %v9871_v55, %v9829_v30 }
 0xa9c   : > { %v9873_v3 = vpop.f32.mrf.mxu1  ;;  %v9916_v2 = vpop.f32.mrf.mxu0 }
 0xa9d   : > { %10057 = vst [vmem:[#allocation2] sm:$0xff] %v15357_v22  ;;  %v15361_v61 = vadd.f32 %v9872_v23, %v14772_v9  ;;  %v9874_v46 = vadd.f32 %v9873_v3, %v9831_v45 }
 0xa9f   : > { %10060 = vst [vmem:[#allocation2 + $0x8] sm:$0xff] %v15361_v61  ;;  %v15365_v32 = vadd.f32 %v9874_v46, %v14778_v59 }
 0xaa1   : > { %10061 = vst [vmem:[#allocation2 + $0x20] sm:$0xff] %v15365_v32 }
 0xad6   : > { %v9953_v11 = vpop.f32.mrf.mxu1  ;;  %v9996_v57 = vpop.f32.mrf.mxu0 }
 0xad7   : > { %v9954_v43 = vadd.f32 %v9953_v11, %v9910_v41 }
 0xad8   : > { %v9955_v15 = vpop.f32.mrf.mxu1  ;;  %v9998_v26 = vpop.f32.mrf.mxu0 }
 0xad9   : > { %v9956_v9 = vadd.f32 %v9955_v15, %v9912_v20  ;;  %v9997_v60 = vadd.f32 %v9996_v57, %v9954_v43 }
 0xada   : > { %v9957_v58 = vpop.f32.mrf.mxu1  ;;  %v10000_v42 = vpop.f32.mrf.mxu0 }
 0xadb   : > { %v9958_v10 = vadd.f32 %v9957_v58, %v9914_v52  ;;  %v9999_v59 = vadd.f32 %v9998_v26, %v9956_v9 }
 0xadc   : > { %v9959_v38 = vpop.f32.mrf.mxu1  ;;  %v10002_v33 = vpop.f32.mrf.mxu0 }
 0xadd   : > { %v9960_v25 = vadd.f32 %v9959_v38, %v9916_v2  ;;  %v10001_v34 = vadd.f32 %v10000_v42, %v9958_v10 }
 0xadf   : > { %v10003_v12 = vadd.f32 %v10002_v33, %v9960_v25 }
 0xb16   : > { %v10039_v19 = vpop.f32.mrf.mxu1 }
 0xb17   : > { %v10040_v44 = vadd.f32 %v10039_v19, %v9997_v60 }
 0xb18   : > { %v10041_v5 = vpop.f32.mrf.mxu1 }
 0xb19   : > { %v10050_v28 = vadd.f32 %v10040_v44, %v14759_v62  ;;  %v10042_v6 = vadd.f32 %v10041_v5, %v9999_v59 }
 0xb1a   : > { %v10043_v14 = vpop.f32.mrf.mxu1 }
 0xb1b   : > { %10058 = vst [vmem:[#allocation2 + $0x18] sm:$0xff] %v10050_v28  ;;  %v10051_v63 = vadd.f32 %v10042_v6, %v14767_v35  ;;  %v10044_v13 = vadd.f32 %v10043_v14, %v10001_v34 }
 0xb1c   : > { %v10045_v47 = vpop.f32.mrf.mxu1 }
 0xb1d   : > { %10059 = vst [vmem:[#allocation2 + $0x10] sm:$0xff] %v10051_v63  ;;  %v10054_v29 = vadd.f32 %v10044_v13, %v14775_v16  ;;  %v10046_v53 = vadd.f32 %v10045_v47, %v10003_v12  ;;  %10067 = sbr.rel (%p11444_p12) target bundleno = 3024 (0xbd0), region = 100 }
 0xb1f   : > { %10062 = vst [vmem:[#allocation2 + $0x28] sm:$0xff] %v10054_v29  ;;  %v10055_v51 = vadd.f32 %v10046_v53, %v14789_v4 }
 0xb21   : > { %10063 = vst [vmem:[#allocation2 + $0x38] sm:$0xff] %v10055_v51 }
 0xb22   : > { %v10069_v62 = vmul.f32 %v15353_v56, %v15353_v56  ;;  %v10070_v18 = vmul.f32 %v15357_v22, %v15357_v22  ;;  %v10071_v35 = vmul.f32 %v10050_v28, %v10050_v28  ;;  %v10073_v49 = vmul.f32 %v15361_v61, %v15361_v61  ;;  %v10068_v27 = vld [vmem:[%s15507_s27] sm:$0xf]  ;;  %v15508_v30 = vld [vmem:[#allocation23_spill] sm:$0xff]  ;;  %v15510_v23 = vld [vmem:[#allocation24_spill] sm:$0xff] }
 0xb23   : > { %v10074_v16 = vmul.f32 %v15365_v32, %v15365_v32  ;;  %v10075_v8 = vmul.f32 %v10054_v29, %v10054_v29  ;;  %v10072_v50 = vmul.f32 %v10051_v63, %v10051_v63  ;;  %v10076_v24 = vmul.f32 %v10055_v51, %v10055_v51  ;;  %v15509_v55 = vld [vmem:[#allocation21_spill] sm:$0xff]  ;;  %v15511_v46 = vld [vmem:[#allocation22_spill] sm:$0xff] }
 0xb24   : > { %v10077_v4 = vadd.f32 %v10070_v18, %v10069_v62  ;;  %v10105_v0 = vrot.slane %v10068_v27, %v15508_v30  ;;  %v10109_v45 = vrot.slane %v10068_v27, %v15509_v55  ;;  %v10113_v3 = vrot.slane %v10068_v27, %v15510_v23 }
 0xb25   : > { %v10082_v1 = vadd.f32 %v10074_v16, %v10073_v49  ;;  %v10117_v41 = vrot.slane %v10068_v27, %v15511_v46 }
 0xb26   : > { %v10078_v37 = vadd.f32 %v10077_v4, %v10071_v35 }
 0xb27   : > { %v10083_v21 = vadd.f32 %v10082_v1, %v10075_v8 }
 0xb28   : > { %v10079_v39 = vadd.f32 %v10078_v37, %v10072_v50 }
 0xb29   : > { %v10084_v40 = vadd.f32 %v10083_v21, %v10076_v24 }
 0xb2a   : > { %10080 = vadd.xlane.f32.xlu0 %v10079_v39 }
 0xb2e   : > { %10085 = vadd.xlane.f32.xlu0 %v10084_v40 }
 0xbb3   : > { %v10081_v31 = vpop.xlane.xlu0 %10080 }
 0xbb4   : > { %v10087_v54 = vmul.f32 0.001953125, %v10081_v31 }
 0xbb6   : > { %v10089_v36 = vadd.f32 1e-06, %v10087_v54 }
 0xbb7   : > { %v10086_v48 = vpop.xlane.xlu0 %10085 }
 0xbb8   : > { %12957 = vrsqrt.f32 %v10089_v36  ;;  %v10088_v17 = vmul.f32 0.001953125, %v10086_v48 }
 0xbba   : > { %v10090_v7 = vadd.f32 1e-06, %v10088_v17 }
 0xbbc   : > { %12959 = vrsqrt.f32 %v10090_v7 }
 0xbc5   : > { %v12958_v20 = vpop.eup %12957 }
 0xbc6   : > { %v10093_v52 = vmul.f32 %v12958_v20, %v15353_v56  ;;  %v10094_v11 = vmul.f32 %v12958_v20, %v15357_v22  ;;  %v10095_v2 = vmul.f32 %v12958_v20, %v10050_v28  ;;  %v10096_v15 = vmul.f32 %v12958_v20, %v10051_v63 }
 0xbc8   : > { %v10122_v57 = vmul.f32 %v10105_v0, %v10093_v52  ;;  %v10123_v58 = vmul.f32 %v10109_v45, %v10094_v11  ;;  %v10124_v43 = vmul.f32 %v10113_v3, %v10095_v2  ;;  %v10125_v26 = vmul.f32 %v10117_v41, %v10096_v15 }
 0xbc9   : > { %v12960_v9 = vpop.eup %12959 }
 0xbca   : > { %10130 = vst [vmem:[%s15512_s24] sm:$0xff] %v10122_v57  ;;  %v10097_v56 = vmul.f32 %v12960_v9, %v15361_v61  ;;  %v10098_v22 = vmul.f32 %v12960_v9, %v15365_v32  ;;  %v10099_v38 = vmul.f32 %v12960_v9, %v10054_v29  ;;  %v10100_v60 = vmul.f32 %v12960_v9, %v10055_v51 }
 0xbcb   : > { %10131 = vst [vmem:[%s15513_s1 + $0x8] sm:$0xff] %v10123_v58  ;;  %10132 = vst [vmem:[%s15513_s1 + $0x10] sm:$0xff] %v10124_v43 }
 0xbcc   : > { %10133 = vst [vmem:[%s15513_s1 + $0x18] sm:$0xff] %v10125_v26  ;;  %v10126_v10 = vmul.f32 %v10105_v0, %v10097_v56  ;;  %v10127_v42 = vmul.f32 %v10109_v45, %v10098_v22  ;;  %v10128_v19 = vmul.f32 %v10113_v3, %v10099_v38  ;;  %v10129_v59 = vmul.f32 %v10117_v41, %v10100_v60 }
 0xbce   : > { %10134 = vst [vmem:[%s15513_s1 + $0x20] sm:$0xff] %v10126_v10  ;;  %10135 = vst [vmem:[%s15513_s1 + $0x28] sm:$0xff] %v10127_v42 }
 0xbcf   : > { %10136 = vst [vmem:[%s15513_s1 + $0x30] sm:$0xff] %v10128_v19  ;;  %10137 = vst [vmem:[%s15513_s1 + $0x38] sm:$0xff] %v10129_v59 }
 0xbd0 PF: > { %s15514_s24 = sld [smem:[#allocation19_spill]]  ;;  %s15517_s21 = smov %s13193_s22 }
 0xbd1   : > { %s15515_s20 = sld [smem:[#allocation18_spill]] }
 0xbd2   : > { %s15516_s23 = sld [smem:[#allocation20_spill]] }
 0xbd6   : > { %p30_p13 = scmp.ge.s32.totalorder %s15514_s24, 4  }
 0xbd7   : > { %s15518_s22 = smov %s15515_s20 }
 0xbd8   :  { %32 = sbr.rel (!%p30_p13) target bundleno = 16 (0x10), region = 190 }
 0xbdd   :  { %10165 = vsyncpa [#allocation4], 1 }
 0xbde   :  { %10167 = vsyncpa [#allocation4 + $0x1], 1 }
 0xbdf   :  { %10168 = vsyncpa [#allocation6], 1 }
 0xbe0   :  { %10170 = vsyncpa [#allocation6 + $0x1], 1 }
 0xbe1   :  { %10171 = vsyncpa [#allocation9], 1 }
 0xbe2   :  { %10173 = vsyncpa [#allocation9 + $0x1], 1 }
 0xbe3   :  { %10174 = vsyncpa [#allocation12], 1 }
 0xbe4   :  { %10176 = vsyncpa [#allocation12 + $0x1], 1 }

</bundles_post_ra>
